<compile_context>
chip_gen: v5e
topology: v5e:2x2
jax: 0.10.0
libtpu: 0.0.40
codegen_flags: <defaults>
</compile_context>

<pallas_src>
import functools

import jax
import jax.numpy as jnp
import numpy as np
from jax.experimental import pallas as pl
from jax.experimental.pallas import tpu as pltpu

C = 32          # fc1 output width / conv channel count
T = 8           # observation window, fixed by fc2 = Linear(32 * 8, ...)
BN_EPS = 1e-5
LANE = 128      # TPU lane width


def _convnet_kernel(x_ref, mask_ref, fc1w_ref, fc1b_ref, prelu_ref,
                    convw_ref, bng_ref, bnb_ref, fc2w_ref, fc2b_ref,
                    out_ref, *, n_real):
    hw = x_ref.shape[1]                   # T * Wp   (lane axis)
    wp = hw // T                          # padded pedestrian count
    inv_count = 1.0 / float(T * n_real)   # BN stats over (1, T, n_real)

    # Valid-pedestrian-column mask, pre-broadcast to (C, T*Wp) in the wrapper
    # and loaded once (hoisted) -- JAX does not CSE broadcast_in_dim.
    m = mask_ref[...]

    # --- fc1 (Linear(2, 32)) + PReLU: K=2 contraction stays on the VPU ------
    x = x_ref[...]                                        # (2, T*Wp)
    w1 = fc1w_ref[...]                                    # (C, 2)
    pre = (w1[:, 0:1] * x[0:1, :] + w1[:, 1:2] * x[1:2, :]
           + fc1b_ref[...])                               # (C, T*Wp)
    a = prelu_ref[0]                                      # PReLU slope (SMEM)
    cur = jnp.where(pre >= 0.0, pre, a * pre) * m         # zero pad columns

    zrow = jnp.zeros((C, wp), jnp.float32)

    # --- 4 x [3x3 conv pad=1 as one K=288 matmul -> fused BatchNorm] --------
    for layer in range(4):
        # Height-padded plane (C, (T+2)*Wp): rows 0 / T+1 are the conv zero
        # padding rows; pedestrian columns >= n_real are zero, so the +/-1
        # lane rolls below realize the width zero padding with no masks.
        p = jnp.concatenate([zrow, cur, zrow], axis=1)
        p_l = pltpu.roll(p, 1, axis=1)                    # tap reads w-1
        p_r = pltpu.roll(p, p.shape[1] - 1, axis=1)       # tap reads w+1

        # 9 taps = lane-tile-aligned views of the three planes, stacked along
        # sublanes (row block index = kh*3 + kw, rows within a block = cin).
        col = jnp.concatenate(
            [src[:, kh * wp:(kh + T) * wp]
             for kh in range(3) for src in (p_l, p, p_r)],
            axis=0)                                       # (9*C, T*Wp)

        # Conv bias dropped: it cancels exactly under training-mode BN.
        acc = jnp.dot(convw_ref[layer], col,
                      preferred_element_type=jnp.float32)  # (C, T*Wp)

        # BatchNorm2d training mode: masked, two-pass centered batch stats,
        # folded into a single multiply-add over the whole tile.
        mu = jnp.sum(acc * m, axis=1, keepdims=True) * inv_count   # (C, 1)
        d = (acc - mu) * m
        var = jnp.sum(d * d, axis=1, keepdims=True) * inv_count
        scale = bng_ref[layer] * jax.lax.rsqrt(var + BN_EPS)       # (C, 1)
        cur = (d * scale + bnb_ref[layer]) * m                     # (C, T*Wp)

    # --- squeeze + transpose(-1,0) + reshape(N, T*C) + fc2 ------------------
    # torch flattens (N, T, C) row-major over (t, c): flat[t*C + c, n] =
    # cur[c, t*Wp + n]; build it as a free sublane stack -> one K=256 matmul.
    flat = jnp.concatenate([cur[:, t * wp:(t + 1) * wp] for t in range(T)],
                           axis=0)                                 # (T*C, Wp)
    out_ref[...] = (jnp.dot(fc2w_ref[...], flat,
                            preferred_element_type=jnp.float32)
                    + fc2b_ref[...])                               # (out, Wp)


def simplest_convnet_forward(x, params):
    N = x.shape[0]
    out_dim = params['fc2_b'].shape[0]
    # Pad pedestrians (conv W axis) up to a lane multiple, always keeping at
    # least one zero column so both w-direction conv pads are plain zeros.
    Wp = (N // LANE + 1) * LANE
    HW = T * Wp

    # (Cout, Cin, 3, 3) -> (Cout, (kh*3+kw)*Cin + cin), lane-dense, per layer.
    conv_w = jnp.stack([jnp.transpose(w, (0, 2, 3, 1)).reshape(C, 9 * C)
                        for w in params['conv_w']])                # (4, C, 9C)
    bn_g = jnp.stack(params['bn_g']).reshape(4, C, 1)
    bn_b = jnp.stack(params['bn_b']).reshape(4, C, 1)
    fc1_w = params['fc1_w']                                        # (C, 2)
    fc1_b = params['fc1_b'].reshape(C, 1)
    fc2_w = params['fc2_w']                                        # (out, T*C)
    fc2_b = params['fc2_b'].reshape(out_dim, 1)
    prelu = params['prelu_a'].reshape(1)                           # (1,), SMEM

    # (N, T, 2) -> (2, T, N) -> zero-pad N -> (2, T*Wp); lane index = t*Wp+n.
    x_t = jnp.transpose(x, (2, 1, 0))
    x_t = jnp.pad(x_t, ((0, 0), (0, 0), (0, Wp - N))).reshape(2, HW)

    # Valid-column mask, pre-broadcast to (C, T*Wp) on the host.
    valid = (np.arange(HW) % Wp) < N
    mask = jnp.asarray(np.broadcast_to(valid, (C, HW)).astype(np.float32))

    vmem = pl.BlockSpec(memory_space=pltpu.MemorySpace.VMEM)
    smem = pl.BlockSpec(memory_space=pltpu.MemorySpace.SMEM)
    # TODO(synk): for very large N, add a grid over the pedestrian (lane) axis
    # with "parallel" semantics (v7x: 2 TensorCores, 64 MiB VMEM); BatchNorm
    # batch stats couple all pedestrians, so that needs a 2-pass reduction.
    # TODO(synk): cast matmul inputs to bf16 on v6e/v7x once the accuracy
    # budget allows (kept f32 here to hold the 1e-3 correctness check).
    out_padded = pl.pallas_call(
        functools.partial(_convnet_kernel, n_real=N),
        out_shape=jax.ShapeDtypeStruct((out_dim, Wp), jnp.float32),
        in_specs=[vmem, vmem, vmem, vmem, smem,
                  vmem, vmem, vmem, vmem, vmem],
        out_specs=vmem,
    )(x_t, mask, fc1_w, fc1_b, prelu, conv_w, bn_g, bn_b, fc2_w, fc2_b)

    # Drop pad columns and return torch layout (N, out_dim); cheap in XLA.
    return out_padded[:, :N].T


def reference_forward(x, params):
    """Pure-JAX mirror of the torch graph (NCHW conv) for a correctness check."""
    h = x @ params['fc1_w'].T + params['fc1_b']
    a = params['prelu_a'][0]
    h = jnp.where(h >= 0.0, h, a * h)                     # (N, T, C)
    z = jnp.transpose(h, (2, 1, 0))[None]                 # (1, C, T, N)
    for l in range(4):
        z = jax.lax.conv_general_dilated(
            z, params['conv_w'][l], window_strides=(1, 1),
            padding=((1, 1), (1, 1)),
            dimension_numbers=('NCHW', 'OIHW', 'NCHW'))
        z = z + params['conv_b'][l][None, :, None, None]
        mu = jnp.mean(z, axis=(0, 2, 3), keepdims=True)
        var = jnp.mean((z - mu) ** 2, axis=(0, 2, 3), keepdims=True)
        z = (z - mu) * jax.lax.rsqrt(var + BN_EPS)
        z = (z * params['bn_g'][l][None, :, None, None]
             + params['bn_b'][l][None, :, None, None])
    z = jnp.transpose(z[0], (2, 1, 0))                    # (N, T, C)
    flat = z.reshape(z.shape[0], -1)                      # (N, 256)
    return flat @ params['fc2_w'].T + params['fc2_b']


if __name__ == "__main__":
    key = jax.random.PRNGKey(0)
    ks = jax.random.split(key, 21)

    N = 16                     # pedestrians (conv W dim)
    output_window = 12
    out_dim = output_window * 2

    params = {
        'fc1_w': 0.3 * jax.random.normal(ks[0], (C, 2), jnp.float32),
        'fc1_b': 0.1 * jax.random.normal(ks[1], (C,), jnp.float32),
        'prelu_a': jnp.array([0.25], jnp.float32),        # PReLU default init
        'conv_w': [0.05 * jax.random.normal(ks[2 + i], (C, C, 3, 3), jnp.float32)
                   for i in range(4)],
        'conv_b': [0.05 * jax.random.normal(ks[6 + i], (C,), jnp.float32)
                   for i in range(4)],
        'bn_g': [1.0 + 0.05 * jax.random.normal(ks[10 + i], (C,), jnp.float32)
                 for i in range(4)],
        'bn_b': [0.05 * jax.random.normal(ks[14 + i], (C,), jnp.float32)
                 for i in range(4)],
        'fc2_w': 0.05 * jax.random.normal(ks[18], (out_dim, T * C), jnp.float32),
        'fc2_b': 0.1 * jax.random.normal(ks[19], (out_dim,), jnp.float32),
    }

    x = jax.random.normal(ks[20], (N, T, 2), jnp.float32)

    out = simplest_convnet_forward(x, params)
    out = jax.block_until_ready(out)

    ref = jax.block_until_ready(reference_forward(x, params))
    assert out.shape == (N, out_dim)
    np.testing.assert_allclose(np.asarray(out), np.asarray(ref),
                               rtol=1e-3, atol=1e-3)
    print("KERNEL_OK")
</pallas_src>

<mosaic_0001>
module attributes {stable_mosaic.version = 11 : i64} {
  func.func @_convnet_kernel(%arg0: memref<2x1024xf32, #tpu.memory_space<vmem>>, %arg1: memref<32x1024xf32, #tpu.memory_space<vmem>>, %arg2: memref<32x2xf32, #tpu.memory_space<vmem>>, %arg3: memref<32x1xf32, #tpu.memory_space<vmem>>, %arg4: memref<1xf32, #tpu.memory_space<smem>>, %arg5: memref<4x32x288xf32, #tpu.memory_space<vmem>>, %arg6: memref<4x32x1xf32, #tpu.memory_space<vmem>>, %arg7: memref<4x32x1xf32, #tpu.memory_space<vmem>>, %arg8: memref<24x256xf32, #tpu.memory_space<vmem>>, %arg9: memref<24x1xf32, #tpu.memory_space<vmem>>, %arg10: memref<24x128xf32, #tpu.memory_space<vmem>>) attributes {dimension_semantics = [], scalar_prefetch = 0 : i64, scratch_operands = 0 : i64, tpu.core_type = #tpu.core_type<tc>} {
    %c0 = arith.constant 0 : index
    %c0_0 = arith.constant 0 : index
    %0 = vector.load %arg1[%c0, %c0_0] : memref<32x1024xf32, #tpu.memory_space<vmem>>, vector<32x1024xf32>
    %c0_1 = arith.constant 0 : index
    %c0_2 = arith.constant 0 : index
    %1 = vector.load %arg0[%c0_1, %c0_2] : memref<2x1024xf32, #tpu.memory_space<vmem>>, vector<2x1024xf32>
    %c0_3 = arith.constant 0 : index
    %c0_4 = arith.constant 0 : index
    %2 = vector.load %arg2[%c0_3, %c0_4] : memref<32x2xf32, #tpu.memory_space<vmem>>, vector<32x2xf32>
    %3 = vector.extract_strided_slice %2 {offsets = [0, 0], sizes = [32, 1], strides = [1, 1]} : vector<32x2xf32> to vector<32x1xf32>
    %4 = vector.extract_strided_slice %1 {offsets = [0, 0], sizes = [1, 1024], strides = [1, 1]} : vector<2x1024xf32> to vector<1x1024xf32>
    %5 = vector.broadcast %3 : vector<32x1xf32> to vector<32x1024xf32>
    %6 = vector.broadcast %4 : vector<1x1024xf32> to vector<32x1024xf32>
    %7 = arith.mulf %5, %6 : vector<32x1024xf32>
    %8 = vector.extract_strided_slice %2 {offsets = [0, 1], sizes = [32, 1], strides = [1, 1]} : vector<32x2xf32> to vector<32x1xf32>
    %9 = vector.extract_strided_slice %1 {offsets = [1, 0], sizes = [1, 1024], strides = [1, 1]} : vector<2x1024xf32> to vector<1x1024xf32>
    %10 = vector.broadcast %8 : vector<32x1xf32> to vector<32x1024xf32>
    %11 = vector.broadcast %9 : vector<1x1024xf32> to vector<32x1024xf32>
    %12 = arith.mulf %10, %11 : vector<32x1024xf32>
    %13 = arith.addf %7, %12 : vector<32x1024xf32>
    %c0_5 = arith.constant 0 : index
    %c0_6 = arith.constant 0 : index
    %14 = vector.load %arg3[%c0_5, %c0_6] : memref<32x1xf32, #tpu.memory_space<vmem>>, vector<32x1xf32>
    %15 = vector.broadcast %14 : vector<32x1xf32> to vector<32x1024xf32>
    %16 = arith.addf %13, %15 : vector<32x1024xf32>
    %c0_7 = arith.constant 0 : index
    %17 = memref.load %arg4[%c0_7] : memref<1xf32, #tpu.memory_space<smem>>
    %cst = arith.constant 0.000000e+00 : f32
    %18 = vector.broadcast %cst : f32 to vector<32x1024xf32>
    %19 = arith.cmpf oge, %16, %18 : vector<32x1024xf32>
    %20 = vector.broadcast %17 : f32 to vector<32x1024xf32>
    %21 = arith.mulf %20, %16 : vector<32x1024xf32>
    %22 = arith.select %19, %16, %21 : vector<32x1024xi1>, vector<32x1024xf32>
    %23 = arith.mulf %22, %0 : vector<32x1024xf32>
    %cst_8 = arith.constant 0.000000e+00 : f32
    %24 = vector.broadcast %cst_8 : f32 to vector<32x128xf32>
    %25 = tpu.concatenate %24, %23, %24 in 1 : vector<32x128xf32>, vector<32x1024xf32>, vector<32x128xf32> -> vector<32x1280xf32>
    %c1_i32 = arith.constant 1 : i32
    %26 = tpu.dynamic_rotate %25 by %c1_i32 dim 1 : vector<32x1280xf32>, i32 -> vector<32x1280xf32>
    %c1279_i32 = arith.constant 1279 : i32
    %27 = tpu.dynamic_rotate %25 by %c1279_i32 dim 1 : vector<32x1280xf32>, i32 -> vector<32x1280xf32>
    %28 = vector.extract_strided_slice %26 {offsets = [0, 0], sizes = [32, 1024], strides = [1, 1]} : vector<32x1280xf32> to vector<32x1024xf32>
    %29 = vector.extract_strided_slice %25 {offsets = [0, 0], sizes = [32, 1024], strides = [1, 1]} : vector<32x1280xf32> to vector<32x1024xf32>
    %30 = vector.extract_strided_slice %27 {offsets = [0, 0], sizes = [32, 1024], strides = [1, 1]} : vector<32x1280xf32> to vector<32x1024xf32>
    %31 = vector.extract_strided_slice %26 {offsets = [0, 128], sizes = [32, 1024], strides = [1, 1]} : vector<32x1280xf32> to vector<32x1024xf32>
    %32 = vector.extract_strided_slice %25 {offsets = [0, 128], sizes = [32, 1024], strides = [1, 1]} : vector<32x1280xf32> to vector<32x1024xf32>
    %33 = vector.extract_strided_slice %27 {offsets = [0, 128], sizes = [32, 1024], strides = [1, 1]} : vector<32x1280xf32> to vector<32x1024xf32>
    %34 = vector.extract_strided_slice %26 {offsets = [0, 256], sizes = [32, 1024], strides = [1, 1]} : vector<32x1280xf32> to vector<32x1024xf32>
    %35 = vector.extract_strided_slice %25 {offsets = [0, 256], sizes = [32, 1024], strides = [1, 1]} : vector<32x1280xf32> to vector<32x1024xf32>
    %36 = vector.extract_strided_slice %27 {offsets = [0, 256], sizes = [32, 1024], strides = [1, 1]} : vector<32x1280xf32> to vector<32x1024xf32>
    %37 = tpu.concatenate %28, %29, %30, %31, %32, %33, %34, %35, %36 in 0 : vector<32x1024xf32>, vector<32x1024xf32>, vector<32x1024xf32>, vector<32x1024xf32>, vector<32x1024xf32>, vector<32x1024xf32>, vector<32x1024xf32>, vector<32x1024xf32>, vector<32x1024xf32> -> vector<288x1024xf32>
    %c0_9 = arith.constant 0 : index
    %c0_10 = arith.constant 0 : index
    %c0_11 = arith.constant 0 : index
    %38 = vector.load %arg5[%c0_9, %c0_10, %c0_11] : memref<4x32x288xf32, #tpu.memory_space<vmem>>, vector<1x32x288xf32>
    %39 = vector.shape_cast %38 : vector<1x32x288xf32> to vector<32x288xf32>
    %cst_12 = arith.constant dense<0.000000e+00> : vector<32x1024xf32>
    %40 = tpu.matmul %39, %37, %cst_12 {dimension_numbers = #tpu.dot_dimension_numbers<[1], [0], [0], [1], [0, 0, 1, 1], [], []>} : vector<32x288xf32>, vector<288x1024xf32>, vector<32x1024xf32> -> vector<32x1024xf32>
    %41 = arith.mulf %40, %0 : vector<32x1024xf32>
    %cst_13 = arith.constant dense<0.000000e+00> : vector<32xf32>
    %42 = vector.multi_reduction <add>, %41, %cst_13 [1] : vector<32x1024xf32> to vector<32xf32>
    %43 = vector.shape_cast %42 : vector<32xf32> to vector<32x1xf32>
    %cst_14 = arith.constant 7.812500e-03 : f32
    %44 = vector.broadcast %cst_14 : f32 to vector<32x1xf32>
    %45 = arith.mulf %43, %44 : vector<32x1xf32>
    %46 = vector.broadcast %45 : vector<32x1xf32> to vector<32x1024xf32>
    %47 = arith.subf %40, %46 : vector<32x1024xf32>
    %48 = arith.mulf %47, %0 : vector<32x1024xf32>
    %49 = arith.mulf %48, %48 : vector<32x1024xf32>
    %cst_15 = arith.constant dense<0.000000e+00> : vector<32xf32>
    %50 = vector.multi_reduction <add>, %49, %cst_15 [1] : vector<32x1024xf32> to vector<32xf32>
    %51 = vector.shape_cast %50 : vector<32xf32> to vector<32x1xf32>
    %cst_16 = arith.constant 7.812500e-03 : f32
    %52 = vector.broadcast %cst_16 : f32 to vector<32x1xf32>
    %53 = arith.mulf %51, %52 : vector<32x1xf32>
    %c0_17 = arith.constant 0 : index
    %c0_18 = arith.constant 0 : index
    %c0_19 = arith.constant 0 : index
    %54 = vector.load %arg6[%c0_17, %c0_18, %c0_19] : memref<4x32x1xf32, #tpu.memory_space<vmem>>, vector<1x32x1xf32>
    %55 = vector.shape_cast %54 : vector<1x32x1xf32> to vector<32x1xf32>
    %cst_20 = arith.constant 9.99999974E-6 : f32
    %56 = vector.broadcast %cst_20 : f32 to vector<32x1xf32>
    %57 = arith.addf %53, %56 : vector<32x1xf32>
    %58 = math.rsqrt %57 : vector<32x1xf32>
    %59 = arith.mulf %55, %58 : vector<32x1xf32>
    %60 = vector.broadcast %59 : vector<32x1xf32> to vector<32x1024xf32>
    %61 = arith.mulf %48, %60 : vector<32x1024xf32>
    %c0_21 = arith.constant 0 : index
    %c0_22 = arith.constant 0 : index
    %c0_23 = arith.constant 0 : index
    %62 = vector.load %arg7[%c0_21, %c0_22, %c0_23] : memref<4x32x1xf32, #tpu.memory_space<vmem>>, vector<1x32x1xf32>
    %63 = vector.shape_cast %62 : vector<1x32x1xf32> to vector<32x1xf32>
    %64 = vector.broadcast %63 : vector<32x1xf32> to vector<32x1024xf32>
    %65 = arith.addf %61, %64 : vector<32x1024xf32>
    %66 = arith.mulf %65, %0 : vector<32x1024xf32>
    %67 = tpu.concatenate %24, %66, %24 in 1 : vector<32x128xf32>, vector<32x1024xf32>, vector<32x128xf32> -> vector<32x1280xf32>
    %c1_i32_24 = arith.constant 1 : i32
    %68 = tpu.dynamic_rotate %67 by %c1_i32_24 dim 1 : vector<32x1280xf32>, i32 -> vector<32x1280xf32>
    %c1279_i32_25 = arith.constant 1279 : i32
    %69 = tpu.dynamic_rotate %67 by %c1279_i32_25 dim 1 : vector<32x1280xf32>, i32 -> vector<32x1280xf32>
    %70 = vector.extract_strided_slice %68 {offsets = [0, 0], sizes = [32, 1024], strides = [1, 1]} : vector<32x1280xf32> to vector<32x1024xf32>
    %71 = vector.extract_strided_slice %67 {offsets = [0, 0], sizes = [32, 1024], strides = [1, 1]} : vector<32x1280xf32> to vector<32x1024xf32>
    %72 = vector.extract_strided_slice %69 {offsets = [0, 0], sizes = [32, 1024], strides = [1, 1]} : vector<32x1280xf32> to vector<32x1024xf32>
    %73 = vector.extract_strided_slice %68 {offsets = [0, 128], sizes = [32, 1024], strides = [1, 1]} : vector<32x1280xf32> to vector<32x1024xf32>
    %74 = vector.extract_strided_slice %67 {offsets = [0, 128], sizes = [32, 1024], strides = [1, 1]} : vector<32x1280xf32> to vector<32x1024xf32>
    %75 = vector.extract_strided_slice %69 {offsets = [0, 128], sizes = [32, 1024], strides = [1, 1]} : vector<32x1280xf32> to vector<32x1024xf32>
    %76 = vector.extract_strided_slice %68 {offsets = [0, 256], sizes = [32, 1024], strides = [1, 1]} : vector<32x1280xf32> to vector<32x1024xf32>
    %77 = vector.extract_strided_slice %67 {offsets = [0, 256], sizes = [32, 1024], strides = [1, 1]} : vector<32x1280xf32> to vector<32x1024xf32>
    %78 = vector.extract_strided_slice %69 {offsets = [0, 256], sizes = [32, 1024], strides = [1, 1]} : vector<32x1280xf32> to vector<32x1024xf32>
    %79 = tpu.concatenate %70, %71, %72, %73, %74, %75, %76, %77, %78 in 0 : vector<32x1024xf32>, vector<32x1024xf32>, vector<32x1024xf32>, vector<32x1024xf32>, vector<32x1024xf32>, vector<32x1024xf32>, vector<32x1024xf32>, vector<32x1024xf32>, vector<32x1024xf32> -> vector<288x1024xf32>
    %c1 = arith.constant 1 : index
    %c0_26 = arith.constant 0 : index
    %c0_27 = arith.constant 0 : index
    %80 = vector.load %arg5[%c1, %c0_26, %c0_27] : memref<4x32x288xf32, #tpu.memory_space<vmem>>, vector<1x32x288xf32>
    %81 = vector.shape_cast %80 : vector<1x32x288xf32> to vector<32x288xf32>
    %cst_28 = arith.constant dense<0.000000e+00> : vector<32x1024xf32>
    %82 = tpu.matmul %81, %79, %cst_28 {dimension_numbers = #tpu.dot_dimension_numbers<[1], [0], [0], [1], [0, 0, 1, 1], [], []>} : vector<32x288xf32>, vector<288x1024xf32>, vector<32x1024xf32> -> vector<32x1024xf32>
    %83 = arith.mulf %82, %0 : vector<32x1024xf32>
    %cst_29 = arith.constant dense<0.000000e+00> : vector<32xf32>
    %84 = vector.multi_reduction <add>, %83, %cst_29 [1] : vector<32x1024xf32> to vector<32xf32>
    %85 = vector.shape_cast %84 : vector<32xf32> to vector<32x1xf32>
    %cst_30 = arith.constant 7.812500e-03 : f32
    %86 = vector.broadcast %cst_30 : f32 to vector<32x1xf32>
    %87 = arith.mulf %85, %86 : vector<32x1xf32>
    %88 = vector.broadcast %87 : vector<32x1xf32> to vector<32x1024xf32>
    %89 = arith.subf %82, %88 : vector<32x1024xf32>
    %90 = arith.mulf %89, %0 : vector<32x1024xf32>
    %91 = arith.mulf %90, %90 : vector<32x1024xf32>
    %cst_31 = arith.constant dense<0.000000e+00> : vector<32xf32>
    %92 = vector.multi_reduction <add>, %91, %cst_31 [1] : vector<32x1024xf32> to vector<32xf32>
    %93 = vector.shape_cast %92 : vector<32xf32> to vector<32x1xf32>
    %cst_32 = arith.constant 7.812500e-03 : f32
    %94 = vector.broadcast %cst_32 : f32 to vector<32x1xf32>
    %95 = arith.mulf %93, %94 : vector<32x1xf32>
    %c1_33 = arith.constant 1 : index
    %c0_34 = arith.constant 0 : index
    %c0_35 = arith.constant 0 : index
    %96 = vector.load %arg6[%c1_33, %c0_34, %c0_35] : memref<4x32x1xf32, #tpu.memory_space<vmem>>, vector<1x32x1xf32>
    %97 = vector.shape_cast %96 : vector<1x32x1xf32> to vector<32x1xf32>
    %cst_36 = arith.constant 9.99999974E-6 : f32
    %98 = vector.broadcast %cst_36 : f32 to vector<32x1xf32>
    %99 = arith.addf %95, %98 : vector<32x1xf32>
    %100 = math.rsqrt %99 : vector<32x1xf32>
    %101 = arith.mulf %97, %100 : vector<32x1xf32>
    %102 = vector.broadcast %101 : vector<32x1xf32> to vector<32x1024xf32>
    %103 = arith.mulf %90, %102 : vector<32x1024xf32>
    %c1_37 = arith.constant 1 : index
    %c0_38 = arith.constant 0 : index
    %c0_39 = arith.constant 0 : index
    %104 = vector.load %arg7[%c1_37, %c0_38, %c0_39] : memref<4x32x1xf32, #tpu.memory_space<vmem>>, vector<1x32x1xf32>
    %105 = vector.shape_cast %104 : vector<1x32x1xf32> to vector<32x1xf32>
    %106 = vector.broadcast %105 : vector<32x1xf32> to vector<32x1024xf32>
    %107 = arith.addf %103, %106 : vector<32x1024xf32>
    %108 = arith.mulf %107, %0 : vector<32x1024xf32>
    %109 = tpu.concatenate %24, %108, %24 in 1 : vector<32x128xf32>, vector<32x1024xf32>, vector<32x128xf32> -> vector<32x1280xf32>
    %c1_i32_40 = arith.constant 1 : i32
    %110 = tpu.dynamic_rotate %109 by %c1_i32_40 dim 1 : vector<32x1280xf32>, i32 -> vector<32x1280xf32>
    %c1279_i32_41 = arith.constant 1279 : i32
    %111 = tpu.dynamic_rotate %109 by %c1279_i32_41 dim 1 : vector<32x1280xf32>, i32 -> vector<32x1280xf32>
    %112 = vector.extract_strided_slice %110 {offsets = [0, 0], sizes = [32, 1024], strides = [1, 1]} : vector<32x1280xf32> to vector<32x1024xf32>
    %113 = vector.extract_strided_slice %109 {offsets = [0, 0], sizes = [32, 1024], strides = [1, 1]} : vector<32x1280xf32> to vector<32x1024xf32>
    %114 = vector.extract_strided_slice %111 {offsets = [0, 0], sizes = [32, 1024], strides = [1, 1]} : vector<32x1280xf32> to vector<32x1024xf32>
    %115 = vector.extract_strided_slice %110 {offsets = [0, 128], sizes = [32, 1024], strides = [1, 1]} : vector<32x1280xf32> to vector<32x1024xf32>
    %116 = vector.extract_strided_slice %109 {offsets = [0, 128], sizes = [32, 1024], strides = [1, 1]} : vector<32x1280xf32> to vector<32x1024xf32>
    %117 = vector.extract_strided_slice %111 {offsets = [0, 128], sizes = [32, 1024], strides = [1, 1]} : vector<32x1280xf32> to vector<32x1024xf32>
    %118 = vector.extract_strided_slice %110 {offsets = [0, 256], sizes = [32, 1024], strides = [1, 1]} : vector<32x1280xf32> to vector<32x1024xf32>
    %119 = vector.extract_strided_slice %109 {offsets = [0, 256], sizes = [32, 1024], strides = [1, 1]} : vector<32x1280xf32> to vector<32x1024xf32>
    %120 = vector.extract_strided_slice %111 {offsets = [0, 256], sizes = [32, 1024], strides = [1, 1]} : vector<32x1280xf32> to vector<32x1024xf32>
    %121 = tpu.concatenate %112, %113, %114, %115, %116, %117, %118, %119, %120 in 0 : vector<32x1024xf32>, vector<32x1024xf32>, vector<32x1024xf32>, vector<32x1024xf32>, vector<32x1024xf32>, vector<32x1024xf32>, vector<32x1024xf32>, vector<32x1024xf32>, vector<32x1024xf32> -> vector<288x1024xf32>
    %c2 = arith.constant 2 : index
    %c0_42 = arith.constant 0 : index
    %c0_43 = arith.constant 0 : index
    %122 = vector.load %arg5[%c2, %c0_42, %c0_43] : memref<4x32x288xf32, #tpu.memory_space<vmem>>, vector<1x32x288xf32>
    %123 = vector.shape_cast %122 : vector<1x32x288xf32> to vector<32x288xf32>
    %cst_44 = arith.constant dense<0.000000e+00> : vector<32x1024xf32>
    %124 = tpu.matmul %123, %121, %cst_44 {dimension_numbers = #tpu.dot_dimension_numbers<[1], [0], [0], [1], [0, 0, 1, 1], [], []>} : vector<32x288xf32>, vector<288x1024xf32>, vector<32x1024xf32> -> vector<32x1024xf32>
    %125 = arith.mulf %124, %0 : vector<32x1024xf32>
    %cst_45 = arith.constant dense<0.000000e+00> : vector<32xf32>
    %126 = vector.multi_reduction <add>, %125, %cst_45 [1] : vector<32x1024xf32> to vector<32xf32>
    %127 = vector.shape_cast %126 : vector<32xf32> to vector<32x1xf32>
    %cst_46 = arith.constant 7.812500e-03 : f32
    %128 = vector.broadcast %cst_46 : f32 to vector<32x1xf32>
    %129 = arith.mulf %127, %128 : vector<32x1xf32>
    %130 = vector.broadcast %129 : vector<32x1xf32> to vector<32x1024xf32>
    %131 = arith.subf %124, %130 : vector<32x1024xf32>
    %132 = arith.mulf %131, %0 : vector<32x1024xf32>
    %133 = arith.mulf %132, %132 : vector<32x1024xf32>
    %cst_47 = arith.constant dense<0.000000e+00> : vector<32xf32>
    %134 = vector.multi_reduction <add>, %133, %cst_47 [1] : vector<32x1024xf32> to vector<32xf32>
    %135 = vector.shape_cast %134 : vector<32xf32> to vector<32x1xf32>
    %cst_48 = arith.constant 7.812500e-03 : f32
    %136 = vector.broadcast %cst_48 : f32 to vector<32x1xf32>
    %137 = arith.mulf %135, %136 : vector<32x1xf32>
    %c2_49 = arith.constant 2 : index
    %c0_50 = arith.constant 0 : index
    %c0_51 = arith.constant 0 : index
    %138 = vector.load %arg6[%c2_49, %c0_50, %c0_51] : memref<4x32x1xf32, #tpu.memory_space<vmem>>, vector<1x32x1xf32>
    %139 = vector.shape_cast %138 : vector<1x32x1xf32> to vector<32x1xf32>
    %cst_52 = arith.constant 9.99999974E-6 : f32
    %140 = vector.broadcast %cst_52 : f32 to vector<32x1xf32>
    %141 = arith.addf %137, %140 : vector<32x1xf32>
    %142 = math.rsqrt %141 : vector<32x1xf32>
    %143 = arith.mulf %139, %142 : vector<32x1xf32>
    %144 = vector.broadcast %143 : vector<32x1xf32> to vector<32x1024xf32>
    %145 = arith.mulf %132, %144 : vector<32x1024xf32>
    %c2_53 = arith.constant 2 : index
    %c0_54 = arith.constant 0 : index
    %c0_55 = arith.constant 0 : index
    %146 = vector.load %arg7[%c2_53, %c0_54, %c0_55] : memref<4x32x1xf32, #tpu.memory_space<vmem>>, vector<1x32x1xf32>
    %147 = vector.shape_cast %146 : vector<1x32x1xf32> to vector<32x1xf32>
    %148 = vector.broadcast %147 : vector<32x1xf32> to vector<32x1024xf32>
    %149 = arith.addf %145, %148 : vector<32x1024xf32>
    %150 = arith.mulf %149, %0 : vector<32x1024xf32>
    %151 = tpu.concatenate %24, %150, %24 in 1 : vector<32x128xf32>, vector<32x1024xf32>, vector<32x128xf32> -> vector<32x1280xf32>
    %c1_i32_56 = arith.constant 1 : i32
    %152 = tpu.dynamic_rotate %151 by %c1_i32_56 dim 1 : vector<32x1280xf32>, i32 -> vector<32x1280xf32>
    %c1279_i32_57 = arith.constant 1279 : i32
    %153 = tpu.dynamic_rotate %151 by %c1279_i32_57 dim 1 : vector<32x1280xf32>, i32 -> vector<32x1280xf32>
    %154 = vector.extract_strided_slice %152 {offsets = [0, 0], sizes = [32, 1024], strides = [1, 1]} : vector<32x1280xf32> to vector<32x1024xf32>
    %155 = vector.extract_strided_slice %151 {offsets = [0, 0], sizes = [32, 1024], strides = [1, 1]} : vector<32x1280xf32> to vector<32x1024xf32>
    %156 = vector.extract_strided_slice %153 {offsets = [0, 0], sizes = [32, 1024], strides = [1, 1]} : vector<32x1280xf32> to vector<32x1024xf32>
    %157 = vector.extract_strided_slice %152 {offsets = [0, 128], sizes = [32, 1024], strides = [1, 1]} : vector<32x1280xf32> to vector<32x1024xf32>
    %158 = vector.extract_strided_slice %151 {offsets = [0, 128], sizes = [32, 1024], strides = [1, 1]} : vector<32x1280xf32> to vector<32x1024xf32>
    %159 = vector.extract_strided_slice %153 {offsets = [0, 128], sizes = [32, 1024], strides = [1, 1]} : vector<32x1280xf32> to vector<32x1024xf32>
    %160 = vector.extract_strided_slice %152 {offsets = [0, 256], sizes = [32, 1024], strides = [1, 1]} : vector<32x1280xf32> to vector<32x1024xf32>
    %161 = vector.extract_strided_slice %151 {offsets = [0, 256], sizes = [32, 1024], strides = [1, 1]} : vector<32x1280xf32> to vector<32x1024xf32>
    %162 = vector.extract_strided_slice %153 {offsets = [0, 256], sizes = [32, 1024], strides = [1, 1]} : vector<32x1280xf32> to vector<32x1024xf32>
    %163 = tpu.concatenate %154, %155, %156, %157, %158, %159, %160, %161, %162 in 0 : vector<32x1024xf32>, vector<32x1024xf32>, vector<32x1024xf32>, vector<32x1024xf32>, vector<32x1024xf32>, vector<32x1024xf32>, vector<32x1024xf32>, vector<32x1024xf32>, vector<32x1024xf32> -> vector<288x1024xf32>
    %c3 = arith.constant 3 : index
    %c0_58 = arith.constant 0 : index
    %c0_59 = arith.constant 0 : index
    %164 = vector.load %arg5[%c3, %c0_58, %c0_59] : memref<4x32x288xf32, #tpu.memory_space<vmem>>, vector<1x32x288xf32>
    %165 = vector.shape_cast %164 : vector<1x32x288xf32> to vector<32x288xf32>
    %cst_60 = arith.constant dense<0.000000e+00> : vector<32x1024xf32>
    %166 = tpu.matmul %165, %163, %cst_60 {dimension_numbers = #tpu.dot_dimension_numbers<[1], [0], [0], [1], [0, 0, 1, 1], [], []>} : vector<32x288xf32>, vector<288x1024xf32>, vector<32x1024xf32> -> vector<32x1024xf32>
    %167 = arith.mulf %166, %0 : vector<32x1024xf32>
    %cst_61 = arith.constant dense<0.000000e+00> : vector<32xf32>
    %168 = vector.multi_reduction <add>, %167, %cst_61 [1] : vector<32x1024xf32> to vector<32xf32>
    %169 = vector.shape_cast %168 : vector<32xf32> to vector<32x1xf32>
    %cst_62 = arith.constant 7.812500e-03 : f32
    %170 = vector.broadcast %cst_62 : f32 to vector<32x1xf32>
    %171 = arith.mulf %169, %170 : vector<32x1xf32>
    %172 = vector.broadcast %171 : vector<32x1xf32> to vector<32x1024xf32>
    %173 = arith.subf %166, %172 : vector<32x1024xf32>
    %174 = arith.mulf %173, %0 : vector<32x1024xf32>
    %175 = arith.mulf %174, %174 : vector<32x1024xf32>
    %cst_63 = arith.constant dense<0.000000e+00> : vector<32xf32>
    %176 = vector.multi_reduction <add>, %175, %cst_63 [1] : vector<32x1024xf32> to vector<32xf32>
    %177 = vector.shape_cast %176 : vector<32xf32> to vector<32x1xf32>
    %cst_64 = arith.constant 7.812500e-03 : f32
    %178 = vector.broadcast %cst_64 : f32 to vector<32x1xf32>
    %179 = arith.mulf %177, %178 : vector<32x1xf32>
    %c3_65 = arith.constant 3 : index
    %c0_66 = arith.constant 0 : index
    %c0_67 = arith.constant 0 : index
    %180 = vector.load %arg6[%c3_65, %c0_66, %c0_67] : memref<4x32x1xf32, #tpu.memory_space<vmem>>, vector<1x32x1xf32>
    %181 = vector.shape_cast %180 : vector<1x32x1xf32> to vector<32x1xf32>
    %cst_68 = arith.constant 9.99999974E-6 : f32
    %182 = vector.broadcast %cst_68 : f32 to vector<32x1xf32>
    %183 = arith.addf %179, %182 : vector<32x1xf32>
    %184 = math.rsqrt %183 : vector<32x1xf32>
    %185 = arith.mulf %181, %184 : vector<32x1xf32>
    %186 = vector.broadcast %185 : vector<32x1xf32> to vector<32x1024xf32>
    %187 = arith.mulf %174, %186 : vector<32x1024xf32>
    %c3_69 = arith.constant 3 : index
    %c0_70 = arith.constant 0 : index
    %c0_71 = arith.constant 0 : index
    %188 = vector.load %arg7[%c3_69, %c0_70, %c0_71] : memref<4x32x1xf32, #tpu.memory_space<vmem>>, vector<1x32x1xf32>
    %189 = vector.shape_cast %188 : vector<1x32x1xf32> to vector<32x1xf32>
    %190 = vector.broadcast %189 : vector<32x1xf32> to vector<32x1024xf32>
    %191 = arith.addf %187, %190 : vector<32x1024xf32>
    %192 = arith.mulf %191, %0 : vector<32x1024xf32>
    %193 = vector.extract_strided_slice %192 {offsets = [0, 0], sizes = [32, 128], strides = [1, 1]} : vector<32x1024xf32> to vector<32x128xf32>
    %194 = vector.extract_strided_slice %192 {offsets = [0, 128], sizes = [32, 128], strides = [1, 1]} : vector<32x1024xf32> to vector<32x128xf32>
    %195 = vector.extract_strided_slice %192 {offsets = [0, 256], sizes = [32, 128], strides = [1, 1]} : vector<32x1024xf32> to vector<32x128xf32>
    %196 = vector.extract_strided_slice %192 {offsets = [0, 384], sizes = [32, 128], strides = [1, 1]} : vector<32x1024xf32> to vector<32x128xf32>
    %197 = vector.extract_strided_slice %192 {offsets = [0, 512], sizes = [32, 128], strides = [1, 1]} : vector<32x1024xf32> to vector<32x128xf32>
    %198 = vector.extract_strided_slice %192 {offsets = [0, 640], sizes = [32, 128], strides = [1, 1]} : vector<32x1024xf32> to vector<32x128xf32>
    %199 = vector.extract_strided_slice %192 {offsets = [0, 768], sizes = [32, 128], strides = [1, 1]} : vector<32x1024xf32> to vector<32x128xf32>
    %200 = vector.extract_strided_slice %192 {offsets = [0, 896], sizes = [32, 128], strides = [1, 1]} : vector<32x1024xf32> to vector<32x128xf32>
    %201 = tpu.concatenate %193, %194, %195, %196, %197, %198, %199, %200 in 0 : vector<32x128xf32>, vector<32x128xf32>, vector<32x128xf32>, vector<32x128xf32>, vector<32x128xf32>, vector<32x128xf32>, vector<32x128xf32>, vector<32x128xf32> -> vector<256x128xf32>
    %c0_72 = arith.constant 0 : index
    %c0_73 = arith.constant 0 : index
    %202 = vector.load %arg8[%c0_72, %c0_73] : memref<24x256xf32, #tpu.memory_space<vmem>>, vector<24x256xf32>
    %cst_74 = arith.constant dense<0.000000e+00> : vector<24x128xf32>
    %203 = tpu.matmul %202, %201, %cst_74 {dimension_numbers = #tpu.dot_dimension_numbers<[1], [0], [0], [1], [0, 0, 1, 1], [], []>} : vector<24x256xf32>, vector<256x128xf32>, vector<24x128xf32> -> vector<24x128xf32>
    %c0_75 = arith.constant 0 : index
    %c0_76 = arith.constant 0 : index
    %204 = vector.load %arg9[%c0_75, %c0_76] : memref<24x1xf32, #tpu.memory_space<vmem>>, vector<24x1xf32>
    %205 = vector.broadcast %204 : vector<24x1xf32> to vector<24x128xf32>
    %206 = arith.addf %203, %205 : vector<24x128xf32>
    %c0_77 = arith.constant 0 : index
    %c0_78 = arith.constant 0 : index
    %207 = vector.load %arg10[%c0_77, %c0_78] : memref<24x128xf32, #tpu.memory_space<vmem>>, vector<24x128xf32>
    tpu.vector_store %arg10[%c0_77, %c0_78], %206 {strides = array<i32>} : memref<24x128xf32, #tpu.memory_space<vmem>>, vector<24x128xf32>,
    return
  }
}

</mosaic_0001>

<bundles_post_ra>
// kernel: tpu_custom_call.1
= control target key start
LH: loop header
LB: loop body
LE: loop exit
PB: predicated region body
PF: predicated region fallthrough
CT: control target
= control target key end

     0   :  { %16 = vsyncpa [#allocation4], 0  ;;  %s14970_s0 = inlined_call_operand.vmem [shape: f32[2,1024], index: 0, kind: input, shape index: {}]   ;;  %s14971_s1 = inlined_call_operand.vmem [shape: f32[32,1024], index: 1, kind: input, shape index: {}]   ;;  %s14972_s2 = inlined_call_operand.vmem [shape: f32[32,2], index: 2, kind: input, shape index: {}]   ;;  %s14973_s3 = inlined_call_operand.vmem [shape: f32[32,1], index: 3, kind: input, shape index: {}]   ;;  %s14974_s4 = inlined_call_operand.<no memory space> [shape: f32[1], index: 4, kind: input, shape index: {}]   ;;  %s14975_s5 = inlined_call_operand.hbm [shape: f32[4,32,288], index: 5, kind: input, shape index: {}]   ;;  %s14976_s6 = inlined_call_operand.vmem [shape: f32[4,32,1], index: 6, kind: input, shape index: {}]   ;;  %s14977_s7 = inlined_call_operand.vmem [shape: f32[4,32,1], index: 7, kind: input, shape index: {}]   ;;  %s14978_s8 = inlined_call_operand.vmem [shape: f32[24,256], index: 8, kind: input, shape index: {}]   ;;  %s14979_s9 = inlined_call_operand.vmem [shape: f32[24,1], index: 9, kind: input, shape index: {}]   ;;  %s14980_s10 = inlined_call_operand.hbm [shape: f32[24,128], index: 10, kind: output, shape index: {}]  }
   0x1   :  { %17 = vsyncpa [#allocation5], 0  ;;  %s32_s15 = sshll.u32 %s14975_s5, 4  ;;  %s6913_s16 = smov [#allocation3]   ;;  %s33_s15 = int_to_ptr.hbm [resolvable:$true] %s32_s15 }
   0x2   :  { %s34_s17 = sshll.u32 %s6913_s16, 4  ;;  %s6914_s18 = smov 384   ;;  %s35_s17 = int_to_ptr.vmem [resolvable:$true] %s34_s17 }
   0x3   :  { %s6915_s19 = smov 24  }
   0x4   :  { %40 = dma.hbm_to_vmem [thread:$0]  %s33_s15, 6144, %s35_s17, [#allocation4], %s6914_s18, %s6914_s18, %s6915_s19  }
   0x5   :  { %6909 = dma.done.wait [#allocation4], 6144  }
   0x6   :  { %6910 = vsyncadd [#allocation4], 4294961152  ;;  %v6916_v0 = vmov 0   ;;  %v90_v1 = vld [vmem:[%s14972_s2 + $0x18] sm:$0xff]  ;;  %v89_v2 = vld [vmem:[%s14972_s2 + $0x10] sm:$0xff]  ;;  %v6917_v4 = vmov 1   ;;  %v7045_v40 = vstv %s14974_s4 }
   0x7   :  { %6054 = vset.pattern.permute.xlu2 %v6916_v0  ;;  %6052 = vset.pattern.permute.xlu1 %v6916_v0  ;;  %v88_v3 = vld [vmem:[%s14972_s2 + $0x8] sm:$0xff]  ;;  %v87_v5 = vld [vmem:[%s14972_s2] sm:$0xff]  ;;  %v276_v6 = vld [vmem:[%s14973_s3 + $0x18] sm:$0xff]  ;;  %s6918_s5 = smov 127   ;;  %s6919_s24 = smov 1  }
   0x8   :  { %6050 = vset.pattern.permute.xlu0 %v6916_v0  ;;  %103 = vperm.xlu1 %6052, %v89_v2   ;;  %v273_v7 = vld [vmem:[%s14973_s3] sm:$0xff]  ;;  %v275_v8 = vld [vmem:[%s14973_s3 + $0x10] sm:$0xff]  ;;  %v274_v9 = vld [vmem:[%s14973_s3 + $0x8] sm:$0xff]  ;;  %s6921_s4 = smov [#allocation6]   ;;  %s6922_s20 = smov 128  }
   0x9   :  { %108 = vperm.xlu0 %6050, %v90_v1   ;;  %98 = vperm.xlu2 %6054, %v88_v3   ;;  %v7013_v12 = vld [vmem:[%s14970_s0] sm:$0xff]  ;;  %v78_v58 = vld [vmem:[%s14971_s1 + $0xc8] sm:$0xff]  ;;  %s5840_s17 = sshll.u32 %s6921_s4, 4  ;;  %s6923_s21 = smov 8   ;;  %s5841_s17 = int_to_ptr.vmem [resolvable:$true] %s5840_s17 }
   0xa   :  { %v114_v13 = vperm.slane %v7013_v12, 2  ;;  %v186_v16 = vperm.slane %v7013_v12, 3  ;;  %v113_v17 = vperm.slane %v7013_v12, 0  ;;  %v185_v18 = vperm.slane %v7013_v12, 1  ;;  %v77_v63 = vld [vmem:[%s14971_s1 + $0xc0] sm:$0xff] }
   0xb   :  { %v115_v33 = vperm.slane %v7013_v12, 4  ;;  %v116_v34 = vperm.slane %v7013_v12, 6  ;;  %v187_v36 = vperm.slane %v7013_v12, 5  ;;  %v188_v47 = vperm.slane %v7013_v12, 7 }
   0xc   :  { %v130_v20 = vperm.slane %v114_v13, 0  ;;  %v202_v21 = vperm.slane %v186_v16, 1  ;;  %v129_v22 = vperm.slane %v113_v17, 0  ;;  %v201_v23 = vperm.slane %v185_v18, 1 }
   0xd   :  { %v7051_v44 = vperm.slane %v115_v33, 0  ;;  %v7053_v45 = vperm.slane %v116_v34, 0  ;;  %v7056_v48 = vperm.slane %v187_v36, 1 }
  0x10   :  { %6053 = vset.pattern.permute.xlu1 %v6917_v4 }
  0x11   :  { %6051 = vset.pattern.permute.xlu0 %v6917_v4  ;;  %6055 = vset.pattern.permute.xlu2 %v6917_v4 }
  0x12   :  { %182 = vperm.xlu0 %6051, %v90_v1   ;;  %178 = vperm.xlu1 %6053, %v89_v2  }
  0x13   :  { %174 = vperm.xlu2 %6055, %v88_v3  }
  0x1a   :  { %170 = vperm.xlu0 %6051, %v87_v5   ;;  %6056 = vset.pattern.permute.xlu1 %v6916_v0 }
  0x1b   :  { %6057 = vset.pattern.permute.xlu2 %v6916_v0  ;;  %294 = vperm.xlu1 %6056, %v276_v6  }
  0x1c   :  { %93 = vperm.xlu2 %6057, %v87_v5  }
  0x22   :  { %6058 = vset.pattern.permute.xlu0 %v6916_v0 }
  0x23   :  { %279 = vperm.xlu0 %6058, %v273_v7   ;;  %289 = vperm.xlu1 %6056, %v275_v8  }
  0x24   :  { %284 = vperm.xlu2 %6057, %v274_v9  }
  0x63   :  { %v7006_v10 = vpop.permute.xlu2 %98 }
  0x64   :  { %v146_v24 = vmul.f32 %v130_v20, %v7006_v10  ;;  %v145_v27 = vmul.f32 %v129_v22, %v7006_v10 }
  0x6d   :  { %v7008_v11 = vpop.permute.xlu2 %174 }
  0x6e   :  { %v218_v25 = vmul.f32 %v202_v21, %v7008_v11  ;;  %v217_v28 = vmul.f32 %v201_v23, %v7008_v11 }
  0x70   :  { %v250_v30 = vadd.f32 %v218_v25, %v146_v24  ;;  %v249_v32 = vadd.f32 %v217_v28, %v145_v27  ;;  %v7103_v28 = vperm.slane %v188_v47, 1  ;;  %v69_v47 = vld [vmem:[%s14971_s1 + $0x80] sm:$0xff] }
  0x76   :  { %v7023_v19 = vpop.permute.xlu2 %93 }
  0x77   :  { %v138_v49 = vmul.f32 %v130_v20, %v7023_v19  ;;  %v137_v54 = vmul.f32 %v129_v22, %v7023_v19 }
  0x7a   :  { %v7016_v14 = vpop.permute.xlu1 %103 }
  0x7b   :  { %v7018_v15 = vpop.permute.xlu0 %108  ;;  %v154_v4 = vmul.f32 %v130_v20, %v7016_v14  ;;  %v153_v5 = vmul.f32 %v129_v22, %v7016_v14 }
  0x7c   :  { %v162_v38 = vmul.f32 %v130_v20, %v7018_v15  ;;  %v161_v42 = vmul.f32 %v129_v22, %v7018_v15  ;;  %v163_v2 = vmul.f32 %v7051_v44, %v7018_v15  ;;  %v62_v22 = vld [vmem:[%s14971_s1 + $0x48] sm:$0xff] }
  0x7e   :  { %v7033_v31 = vpop.permute.xlu2 %284 }
  0x7f   :  { %v306_v39 = vadd.f32 %v7033_v31, %v250_v30  ;;  %v305_v43 = vadd.f32 %v7033_v31, %v249_v32  ;;  %v139_v30 = vmul.f32 %v7051_v44, %v7023_v19 }
  0x81   :  { %vm339_vm0 = vcmp.ge.f32.partialorder %v306_v39, 0.0  ;;  %v372_v53 = vmul.f32 %v7045_v40, %v306_v39  ;;  %vm338_vm1 = vcmp.ge.f32.partialorder %v305_v43, 0.0  ;;  %v371_v61 = vmul.f32 %v7045_v40, %v305_v43 }
  0x83   :  { %v404_v17 = vsel %vm339_vm0, %v306_v39, %v372_v53  ;;  %v403_v18 = vsel %vm338_vm1, %v305_v43, %v371_v61 }
  0x84   :  { %v7027_v26 = vpop.permute.xlu0 %182  ;;  %v7031_v29 = vpop.permute.xlu1 %178 }
  0x85   :  { %v234_v35 = vmul.f32 %v202_v21, %v7027_v26  ;;  %v233_v37 = vmul.f32 %v201_v23, %v7027_v26  ;;  %v226_v60 = vmul.f32 %v202_v21, %v7031_v29  ;;  %v235_v62 = vmul.f32 %v7056_v48, %v7027_v26 }
  0x86   :  { %v225_v1 = vmul.f32 %v201_v23, %v7031_v29  ;;  %v227_v33 = vmul.f32 %v7056_v48, %v7031_v29 }
  0x87   :  { %v266_v46 = vadd.f32 %v234_v35, %v162_v38  ;;  %v265_v51 = vadd.f32 %v233_v37, %v161_v42  ;;  %v258_v16 = vadd.f32 %v226_v60, %v154_v4  ;;  %v267_v27 = vadd.f32 %v235_v62, %v163_v2  ;;  %v70_v42 = vld [vmem:[%s14971_s1 + $0x88] sm:$0xff] }
  0x88   :  { %v257_v20 = vadd.f32 %v225_v1, %v153_v5  ;;  %v155_v37 = vmul.f32 %v7051_v44, %v7016_v14  ;;  %v7118_v38 = vmul.f32 %v404_v17, %v62_v22  ;;  %v164_v4 = vmul.f32 %v7053_v45, %v7018_v15 }
  0x8c   :  { %v7047_v41 = vpop.permute.xlu0 %170 }
  0x8d   :  { %v7059_v50 = vpop.permute.xlu1 %294  ;;  %v210_v55 = vmul.f32 %v202_v21, %v7047_v41  ;;  %v209_v57 = vmul.f32 %v201_v23, %v7047_v41  ;;  %v61_v23 = vld [vmem:[%s14971_s1 + $0x40] sm:$0xff] }
  0x8e   :  { %v322_v52 = vadd.f32 %v7059_v50, %v266_v46  ;;  %v321_v56 = vadd.f32 %v7059_v50, %v265_v51  ;;  %v323_v36 = vadd.f32 %v7059_v50, %v267_v27  ;;  %v7120_v39 = vmul.f32 %v403_v18, %v61_v23  ;;  %v53_v51 = vld [vmem:[%s14971_s1] sm:$0xff]  ;;  %v79_v18 = vld [vmem:[%s14971_s1 + $0xd0] sm:$0xff] }
  0x8f   :  { %v241_v8 = vadd.f32 %v209_v57, %v137_v54  ;;  %v242_v9 = vadd.f32 %v210_v55, %v138_v49  ;;  %v211_v46 = vmul.f32 %v7056_v48, %v7047_v41  ;;  %v7143_v55 = vld [vmem:[%s14970_s0 + $0x8] sm:$0xff]  ;;  %v228_v27 = vmul.f32 %v7103_v28, %v7031_v29 }
  0x90   :  { %vm355_vm2 = vcmp.ge.f32.partialorder %v322_v52, 0.0  ;;  %v388_v59 = vmul.f32 %v7045_v40, %v322_v52  ;;  %vm354_vm3 = vcmp.ge.f32.partialorder %v321_v56, 0.0  ;;  %v387_v0 = vmul.f32 %v7045_v40, %v321_v56 }
  0x91   :  { %vm356_vm8 = vcmp.ge.f32.partialorder %v323_v36, 0.0  ;;  %v7164_v5 = vpack.i.bf16 %v7118_v38, %v7120_v39 }
  0x92   :  { %v420_v3 = vsel %vm355_vm2, %v322_v52, %v388_v59  ;;  %v419_v7 = vsel %vm354_vm3, %v321_v56, %v387_v0  ;;  %v54_v52 = vld [vmem:[%s14971_s1 + $0x8] sm:$0xff]  ;;  %v236_v56 = vmul.f32 %v7103_v28, %v7027_v26  ;;  %v259_v59 = vadd.f32 %v227_v33, %v155_v37 }
  0x93   :  { %v7084_v6 = vmul.f32 %v420_v3, %v78_v58  ;;  %v7088_v13 = vmul.f32 %v419_v7, %v77_v63  ;;  %v389_v58 = vmul.f32 %v7045_v40, %v323_v36  ;;  %v117_v3 = vperm.slane %v7143_v55, 0 }
  0x94   :  { %v243_v7 = vadd.f32 %v211_v46, %v139_v30  ;;  %v268_v22 = vadd.f32 %v236_v56, %v164_v4 }
  0x95   :  { %v7086_v12 = vpop.permute.xlu0 %279  ;;  %v7092_v21 = vpop.permute.xlu1 %289  ;;  %721 = vmatpush.msra.mxu1 %v7084_v6  ;;  %v6079_v32 = vpack.i.bf16 %v7084_v6, %v7088_v13 }
  0x96   :  { %v297_v24 = vadd.f32 %v7086_v12, %v241_v8  ;;  %v298_v25 = vadd.f32 %v7086_v12, %v242_v9  ;;  %v314_v34 = vadd.f32 %v7092_v21, %v258_v16  ;;  %v313_v35 = vadd.f32 %v7092_v21, %v257_v20 }
  0x97   :  { %6080 = vrot.lane.b32.xlu0 %v6079_v32, %s6918_s5  ;;  %6060 = vrot.lane.b32.xlu1 %v6079_v32, %s6919_s24  ;;  %v189_v8 = vperm.slane %v7143_v55, 1  ;;  %v315_v17 = vadd.f32 %v7092_v21, %v259_v59  ;;  %v421_v20 = vsel %vm356_vm8, %v323_v36, %v389_v58  ;;  %v299_v23 = vadd.f32 %v7086_v12, %v243_v7 }
  0x98   :  { %vm330_vm4 = vcmp.ge.f32.partialorder %v297_v24, 0.0  ;;  %vm347_vm5 = vcmp.ge.f32.partialorder %v314_v34, 0.0  ;;  %v380_v43 = vmul.f32 %v7045_v40, %v314_v34  ;;  %vm346_vm6 = vcmp.ge.f32.partialorder %v313_v35, 0.0 }
  0x99   :  { %vm331_vm7 = vcmp.ge.f32.partialorder %v298_v25, 0.0  ;;  %v379_v49 = vmul.f32 %v7045_v40, %v313_v35  ;;  %v363_v53 = vmul.f32 %v7045_v40, %v297_v24  ;;  %v364_v54 = vmul.f32 %v7045_v40, %v298_v25 }
  0x9a   :  { %v412_v57 = vsel %vm347_vm5, %v314_v34, %v380_v43  ;;  %v324_v30 = vadd.f32 %v7059_v50, %v268_v22  ;;  %v7189_v32 = vperm.slane %v117_v3, 0  ;;  %v7191_v33 = vperm.slane %v189_v8, 1  ;;  %v80_v3 = vld [vmem:[%s14971_s1 + $0xd8] sm:$0xff] }
  0x9b   :  { %v7148_v60 = vmul.f32 %v412_v57, %v70_v42  ;;  %v411_v61 = vsel %vm346_vm6, %v313_v35, %v379_v49  ;;  %v395_v62 = vsel %vm330_vm4, %v297_v24, %v363_v53  ;;  %v396_v63 = vsel %vm331_vm7, %v298_v25, %v364_v54  ;;  %v55_v53 = vld [vmem:[%s14971_s1 + $0x10] sm:$0xff] }
  0x9c   :  { %v7152_v0 = vmul.f32 %v411_v61, %v69_v47  ;;  %v7154_v1 = vmul.f32 %v395_v62, %v53_v51  ;;  %v7156_v2 = vmul.f32 %v396_v63, %v54_v52  ;;  %v147_v24 = vmul.f32 %v7051_v44, %v7006_v10  ;;  %v71_v47 = vld [vmem:[%s14971_s1 + $0x90] sm:$0xff] }
  0x9d   :  { %722 = vmatpush.msra.mxu1 %v7148_v60  ;;  %v219_v25 = vmul.f32 %v7056_v48, %v7008_v11  ;;  %v7193_v34 = vmul.f32 %v421_v20, %v79_v18  ;;  %v381_v35 = vmul.f32 %v7045_v40, %v315_v17  ;;  %v156_v44 = vmul.f32 %v7053_v45, %v7016_v14 }
  0x9e   :  { %v6064_v9 = vpack.i.bf16 %v7148_v60, %v7152_v0  ;;  %v6094_v16 = vpack.i.bf16 %v7156_v2, %v7154_v1  ;;  %vm348_vm9 = vcmp.ge.f32.partialorder %v315_v17, 0.0  ;;  %v365_v48 = vmul.f32 %v7045_v40, %v299_v23 }
  0x9f   :  { %723 = vmatpush.msra.mxu1 %v7118_v38  ;;  %6070 = vrot.lane.b32.xlu1 %v7164_v5, %s6919_s24  ;;  %vm332_vm10 = vcmp.ge.f32.partialorder %v299_v23, 0.0  ;;  %v390_v36 = vmul.f32 %v7045_v40, %v324_v30  ;;  %v260_v37 = vadd.f32 %v228_v27, %v156_v44  ;;  %v251_v42 = vadd.f32 %v219_v25, %v147_v24 }
  0xa0   :  { %6065 = vrot.lane.b32.xlu2 %v6064_v9, %s6919_s24  ;;  %6095 = vrot.lane.b32.xlu0 %v6094_v16, %s6918_s5  ;;  %v14981_v43 = vmov 0.0   ;;  %v413_v49 = vsel %vm348_vm9, %v315_v17, %v381_v35  ;;  %vm357_vm11 = vcmp.ge.f32.partialorder %v324_v30, 0.0  ;;  %v149_v51 = vmul.f32 %v7189_v32, %v7006_v10 }
  0xa1   :  { %724 = vmatpush.msra.mxu1 %v7156_v2  ;;  %v6109_v46 = vpack.i.bf16 %v7193_v34, %v14981_v43  ;;  %v221_v52 = vmul.f32 %v7191_v33, %v7008_v11  ;;  %v397_v54 = vsel %vm332_vm10, %v299_v23, %v365_v48  ;;  %v316_v56 = vadd.f32 %v7092_v21, %v260_v37  ;;  %v72_v48 = vld [vmem:[%s14971_s1 + $0x98] sm:$0xff] }
  0xa2   :  { %v118_v57 = vperm.slane %v7143_v55, 2  ;;  %v148_v58 = vmul.f32 %v7053_v45, %v7006_v10  ;;  %v220_v59 = vmul.f32 %v7103_v28, %v7008_v11  ;;  %v141_v61 = vmul.f32 %v7189_v32, %v7023_v19 }
  0xa3   :  { %v213_v62 = vmul.f32 %v7191_v33, %v7047_v41  ;;  %v7225_v63 = vmul.f32 %v413_v49, %v71_v47  ;;  %v422_v4 = vsel %vm357_vm11, %v324_v30, %v390_v36  ;;  %v307_v7 = vadd.f32 %v7033_v31, %v251_v42  ;;  %v63_v49 = vld [vmem:[%s14971_s1 + $0x50] sm:$0xff] }
  0xa4   :  { %v190_v8 = vperm.slane %v7143_v55, 3  ;;  %v253_v17 = vadd.f32 %v221_v52, %v149_v51  ;;  %v7236_v18 = vmul.f32 %v422_v4, %v80_v3  ;;  %vm349_vm12 = vcmp.ge.f32.partialorder %v316_v56, 0.0 }
  0xa5   :  { %v252_v20 = vadd.f32 %v220_v59, %v148_v58  ;;  %v134_v22 = vperm.slane %v118_v57, 0  ;;  %v245_v23 = vadd.f32 %v213_v62, %v141_v61  ;;  %v6099_v24 = vpack.i.bf16 %v7225_v63, %v7193_v34 }
  0xa6   :  { %v373_v25 = vmul.f32 %v7045_v40, %v307_v7  ;;  %v206_v27 = vperm.slane %v190_v8, 1  ;;  %vm340_vm13 = vcmp.ge.f32.partialorder %v307_v7, 0.0  ;;  %v309_v35 = vadd.f32 %v7033_v31, %v253_v17 }
  0xa7   :  { %6085 = vrot.lane.b32.xlu1 %v6064_v9, %s6918_s5  ;;  %v7233_v9 = vmul.f32 %v397_v54, %v55_v53  ;;  %v301_v44 = vadd.f32 %v7086_v12, %v245_v23  ;;  %v140_v37 = vmul.f32 %v7053_v45, %v7023_v19  ;;  %v212_v42 = vmul.f32 %v7103_v28, %v7047_v41  ;;  %v57_v23 = vld [vmem:[%s14971_s1 + $0x20] sm:$0xff] }
  0xa8   :  { %6110 = vrot.lane.b32.xlu0 %v6109_v46, %s6919_s24  ;;  %6075 = vrot.lane.b32.xlu2 %v6094_v16, %s6919_s24  ;;  %v382_v16 = vmul.f32 %v7045_v40, %v316_v56  ;;  %v308_v46 = vadd.f32 %v7033_v31, %v252_v20  ;;  %v230_v47 = vmul.f32 %v206_v27, %v7031_v29  ;;  %vm342_vm14 = vcmp.ge.f32.partialorder %v309_v35, 0.0 }
  0xa9   :  { %v6119_v30 = vpack.i.bf16 %v7236_v18, %v7233_v9  ;;  %v405_v51 = vsel %vm340_vm13, %v307_v7, %v373_v25  ;;  %v150_v52 = vmul.f32 %v134_v22, %v7006_v10  ;;  %v222_v45 = vmul.f32 %v206_v27, %v7008_v11 }
  0xaa   :  { %v414_v36 = vsel %vm349_vm12, %v316_v56, %v382_v16  ;;  %v238_v28 = vmul.f32 %v206_v27, %v7027_v26  ;;  %v158_v54 = vmul.f32 %v134_v22, %v7016_v14  ;;  %v367_v56 = vmul.f32 %v7045_v40, %v301_v44 }
  0xab   :  { %v7264_v53 = vmul.f32 %v414_v36, %v72_v48  ;;  %v7269_v57 = vmul.f32 %v405_v51, %v63_v49  ;;  %v374_v58 = vmul.f32 %v7045_v40, %v308_v46  ;;  %vm334_vm15 = vcmp.ge.f32.partialorder %v301_v44, 0.0  ;;  %v64_v36 = vld [vmem:[%s14971_s1 + $0x58] sm:$0xff]  ;;  %v65_v49 = vld [vmem:[%s14971_s1 + $0x60] sm:$0xff] }
  0xac   :  { %v244_v59 = vadd.f32 %v212_v42, %v140_v37  ;;  %v229_v61 = vmul.f32 %v7191_v33, %v7031_v29  ;;  %v262_v62 = vadd.f32 %v230_v47, %v158_v54  ;;  %vm341_vm0 = vcmp.ge.f32.partialorder %v308_v46, 0.0 }
  0xad   :  { %v375_v3 = vmul.f32 %v7045_v40, %v309_v35  ;;  %v6129_v7 = vpack.i.bf16 %v7264_v53, %v7236_v18  ;;  %v6104_v8 = vpack.i.bf16 %v7233_v9, %v7269_v57  ;;  %v119_v16 = vperm.slane %v7143_v55, 4 }
  0xae   :  { %v300_v17 = vadd.f32 %v7086_v12, %v244_v59  ;;  %v318_v20 = vadd.f32 %v7092_v21, %v262_v62  ;;  %v191_v25 = vperm.slane %v7143_v55, 5  ;;  %v406_v37 = vsel %vm341_vm0, %v308_v46, %v374_v58 }
  0xaf   :  { %6100 = vrot.lane.b32.xlu1 %v6099_v24, %s6918_s5  ;;  %v399_v24 = vsel %vm334_vm15, %v301_v44, %v367_v56  ;;  %v142_v42 = vmul.f32 %v134_v22, %v7023_v19  ;;  %v254_v44 = vadd.f32 %v222_v45, %v150_v52  ;;  %v214_v47 = vmul.f32 %v206_v27, %v7047_v41 }
  0xb0   :  { %6120 = vrot.lane.b32.xlu0 %v6119_v30, %s6919_s24  ;;  %6090 = vrot.lane.b32.xlu2 %v7164_v5, %s6918_s5  ;;  %v166_v5 = vmul.f32 %v134_v22, %v7018_v15  ;;  %v157_v30 = vmul.f32 %v7189_v32, %v7016_v14  ;;  %v407_v51 = vsel %vm342_vm14, %v309_v35, %v375_v3  ;;  %vm333_vm1 = vcmp.ge.f32.partialorder %v300_v17, 0.0  ;;  %v56_v3 = vld [vmem:[%s14971_s1 + $0x18] sm:$0xff] }
  0xb1   :  { %v366_v56 = vmul.f32 %v7045_v40, %v300_v17  ;;  %v165_v22 = vmul.f32 %v7189_v32, %v7018_v15  ;;  %v384_v46 = vmul.f32 %v7045_v40, %v318_v20  ;;  %v7311_v27 = vmul.f32 %v406_v37, %v64_v36 }
  0xb2   :  { %v270_v4 = vadd.f32 %v238_v28, %v166_v5  ;;  %v237_v28 = vmul.f32 %v7191_v33, %v7027_v26  ;;  %v261_v54 = vadd.f32 %v229_v61, %v157_v30  ;;  %v7305_v5 = vmul.f32 %v399_v24, %v57_v23 }
  0xb3   :  { %vm351_vm2 = vcmp.ge.f32.partialorder %v318_v20, 0.0  ;;  %v7315_v45 = vmul.f32 %v407_v51, %v65_v49  ;;  %v7317_v33 = vperm.slane %v191_v25, 1  ;;  %v246_v58 = vadd.f32 %v214_v47, %v142_v42  ;;  %v74_v25 = vld [vmem:[%s14971_s1 + $0xa8] sm:$0xff] }
  0xb4   :  { %v326_v48 = vadd.f32 %v7059_v50, %v270_v4  ;;  %v317_v35 = vadd.f32 %v7092_v21, %v261_v54  ;;  %v6124_v59 = vpack.i.bf16 %v7311_v27, %v7264_v53  ;;  %v269_v32 = vadd.f32 %v237_v28, %v165_v22  ;;  %v82_v42 = vld [vmem:[%s14971_s1 + $0xe8] sm:$0xff] }
  0xb5   :  { %v7323_v61 = vpack.i.bf16 %v7305_v5, %v7315_v45  ;;  %v6114_v62 = vpack.i.bf16 %v7269_v57, %v7225_v63  ;;  %v398_v4 = vsel %vm333_vm1, %v300_v17, %v366_v56  ;;  %v416_v23 = vsel %vm351_vm2, %v318_v20, %v384_v46 }
  0xb6   :  { %v392_v52 = vmul.f32 %v7045_v40, %v326_v48  ;;  %vm359_vm3 = vcmp.ge.f32.partialorder %v326_v48, 0.0  ;;  %v302_v24 = vadd.f32 %v7086_v12, %v246_v58  ;;  %v7338_v30 = vperm.slane %v119_v16, 0 }
  0xb7   :  { %564 = vrot.lane.b32.xlu1 %v14981_v43, %s6918_s5  ;;  %v325_v36 = vadd.f32 %v7059_v50, %v269_v32  ;;  %v383_v20 = vmul.f32 %v7045_v40, %v317_v35  ;;  %v7346_v37 = vmul.f32 %v398_v4, %v56_v3  ;;  %vm350_vm4 = vcmp.ge.f32.partialorder %v317_v35, 0.0 }
  0xb8   :  { %6130 = vrot.lane.b32.xlu0 %v6129_v7, %s6918_s5  ;;  %6105 = vrot.lane.b32.xlu2 %v6104_v8, %s6918_s5  ;;  %v310_v7 = vadd.f32 %v7033_v31, %v254_v44  ;;  %v231_v8 = vmul.f32 %v7317_v33, %v7031_v29  ;;  %v424_v17 = vsel %vm359_vm3, %v326_v48, %v392_v52  ;;  %v120_v16 = vperm.slane %v7143_v55, 6  ;;  %v73_v52 = vld [vmem:[%s14971_s1 + $0xa0] sm:$0xff] }
  0xb9   :  { %v192_v44 = vperm.slane %v7143_v55, 7  ;;  %v159_v48 = vmul.f32 %v7338_v30, %v7016_v14  ;;  %v167_v47 = vmul.f32 %v7338_v30, %v7018_v15  ;;  %v239_v49 = vmul.f32 %v7317_v33, %v7027_v26 }
  0xba   :  { %v7359_v51 = vmul.f32 %v416_v23, %v74_v25  ;;  %vm343_vm5 = vcmp.ge.f32.partialorder %v310_v7, 0.0  ;;  %v376_v28 = vmul.f32 %v7045_v40, %v310_v7  ;;  %vm335_vm6 = vcmp.ge.f32.partialorder %v302_v24, 0.0 }
  0xbb   :  { %v368_v54 = vmul.f32 %v7045_v40, %v302_v24  ;;  %v7363_v56 = vmul.f32 %v424_v17, %v82_v42  ;;  %vm358_vm7 = vcmp.ge.f32.partialorder %v325_v36, 0.0  ;;  %v391_v55 = vmul.f32 %v7045_v40, %v325_v36 }
  0xbc   :  { %v415_v22 = vsel %vm350_vm4, %v317_v35, %v383_v20  ;;  %v6134_v46 = vpack.i.bf16 %v7346_v37, %v7311_v27  ;;  %v263_v58 = vadd.f32 %v231_v8, %v159_v48  ;;  %v208_v32 = vperm.slane %v192_v44, 1  ;;  %v58_v35 = vld [vmem:[%s14971_s1 + $0x28] sm:$0xff]  ;;  %v81_v8 = vld [vmem:[%s14971_s1 + $0xe0] sm:$0xff] }
  0xbd   :  { %v271_v3 = vadd.f32 %v239_v49, %v167_v47  ;;  %v408_v4 = vsel %vm343_vm5, %v310_v7, %v376_v28  ;;  %v400_v23 = vsel %vm335_vm6, %v302_v24, %v368_v54  ;;  %v423_v7 = vsel %vm358_vm7, %v325_v36, %v391_v55  ;;  %v66_v20 = vld [vmem:[%s14971_s1 + $0x68] sm:$0xff] }
  0xbe   :  { %v319_v25 = vadd.f32 %v7092_v21, %v263_v58  ;;  %v7388_v24 = vmul.f32 %v415_v22, %v73_v52  ;;  %v216_v44 = vmul.f32 %v208_v32, %v7047_v41  ;;  %v224_v48 = vmul.f32 %v208_v32, %v7008_v11  ;;  %v75_v58 = vld [vmem:[%s14971_s1 + $0xb0] sm:$0xff] }
  0xbf   :  { %6125 = vrot.lane.b32.xlu1 %v6124_v59, %s6919_s24  ;;  %v136_v59 = vperm.slane %v120_v16, 0  ;;  %v327_v17 = vadd.f32 %v7059_v50, %v271_v3  ;;  %v7398_v47 = vmul.f32 %v400_v23, %v58_v35  ;;  %v7400_v49 = vmul.f32 %v423_v7, %v81_v8 }
  0xc0   :  { %6145 = vrot.lane.b32.xlu0 %v7323_v61, %s6919_s24  ;;  %6115 = vrot.lane.b32.xlu2 %v6114_v62, %s6919_s24  ;;  %v7373_v62 = vpack.i.bf16 %v7359_v51, %v7363_v56  ;;  %v385_v36 = vmul.f32 %v7045_v40, %v319_v25  ;;  %v7403_v28 = vmul.f32 %v408_v4, %v66_v20  ;;  %vm352_vm8 = vcmp.ge.f32.partialorder %v319_v25, 0.0  ;;  %v83_v20 = vld [vmem:[%s14971_s1 + $0xf0] sm:$0xff] }
  0xc1   :  { %v144_v42 = vmul.f32 %v136_v59, %v7023_v19  ;;  %v152_v16 = vmul.f32 %v136_v59, %v7006_v10  ;;  %v6149_v54 = vpack.i.bf16 %v7388_v24, %v7400_v49  ;;  %v393_v55 = vmul.f32 %v7045_v40, %v327_v17 }
  0xc2   :  { %v6174_v52 = vpack.i.bf16 %v7398_v47, %v7403_v28  ;;  %vm360_vm9 = vcmp.ge.f32.partialorder %v327_v17, 0.0  ;;  %v417_v3 = vsel %vm352_vm8, %v319_v25, %v385_v36  ;;  %v151_v23 = vmul.f32 %v7338_v30, %v7006_v10 }
  0xc3   :  { %v248_v22 = vadd.f32 %v216_v44, %v144_v42  ;;  %v223_v35 = vmul.f32 %v7317_v33, %v7008_v11  ;;  %v232_v8 = vmul.f32 %v208_v32, %v7031_v29  ;;  %v143_v7 = vmul.f32 %v7338_v30, %v7023_v19 }
  0xc4   :  { %v215_v25 = vmul.f32 %v7317_v33, %v7047_v41  ;;  %v425_v10 = vsel %vm360_vm9, %v327_v17, %v393_v55  ;;  %v7430_v11 = vmul.f32 %v417_v3, %v75_v58  ;;  %v240_v44 = vmul.f32 %v208_v32, %v7027_v26  ;;  %v60_v26 = vld [vmem:[%s14971_s1 + $0x38] sm:$0xff] }
  0xc5   :  { %v304_v4 = vadd.f32 %v7086_v12, %v248_v22  ;;  %v168_v19 = vmul.f32 %v136_v59, %v7018_v15  ;;  %v255_v17 = vadd.f32 %v223_v35, %v151_v23  ;;  %v59_v23 = vld [vmem:[%s14971_s1 + $0x30] sm:$0xff]  ;;  %vm679_vm2 = vcmask 261120  }
  0xc6   :  { %v247_v30 = vadd.f32 %v215_v25, %v143_v7  ;;  %v67_v25 = vld [vmem:[%s14971_s1 + $0x70] sm:$0xff] }
  0xc7   :  { %6135 = vrot.lane.b32.xlu1 %v6134_v46, %s6918_s5  ;;  %v256_v46 = vadd.f32 %v224_v48, %v152_v16  ;;  %v160_v16 = vmul.f32 %v136_v59, %v7016_v14  ;;  %v370_v29 = vmul.f32 %v7045_v40, %v304_v4  ;;  %v7435_v48 = vmul.f32 %v425_v10, %v83_v20 }
  0xc8   :  { %6160 = vrot.lane.b32.xlu0 %v7373_v62, %s6918_s5  ;;  %485 = vrot.lane.b32.xlu2 %v7346_v37, %s6919_s24  ;;  %vm337_vm10 = vcmp.ge.f32.partialorder %v304_v4, 0.0  ;;  %v303_v15 = vadd.f32 %v7086_v12, %v247_v30  ;;  %v311_v22 = vadd.f32 %v7033_v31, %v255_v17 }
  0xc9   :  { %v312_v42 = vadd.f32 %v7033_v31, %v256_v46  ;;  %v264_v41 = vadd.f32 %v232_v8, %v160_v16  ;;  %v6189_v36 = vpack.i.bf16 %v7430_v11, %v7435_v48  ;;  %v402_v32 = vsel %vm337_vm10, %v304_v4, %v370_v29  ;;  %v76_v31 = vld [vmem:[%s14971_s1 + $0xb8] sm:$0xff] }
  0xca   :  { %v7455_v46 = vmul.f32 %v402_v32, %v60_v26  ;;  %v369_v12 = vmul.f32 %v7045_v40, %v303_v15  ;;  %vm336_vm13 = vcmp.ge.f32.partialorder %v303_v15, 0.0  ;;  %vm344_vm15 = vcmp.ge.f32.partialorder %v311_v22, 0.0 }
  0xcb   :  { %v378_v33 = vmul.f32 %v7045_v40, %v312_v42  ;;  %vm345_vm11 = vcmp.ge.f32.partialorder %v312_v42, 0.0  ;;  %v320_v14 = vadd.f32 %v7092_v21, %v264_v41  ;;  %v68_v21 = vld [vmem:[%s14971_s1 + $0x78] sm:$0xff] }
  0xcc   :  { %15270 = vst [vmem:[#allocation9_spill] sm:$0xff] %v7455_v46  ;;  %v401_v35 = vsel %vm336_vm13, %v303_v15, %v369_v12 }
  0xcd   :  { %v410_v55 = vsel %vm345_vm11, %v312_v42, %v378_v33  ;;  %vm353_vm12 = vcmp.ge.f32.partialorder %v320_v14, 0.0  ;;  %v7483_v10 = vmul.f32 %v401_v35, %v59_v23 }
  0xce   :  { %v7459_v58 = vmul.f32 %v410_v55, %v68_v21 }
  0xcf   :  { %6150 = vrot.lane.b32.xlu1 %v6149_v54, %s6918_s5  ;;  %15273 = vst [vmem:[#allocation12_spill] sm:$0xff] %v7483_v10 }
  0xd0   :  { %6175 = vrot.lane.b32.xlu0 %v6174_v52, %s6919_s24  ;;  %6140 = vrot.lane.b32.xlu2 %v6149_v54, %s6919_s24  ;;  %v272_v54 = vadd.f32 %v240_v44, %v168_v19  ;;  %15271 = vst [vmem:[#allocation10_spill] sm:$0xff] %v7459_v58  ;;  %v6204_v3 = vpack.i.bf16 %v7455_v46, %v7459_v58  ;;  %v525_v19 = vlaneseq  ;;  %v7661_v46 = vld [vmem:[#allocation3 + $0x10] sm:$0xff] }
  0xd2   :  { %v328_v59 = vadd.f32 %v7059_v50, %v272_v54  ;;  %v377_v50 = vmul.f32 %v7045_v40, %v311_v22  ;;  %v7502_v33 = vand.u32 127, %v525_v19 }
  0xd4   :  { %vm361_vm14 = vcmp.ge.f32.partialorder %v328_v59, 0.0  ;;  %v409_v20 = vsel %vm344_vm15, %v311_v22, %v377_v50  ;;  %15275 = vst [vmem:[#allocation14_spill] sm:$0xff] %v7502_v33  ;;  %vm527_vm0 = vcmp.lt.s32.totalorder %v7502_v33, 1  ;;  %vm630_vm1 = vcmp.lt.s32.totalorder %v7502_v33, 127 }
  0xd5   :  { %v7487_v16 = vmul.f32 %v409_v20, %v67_v25 }
  0xd7   :  { %6165 = vrot.lane.b32.xlu1 %v6174_v52, %s6918_s5  ;;  %v386_v52 = vmul.f32 %v7045_v40, %v320_v14  ;;  %v6184_v44 = vpack.i.bf16 %v7483_v10, %v7487_v16 }
  0xd8   :  { %6190 = vrot.lane.b32.xlu0 %v6189_v36, %s6918_s5  ;;  %6155 = vrot.lane.b32.xlu2 %v7323_v61, %s6918_s5  ;;  %v394_v61 = vmul.f32 %v7045_v40, %v328_v59  ;;  %v84_v40 = vld [vmem:[%s14971_s1 + $0xf8] sm:$0xff] }
  0xd9   :  { %v418_v4 = vsel %vm353_vm12, %v320_v14, %v386_v52 }
  0xda   :  { %v426_v8 = vsel %vm361_vm14, %v328_v59, %v394_v61  ;;  %v7478_v7 = vmul.f32 %v418_v4, %v76_v31 }
  0xdb   :  { %v7485_v42 = vmul.f32 %v426_v8, %v84_v40 }
  0xdc   :  { %15272 = vst [vmem:[#allocation11_spill] sm:$0xff] %v7478_v7 }
  0xdd   :  { %15274 = vst [vmem:[#allocation13_spill] sm:$0xff] %v7485_v42 }
  0xdf   :  { %6180 = vrot.lane.b32.xlu1 %v6189_v36, %s6919_s24 }
  0xe0   :  { %6205 = vrot.lane.b32.xlu0 %v6204_v3, %s6919_s24  ;;  %6170 = vrot.lane.b32.xlu2 %v7373_v62, %s6919_s24  ;;  %v6194_v62 = vpack.i.bf16 %v7478_v7, %v7485_v42 }
  0xe7   :  { %6195 = vrot.lane.b32.xlu1 %v6194_v62, %s6919_s24 }
  0xe8   :  { %6185 = vrot.lane.b32.xlu2 %v6184_v44, %s6919_s24 }
  0xef   :  { %6210 = vrot.lane.b32.xlu1 %v6194_v62, %s6918_s5 }
  0xf0   :  { %6200 = vrot.lane.b32.xlu2 %v6184_v44, %s6918_s5 }
  0xf8   :  { %6215 = vrot.lane.b32.xlu2 %v6204_v3, %s6918_s5 }
  0xfa   :  { %v7498_v29 = vpop.permute.xlu2 %6065 }
  0xfb   :  { %v14985_v36 = vunpack.i.h.bf16 %v7498_v29  ;;  %v6067_v54 = vunpack.i.l.bf16 %v7498_v29 }
  0xfd   :  { %v7525_v15 = vsel %vm527_vm0, %v6067_v54, %v14985_v36 }
 0x102   :  { %v7500_v41 = vpop.permute.xlu2 %6075 }
 0x103   :  { %v14983_v55 = vunpack.i.h.bf16 %v7500_v41  ;;  %v6077_v22 = vunpack.i.l.bf16 %v7500_v41 }
 0x105   :  { %v7554_v4 = vsel %vm527_vm0, %v6077_v22, %v14983_v55 }
 0x109   :  { %v7504_v30 = vpop.permute.xlu0 %6080  ;;  %v7506_v17 = vpop.permute.xlu1 %6060 }
 0x10a   :  { %v14990_v14 = vunpack.i.h.bf16 %v7506_v17  ;;  %v6062_v26 = vunpack.i.l.bf16 %v7506_v17  ;;  %v7529_v59 = vpop.permute.xlu2 %6090  ;;  %v6083_v50 = vunpack.i.h.bf16 %v7504_v30  ;;  %v14986_v3 = vunpack.i.l.bf16 %v7504_v30 }
 0x10b   :  { %v6093_v40 = vunpack.i.h.bf16 %v7529_v59  ;;  %v14988_v8 = vunpack.i.l.bf16 %v7529_v59 }
 0x10c   :  { %v7517_v32 = vsel %vm527_vm0, %v6062_v26, %v14990_v14  ;;  %v662_v23 = vsel %vm630_vm1, %v14986_v3, %v6083_v50 }
 0x10d   :  { %725 = vmatpush.msra.mxu1 %v7517_v32  ;;  %779 = vmatpush.msra.mxu3 %v7517_v32  ;;  %v660_v36 = vsel %vm630_vm1, %v14988_v8, %v6093_v40 }
 0x10f   :  { %726 = vmatpush.msra.mxu1 %v7525_v15  ;;  %780 = vmatpush.msra.mxu3 %v7525_v15 }
 0x111   :  { %v7531_v21 = vpop.permute.xlu1 %6070 }
 0x112   :  { %v14984_v52 = vunpack.i.h.bf16 %v7531_v21  ;;  %v6072_v12 = vunpack.i.l.bf16 %v7531_v21  ;;  %v7537_v61 = vpop.permute.xlu0 %6095  ;;  %v7570_v44 = vpop.permute.xlu2 %6105 }
 0x113   :  { %v6098_v43 = vunpack.i.h.bf16 %v7537_v61  ;;  %v14989_v55 = vunpack.i.l.bf16 %v7537_v61 }
 0x114   :  { %v7545_v31 = vsel %vm527_vm0, %v6072_v12, %v14984_v52 }
 0x115   :  { %727 = vmatpush.msra.mxu1 %v7545_v31  ;;  %781 = vmatpush.msra.mxu3 %v7545_v31 }
 0x117   :  { %728 = vmatpush.msra.mxu1 %v7554_v4  ;;  %782 = vmatpush.msra.mxu3 %v7554_v4 }
 0x119   :  { %v7562_v35 = vpop.permute.xlu1 %6085  ;;  %729 = vmatpush.msra.mxu1 %v662_v23  ;;  %783 = vmatpush.msra.mxu3 %v662_v23 }
 0x11a   :  { %v6088_v25 = vunpack.i.h.bf16 %v7562_v35  ;;  %v14987_v20 = vunpack.i.l.bf16 %v7562_v35  ;;  %v7568_v62 = vpop.permute.xlu0 %6110 }
 0x11b   :  { %v7573_v19 = vunpack.i.l.bf16 %v7568_v62 }
 0x11c   :  { %v661_v23 = vsel %vm630_vm1, %v14987_v20, %v6088_v25 }
 0x11d   :  { %15276 = vst [vmem:[#allocation15_spill] sm:$0xff] %v7573_v19  ;;  %v563_v52 = vsel %vm527_vm0, %v7573_v19, %v6062_v26  ;;  %730 = vmatpush.msra.mxu1 %v661_v23  ;;  %784 = vmatpush.msra.mxu3 %v661_v23  ;;  %v562_v3 = vsel %vm527_vm0, %v7573_v19, %v6067_v54 }
 0x11e   :  { %692 = vmatpush.msra.mxu0 %v563_v52  ;;  %v659_v26 = vsel %vm630_vm1, %v14989_v55, %v6098_v43  ;;  %v561_v23 = vsel %vm527_vm0, %v7573_v19, %v6072_v12  ;;  %v14993_v55 = vunpack.i.l.bf16 %v7570_v44 }
 0x11f   :  { %731 = vmatpush.msra.mxu1 %v660_v36  ;;  %785 = vmatpush.msra.mxu3 %v660_v36  ;;  %v560_v36 = vsel %vm527_vm0, %v7573_v19, %v6077_v22  ;;  %v14996_v22 = vunpack.i.h.bf16 %v7568_v62 }
 0x120   :  { %693 = vmatpush.msra.mxu0 %v562_v3 }
 0x121   :  { %v7595_v20 = vpop.permute.xlu1 %6100  ;;  %732 = vmatpush.msra.mxu1 %v659_v26  ;;  %786 = vmatpush.msra.mxu3 %v659_v26  ;;  %v7614_v26 = vpop.permute.xlu2 %6115 }
 0x122   :  { %v14992_v8 = vunpack.i.h.bf16 %v7595_v20  ;;  %v14991_v54 = vunpack.i.l.bf16 %v7595_v20  ;;  %694 = vmatpush.msra.mxu0 %v561_v23  ;;  %v14998_v14 = vunpack.i.h.bf16 %v7614_v26  ;;  %v15298_v7 = vunpack.i.h.bf16 %v7595_v20 }
 0x123   :  { %733 = vmatpush.msra.mxu1 %v7088_v13  ;;  %787 = vmatpush.msra.mxu3 %v7088_v13 }
 0x124   :  { %695 = vmatpush.msra.mxu0 %v560_v36  ;;  %v7612_v12 = vsel %vm630_vm1, %v6083_v50, %v14991_v54  ;;  %v7624_v13 = vsel %vm630_vm1, %v6088_v25, %v14992_v8  ;;  %v7629_v50 = vld [vmem:[#allocation3 + $0x8] sm:$0xff]  ;;  %v7639_v25 = vpop.permute.xlu0 %6120 }
 0x125   :  { %734 = vmatpush.msra.mxu1 %v7152_v0  ;;  %762 = vmatpush.msra.mxu2 %v7612_v12 }
 0x126   :  { %788 = vmatpush.msra.mxu3 %v7152_v0  ;;  %v7637_v0 = vsel %vm630_vm1, %v6093_v40, %v14993_v55  ;;  %v15279_v55 = vunpack.i.l.bf16 %v7504_v30  ;;  %v15281_v30 = vunpack.i.l.bf16 %v7614_v26 }
 0x127   :  { %735 = vmatpush.msra.mxu1 %v7120_v39  ;;  %763 = vmatpush.msra.mxu2 %v7624_v13 }
 0x128   :  { %789 = vmatpush.msra.mxu3 %v7120_v39  ;;  %v15278_v39 = vunpack.i.h.bf16 %v7506_v17 }
 0x129   :  { %v7641_v8 = vpop.permute.xlu1 %564  ;;  %736 = vmatpush.msra.mxu1 %v7154_v1  ;;  %764 = vmatpush.msra.mxu2 %v7637_v0 }
 0x12a   :  { %15277 = vst [vmem:[#allocation16_spill] sm:$0xff] %v7641_v8  ;;  %790 = vmatpush.msra.mxu3 %v7154_v1  ;;  %737 = vmatmul.f32.vlgmr.msra.gmra.mxu1 %v7629_v50  ;;  %v7654_v40 = vsel %vm527_vm0, %v15278_v39, %v14996_v22  ;;  %v666_v54 = vsel %vm630_vm1, %v7641_v8, %v15279_v55  ;;  %v15280_v1 = vunpack.i.h.bf16 %v7570_v44  ;;  %v14997_v39 = vunpack.i.l.bf16 %v7639_v25 }
 0x12b   :  { %866 = vmatpush.msrb.mxu1 %v7654_v40  ;;  %696 = vmatpush.msra.mxu0 %v666_v54  ;;  %v15282_v55 = vunpack.i.h.bf16 %v7498_v29  ;;  %v15284_v29 = vunpack.i.h.bf16 %v7531_v21  ;;  %v15286_v21 = vunpack.i.h.bf16 %v7500_v41  ;;  %v7724_v41 = vld [vmem:[#allocation3 + $0x28] sm:$0xff] }
 0x12c   :  { %v7668_v17 = vsel %vm630_vm1, %v6098_v43, %v15280_v1  ;;  %791 = vmatpush.msra.mxu3 %v563_v52  ;;  %v15283_v43 = vunpack.i.l.bf16 %v7562_v35  ;;  %v15285_v35 = vunpack.i.l.bf16 %v7529_v59  ;;  %v15287_v59 = vunpack.i.l.bf16 %v7537_v61 }
 0x12d   :  { %765 = vmatpush.msra.mxu2 %v7668_v17  ;;  %v7678_v22 = vsel %vm527_vm0, %v15282_v55, %v15281_v30  ;;  %v7695_v52 = vsel %vm527_vm0, %v15284_v29, %v14998_v14  ;;  %v7710_v30 = vsel %vm527_vm0, %v15286_v21, %v14997_v39  ;;  %v15289_v61 = vmov 0.0   ;;  %v7746_v29 = vld [vmem:[#allocation3 + $0x18] sm:$0xff]  ;;  %v7757_v21 = vpop.permute.xlu2 %485  ;;  %v7772_v14 = vpop.permute.xlu0 %6130 }
 0x12e   :  { %5855 = vmatmul.msk.f32.vlgmr.msra.gmra.mxu2 %vm679_vm2, %v7661_v46  ;;  %867 = vmatpush.msrb.mxu1 %v7678_v22  ;;  %v665_v54 = vsel %vm630_vm1, %v7641_v8, %v15283_v43  ;;  %v664_v1 = vsel %vm630_vm1, %v7641_v8, %v15285_v35  ;;  %v663_v55 = vsel %vm630_vm1, %v7641_v8, %v15287_v59  ;;  %v7720_v43 = vld [vmem:[#allocation3] sm:$0xff]  ;;  %v15292_v59 = vunpack.i.l.bf16 %v7614_v26 }
 0x12f   :  { %808 = vmatpush.msrb.mxu2 %v7193_v34  ;;  %697 = vmatpush.msra.mxu0 %v665_v54  ;;  %15288 = vst [vmem:[#allocation17_spill] sm:$0xff] %v7720_v43  ;;  %v7744_v54 = vld [vmem:[#allocation3 + $0x38] sm:$0xff] }
 0x130   :  { %792 = vmatpush.msra.mxu3 %v562_v3  ;;  %868 = vmatpush.msrb.mxu1 %v7695_v52  ;;  %v7712_v3 = vld [vmem:[#allocation3 + $0x20] sm:$0xff]  ;;  %15290 = vst [vmem:[#allocation18_spill] sm:$0xff] %v7746_v29 }
 0x131   :  { %809 = vmatpush.msrb.mxu2 %v7225_v63  ;;  %698 = vmatpush.msra.mxu0 %v664_v1  ;;  %v7755_v1 = vld [vmem:[#allocation3 + $0x40] sm:$0xff] }
 0x132   :  { %793 = vmatpush.msra.mxu3 %v561_v23  ;;  %869 = vmatpush.msrb.mxu1 %v7710_v30  ;;  %v7735_v23 = vpop.permute.xlu1 %6125 }
 0x133   :  { %810 = vmatpush.msrb.mxu2 %v7269_v57  ;;  %699 = vmatpush.msra.mxu0 %v663_v55  ;;  %v15003_v35 = vunpack.i.l.bf16 %v7735_v23  ;;  %v15291_v55 = vunpack.i.h.bf16 %v7568_v62 }
 0x134   :  { %794 = vmatpush.msra.mxu3 %v560_v36  ;;  %740 = vmatmul.f32.gmra.mxu1 %v7712_v3  ;;  %v14999_v36 = vunpack.i.h.bf16 %v7639_v25 }
 0x135   :  { %795 = vmatmul.f32.vlgmr.msra.gmra.mxu3 %v7720_v43  ;;  %811 = vmatpush.msrb.mxu2 %v7233_v9  ;;  %v7783_v62 = vsel %vm527_vm0, %v15292_v59, %v15003_v35  ;;  %v6132_v59 = vunpack.i.l.bf16 %v7772_v14  ;;  %v15295_v35 = vunpack.i.l.bf16 %v7639_v25 }
 0x136   :  { %870 = vmatpush.msrb.mxu1 %v7612_v12  ;;  %895 = vmatpush.msrb.mxu3 %v7236_v18  ;;  %v7768_v39 = vsel %vm527_vm0, %v15291_v55, %v14999_v36  ;;  %v15293_v36 = vunpack.i.h.bf16 %v7735_v23 }
 0x137   :  { %700 = vmatpush.msra.mxu0 %v15289_v61  ;;  %5856 = vmatmul.msk.f32.gmra.mxu2 %vm679_vm2, %v7724_v41 }
 0x138   :  { %812 = vmatpush.msrb.mxu2 %v7654_v40  ;;  %871 = vmatpush.msrb.mxu1 %v7624_v13 }
 0x139   :  { %896 = vmatpush.msrb.mxu3 %v7264_v53  ;;  %701 = vmatpush.msra.mxu0 %v15289_v61 }
 0x13a   :  { %813 = vmatpush.msrb.mxu2 %v7678_v22  ;;  %872 = vmatpush.msrb.mxu1 %v7637_v0  ;;  %v7787_v55 = vpop.permute.xlu1 %6135 }
 0x13b   :  { %897 = vmatpush.msrb.mxu3 %v7311_v27  ;;  %702 = vmatpush.msra.mxu0 %v15289_v61 }
 0x13c   :  { %814 = vmatpush.msrb.mxu2 %v7695_v52  ;;  %873 = vmatpush.msrb.mxu1 %v7668_v17 }
 0x13d   :  { %898 = vmatpush.msrb.mxu3 %v7346_v37  ;;  %703 = vmatpush.msra.mxu0 %v15289_v61  ;;  %v15294_v61 = vunpack.i.h.bf16 %v7614_v26  ;;  %v7811_v26 = vsel %vm527_vm0, %v15295_v35, %v7757_v21  ;;  %v15296_v35 = vunpack.i.l.bf16 %v7595_v20  ;;  %v7855_v20 = vpop.permute.xlu0 %6145 }
 0x13e   :  { %743 = vmatmul.f32.gmra.mxu1 %v7744_v54  ;;  %798 = vmatmul.f32.gmra.mxu3 %v7746_v29  ;;  %v6147_v10 = vunpack.i.l.bf16 %v7855_v20 }
 0x13f   :  { %815 = vmatpush.msrb.mxu2 %v7710_v30  ;;  %874 = vmatpush.msrb.mxu1 %v7084_v6  ;;  %v7797_v8 = vsel %vm527_vm0, %v15294_v61, %v15293_v36  ;;  %v7813_v61 = vld [vmem:[#allocation3 + $0x30] sm:$0xff]  ;;  %v6133_v36 = vunpack.i.h.bf16 %v7772_v14  ;;  %v7827_v58 = vsel %vm630_vm1, %v15296_v35, %v6132_v59  ;;  %v7829_v14 = vld [vmem:[#allocation3 + $0x58] sm:$0xff] }
 0x140   :  { %899 = vmatpush.msrb.mxu3 %v7768_v39  ;;  %704 = vmatpush.msra.mxu0 %v7573_v19  ;;  %15297 = vst [vmem:[#allocation19_spill] sm:$0xff] %v7829_v14 }
 0x141   :  { %5857 = vmatmul.msk.f32.gmra.mxu2 %vm679_vm2, %v7755_v1  ;;  %875 = vmatpush.msrb.mxu1 %v7148_v60  ;;  %v7842_v35 = vsel %vm630_vm1, %v15298_v7, %v6133_v36 }
 0x142   :  { %816 = vmatpush.msrb.mxu2 %v7612_v12  ;;  %900 = vmatpush.msrb.mxu3 %v7783_v62  ;;  %v7802_v12 = vld [vmem:[#allocation3 + $0x50] sm:$0xff] }
 0x143   :  { %705 = vmatpush.msra.mxu0 %v7573_v19  ;;  %876 = vmatpush.msrb.mxu1 %v7118_v38 }
 0x144   :  { %817 = vmatpush.msrb.mxu2 %v7624_v13  ;;  %901 = vmatpush.msrb.mxu3 %v7797_v8  ;;  %v6137_v13 = vunpack.i.l.bf16 %v7787_v55 }
 0x145   :  { %706 = vmatpush.msra.mxu0 %v7573_v19  ;;  %877 = vmatpush.msrb.mxu1 %v7156_v2 }
 0x146   :  { %818 = vmatpush.msrb.mxu2 %v7637_v0  ;;  %902 = vmatpush.msrb.mxu3 %v7811_v26  ;;  %v7831_v0 = vpop.permute.xlu2 %6140 }
 0x147   :  { %707 = vmatpush.msra.mxu0 %v7573_v19  ;;  %746 = vmatmul.f32.gmra.mxu1 %v7802_v12  ;;  %v6138_v19 = vunpack.i.h.bf16 %v7787_v55  ;;  %v7857_v55 = vpop.permute.xlu1 %6150  ;;  %v6143_v42 = vunpack.i.h.bf16 %v7831_v0 }
 0x148   :  { %708 = vmatmul.f32.vlgmr.msra.gmra.mxu0 %v7720_v43  ;;  %801 = vmatmul.f32.gmra.mxu3 %v7813_v61 }
 0x149   :  { %819 = vmatpush.msrb.mxu2 %v7668_v17  ;;  %849 = vmatpush.msrb.mxu0 %v7827_v58  ;;  %v15299_v17 = vunpack.i.l.bf16 %v7570_v44 }
 0x14a   :  { %878 = vmatpush.msrb.mxu1 %v7517_v32  ;;  %903 = vmatpush.msrb.mxu3 %v7827_v58 }
 0x14b   :  { %5858 = vmatmul.msk.f32.gmra.mxu2 %vm679_vm2, %v7829_v14  ;;  %850 = vmatpush.msrb.mxu0 %v7842_v35  ;;  %v7853_v32 = vsel %vm630_vm1, %v15299_v17, %v6137_v13  ;;  %v7874_v17 = vld [vmem:[#allocation3 + $0x48] sm:$0xff] }
 0x14c   :  { %820 = vmatpush.msrb.mxu2 %v7084_v6  ;;  %879 = vmatpush.msrb.mxu1 %v7525_v15  ;;  %v15300_v6 = vunpack.i.h.bf16 %v7570_v44  ;;  %v6152_v15 = vunpack.i.l.bf16 %v7857_v55  ;;  %v6142_v44 = vunpack.i.l.bf16 %v7831_v0  ;;  %v15302_v0 = vunpack.i.l.bf16 %v7735_v23 }
 0x14d   :  { %904 = vmatpush.msrb.mxu3 %v7842_v35  ;;  %851 = vmatpush.msrb.mxu0 %v7853_v32 }
 0x14e   :  { %821 = vmatpush.msrb.mxu2 %v7148_v60  ;;  %880 = vmatpush.msrb.mxu1 %v7545_v31  ;;  %v7867_v7 = vsel %vm630_vm1, %v15300_v6, %v6138_v19  ;;  %v6153_v60 = vunpack.i.h.bf16 %v7857_v55  ;;  %v7881_v31 = vpop.permute.xlu2 %6155  ;;  %v7901_v55 = vpop.permute.xlu0 %6160 }
 0x14f   :  { %905 = vmatpush.msrb.mxu3 %v7853_v32  ;;  %852 = vmatpush.msrb.mxu0 %v7867_v7 }
 0x150   :  { %822 = vmatpush.msrb.mxu2 %v7118_v38  ;;  %881 = vmatpush.msrb.mxu1 %v7554_v4  ;;  %v7889_v38 = vsel %vm630_vm1, %v6132_v59, %v6152_v15  ;;  %v6157_v4 = vunpack.i.l.bf16 %v7881_v31  ;;  %v6158_v59 = vunpack.i.h.bf16 %v7881_v31 }
 0x151   :  { %906 = vmatpush.msrb.mxu3 %v7867_v7  ;;  %953 = vmatpush.msra.mxu0 %v7768_v39 }
 0x152   :  { %982 = vmatpush.msra.mxu1 %v7400_v49  ;;  %711 = vmatmul.f32.gmra.mxu0 %v7746_v29  ;;  %v7910_v6 = vsel %vm630_vm1, %v6137_v13, %v6157_v4  ;;  %v7919_v31 = vsel %vm630_vm1, %v6138_v19, %v6158_v59  ;;  %v15301_v13 = vunpack.i.h.bf16 %v7639_v25  ;;  %v15021_v25 = vunpack.i.h.bf16 %v7901_v55 }
 0x153   :  { %804 = vmatmul.f32.gmra.mxu3 %v7874_v17  ;;  %823 = vmatpush.msrb.mxu2 %v7156_v2  ;;  %v7898_v2 = vsel %vm630_vm1, %v6133_v36, %v6153_v60  ;;  %v15018_v36 = vunpack.i.l.bf16 %v7901_v55 }
 0x154   :  { %882 = vmatmul.f32.vlgmr.msrb.gmra.mxu1 %v7720_v43  ;;  %907 = vmatpush.msrb.mxu3 %v7193_v34  ;;  %v7921_v43 = vpop.permute.xlu1 %6165  ;;  %v7929_v14 = vsel %vm527_vm0, %v15301_v13, %v6142_v44 }
 0x155   :  { %936 = vmatpush.msra.mxu2 %v7889_v38  ;;  %954 = vmatpush.msra.mxu0 %v7783_v62  ;;  %v7937_v19 = vsel %vm630_vm1, %v6152_v15, %v15018_v36  ;;  %v6148_v15 = vunpack.i.h.bf16 %v7855_v20  ;;  %v7956_v36 = vsel %vm527_vm0, %v15302_v0, %v6143_v42  ;;  %v15303_v20 = vunpack.i.h.bf16 %v7735_v23 }
 0x156   :  { %983 = vmatpush.msra.mxu1 %v7388_v24  ;;  %824 = vmatmul.f32.vlgmr.msrb.gmra.mxu2 %v7629_v50  ;;  %v7944_v13 = vpop.permute.xlu2 %6170 }
 0x157   :  { %908 = vmatpush.msrb.mxu3 %v7225_v63  ;;  %937 = vmatpush.msra.mxu2 %v7898_v2  ;;  %v7974_v0 = vsel %vm527_vm0, %v15303_v20, %v6147_v10  ;;  %v7991_v23 = vsel %vm527_vm0, %v7757_v21, %v6148_v15 }
 0x158   :  { %955 = vmatpush.msra.mxu0 %v7797_v8  ;;  %984 = vmatpush.msra.mxu1 %v7315_v45 }
 0x159   :  { %909 = vmatpush.msrb.mxu3 %v7269_v57  ;;  %938 = vmatpush.msra.mxu2 %v7910_v6 }
 0x15a   :  { %956 = vmatpush.msra.mxu0 %v7811_v26  ;;  %985 = vmatpush.msra.mxu1 %v7305_v5 }
 0x15b   :  { %910 = vmatpush.msrb.mxu3 %v7233_v9  ;;  %939 = vmatpush.msra.mxu2 %v7919_v31 }
 0x15c   :  { %957 = vmatpush.msra.mxu0 %v7827_v58  ;;  %986 = vmatpush.msra.mxu1 %v7929_v14  ;;  %v7962_v58 = vsel %vm630_vm1, %v6153_v60, %v15021_v25  ;;  %v15304_v60 = vunpack.i.l.bf16 %v7921_v43 }
 0x15d   :  { %1023 = vmatpush.msra.mxu3 %v7937_v19  ;;  %714 = vmatmul.f32.gmra.mxu0 %v7813_v61 }
 0x15e   :  { %885 = vmatmul.f32.gmra.mxu1 %v7746_v29  ;;  %911 = vmatmul.f32.vlgmr.msrb.gmra.mxu3 %v7629_v50  ;;  %v6168_v29 = vunpack.i.h.bf16 %v7921_v43  ;;  %v7982_v25 = vsel %vm630_vm1, %v6157_v4, %v15304_v60 }
 0x15f   :  { %1040 = vmatpush.msrb.mxu2 %v7929_v14  ;;  %958 = vmatpush.msra.mxu0 %v7842_v35  ;;  %v7984_v35 = vpop.permute.xlu0 %6175 }
 0x160   :  { %987 = vmatpush.msra.mxu1 %v7956_v36  ;;  %1024 = vmatpush.msra.mxu3 %v7962_v58  ;;  %v8000_v4 = vsel %vm630_vm1, %v6158_v59, %v6168_v29  ;;  %v6177_v20 = vunpack.i.l.bf16 %v7984_v35  ;;  %v6178_v59 = vunpack.i.h.bf16 %v7984_v35  ;;  %v15313_v35 = vunpack.i.l.bf16 %v7901_v55 }
 0x161   :  { %827 = vmatmul.f32.gmra.mxu2 %v7712_v3  ;;  %959 = vmatpush.msra.mxu0 %v7853_v32  ;;  %v6173_v32 = vunpack.i.h.bf16 %v7944_v13 }
 0x162   :  { %1041 = vmatpush.msrb.mxu2 %v7956_v36  ;;  %988 = vmatpush.msra.mxu1 %v7974_v0 }
 0x163   :  { %1025 = vmatpush.msra.mxu3 %v7982_v25  ;;  %960 = vmatpush.msra.mxu0 %v7867_v7  ;;  %v15305_v7 = vunpack.i.l.bf16 %v7944_v13 }
 0x164   :  { %1042 = vmatpush.msrb.mxu2 %v7974_v0  ;;  %989 = vmatpush.msra.mxu1 %v7991_v23 }
 0x165   :  { %1026 = vmatpush.msra.mxu3 %v8000_v4  ;;  %v8007_v21 = vsel %vm527_vm0, %v6142_v44, %v15305_v7  ;;  %961 = vmatpush.msra.mxu0 %v7193_v34  ;;  %v8022_v34 = vsel %vm527_vm0, %v6143_v42, %v6173_v32  ;;  %v8032_v44 = vsel %vm527_vm0, %v6147_v10, %v6177_v20  ;;  %v15307_v10 = vld [vmem:[#allocation13_spill] sm:$0xff] }
 0x166   :  { %1043 = vmatpush.msrb.mxu2 %v7991_v23  ;;  %990 = vmatpush.msra.mxu1 %v7889_v38  ;;  %v15308_v42 = vmov %v15305_v7 }
 0x167   :  { %1127 = vmatpush.msrb.mxu3 %v8007_v21  ;;  %717 = vmatmul.f32.gmra.mxu0 %v7874_v17 }
 0x168   :  { %888 = vmatmul.f32.gmra.mxu1 %v7813_v61  ;;  %914 = vmatmul.f32.gmra.mxu3 %v7712_v3 }
 0x169   :  { %1044 = vmatpush.msrb.mxu2 %v7889_v38  ;;  %1128 = vmatpush.msrb.mxu3 %v8022_v34 }
 0x16a   :  { %962 = vmatpush.msra.mxu0 %v7225_v63  ;;  %991 = vmatpush.msra.mxu1 %v7898_v2  ;;  %v8042_v63 = vsel %vm527_vm0, %v6148_v15, %v6178_v59 }
 0x16b   :  { %830 = vmatmul.f32.gmra.mxu2 %v7744_v54  ;;  %1129 = vmatpush.msrb.mxu3 %v8032_v44 }
 0x16c   :  { %1045 = vmatpush.msrb.mxu2 %v7898_v2  ;;  %963 = vmatpush.msra.mxu0 %v7269_v57  ;;  %v8115_v57 = vpop.permute.xlu0 %6190 }
 0x16d   :  { %992 = vmatpush.msra.mxu1 %v7910_v6  ;;  %1130 = vmatpush.msrb.mxu3 %v8042_v63  ;;  %v6192_v38 = vunpack.i.l.bf16 %v8115_v57 }
 0x16e   :  { %1046 = vmatpush.msrb.mxu2 %v7910_v6  ;;  %964 = vmatpush.msra.mxu0 %v7233_v9  ;;  %v8097_v9 = vpop.permute.xlu1 %6180 }
 0x16f   :  { %993 = vmatpush.msra.mxu1 %v7919_v31  ;;  %1131 = vmatpush.msrb.mxu3 %v7937_v19 }
 0x170   :  { %1047 = vmatpush.msrb.mxu2 %v7919_v31  ;;  %965 = vmatpush.msra.mxu0 %v7654_v40 }
 0x171   :  { %994 = vmatpush.msra.mxu1 %v7236_v18  ;;  %5859 = vmatmul.msk.f32.vlgmr.msrb.gmra.mxu0 %vm679_vm2, %v7661_v46 }
 0x172   :  { %891 = vmatmul.f32.gmra.mxu1 %v7874_v17  ;;  %917 = vmatmul.f32.gmra.mxu3 %v7744_v54 }
 0x173   :  { %1048 = vmatpush.msrb.mxu2 %v7236_v18  ;;  %1132 = vmatpush.msrb.mxu3 %v7962_v58  ;;  %v6182_v18 = vunpack.i.l.bf16 %v8097_v9 }
 0x174   :  { %966 = vmatpush.msra.mxu0 %v7678_v22  ;;  %995 = vmatpush.msra.mxu1 %v7264_v53 }
 0x175   :  { %833 = vmatmul.f32.gmra.mxu2 %v7802_v12  ;;  %1133 = vmatpush.msrb.mxu3 %v7982_v25 }
 0x176   :  { %1049 = vmatpush.msrb.mxu2 %v7264_v53  ;;  %967 = vmatpush.msra.mxu0 %v7695_v52  ;;  %v8113_v53 = vpop.permute.xlu2 %6185  ;;  %v8135_v40 = vpop.permute.xlu1 %6195  ;;  %v15310_v52 = vld [vmem:[#allocation19_spill] sm:$0xff] }
 0x177   :  { %996 = vmatpush.msra.mxu1 %v7311_v27  ;;  %1134 = vmatpush.msrb.mxu3 %v8000_v4  ;;  %v6187_v22 = vunpack.i.l.bf16 %v8113_v53  ;;  %v6198_v31 = vunpack.i.h.bf16 %v8135_v40 }
 0x178   :  { %1050 = vmatpush.msrb.mxu2 %v7311_v27  ;;  %968 = vmatpush.msra.mxu0 %v7710_v30  ;;  %v6183_v27 = vunpack.i.h.bf16 %v8097_v9 }
 0x179   :  { %997 = vmatpush.msra.mxu1 %v7346_v37  ;;  %1135 = vmatpush.msrb.mxu3 %v7400_v49  ;;  %v8163_v2 = vsel %vm527_vm0, %v6177_v20, %v6187_v22 }
 0x17a   :  { %1069 = vmatpush.msrb.mxu0 %v7363_v56  ;;  %1051 = vmatpush.msrb.mxu2 %v7346_v37  ;;  %v15306_v37 = vld [vmem:[#allocation12_spill] sm:$0xff]  ;;  %v8146_v30 = vsel %vm527_vm0, %v6173_v32, %v6183_v27  ;;  %v8204_v60 = vsel %vm527_vm0, %v6183_v27, %v6198_v31 }
 0x17b   :  { %6007 = vmatpush.msrb.mxu1 %v7363_v56  ;;  %5860 = vmatmul.msk.f32.gmra.mxu0 %vm679_vm2, %v7724_v41 }
 0x17c   :  { %920 = vmatmul.f32.gmra.mxu3 %v7802_v12  ;;  %998 = vmatmul.f32.vlgmr.msra.gmra.mxu1 %v7629_v50 }
 0x17d   :  { %1052 = vmatpush.msrb.mxu2 %v7768_v39  ;;  %1070 = vmatpush.msrb.mxu0 %v7359_v51  ;;  %v15309_v39 = vld [vmem:[#allocation11_spill] sm:$0xff] }
 0x17e   :  { %6008 = vmatpush.msrb.mxu1 %v7359_v51  ;;  %1136 = vmatpush.msrb.mxu3 %v7388_v24  ;;  %v8165_v6 = vpop.permute.xlu2 %6200  ;;  %v8207_v32 = vpop.permute.xlu1 %6210 }
 0x17f   :  { %5863 = vmatmul.msk.f32.vlgmr.msra.gmra.mxu2 %vm679_vm2, %v7661_v46  ;;  %1071 = vmatpush.msrb.mxu0 %v7403_v28 }
 0x180   :  { %1053 = vmatpush.msrb.mxu2 %v7783_v62  ;;  %6009 = vmatpush.msrb.mxu1 %v7403_v28  ;;  %v6188_v62 = vunpack.i.h.bf16 %v8113_v53 }
 0x181   :  { %1137 = vmatpush.msrb.mxu3 %v7315_v45  ;;  %1072 = vmatpush.msrb.mxu0 %v7398_v47 }
 0x182   :  { %1054 = vmatpush.msrb.mxu2 %v7797_v8  ;;  %6010 = vmatpush.msrb.mxu1 %v7398_v47  ;;  %v8130_v8 = vsel %vm527_vm0, %v15308_v42, %v6182_v18  ;;  %v8178_v13 = vsel %vm527_vm0, %v6178_v59, %v6188_v62  ;;  %v6203_v59 = vunpack.i.h.bf16 %v8165_v6 }
 0x183   :  { %1138 = vmatpush.msrb.mxu3 %v7305_v5  ;;  %1073 = vmatpush.msrb.mxu0 %v8007_v21 }
 0x184   :  { %1055 = vmatpush.msrb.mxu2 %v7811_v26  ;;  %6011 = vmatpush.msrb.mxu1 %v8007_v21  ;;  %v6197_v26 = vunpack.i.l.bf16 %v8135_v40  ;;  %v639_v42 = vsel %vm630_vm1, %v6168_v29, %v6203_v59  ;;  %v15317_v29 = vld [vmem:[#allocation18_spill] sm:$0xff] }
 0x185   :  { %1139 = vmatpush.msrb.mxu3 %v7929_v14  ;;  %5861 = vmatmul.msk.f32.gmra.mxu0 %vm679_vm2, %v7755_v1  ;;  %v15311_v14 = vld [vmem:[#allocation10_spill] sm:$0xff] }
 0x186   :  { %1156 = vmatpush.msra.mxu2 %v7435_v48  ;;  %1001 = vmatmul.f32.gmra.mxu1 %v7712_v3  ;;  %v8242_v53 = vpop.permute.xlu2 %6215 }
 0x187   :  { %1074 = vmatpush.msrb.mxu0 %v8022_v34  ;;  %6012 = vmatpush.msrb.mxu1 %v8022_v34 }
 0x188   :  { %1140 = vmatpush.msrb.mxu3 %v7956_v36  ;;  %1157 = vmatpush.msra.mxu2 %v7430_v11  ;;  %v8167_v36 = vpop.permute.xlu0 %6205 }
 0x189   :  { %5864 = vmatmul.msk.f32.gmra.mxu2 %vm679_vm2, %v7724_v41  ;;  %5867 = vmatmul.msk.f32.vlgmr.msra.gmra.mxu3 %vm679_vm2, %v7661_v46  ;;  %v6207_v15 = vunpack.i.l.bf16 %v8167_v36  ;;  %v6208_v7 = vunpack.i.h.bf16 %v8167_v36  ;;  %v6731_v36 = vld [vmem:[#allocation3 + $0x8] sm:$0xff] }
 0x18a   :  { %1075 = vmatpush.msrb.mxu0 %v8032_v44  ;;  %6013 = vmatpush.msrb.mxu1 %v8032_v44 }
 0x18b   :  { %1141 = vmatpush.msrb.mxu3 %v7974_v0  ;;  %1158 = vmatpush.msra.mxu2 %v7487_v16  ;;  %v8196_v0 = vsel %vm630_vm1, %v15313_v35, %v6192_v38  ;;  %v8227_v9 = vsel %vm527_vm0, %v6187_v22, %v6207_v15  ;;  %v8251_v27 = vsel %vm527_vm0, %v6188_v62, %v6208_v7  ;;  %v6217_v22 = vunpack.i.l.bf16 %v8242_v53  ;;  %v15318_v35 = vld [vmem:[#allocation16_spill] sm:$0xff] }
 0x18c   :  { %1076 = vmatpush.msrb.mxu0 %v8042_v63  ;;  %6014 = vmatpush.msrb.mxu1 %v8042_v63 }
 0x18d   :  { %1142 = vmatpush.msrb.mxu3 %v7991_v23  ;;  %1159 = vmatpush.msra.mxu2 %v15306_v37  ;;  %v6202_v23 = vunpack.i.l.bf16 %v8165_v6 }
 0x18e   :  { %1077 = vmatpush.msrb.mxu0 %v7937_v19  ;;  %6015 = vmatpush.msrb.mxu1 %v7937_v19  ;;  %v15312_v19 = vld [vmem:[#allocation9_spill] sm:$0xff] }
 0x18f   :  { %1243 = vmatpush.msra.mxu3 %v15307_v10  ;;  %1160 = vmatpush.msra.mxu2 %v8130_v8  ;;  %v8288_v62 = vsel %vm630_vm1, %v6202_v23, %v6217_v22 }
 0x190   :  { %5862 = vmatmul.msk.f32.gmra.mxu0 %vm679_vm2, %v15310_v52  ;;  %1004 = vmatmul.f32.gmra.mxu1 %v7744_v54 }
 0x191   :  { %1244 = vmatpush.msra.mxu3 %v15309_v39  ;;  %1078 = vmatpush.msrb.mxu0 %v7962_v58 }
 0x192   :  { %6016 = vmatpush.msrb.mxu1 %v7962_v58  ;;  %1161 = vmatpush.msra.mxu2 %v8146_v30  ;;  %v6193_v58 = vunpack.i.h.bf16 %v8115_v57  ;;  %v6213_v57 = vunpack.i.h.bf16 %v8207_v32 }
 0x193   :  { %1245 = vmatpush.msra.mxu3 %v15311_v14  ;;  %5865 = vmatmul.msk.f32.gmra.mxu2 %vm679_vm2, %v7755_v1 }
 0x194   :  { %5868 = vmatmul.msk.f32.gmra.mxu3 %vm679_vm2, %v7724_v41  ;;  %1079 = vmatpush.msrb.mxu0 %v7982_v25 }
 0x195   :  { %6017 = vmatpush.msrb.mxu1 %v7982_v25  ;;  %1162 = vmatpush.msra.mxu2 %v8163_v2  ;;  %v8187_v25 = vsel %vm527_vm0, %v6182_v18, %v6197_v26  ;;  %v6212_v18 = vunpack.i.l.bf16 %v8207_v32 }
 0x196   :  { %1246 = vmatpush.msra.mxu3 %v15312_v19  ;;  %1080 = vmatpush.msrb.mxu0 %v8000_v4 }
 0x197   :  { %6018 = vmatpush.msrb.mxu1 %v8000_v4  ;;  %1163 = vmatpush.msra.mxu2 %v8178_v13  ;;  %v15314_v4 = vld [vmem:[#allocation17_spill] sm:$0xff] }
 0x198   :  { %1247 = vmatpush.msra.mxu3 %v8187_v25  ;;  %1081 = vmatpush.msrb.mxu0 %v7400_v49 }
 0x199   :  { %6019 = vmatpush.msrb.mxu1 %v7400_v49  ;;  %1164 = vmatpush.msra.mxu2 %v8196_v0  ;;  %v15315_v49 = vunpack.i.h.bf16 %v7901_v55 }
 0x19a   :  { %1248 = vmatpush.msra.mxu3 %v8204_v60  ;;  %969 = vmatmul.f32.vlgmr.msra.gmra.mxu0 %v15314_v4 }
 0x19b   :  { %1007 = vmatmul.f32.gmra.mxu1 %v7802_v12  ;;  %1082 = vmatpush.msrb.mxu0 %v7388_v24  ;;  %v8218_v20 = vsel %vm630_vm1, %v15315_v49, %v6193_v58 }
 0x19c   :  { %6020 = vmatpush.msrb.mxu1 %v7388_v24  ;;  %1165 = vmatpush.msra.mxu2 %v8218_v20  ;;  %v15316_v24 = vunpack.i.l.bf16 %v7921_v43  ;;  %v6218_v43 = vunpack.i.h.bf16 %v8242_v53 }
 0x19d   :  { %1249 = vmatpush.msra.mxu3 %v8227_v9  ;;  %5866 = vmatmul.msk.f32.gmra.mxu2 %vm679_vm2, %v15310_v52 }
 0x19e   :  { %5869 = vmatmul.msk.f32.gmra.mxu3 %vm679_vm2, %v7755_v1  ;;  %1083 = vmatpush.msrb.mxu0 %v7315_v45  ;;  %v8240_v55 = vsel %vm630_vm1, %v15316_v24, %v6202_v23 }
 0x19f   :  { %6021 = vmatpush.msrb.mxu1 %v7315_v45  ;;  %1166 = vmatpush.msra.mxu2 %v8240_v55  ;;  %v8264_v45 = vsel %vm630_vm1, %v6192_v38, %v6212_v18  ;;  %v8300_v38 = vsel %vm630_vm1, %v6203_v59, %v6218_v43 }
 0x1a0   :  { %1250 = vmatpush.msra.mxu3 %v8251_v27  ;;  %1084 = vmatpush.msrb.mxu0 %v7305_v5 }
 0x1a1   :  { %6022 = vmatpush.msrb.mxu1 %v7305_v5  ;;  %1167 = vmatpush.msra.mxu2 %v639_v42  ;;  %v8275_v5 = vsel %vm630_vm1, %v6193_v58, %v6213_v57 }
 0x1a2   :  { %1197 = vmatpush.msra.mxu0 %v8264_v45  ;;  %1251 = vmatpush.msra.mxu3 %v8264_v45 }
 0x1a3   :  { %1110 = vmatpush.msra.mxu1 %v8196_v0  ;;  %1168 = vmatpush.msra.mxu2 %v7363_v56 }
 0x1a4   :  { %1198 = vmatpush.msra.mxu0 %v8275_v5  ;;  %1252 = vmatpush.msra.mxu3 %v8275_v5 }
 0x1a5   :  { %1111 = vmatpush.msra.mxu1 %v8218_v20  ;;  %972 = vmatmul.f32.gmra.mxu0 %v15317_v29 }
 0x1a6   :  { %1091 = vmatmul.f32.vlgmr.msrb.gmra.mxu1 %v7744_v54  ;;  %1169 = vmatpush.msra.mxu2 %v7359_v51 }
 0x1a7   :  { %1112 = vmatpush.msra.mxu1 %v8240_v55  ;;  %1199 = vmatpush.msra.mxu0 %v8288_v62  ;;  %v8306_v6 = vpop.f32.mrf.mxu1 }
 0x1a8   :  { %1253 = vmatpush.msra.mxu3 %v8288_v62  ;;  %1056 = vmatmul.f32.vlgmr.msrb.gmra.mxu2 %v15314_v4 }
 0x1a9   :  { %5870 = vmatmul.msk.f32.gmra.mxu3 %vm679_vm2, %v15310_v52  ;;  %1113 = vmatpush.msra.mxu1 %v639_v42 }
 0x1aa   :  { %1170 = vmatpush.msra.mxu2 %v7403_v28  ;;  %1200 = vmatpush.msra.mxu0 %v8300_v38 }
 0x1ab   :  { %1254 = vmatpush.msra.mxu3 %v8300_v38  ;;  %1214 = vmatpush.msrb.mxu1 %v8130_v8 }
 0x1ac   :  { %1171 = vmatpush.msra.mxu2 %v7398_v47 }
 0x1ad   :  { %1255 = vmatpush.msra.mxu3 %v7435_v48  ;;  %1215 = vmatpush.msrb.mxu1 %v8146_v30 }
 0x1ae   :  { %6023 = vmatpush.msrb.mxu2 %v8130_v8  ;;  %975 = vmatmul.f32.gmra.mxu0 %v7813_v61 }
 0x1af   :  { %1256 = vmatpush.msra.mxu3 %v7430_v11  ;;  %1094 = vmatmul.f32.gmra.mxu1 %v7802_v12 }
 0x1b0   :  { %6024 = vmatpush.msrb.mxu2 %v8146_v30  ;;  %1216 = vmatpush.msrb.mxu1 %v8163_v2 }
 0x1b1   :  { %1257 = vmatpush.msra.mxu3 %v7487_v16  ;;  %1059 = vmatmul.f32.gmra.mxu2 %v15317_v29  ;;  %v8323_v58 = vpop.f32.mrf.mxu2  ;;  %v8328_v23 = vpop.f32.mrf.mxu1 }
 0x1b2   :  { %1143 = vmatmul.f32.vlgmr.msrb.gmra.mxu3 %v15314_v4  ;;  %6025 = vmatpush.msrb.mxu2 %v8163_v2 }
 0x1b3   :  { %1217 = vmatpush.msrb.mxu1 %v8178_v13  ;;  %1258 = vmatpush.msra.mxu3 %v15306_v37 }
 0x1b4   :  { %6026 = vmatpush.msrb.mxu2 %v8178_v13 }
 0x1b5   :  { %1371 = vmatpush.msrb.mxu3 %v15318_v35  ;;  %1218 = vmatpush.msrb.mxu1 %v8196_v0 }
 0x1b6   :  { %6027 = vmatpush.msrb.mxu2 %v8196_v0  ;;  %978 = vmatmul.f32.gmra.mxu0 %v7874_v17 }
 0x1b7   :  { %1372 = vmatpush.msrb.mxu3 %v15318_v35  ;;  %1219 = vmatpush.msrb.mxu1 %v8218_v20 }
 0x1b8   :  { %5871 = vmatmul.msk.f32.vlgmr.msra.gmra.mxu1 %vm679_vm2, %v7661_v46  ;;  %6028 = vmatpush.msrb.mxu2 %v8218_v20  ;;  %v8353_v20 = vpop.f32.mrf.mxu3 }
 0x1b9   :  { %1220 = vmatpush.msrb.mxu1 %v8240_v55  ;;  %1373 = vmatpush.msrb.mxu3 %v15318_v35 }
 0x1ba   :  { %1062 = vmatmul.f32.gmra.mxu2 %v7813_v61  ;;  %1146 = vmatmul.f32.gmra.mxu3 %v15317_v29  ;;  %v8344_v0 = vpop.f32.mrf.mxu2 }
 0x1bb   :  { %6029 = vmatpush.msrb.mxu2 %v8240_v55  ;;  %1221 = vmatpush.msrb.mxu1 %v639_v42  ;;  %v8348_v49 = vpop.f32.mrf.mxu1 }
 0x1bc   :  { %1374 = vmatpush.msrb.mxu3 %v15318_v35 }
 0x1bd   :  { %6030 = vmatpush.msrb.mxu2 %v639_v42  ;;  %1222 = vmatpush.msrb.mxu1 %v7363_v56 }
 0x1be   :  { %1085 = vmatmul.f32.vlgmr.msrb.gmra.mxu0 %v7629_v50 }
 0x1bf   :  { %6031 = vmatpush.msrb.mxu2 %v7363_v56  ;;  %1223 = vmatpush.msrb.mxu1 %v7359_v51 }
 0x1c0   :  { %5872 = vmatmul.msk.f32.gmra.mxu1 %vm679_vm2, %v7724_v41  ;;  %1301 = vmatpush.msrb.mxu0 %v8187_v25  ;;  %v634_v25 = vsel %vm630_vm1, %v6212_v18, %v15318_v35 }
 0x1c1   :  { %6032 = vmatpush.msrb.mxu2 %v7359_v51  ;;  %1224 = vmatpush.msrb.mxu1 %v7403_v28 }
 0x1c2   :  { %1065 = vmatmul.f32.gmra.mxu2 %v7874_v17  ;;  %1149 = vmatmul.f32.gmra.mxu3 %v7813_v61 }
 0x1c3   :  { %6033 = vmatpush.msrb.mxu2 %v7403_v28  ;;  %1225 = vmatpush.msrb.mxu1 %v7398_v47  ;;  %v8380_v28 = vpop.f32.mrf.mxu3 }
 0x1c4   :  { %1302 = vmatpush.msrb.mxu0 %v8204_v60  ;;  %v8367_v51 = vpop.f32.mrf.mxu2  ;;  %v632_v60 = vsel %vm630_vm1, %v6217_v22, %v15318_v35 }
 0x1c5   :  { %6034 = vmatpush.msrb.mxu2 %v7398_v47  ;;  %1226 = vmatpush.msrb.mxu1 %v8007_v21  ;;  %v8371_v56 = vpop.f32.mrf.mxu0  ;;  %v8376_v47 = vpop.f32.mrf.mxu1 }
 0x1c6   :  { %1303 = vmatpush.msrb.mxu0 %v8227_v9 }
 0x1c7   :  { %6035 = vmatpush.msrb.mxu2 %v8007_v21  ;;  %1227 = vmatpush.msrb.mxu1 %v8022_v34  ;;  %v15319_v21 = vld [vmem:[#allocation15_spill] sm:$0xff] }
 0x1c8   :  { %1304 = vmatpush.msrb.mxu0 %v8251_v27  ;;  %5873 = vmatmul.msk.f32.gmra.mxu1 %vm679_vm2, %v7755_v1 }
 0x1c9   :  { %1088 = vmatmul.f32.gmra.mxu0 %v7712_v3  ;;  %6036 = vmatpush.msrb.mxu2 %v8022_v34  ;;  %v531_v34 = vsel %vm527_vm0, %v6197_v26, %v15319_v21  ;;  %v529_v26 = vsel %vm527_vm0, %v6207_v15, %v15319_v21  ;;  %v528_v15 = vsel %vm527_vm0, %v6208_v7, %v15319_v21 }
 0x1ca   :  { %1228 = vmatpush.msrb.mxu1 %v8032_v44  ;;  %1305 = vmatpush.msrb.mxu0 %v8264_v45 }
 0x1cb   :  { %1152 = vmatmul.f32.gmra.mxu3 %v7874_v17  ;;  %1172 = vmatmul.f32.vlgmr.msra.gmra.mxu2 %v7629_v50  ;;  %v8436_v59 = vpop.f32.mrf.mxu3 }
 0x1cc   :  { %1229 = vmatpush.msrb.mxu1 %v8042_v63  ;;  %6037 = vmatpush.msrb.mxu2 %v8032_v44  ;;  %v530_v44 = vsel %vm527_vm0, %v6198_v31, %v15319_v21 }
 0x1cd   :  { %1306 = vmatpush.msrb.mxu0 %v8275_v5 }
 0x1ce   :  { %1334 = vmatpush.msra.mxu1 %v531_v34  ;;  %6038 = vmatpush.msrb.mxu2 %v8042_v63  ;;  %v633_v63 = vsel %vm630_vm1, %v6213_v57, %v15318_v35  ;;  %v8418_v40 = vpop.f32.mrf.mxu2 }
 0x1cf   :  { %1307 = vmatpush.msrb.mxu0 %v8288_v62  ;;  %v8420_v31 = vpop.f32.mrf.mxu0 }
 0x1d0   :  { %1284 = vmatpush.msra.mxu2 %v634_v25  ;;  %1335 = vmatpush.msra.mxu1 %v530_v44 }
 0x1d1   :  { %1308 = vmatpush.msrb.mxu0 %v8300_v38  ;;  %5874 = vmatmul.msk.f32.gmra.mxu1 %vm679_vm2, %v15310_v52  ;;  %v8434_v32 = vpop.f32.mrf.mxu1 }
 0x1d2   :  { %1285 = vmatpush.msra.mxu2 %v633_v63  ;;  %1336 = vmatpush.msra.mxu1 %v529_v26 }
 0x1d3   :  { %1309 = vmatpush.msrb.mxu0 %v7435_v48  ;;  %1259 = vmatmul.f32.vlgmr.msra.gmra.mxu3 %v7629_v50  ;;  %v631_v48 = vsel %vm630_vm1, %v6218_v43, %v15318_v35 }
 0x1d4   :  { %1286 = vmatpush.msra.mxu2 %v632_v60  ;;  %1337 = vmatpush.msra.mxu1 %v528_v15 }
 0x1d5   :  { %1175 = vmatmul.f32.gmra.mxu2 %v7712_v3  ;;  %5875 = vmatmul.msk.f32.vlgmr.msra.gmra.mxu0 %vm679_vm2, %v7661_v46 }
 0x1d6   :  { %1310 = vmatpush.msrb.mxu0 %v7430_v11  ;;  %1287 = vmatpush.msra.mxu2 %v631_v48 }
 0x1d7   :  { %1338 = vmatpush.msra.mxu1 %v634_v25 }
 0x1d8   :  { %1311 = vmatpush.msrb.mxu0 %v7487_v16  ;;  %v8461_v16 = vpop.f32.mrf.mxu3 }
 0x1d9   :  { %1339 = vmatpush.msra.mxu1 %v633_v63  ;;  %v8451_v46 = vpop.f32.mrf.mxu2 }
 0x1da   :  { %1312 = vmatpush.msrb.mxu0 %v15306_v37  ;;  %1230 = vmatmul.f32.vlgmr.msrb.gmra.mxu1 %v15314_v4  ;;  %v8454_v50 = vpop.f32.mrf.mxu0 }
 0x1db   :  { %1340 = vmatpush.msra.mxu1 %v632_v60  ;;  %1262 = vmatmul.f32.gmra.mxu3 %v7712_v3  ;;  %v8457_v11 = vpop.f32.mrf.mxu1 }
 0x1dc   :  { %1313 = vmatpush.msrb.mxu0 %v8130_v8 }
 0x1dd   :  { %1341 = vmatpush.msra.mxu1 %v631_v48  ;;  %1178 = vmatmul.f32.gmra.mxu2 %v7744_v54 }
 0x1de   :  { %5876 = vmatmul.msk.f32.gmra.mxu0 %vm679_vm2, %v7724_v41 }
 0x1df   :  { %1314 = vmatpush.msrb.mxu0 %v8146_v30  ;;  %1342 = vmatpush.msra.mxu1 %v15307_v10 }
 0x1e1   :  { %1315 = vmatpush.msrb.mxu0 %v8163_v2  ;;  %1343 = vmatpush.msra.mxu1 %v15309_v39  ;;  %v8481_v39 = vpop.f32.mrf.mxu3 }
 0x1e2   :  { %1233 = vmatmul.f32.gmra.mxu1 %v15317_v29 }
 0x1e3   :  { %1316 = vmatpush.msrb.mxu0 %v8178_v13  ;;  %1344 = vmatpush.msra.mxu1 %v15311_v14  ;;  %v6732_v13 = vld [vmem:[#allocation3 + $0x10] sm:$0xff] }
 0x1e4   :  { %1265 = vmatmul.f32.gmra.mxu3 %v7744_v54  ;;  %v8473_v37 = vpop.f32.mrf.mxu2  ;;  %v8477_v10 = vpop.f32.mrf.mxu0 }
 0x1e5   :  { %1345 = vmatpush.msra.mxu1 %v15312_v19  ;;  %1181 = vmatmul.f32.gmra.mxu2 %v7802_v12  ;;  %v8479_v8 = vpop.f32.mrf.mxu1 }
 0x1e6   :  { %5877 = vmatmul.msk.f32.gmra.mxu0 %vm679_vm2, %v7755_v1 }
 0x1ea   :  { %1236 = vmatmul.f32.gmra.mxu1 %v7813_v61 }
 0x1eb   :  { %v8494_v19 = vpop.f32.mrf.mxu3 }
 0x1ec   :  { %1268 = vmatmul.f32.gmra.mxu3 %v7802_v12 }
 0x1ed   :  { %1239 = vmatmul.f32.vlgmr.msrb.gmra.mxu2 %v7874_v17 }
 0x1ee   :  { %5878 = vmatmul.msk.f32.gmra.mxu0 %vm679_vm2, %v15310_v52  ;;  %v8488_v30 = vpop.f32.mrf.mxu2  ;;  %v8490_v14 = vpop.f32.mrf.mxu0 }
 0x1ef   :  { %v8492_v2 = vpop.f32.mrf.mxu1 }
 0x1f2   :  { %1346 = vmatmul.f32.vlgmr.msra.gmra.mxu1 %v6731_v36 }
 0x1f4   :  { %5883 = vmatmul.msk.f32.vlgmr.msrb.gmra.mxu3 %vm679_vm2, %v6732_v13 }
 0x1f5   :  { %5879 = vmatmul.msk.f32.vlgmr.msra.gmra.mxu2 %vm679_vm2, %v6732_v13  ;;  %v8508_v24 = vpop.f32.mrf.mxu3 }
 0x1f6   :  { %1317 = vmatmul.f32.vlgmr.msrb.gmra.mxu0 %v15314_v4 }
 0x1f8   :  { %v8499_v7 = vpop.f32.mrf.mxu2  ;;  %v8502_v9 = vpop.f32.mrf.mxu0 }
 0x1f9   :  { %v8504_v18 = vpop.f32.mrf.mxu1 }
 0x1fa   :  { %1349 = vmatmul.f32.gmra.mxu1 %v7712_v3 }
 0x1fc   :  { %5884 = vmatmul.msk.f32.gmra.mxu3 %vm679_vm2, %v7724_v41 }
 0x1fd   :  { %5880 = vmatmul.msk.f32.gmra.mxu2 %vm679_vm2, %v7724_v41 }
 0x1fe   :  { %1320 = vmatmul.f32.gmra.mxu0 %v15317_v29 }
 0x1ff   :  { %v8523_v53 = vpop.f32.mrf.mxu3 }
 0x202   :  { %1352 = vmatmul.f32.gmra.mxu1 %v7744_v54  ;;  %v8514_v4 = vpop.f32.mrf.mxu2  ;;  %v8518_v3 = vpop.f32.mrf.mxu0 }
 0x203   :  { %v1002_v55 = vpop.f32.mrf.mxu1 }
 0x204   :  { %5885 = vmatmul.msk.f32.gmra.mxu3 %vm679_vm2, %v7755_v1 }
 0x205   :  { %5881 = vmatmul.msk.f32.gmra.mxu2 %vm679_vm2, %v7755_v1 }
 0x206   :  { %1323 = vmatmul.f32.gmra.mxu0 %v7813_v61 }
 0x20a   :  { %1355 = vmatmul.f32.gmra.mxu1 %v7802_v12 }
 0x20c   :  { %5886 = vmatmul.msk.f32.gmra.mxu3 %vm679_vm2, %v15310_v52  ;;  %v944_v41 = vpop.f32.mrf.mxu2  ;;  %v8533_v57 = vpop.f32.mrf.mxu3 }
 0x20d   :  { %5882 = vmatmul.msk.f32.gmra.mxu2 %vm679_vm2, %v15310_v52  ;;  %v8531_v54 = vpop.f32.mrf.mxu0  ;;  %v8535_v1 = vpop.f32.mrf.mxu1 }
 0x20e   :  { %1326 = vmatmul.f32.gmra.mxu0 %v7874_v17 }
 0x216   :  { %v8537_v61 = vpop.f32.mrf.mxu2 }
 0x217   :  { %v8539_v27 = vpop.f32.mrf.mxu0  ;;  %v8541_v12 = vpop.f32.mrf.mxu3 }
 0x218   :  { %v8543_v42 = vpop.f32.mrf.mxu1 }
 0x219   :  { %15320 = vst [vmem:[#allocation12_spill] sm:$0xff] %v8543_v42 }
 0x220   :  { %v8545_v45 = vpop.f32.mrf.mxu2 }
 0x221   :  { %15321 = vst [vmem:[#allocation13_spill] sm:$0xff] %v8545_v45  ;;  %v8547_v22 = vpop.f32.mrf.mxu3 }
 0x222   :  { %v973_v52 = vpop.f32.mrf.mxu0 }
 0x223   :  { %v8549_v17 = vpop.f32.mrf.mxu1 }
 0x224   :  { %15322 = vst [vmem:[#allocation11_spill] sm:$0xff] %v8549_v17 }
 0x22b   :  { %v8551_v5 = vpop.f32.mrf.mxu0  ;;  %v8553_v43 = vpop.f32.mrf.mxu2 }
 0x22c   :  { %v8555_v29 = vpop.f32.mrf.mxu3  ;;  %v8557_v62 = vpop.f32.mrf.mxu1 }
 0x22d   :  { %15323 = vst [vmem:[#allocation19_spill] sm:$0xff] %v8555_v29 }
 0x22e   :  { %15324 = vst [vmem:[#allocation10_spill] sm:$0xff] %v8557_v62 }
 0x233   :  { %v8563_v44 = vpop.f32.mrf.mxu0 }
 0x234   :  { %v1060_v38 = vpop.f32.mrf.mxu2  ;;  %15326 = vst [vmem:[#allocation17_spill] sm:$0xff] %v8563_v44 }
 0x235   :  { %v8559_v34 = vpop.f32.mrf.mxu1  ;;  %v8561_v25 = vpop.f32.mrf.mxu3 }
 0x236   :  { %15325 = vst [vmem:[#allocation9_spill] sm:$0xff] %v8559_v34 }
 0x23b   :  { %v8569_v15 = vpop.f32.mrf.mxu0 }
 0x23d   :  { %v8565_v63 = vpop.f32.mrf.mxu2  ;;  %v8567_v26 = vpop.f32.mrf.mxu1 }
 0x23e   :  { %v1147_v60 = vpop.f32.mrf.mxu3 }
 0x245   :  { %v8571_v48 = vpop.f32.mrf.mxu2  ;;  %v8573_v36 = vpop.f32.mrf.mxu1 }
 0x246   :  { %15327 = vst [vmem:[#allocation18_spill] sm:$0xff] %v8571_v48  ;;  %v8575_v13 = vpop.f32.mrf.mxu3  ;;  %v1089_v35 = vpop.f32.mrf.mxu0 }
 0x247   :  { %15328 = vst [vmem:[#allocation20_spill] sm:$0xff] %v8573_v36 }
 0x248   :  { %15329 = vst [vmem:[#allocation21_spill] sm:$0xff] %v8575_v13 }
 0x24e   :  { %v8577_v33 = vpop.f32.mrf.mxu1  ;;  %v8579_v21 = vpop.f32.mrf.mxu3 }
 0x24f   :  { %15330 = vst [vmem:[#allocation22_spill] sm:$0xff] %v8577_v33  ;;  %v8581_v62 = vpop.f32.mrf.mxu2 }
 0x250   :  { %15331 = vst [vmem:[#allocation23_spill] sm:$0xff] %v8579_v21 }
 0x252   :  { %v8583_v29 = vpop.f32.mrf.mxu0 }
 0x253   :  { %15332 = vst [vmem:[#allocation24_spill] sm:$0xff] %v8583_v29 }
 0x256   :  { %v8585_v45 = vpop.f32.mrf.mxu3 }
 0x257   :  { %15333 = vst [vmem:[#allocation25_spill] sm:$0xff] %v8585_v45  ;;  %v8587_v42 = vpop.f32.mrf.mxu1 }
 0x258   :  { %15334 = vst [vmem:[#allocation26_spill] sm:$0xff] %v8587_v42  ;;  %v1176_v44 = vpop.f32.mrf.mxu2  ;;  %v739_v42 = vadd.f32 %v8306_v6, %v8371_v56 }
 0x25b   :  { %v8589_v34 = vpop.f32.mrf.mxu0 }
 0x25e   :  { %v8591_v48 = vpop.f32.mrf.mxu3 }
 0x25f   :  { %15335 = vst [vmem:[#allocation27_spill] sm:$0xff] %v8591_v48  ;;  %v8593_v36 = vpop.f32.mrf.mxu1  ;;  %v742_v48 = vadd.f32 %v8328_v23, %v8420_v31  ;;  %v916_v23 = vadd.f32 %v8494_v19, %v8457_v11 }
 0x260   :  { %15336 = vst [vmem:[#allocation28_spill] sm:$0xff] %v8593_v36  ;;  %v8595_v13 = vpop.f32.mrf.mxu2  ;;  %v829_v36 = vadd.f32 %v8473_v37, %v8380_v28  ;;  %v1003_v28 = vadd.f32 %v1002_v55, %v973_v52  ;;  %v1090_v37 = vadd.f32 %v1089_v35, %v1060_v38  ;;  %v8671_v35 = vld [vmem:[%s14971_s1 + $0x40] sm:$0xff]  ;;  %v1177_v55 = vadd.f32 %v1176_v44, %v1147_v60  ;;  %v8717_v44 = vld [vmem:[%s14971_s1 + $0x10] sm:$0xff] }
 0x261   :  { %15337 = vst [vmem:[#allocation29_spill] sm:$0xff] %v8595_v13  ;;  %v8632_v31 = vadd.f32 %v8344_v0, %v742_v48 }
 0x262   :  { %v8629_v56 = vadd.f32 %v8502_v9, %v829_v36  ;;  %v8666_v9 = vadd.f32 %v8541_v12, %v1003_v28  ;;  %v8712_v38 = vadd.f32 %v8567_v26, %v1090_v37  ;;  %15347 = vst [vmem:[#allocation39_spill] sm:$0xff] %v8717_v44  ;;  %v1087_v26 = vadd.f32 %v8569_v15, %v8553_v43  ;;  %v8760_v15 = vld [vmem:[%s14971_s1 + $0x60] sm:$0xff] }
 0x263   :  { %v8597_v33 = vpop.f32.mrf.mxu0  ;;  %v8737_v36 = vadd.f32 %v8589_v34, %v1177_v55  ;;  %v922_v43 = vadd.f32 %v8523_v53, %v8492_v2  ;;  %v8781_v55 = vld [vmem:[%s14971_s1 + $0x68] sm:$0xff] }
 0x264   :  { %15338 = vst [vmem:[#allocation30_spill] sm:$0xff] %v8597_v33 }
 0x267   :  { %v8599_v21 = vpop.f32.mrf.mxu3  ;;  %v8601_v17 = vpop.f32.mrf.mxu1 }
 0x268   :  { %15339 = vst [vmem:[#allocation31_spill] sm:$0xff] %v8599_v21  ;;  %v8603_v29 = vpop.f32.mrf.mxu2  ;;  %v8618_v21 = vadd.f32 %v8323_v58, %v739_v42  ;;  %v8692_v42 = vld [vmem:[%s14971_s1 + $0x50] sm:$0xff] }
 0x269   :  { %15340 = vst [vmem:[#allocation32_spill] sm:$0xff] %v8601_v17  ;;  %v745_v17 = vadd.f32 %v8348_v49, %v8454_v50  ;;  %v913_v49 = vadd.f32 %v8481_v39, %v8434_v32  ;;  %v8639_v50 = vadd.f32 %v944_v41, %v916_v23  ;;  %v8658_v32 = vld [vmem:[%s14971_s1 + $0x48] sm:$0xff]  ;;  %v919_v41 = vadd.f32 %v8508_v24, %v8479_v8  ;;  %v8703_v8 = vld [vmem:[%s14971_s1 + $0x80] sm:$0xff] }
 0x26a   :  { %15342 = vst [vmem:[#allocation34_spill] sm:$0xff] %v8618_v21  ;;  %v1397_v39 = vmul.f32 %v8658_v32, %v8629_v56 }
 0x26b   :  { %v8605_v45 = vpop.f32.mrf.mxu0  ;;  %v8651_v0 = vadd.f32 %v8367_v51, %v745_v17  ;;  %v8663_v19 = vadd.f32 %v8514_v4, %v913_v49  ;;  %v1396_v51 = vmul.f32 %v8671_v35, %v8632_v31  ;;  %v1006_v17 = vadd.f32 %v8535_v1, %v8551_v5 }
 0x26c   :  { %15341 = vst [vmem:[#allocation33_spill] sm:$0xff] %v8605_v45  ;;  %v826_v45 = vadd.f32 %v8451_v46, %v8353_v20  ;;  %v8646_v46 = vld [vmem:[%s14971_s1] sm:$0xff]  ;;  %v8722_v48 = vadd.f32 %v8537_v61, %v919_v41  ;;  %v8742_v61 = vld [vmem:[%s14971_s1 + $0x88] sm:$0xff]  ;;  %v1401_v41 = vmul.f32 %v8781_v55, %v8737_v36 }
 0x26d   :  { %15344 = vst [vmem:[#allocation36_spill] sm:$0xff] %v8646_v46  ;;  %v1388_v11 = vmul.f32 %v8646_v46, %v8618_v21  ;;  %v1404_v24 = vmul.f32 %v8703_v8, %v8651_v0  ;;  %v1390_v60 = vmul.f32 %v8717_v44, %v8663_v19  ;;  %v8755_v34 = vadd.f32 %v8547_v22, %v1006_v17  ;;  %v15364_v46 = vld [vmem:[#allocation25_spill] sm:$0xff]  ;;  %v8957_v21 = vld [vmem:[%s14971_s1 + $0xe8] sm:$0xff] }
 0x26e   :  { %v8635_v58 = vadd.f32 %v8490_v14, %v826_v45  ;;  %v832_v14 = vadd.f32 %v8488_v30, %v8436_v59  ;;  %15345 = vst [vmem:[#allocation37_spill] sm:$0xff] %v8663_v19  ;;  %v748_v59 = vadd.f32 %v8376_v47, %v8477_v10  ;;  %v8680_v30 = vld [vmem:[%s14971_s1 + $0x8] sm:$0xff]  ;;  %v1398_v47 = vmul.f32 %v8692_v42, %v8639_v50 }
 0x26f   :  { %v8613_v13 = vpop.f32.mrf.mxu3  ;;  %v8615_v33 = vpop.f32.mrf.mxu1  ;;  %15346 = vst [vmem:[#allocation38_spill] sm:$0xff] %v8680_v30  ;;  %v1000_v10 = vadd.f32 %v8504_v18, %v8539_v27  ;;  %v1429_v27 = vadd.f32 %v1397_v39, %v1396_v51  ;;  %v1174_v22 = vadd.f32 %v8581_v62, %v8561_v25  ;;  %v15349_v39 = vld [vmem:[#allocation11_spill] sm:$0xff] }
 0x270   :  { %v8624_v6 = vpop.f32.mrf.mxu2  ;;  %15343 = vst [vmem:[#allocation35_spill] sm:$0xff] %v8635_v58  ;;  %v1389_v4 = vmul.f32 %v8680_v30, %v8635_v58  ;;  %v8687_v12 = vadd.f32 %v8518_v3, %v832_v14  ;;  %v835_v3 = vadd.f32 %v8499_v7, %v8461_v16  ;;  %v8727_v16 = vld [vmem:[%s14971_s1 + $0x58] sm:$0xff]  ;;  %v8732_v1 = vadd.f32 %v8418_v40, %v748_v59  ;;  %v8790_v62 = vld [vmem:[%s14971_s1 + $0xc8] sm:$0xff]  ;;  %v15363_v30 = vld [vmem:[#allocation26_spill] sm:$0xff] }
 0x271   :  { %v1399_v7 = vmul.f32 %v8727_v16, %v8666_v9  ;;  %v1430_v40 = vadd.f32 %v1429_v27, %v1398_v47  ;;  %v8750_v49 = vadd.f32 %v8533_v57, %v1000_v10  ;;  %v8767_v57 = vld [vmem:[%s14971_s1 + $0x90] sm:$0xff]  ;;  %v1093_v51 = vadd.f32 %v15349_v39, %v8565_v63  ;;  %v15350_v59 = vld [vmem:[#allocation9_spill] sm:$0xff] }
 0x272   :  { %v1420_v5 = vadd.f32 %v1389_v4, %v1388_v11  ;;  %v1405_v23 = vmul.f32 %v8742_v61, %v8687_v12  ;;  %v8747_v28 = vadd.f32 %v8531_v54, %v835_v3  ;;  %v1400_v54 = vmul.f32 %v8760_v15, %v8712_v38  ;;  %15352 = vst [vmem:[#allocation9_spill] sm:$0xff] %v8781_v55  ;;  %v15353_v47 = vld [vmem:[#allocation21_spill] sm:$0xff]  ;;  %v15356_v27 = vld [vmem:[#allocation28_spill] sm:$0xff] }
 0x273   :  { %v8641_v20 = vpop.f32.mrf.mxu0  ;;  %15348 = vst [vmem:[#allocation40_spill] sm:$0xff] %v8750_v49  ;;  %v1406_v2 = vmul.f32 %v8767_v57, %v8722_v48  ;;  %v1431_v53 = vadd.f32 %v1430_v40, %v1399_v7  ;;  %v8776_v4 = vadd.f32 %v15350_v59, %v1087_v26  ;;  %v15354_v10 = vld [vmem:[#allocation29_spill] sm:$0xff]  ;;  %v15358_v40 = vld [vmem:[#allocation20_spill] sm:$0xff] }
 0x274   :  { %v1421_v14 = vadd.f32 %v1420_v5, %v1390_v60  ;;  %v1438_v3 = vadd.f32 %v1405_v23, %v1404_v24  ;;  %v1413_v25 = vmul.f32 %v8790_v62, %v8747_v28  ;;  %v8797_v63 = vld [vmem:[%s14971_s1 + $0x18] sm:$0xff]  ;;  %v15357_v60 = vld [vmem:[#allocation27_spill] sm:$0xff] }
 0x275   :  { %15351 = vst [vmem:[#allocation11_spill] sm:$0xff] %v8776_v4  ;;  %v1391_v17 = vmul.f32 %v8797_v63, %v8750_v49  ;;  %v1264_v7 = vadd.f32 %v15357_v60, %v15356_v27  ;;  %v8806_v26 = vld [vmem:[%s14971_s1 + $0x98] sm:$0xff]  ;;  %v15361_v60 = vld [vmem:[#allocation24_spill] sm:$0xff]  ;;  %v1261_v49 = vadd.f32 %v15364_v46, %v15363_v30  ;;  %v1348_v46 = vadd.f32 %v8615_v33, %v8641_v20  ;;  %v8858_v20 = vld [vmem:[%s14971_s1 + $0xa0] sm:$0xff] }
 0x276   :  { %15355 = vst [vmem:[#allocation21_spill] sm:$0xff] %v8797_v63  ;;  %v1407_v23 = vmul.f32 %v8806_v26, %v8755_v34  ;;  %v15360_v63 = vld [vmem:[#allocation12_spill] sm:$0xff]  ;;  %v8818_v44 = vadd.f32 %v15361_v60, %v1174_v22  ;;  %v1439_v58 = vadd.f32 %v1438_v3, %v1406_v2  ;;  %v15374_v60 = vld [vmem:[#allocation10_spill] sm:$0xff] }
 0x277   :  { %v8698_v45 = vpop.f32.mrf.mxu3  ;;  %v1350_v52 = vpop.f32.mrf.mxu1  ;;  %v8841_v30 = vld [vmem:[%s14971_s1 + $0x70] sm:$0xff]  ;;  %15387 = vst [vmem:[#allocation10_spill] sm:$0xff] %v8957_v21 }
 0x278   :  { %v1289_v18 = vpop.f32.mrf.mxu2  ;;  %15362 = vst [vmem:[#allocation29_spill] sm:$0xff] %v8818_v44 }
 0x279   :  { %v8834_v22 = vadd.f32 %v1289_v18, %v1261_v49  ;;  %15368 = vst [vmem:[#allocation20_spill] sm:$0xff] %v8841_v30  ;;  %v1422_v49 = vadd.f32 %v1421_v14, %v1391_v17  ;;  %v8868_v14 = vld [vmem:[%s14971_s1 + $0x28] sm:$0xff] }
 0x27a   :  { %15372 = vst [vmem:[#allocation12_spill] sm:$0xff] %v8868_v14 }
 0x27b   :  { %v1321_v11 = vpop.f32.mrf.mxu0  ;;  %15367 = vst [vmem:[#allocation27_spill] sm:$0xff] %v8834_v22 }
 0x27c   :  { %v1351_v37 = vadd.f32 %v1350_v52, %v1321_v11  ;;  %v1180_v52 = vadd.f32 %v15354_v10, %v15353_v47  ;;  %v8811_v11 = vadd.f32 %v15358_v40, %v1093_v51  ;;  %v1432_v47 = vadd.f32 %v1431_v53, %v1400_v54  ;;  %v15359_v10 = vld [vmem:[#allocation17_spill] sm:$0xff]  ;;  %v8827_v51 = vld [vmem:[%s14971_s1 + $0x20] sm:$0xff]  ;;  %v15371_v40 = vld [vmem:[#allocation19_spill] sm:$0xff] }
 0x27d   :  { %v1009_v27 = vadd.f32 %v15360_v63, %v15359_v10  ;;  %15365 = vst [vmem:[#allocation28_spill] sm:$0xff] %v8827_v51  ;;  %v1392_v54 = vmul.f32 %v8827_v51, %v8776_v4  ;;  %v15373_v10 = vld [vmem:[#allocation18_spill] sm:$0xff]  ;;  %v8919_v4 = vld [vmem:[%s14971_s1 + $0xd8] sm:$0xff] }
 0x27e   :  { %v1433_v63 = vadd.f32 %v1432_v47, %v1401_v41  ;;  %v15370_v41 = vld [vmem:[#allocation13_spill] sm:$0xff]  ;;  %v1440_v47 = vadd.f32 %v1439_v58, %v1407_v23  ;;  %v15376_v23 = vld [vmem:[#allocation23_spill] sm:$0xff] }
 0x27f   :  { %v1379_v24 = vpop.f32.mrf.mxu3  ;;  %v1353_v5 = vpop.f32.mrf.mxu1  ;;  %v8853_v33 = vadd.f32 %v15370_v41, %v922_v43  ;;  %v1393_v43 = vmul.f32 %v8868_v14, %v8818_v44  ;;  %v15377_v41 = vld [vmem:[#allocation32_spill] sm:$0xff] }
 0x280   :  { %v1292_v39 = vpop.f32.mrf.mxu2  ;;  %v8813_v59 = vadd.f32 %v1379_v24, %v1351_v37  ;;  %v15366_v37 = vld [vmem:[#allocation30_spill] sm:$0xff] }
 0x281   :  { %v8822_v19 = vadd.f32 %v1292_v39, %v1264_v7  ;;  %v8832_v53 = vadd.f32 %v15366_v37, %v1180_v52  ;;  %v8848_v52 = vld [vmem:[%s14971_s1 + $0x78] sm:$0xff]  ;;  %v1408_v7 = vmul.f32 %v8858_v20, %v8811_v11  ;;  %v8863_v39 = vadd.f32 %v15371_v40, %v1009_v27  ;;  %v15378_v40 = vld [vmem:[#allocation31_spill] sm:$0xff]  ;;  %15382 = vst [vmem:[#allocation30_spill] sm:$0xff] %v8919_v4 }
 0x282   :  { %15369 = vst [vmem:[#allocation17_spill] sm:$0xff] %v8848_v52  ;;  %v1403_v18 = vmul.f32 %v8848_v52, %v8813_v59  ;;  %v1096_v37 = vadd.f32 %v15374_v60, %v15373_v10  ;;  %v1183_v27 = vadd.f32 %v8603_v29, %v15376_v23  ;;  %v1267_v51 = vadd.f32 %v15378_v40, %v15377_v41  ;;  %v8898_v29 = vld [vmem:[%s14971_s1 + $0xc0] sm:$0xff] }
 0x283   :  { %v1402_v2 = vmul.f32 %v8841_v30, %v8822_v19  ;;  %v1324_v3 = vpop.f32.mrf.mxu0  ;;  %v8893_v10 = vadd.f32 %v8698_v45, %v1348_v46  ;;  %v1441_v45 = vadd.f32 %v1440_v47, %v1408_v7  ;;  %v1415_v7 = vmul.f32 %v8919_v4, %v8863_v39  ;;  %v15383_v47 = vld [vmem:[#allocation33_spill] sm:$0xff] }
 0x284   :  { %v1354_v24 = vadd.f32 %v1353_v5, %v1324_v3  ;;  %v8877_v5 = vld [vmem:[%s14971_s1 + $0xa8] sm:$0xff]  ;;  %v1423_v3 = vadd.f32 %v1422_v49, %v1392_v54  ;;  %v1412_v54 = vmul.f32 %v8898_v29, %v8732_v1  ;;  %v8905_v49 = vld [vmem:[%s14971_s1 + $0xd0] sm:$0xff] }
 0x285   :  { %v1434_v17 = vadd.f32 %v1433_v63, %v1402_v2  ;;  %15375 = vst [vmem:[#allocation24_spill] sm:$0xff] %v8877_v5  ;;  %v1409_v58 = vmul.f32 %v8877_v5, %v8832_v53  ;;  %v8888_v63 = vld [vmem:[%s14971_s1 + $0x30] sm:$0xff]  ;;  %v1414_v23 = vmul.f32 %v8905_v49, %v8853_v33 }
 0x286   :  { %15379 = vst [vmem:[#allocation26_spill] sm:$0xff] %v8888_v63  ;;  %v1394_v2 = vmul.f32 %v8888_v63, %v8834_v22  ;;  %v1424_v22 = vadd.f32 %v1423_v3, %v1393_v43  ;;  %v1447_v44 = vadd.f32 %v1413_v25, %v1412_v54 }
 0x287   :  { %15380 = vst [vmem:[#allocation25_spill] sm:$0xff] %v8893_v10  ;;  %v1435_v60 = vadd.f32 %v1434_v17, %v1403_v18  ;;  %v1382_v14 = vpop.f32.mrf.mxu3  ;;  %v15381_v17 = vld [vmem:[#allocation22_spill] sm:$0xff]  ;;  %v1356_v63 = vpop.f32.mrf.mxu1 }
 0x288   :  { %v1295_v46 = vpop.f32.mrf.mxu2  ;;  %v8909_v18 = vadd.f32 %v1382_v14, %v1354_v24  ;;  %v8912_v41 = vadd.f32 %v15381_v17, %v1096_v37  ;;  %v8924_v24 = vadd.f32 %v15383_v47, %v1183_v27  ;;  %v1442_v14 = vadd.f32 %v1441_v45, %v1409_v58  ;;  %v8936_v37 = vld [vmem:[%s14971_s1 + $0xb8] sm:$0xff] }
 0x289   :  { %v8914_v40 = vadd.f32 %v1295_v46, %v1267_v51  ;;  %1436 = vadd.xlane.f32.xlu2 %v1435_v60  ;;  %v8929_v51 = vld [vmem:[%s14971_s1 + $0xb0] sm:$0xff]  ;;  %15385 = vst [vmem:[#allocation19_spill] sm:$0xff] %v8936_v37  ;;  %v8943_v58 = vld [vmem:[%s14971_s1 + $0x38] sm:$0xff]  ;;  %v1425_v60 = vadd.f32 %v1424_v22, %v1394_v2  ;;  %v1448_v54 = vadd.f32 %v1447_v44, %v1414_v23  ;;  %v8950_v46 = vld [vmem:[%s14971_s1 + $0xe0] sm:$0xff] }
 0x28a   :  { %15384 = vst [vmem:[#allocation13_spill] sm:$0xff] %v8929_v51  ;;  %v1411_v3 = vmul.f32 %v8936_v37, %v8909_v18  ;;  %v1395_v27 = vmul.f32 %v8943_v58, %v8893_v10  ;;  %v1416_v17 = vmul.f32 %v8950_v46, %v8912_v41  ;;  %v1417_v22 = vmul.f32 %v8957_v21, %v8924_v24 }
 0x28b   :  { %v1410_v25 = vmul.f32 %v8929_v51, %v8914_v40  ;;  %v1327_v43 = vpop.f32.mrf.mxu0  ;;  %15386 = vst [vmem:[#allocation18_spill] sm:$0xff] %v8943_v58  ;;  %v1449_v4 = vadd.f32 %v1448_v54, %v1415_v7  ;;  %v1270_v44 = vadd.f32 %v8613_v13, %v8624_v6  ;;  %v8970_v7 = vld [vmem:[%s14971_s1 + $0xf0] sm:$0xff]  ;;  %v8977_v13 = vld [vmem:[%s14971_s1 + $0xf8] sm:$0xff] }
 0x28c   :  { %v1357_v45 = vadd.f32 %v1356_v63, %v1327_v43  ;;  %v1426_v2 = vadd.f32 %v1425_v60, %v1395_v27  ;;  %15388 = vst [vmem:[#allocation23_spill] sm:$0xff] %v8970_v7 }
 0x28d   :  { %v1443_v47 = vadd.f32 %v1442_v14, %v1410_v25  ;;  %v1450_v10 = vadd.f32 %v1449_v4, %v1416_v17  ;;  %15389 = vst [vmem:[#allocation32_spill] sm:$0xff] %v8977_v13 }
 0x28f   :  { %v1444_v63 = vadd.f32 %v1443_v47, %v1411_v3  ;;  %v1385_v23 = vpop.f32.mrf.mxu3  ;;  %v1451_v4 = vadd.f32 %v1450_v10, %v1417_v22 }
 0x290   :  { %v1298_v43 = vpop.f32.mrf.mxu2  ;;  %v8963_v58 = vadd.f32 %v1385_v23, %v1357_v45 }
 0x291   :  { %v8965_v14 = vadd.f32 %v1298_v43, %v1270_v44  ;;  %1445 = vadd.xlane.f32.xlu1 %v1444_v63  ;;  %1427 = vadd.xlane.f32.xlu2 %v1426_v2 }
 0x292   :  { %v1419_v6 = vmul.f32 %v8977_v13, %v8963_v58 }
 0x293   :  { %v1418_v25 = vmul.f32 %v8970_v7, %v8965_v14 }
 0x295   :  { %v1452_v3 = vadd.f32 %v1451_v4, %v1418_v25 }
 0x297   :  { %v1453_v27 = vadd.f32 %v1452_v3, %v1419_v6 }
 0x299   :  { %1454 = vadd.xlane.f32.xlu0 %v1453_v27 }
 0x2fc   :  { %v1437_v60 = vpop.xlane.xlu2 %1436 }
 0x2fd   :  { %v1457_v54 = vmul.f32 0.0078125, %v1437_v60 }
 0x2ff   :  { %v1468_v45 = vsub.f32 %v8632_v31, %v1457_v54  ;;  %v1469_v17 = vsub.f32 %v8629_v56, %v1457_v54  ;;  %v1470_v47 = vsub.f32 %v8639_v50, %v1457_v54  ;;  %v1471_v44 = vsub.f32 %v8666_v9, %v1457_v54 }
 0x300   :  { %v1472_v63 = vsub.f32 %v8712_v38, %v1457_v54  ;;  %v1473_v23 = vsub.f32 %v8737_v36, %v1457_v54  ;;  %v1474_v31 = vsub.f32 %v8822_v19, %v1457_v54  ;;  %v1475_v43 = vsub.f32 %v8813_v59, %v1457_v54 }
 0x301   :  { %v8987_v2 = vmul.f32 %v8671_v35, %v1468_v45  ;;  %v8990_v10 = vmul.f32 %v8658_v32, %v1469_v17  ;;  %v8993_v22 = vmul.f32 %v8692_v42, %v1470_v47  ;;  %v8998_v56 = vmul.f32 %v8727_v16, %v1471_v44 }
 0x302   :  { %v9006_v6 = vmul.f32 %v8760_v15, %v1472_v63  ;;  %v9011_v4 = vmul.f32 %v8781_v55, %v1473_v23  ;;  %v9014_v3 = vmul.f32 %v8841_v30, %v1474_v31  ;;  %v9022_v17 = vmul.f32 %v8848_v52, %v1475_v43  ;;  %v15410_v55 = vld [vmem:[#allocation25_spill] sm:$0xff] }
 0x303   :  { %v1532_v50 = vmul.f32 %v8987_v2, %v8987_v2  ;;  %v1533_v9 = vmul.f32 %v8990_v10, %v8990_v10  ;;  %v1534_v36 = vmul.f32 %v8993_v22, %v8993_v22  ;;  %v1535_v27 = vmul.f32 %v8998_v56, %v8998_v56 }
 0x304   :  { %v1446_v38 = vpop.xlane.xlu1 %1445  ;;  %15390 = vst [vmem:[#allocation31_spill] sm:$0xff] %v9011_v4  ;;  %v1428_v44 = vpop.xlane.xlu2 %1427  ;;  %v1536_v63 = vmul.f32 %v9006_v6, %v9006_v6 }
 0x305   :  { %v1458_v25 = vmul.f32 0.0078125, %v1446_v38  ;;  %v1565_v19 = vadd.f32 %v1533_v9, %v1532_v50  ;;  %15391 = vst [vmem:[#allocation22_spill] sm:$0xff] %v9014_v3  ;;  %v1538_v9 = vmul.f32 %v9014_v3, %v9014_v3 }
 0x306   :  { %15392 = vst [vmem:[#allocation33_spill] sm:$0xff] %v9022_v17 }
 0x307   :  { %v1566_v60 = vadd.f32 %v1565_v19, %v1534_v36  ;;  %v1476_v59 = vsub.f32 %v8651_v0, %v1458_v25  ;;  %v1477_v54 = vsub.f32 %v8687_v12, %v1458_v25  ;;  %v1478_v45 = vsub.f32 %v8722_v48, %v1458_v25 }
 0x308   :  { %v1479_v47 = vsub.f32 %v8755_v34, %v1458_v25  ;;  %v1480_v0 = vsub.f32 %v8811_v11, %v1458_v25  ;;  %v1481_v12 = vsub.f32 %v8832_v53, %v1458_v25  ;;  %v1537_v34 = vmul.f32 %v9011_v4, %v9011_v4 }
 0x309   :  { %v1567_v23 = vadd.f32 %v1566_v60, %v1535_v27  ;;  %v9028_v31 = vmul.f32 %v8703_v8, %v1476_v59  ;;  %v9031_v50 = vmul.f32 %v8742_v61, %v1477_v54  ;;  %v9036_v48 = vmul.f32 %v8767_v57, %v1478_v45 }
 0x30a   :  { %v9044_v36 = vmul.f32 0.0078125, %v1428_v44  ;;  %v1539_v11 = vmul.f32 %v9022_v17, %v9022_v17  ;;  %v9049_v53 = vmul.f32 %v8806_v26, %v1479_v47  ;;  %v1482_v54 = vsub.f32 %v8914_v40, %v1458_v25 }
 0x30b   :  { %v1568_v38 = vadd.f32 %v1567_v23, %v1536_v63  ;;  %v1540_v43 = vmul.f32 %v9028_v31, %v9028_v31  ;;  %v1541_v27 = vmul.f32 %v9031_v50, %v9031_v50  ;;  %v1483_v45 = vsub.f32 %v8909_v18, %v1458_v25 }
 0x30c   :  { %v1455_v19 = vpop.xlane.xlu0 %1454  ;;  %v9056_v63 = vmul.f32 %v8858_v20, %v1480_v0  ;;  %v9059_v44 = vmul.f32 %v8877_v5, %v1481_v12  ;;  %v1542_v23 = vmul.f32 %v9036_v48, %v9036_v48  ;;  %v1543_v18 = vmul.f32 %v9049_v53, %v9049_v53  ;;  %v15411_v5 = vld [vmem:[#allocation26_spill] sm:$0xff] }
 0x30d   :  { %v1459_v60 = vmul.f32 0.0078125, %v1455_v19  ;;  %v1569_v59 = vadd.f32 %v1568_v38, %v1537_v34  ;;  %v1574_v47 = vadd.f32 %v1541_v27, %v1540_v43  ;;  %v9070_v12 = vmul.f32 %v8929_v51, %v1482_v54 }
 0x30e   :  { %v1467_v4 = vsub.f32 %v15410_v55, %v9044_v36 }
 0x30f   :  { %v1570_v52 = vadd.f32 %v1569_v59, %v1538_v9  ;;  %v1484_v30 = vsub.f32 %v8732_v1, %v1459_v60  ;;  %v1485_v19 = vsub.f32 %v8747_v28, %v1459_v60  ;;  %v1486_v34 = vsub.f32 %v8853_v33, %v1459_v60  ;;  %15393 = vst [vmem:[#allocation41_spill] sm:$0xff] %v9070_v12  ;;  %v15396_v59 = vld [vmem:[#allocation30_spill] sm:$0xff] }
 0x310   :  { %v1575_v40 = vadd.f32 %v1574_v47, %v1542_v23  ;;  %v1487_v25 = vsub.f32 %v8863_v39, %v1459_v60  ;;  %v1488_v38 = vsub.f32 %v8912_v41, %v1459_v60  ;;  %v1544_v1 = vmul.f32 %v9056_v63, %v9056_v63  ;;  %v15395_v41 = vld [vmem:[#allocation34_spill] sm:$0xff] }
 0x311   :  { %v1571_v0 = vadd.f32 %v1570_v52, %v1539_v11  ;;  %v9074_v9 = vmul.f32 %v8898_v29, %v1484_v30  ;;  %v9079_v33 = vmul.f32 %v8790_v62, %v1485_v19  ;;  %v9082_v43 = vmul.f32 %v8905_v49, %v1486_v34  ;;  %v15397_v34 = vld [vmem:[#allocation35_spill] sm:$0xff] }
 0x312   :  { %v1576_v28 = vadd.f32 %v1575_v40, %v1543_v18  ;;  %v9085_v52 = vmul.f32 %v8936_v37, %v1483_v45  ;;  %v1545_v39 = vmul.f32 %v9059_v44, %v9059_v44  ;;  %v1489_v30 = vsub.f32 %v8924_v24, %v1459_v60 }
 0x313   :  { %1572 = vadd.xlane.f32.xlu2 %v1571_v0  ;;  %v1460_v11 = vsub.f32 %v15395_v41, %v9044_v36  ;;  %v9093_v54 = vmul.f32 %v15396_v59, %v1487_v25  ;;  %v1548_v23 = vmul.f32 %v9074_v9, %v9074_v9  ;;  %v1549_v47 = vmul.f32 %v9079_v33, %v9079_v33 }
 0x314   :  { %15394 = vst [vmem:[#allocation42_spill] sm:$0xff] %v9085_v52  ;;  %v1577_v27 = vadd.f32 %v1576_v28, %v1544_v1  ;;  %v1546_v45 = vmul.f32 %v9070_v12, %v9070_v12  ;;  %v1490_v19 = vsub.f32 %v8965_v14, %v1459_v60  ;;  %v9103_v24 = vmul.f32 %v8950_v46, %v1488_v38  ;;  %v15398_v1 = vld [vmem:[#allocation37_spill] sm:$0xff]  ;;  %v15399_v38 = vld [vmem:[#allocation40_spill] sm:$0xff] }
 0x315   :  { %v1461_v18 = vsub.f32 %v15397_v34, %v9044_v36  ;;  %v1550_v25 = vmul.f32 %v9082_v43, %v9082_v43  ;;  %v1583_v0 = vadd.f32 %v1549_v47, %v1548_v23  ;;  %v1462_v28 = vsub.f32 %v15398_v1, %v9044_v36  ;;  %v15400_v23 = vld [vmem:[#allocation36_spill] sm:$0xff]  ;;  %v15401_v1 = vld [vmem:[#allocation11_spill] sm:$0xff] }
 0x316   :  { %v1578_v40 = vadd.f32 %v1577_v27, %v1545_v39  ;;  %v1547_v41 = vmul.f32 %v9085_v52, %v9085_v52  ;;  %v1491_v37 = vsub.f32 %v8963_v58, %v1459_v60  ;;  %v9115_v14 = vmul.f32 %v8957_v21, %v1489_v30  ;;  %v15402_v52 = vld [vmem:[#allocation38_spill] sm:$0xff]  ;;  %v15403_v58 = vld [vmem:[#allocation39_spill] sm:$0xff] }
 0x317   :  { %v1463_v17 = vsub.f32 %v15399_v38, %v9044_v36  ;;  %v1551_v39 = vmul.f32 %v9093_v54, %v9093_v54  ;;  %v1584_v27 = vadd.f32 %v1583_v0, %v1550_v25  ;;  %v9122_v47 = vmul.f32 %v15400_v23, %v1460_v11  ;;  %v15404_v11 = vld [vmem:[#allocation29_spill] sm:$0xff] }
 0x318   :  { %v1579_v34 = vadd.f32 %v1578_v40, %v1546_v45  ;;  %v1464_v51 = vsub.f32 %v15401_v1, %v9044_v36  ;;  %v9127_v3 = vmul.f32 %v15402_v52, %v1461_v18  ;;  %v9130_v60 = vmul.f32 %v15403_v58, %v1462_v28  ;;  %v15405_v0 = vld [vmem:[#allocation21_spill] sm:$0xff]  ;;  %v15408_v1 = vld [vmem:[#allocation28_spill] sm:$0xff] }
 0x319   :  { %v9133_v38 = vmul.f32 %v8970_v7, %v1490_v19  ;;  %v1552_v45 = vmul.f32 %v9103_v24, %v9103_v24  ;;  %v1585_v40 = vadd.f32 %v1584_v27, %v1551_v39  ;;  %v1465_v25 = vsub.f32 %v15404_v11, %v9044_v36  ;;  %v15407_v39 = vld [vmem:[#allocation27_spill] sm:$0xff] }
 0x31a   :  { %v1580_v30 = vadd.f32 %v1579_v34, %v1547_v41  ;;  %v9140_v12 = vmul.f32 %v15405_v0, %v1463_v17  ;;  %v1524_v18 = vmul.f32 %v9122_v47, %v9122_v47  ;;  %v1525_v28 = vmul.f32 %v9127_v3, %v9127_v3 }
 0x31b   :  { %v9147_v19 = vmul.f32 %v8977_v13, %v1491_v37  ;;  %v1553_v41 = vmul.f32 %v9115_v14, %v9115_v14  ;;  %v1586_v34 = vadd.f32 %v1585_v40, %v1552_v45  ;;  %v1466_v27 = vsub.f32 %v15407_v39, %v9044_v36  ;;  %v15409_v37 = vld [vmem:[#allocation12_spill] sm:$0xff] }
 0x31c   :  { %1581 = vadd.xlane.f32.xlu1 %v1580_v30  ;;  %v9154_v17 = vmul.f32 %v15408_v1, %v1464_v51  ;;  %v1526_v11 = vmul.f32 %v9130_v60, %v9130_v60  ;;  %v1556_v7 = vadd.f32 %v1525_v28, %v1524_v18  ;;  %v1554_v30 = vmul.f32 %v9133_v38, %v9133_v38 }
 0x31d   :  { %15406 = vst [vmem:[#allocation34_spill] sm:$0xff] %v9147_v19  ;;  %v1587_v21 = vadd.f32 %v1586_v34, %v1553_v41  ;;  %v9161_v13 = vmul.f32 %v15409_v37, %v1465_v25  ;;  %v1527_v45 = vmul.f32 %v9140_v12, %v9140_v12  ;;  %v1555_v39 = vmul.f32 %v9147_v19, %v9147_v19 }
 0x31e   :  { %v1557_v40 = vadd.f32 %v1556_v7, %v1526_v11  ;;  %v9170_v18 = vmul.f32 %v15411_v5, %v1466_v27  ;;  %v1528_v28 = vmul.f32 %v9154_v17, %v9154_v17  ;;  %v15413_v7 = vld [vmem:[#allocation18_spill] sm:$0xff] }
 0x31f   :  { %v1588_v51 = vadd.f32 %v1587_v21, %v1554_v30  ;;  %v1529_v34 = vmul.f32 %v9161_v13, %v9161_v13  ;;  %v9177_v11 = vmul.f32 %v15413_v7, %v1467_v4  ;;  %v1702_v4 = vld [vmem:[%s14977_s7 + $0x10] sm:$0xff] }
 0x320   :  { %15412 = vst [vmem:[#allocation30_spill] sm:$0xff] %v9170_v18  ;;  %v1558_v41 = vadd.f32 %v1557_v40, %v1527_v45  ;;  %v1530_v21 = vmul.f32 %v9170_v18, %v9170_v18  ;;  %v1703_v45 = vld [vmem:[%s14977_s7 + $0x18] sm:$0xff] }
 0x321   :  { %v1589_v25 = vadd.f32 %v1588_v51, %v1555_v39  ;;  %15414 = vst [vmem:[#allocation35_spill] sm:$0xff] %v9177_v11  ;;  %v1531_v27 = vmul.f32 %v9177_v11, %v9177_v11 }
 0x322   :  { %v1559_v37 = vadd.f32 %v1558_v41, %v1528_v28 }
 0x323   :  { %1590 = vadd.xlane.f32.xlu0 %v1589_v25 }
 0x324   :  { %v1560_v55 = vadd.f32 %v1559_v37, %v1529_v34  ;;  %v1700_v37 = vld [vmem:[%s14977_s7] sm:$0xff] }
 0x326   :  { %v1561_v36 = vadd.f32 %v1560_v55, %v1530_v21 }
 0x328   :  { %v1562_v30 = vadd.f32 %v1561_v36, %v1531_v27 }
 0x32b   :  { %1563 = vadd.xlane.f32.xlu0 %v1562_v30 }
 0x33f   :  { %1721 = vperm.xlu0 %6058, %v1703_v45  }
 0x347   :  { %1716 = vperm.xlu0 %6058, %v1702_v4  }
 0x34f   :  { %1706 = vperm.xlu0 %6058, %v1700_v37   ;;  %v1597_v37 = vld [vmem:[%s14976_s6 + $0x8] sm:$0xff] }
 0x386   :  { %v1573_v40 = vpop.xlane.xlu2 %1572 }
 0x387   :  { %v1593_v39 = vmul.f32 0.0078125, %v1573_v40 }
 0x389   :  { %v1601_v51 = vadd.f32 1e-05, %v1593_v39 }
 0x38b   :  { %6699 = vrsqrt.f32 %v1601_v51  ;;  %vm1620_vm4 = vweird.f32 %v1601_v51 }
 0x38f   :  { %v1582_v28 = vpop.xlane.xlu1 %1581 }
 0x390   :  { %v1594_v41 = vmul.f32 0.0078125, %v1582_v28 }
 0x391   :  { %v6700_v25 = vpop.eup %6699 }
 0x392   :  { %v1615_v34 = vmul.f32 %v6700_v25, %v1601_v51  ;;  %v1602_v21 = vadd.f32 1e-05, %v1594_v41  ;;  %vm1621_vm3 = vweird.f32 %v6700_v25 }
 0x393   :  { %vm1622_vm5 = vmor %vm1620_vm4, %vm1621_vm3 }
 0x394   :  { %v1616_v55 = vmul.f32 %v6700_v25, %v1615_v34  ;;  %6701 = vrsqrt.f32 %v1602_v21  ;;  %vm1630_vm7 = vweird.f32 %v1602_v21 }
 0x396   :  { %v1617_v36 = vmul.f32 0.5, %v1616_v55  ;;  %v1591_v27 = vpop.xlane.xlu0 %1590 }
 0x397   :  { %v1595_v45 = vmul.f32 0.0078125, %v1591_v27 }
 0x398   :  { %v1618_v30 = vsub.f32 1.5, %v1617_v36 }
 0x399   :  { %v1603_v7 = vadd.f32 1e-05, %v1595_v45 }
 0x39a   :  { %v6702_v4 = vpop.eup %6701  ;;  %v1619_v40 = vmul.f32 %v6700_v25, %v1618_v30  ;;  %v1598_v30 = vld [vmem:[%s14976_s6 + $0x10] sm:$0xff] }
 0x39b   :  { %v1625_v39 = vmul.f32 %v6702_v4, %v1602_v21  ;;  %6703 = vrsqrt.f32 %v1603_v7  ;;  %vm1631_vm6 = vweird.f32 %v6702_v4  ;;  %vm1640_vm10 = vweird.f32 %v1603_v7  ;;  %v1599_v21 = vld [vmem:[%s14976_s6 + $0x18] sm:$0xff] }
 0x39c   :  { %v1623_v28 = vsel %vm1622_vm5, %v6700_v25, %v1619_v40  ;;  %vm1632_vm8 = vmor %vm1630_vm7, %vm1631_vm6 }
 0x39d   :  { %v1626_v41 = vmul.f32 %v6702_v4, %v1625_v39  ;;  %v1645_v34 = vmul.f32 %v1623_v28, %v1597_v37 }
 0x39e   :  { %v1564_v55 = vpop.xlane.xlu0 %1563 }
 0x39f   :  { %v1627_v5 = vmul.f32 0.5, %v1626_v41  ;;  %1655 = vperm.xlu1 %6056, %v1645_v34   ;;  %v1592_v36 = vmul.f32 0.0078125, %v1564_v55 }
 0x3a1   :  { %v1628_v27 = vsub.f32 1.5, %v1627_v5  ;;  %v6704_v19 = vpop.eup %6703  ;;  %v1600_v51 = vadd.f32 1e-05, %v1592_v36 }
 0x3a2   :  { %v1635_v45 = vmul.f32 %v6704_v19, %v1603_v7  ;;  %vm1641_vm9 = vweird.f32 %v6704_v19 }
 0x3a3   :  { %v1629_v11 = vmul.f32 %v6702_v4, %v1628_v27  ;;  %6705 = vrsqrt.f32 %v1600_v51  ;;  %vm1642_vm11 = vmor %vm1640_vm10, %vm1641_vm9  ;;  %vm1610_vm13 = vweird.f32 %v1600_v51 }
 0x3a4   :  { %v1636_v25 = vmul.f32 %v6704_v19, %v1635_v45 }
 0x3a5   :  { %v1633_v40 = vsel %vm1632_vm8, %v6702_v4, %v1629_v11  ;;  %v1596_v4 = vld [vmem:[%s14976_s6] sm:$0xff] }
 0x3a6   :  { %v1646_v37 = vmul.f32 %v1633_v40, %v1598_v30  ;;  %v1637_v39 = vmul.f32 0.5, %v1636_v25  ;;  %v1701_v30 = vld [vmem:[%s14977_s7 + $0x8] sm:$0xff] }
 0x3a8   :  { %1660 = vperm.xlu2 %6057, %v1646_v37   ;;  %v1638_v28 = vsub.f32 1.5, %v1637_v39 }
 0x3a9   :  { %v6706_v5 = vpop.eup %6705 }
 0x3aa   :  { %v1605_v41 = vmul.f32 %v6706_v5, %v1600_v51  ;;  %v1639_v34 = vmul.f32 %v6704_v19, %v1638_v28  ;;  %vm1611_vm12 = vweird.f32 %v6706_v5 }
 0x3ab   :  { %vm1612_vm14 = vmor %vm1610_vm13, %vm1611_vm12 }
 0x3ac   :  { %v1606_v55 = vmul.f32 %v6706_v5, %v1605_v41  ;;  %v1643_v36 = vsel %vm1642_vm11, %v6704_v19, %v1639_v34 }
 0x3ad   :  { %v1647_v27 = vmul.f32 %v1643_v36, %v1599_v21 }
 0x3ae   :  { %v1607_v18 = vmul.f32 0.5, %v1606_v55 }
 0x3af   :  { %1665 = vperm.xlu1 %6056, %v1647_v27  }
 0x3b0   :  { %v1608_v11 = vsub.f32 1.5, %v1607_v18 }
 0x3b1   :  { %v9207_v19 = vpop.permute.xlu0 %1721 }
 0x3b2   :  { %v1609_v7 = vmul.f32 %v6706_v5, %v1608_v11 }
 0x3b4   :  { %v1613_v45 = vsel %vm1612_vm14, %v6706_v5, %v1609_v7 }
 0x3b5   :  { %v1644_v25 = vmul.f32 %v1613_v45, %v1596_v4 }
 0x3b7   :  { %1650 = vperm.xlu2 %6057, %v1644_v25   ;;  %1711 = vperm.xlu1 %6056, %v1701_v30  }
 0x3b9   :  { %v9209_v40 = vpop.permute.xlu0 %1716 }
 0x3c1   :  { %v9220_v5 = vpop.permute.xlu0 %1706 }
 0x402   :  { %v9211_v18 = vpop.permute.xlu2 %1660 }
 0x403   :  { %v1685_v51 = vmul.f32 %v9211_v18, %v9031_v50 }
 0x405   :  { %v1741_v28 = vadd.f32 %v9209_v40, %v1685_v51 }
 0x407   :  { %v9227_v34 = vmul.f32 %v8742_v61, %v1741_v28 }
 0x411   :  { %v9215_v37 = vpop.permute.xlu2 %1650  ;;  %v9231_v55 = vpop.permute.xlu1 %1655 }
 0x412   :  { %v1668_v39 = vmul.f32 %v9215_v37, %v9122_v47  ;;  %v1684_v47 = vmul.f32 %v9211_v18, %v9028_v31  ;;  %v1677_v30 = vmul.f32 %v9231_v55, %v8990_v10 }
 0x414   :  { %v1724_v41 = vadd.f32 %v9220_v5, %v1668_v39  ;;  %v1740_v61 = vadd.f32 %v9209_v40, %v1684_v47  ;;  %v1686_v39 = vmul.f32 %v9211_v18, %v9036_v48 }
 0x416   :  { %v9224_v21 = vmul.f32 %v15400_v23, %v1724_v41  ;;  %v9249_v45 = vmul.f32 %v8703_v8, %v1740_v61 }
 0x418   :  { %v6219_v50 = vpack.i.bf16 %v9224_v21, %v9227_v34 }
 0x41a   :  { %6220 = vrot.lane.b32.xlu0 %v6219_v50, %s6919_s24 }
 0x421   :  { %v9236_v36 = vpop.permute.xlu1 %1665 }
 0x422   :  { %v1693_v27 = vmul.f32 %v9236_v36, %v9079_v33  ;;  %v1692_v23 = vmul.f32 %v9236_v36, %v9074_v9  ;;  %v1669_v33 = vmul.f32 %v9215_v37, %v9127_v3  ;;  %v1694_v51 = vmul.f32 %v9236_v36, %v9082_v43 }
 0x424   :  { %v1749_v11 = vadd.f32 %v9207_v19, %v1693_v27  ;;  %v1748_v4 = vadd.f32 %v9207_v19, %v1692_v23  ;;  %v1725_v3 = vadd.f32 %v9220_v5, %v1669_v33  ;;  %v1750_v47 = vadd.f32 %v9207_v19, %v1694_v51 }
 0x425   :  { %v1695_v27 = vmul.f32 %v9236_v36, %v9093_v54  ;;  %v1670_v23 = vmul.f32 %v9215_v37, %v9130_v60  ;;  %v1687_v60 = vmul.f32 %v9211_v18, %v9049_v53  ;;  %v1671_v53 = vmul.f32 %v9215_v37, %v9140_v12 }
 0x426   :  { %v9246_v7 = vmul.f32 %v8790_v62, %v1749_v11  ;;  %v9252_v31 = vmul.f32 %v8898_v29, %v1748_v4  ;;  %v1676_v62 = vmul.f32 %v9231_v55, %v8987_v2  ;;  %v9284_v41 = vmul.f32 %v15402_v52, %v1725_v3 }
 0x427   :  { %v9295_v48 = vmul.f32 %v8905_v49, %v1750_v47  ;;  %v1678_v52 = vmul.f32 %v9231_v55, %v8993_v22  ;;  %v1726_v49 = vadd.f32 %v9220_v5, %v1670_v23  ;;  %v1689_v47 = vmul.f32 %v9211_v18, %v9059_v44  ;;  %v15416_v23 = vld [vmem:[#allocation31_spill] sm:$0xff] }
 0x428   :  { %2042 = vmatpush.msra.mxu0 %v9246_v7  ;;  %v6224_v9 = vpack.i.bf16 %v9249_v45, %v9252_v31 }
 0x429   :  { %v9263_v25 = vpop.permute.xlu1 %1711  ;;  %v9323_v4 = vmul.f32 %v15403_v58, %v1726_v49 }
 0x42a   :  { %2043 = vmatpush.msra.mxu0 %v9227_v34  ;;  %6225 = vrot.lane.b32.xlu2 %v6224_v9, %s6919_s24  ;;  %v1733_v8 = vadd.f32 %v9263_v25, %v1677_v30  ;;  %v1732_v29 = vadd.f32 %v9263_v25, %v1676_v62  ;;  %v1734_v11 = vadd.f32 %v9263_v25, %v1678_v52 }
 0x42b   :  { %v1680_v30 = vmul.f32 %v9231_v55, %v9006_v6 }
 0x42c   :  { %v9273_v10 = vmul.f32 %v8658_v32, %v1733_v8  ;;  %v9276_v2 = vmul.f32 %v8671_v35, %v1732_v29  ;;  %v1742_v35 = vadd.f32 %v9209_v40, %v1686_v39  ;;  %v9315_v22 = vmul.f32 %v8692_v42, %v1734_v11 }
 0x42d   :  { %v1743_v42 = vadd.f32 %v9209_v40, %v1687_v60  ;;  %v1736_v29 = vadd.f32 %v9263_v25, %v1680_v30  ;;  %v1688_v39 = vmul.f32 %v9211_v18, %v9056_v63  ;;  %v1745_v63 = vadd.f32 %v9209_v40, %v1689_v47  ;;  %v15424_v47 = vld [vmem:[#allocation13_spill] sm:$0xff] }
 0x42e   :  { %2044 = vmatpush.msra.mxu0 %v9273_v10  ;;  %v6234_v28 = vpack.i.bf16 %v9276_v2, %v9246_v7  ;;  %v6229_v32 = vpack.i.bf16 %v9284_v41, %v9273_v10  ;;  %v9298_v43 = vmul.f32 %v8767_v57, %v1742_v35  ;;  %v1751_v57 = vadd.f32 %v9207_v19, %v1695_v27  ;;  %v15415_v35 = vld [vmem:[#allocation24_spill] sm:$0xff] }
 0x42f   :  { %v9338_v58 = vmul.f32 %v8806_v26, %v1743_v42  ;;  %v1727_v26 = vadd.f32 %v9220_v5, %v1671_v53  ;;  %v9361_v3 = vmul.f32 %v8760_v15, %v1736_v29  ;;  %v9392_v52 = vmul.f32 %v15415_v35, %v1745_v63  ;;  %v15419_v42 = vld [vmem:[#allocation12_spill] sm:$0xff]  ;;  %v15421_v29 = vld [vmem:[#allocation23_spill] sm:$0xff] }
 0x430   :  { %6235 = vrot.lane.b32.xlu1 %v6234_v28, %s6919_s24  ;;  %2045 = vmatpush.msra.mxu0 %v9284_v41  ;;  %v6259_v61 = vpack.i.bf16 %v9298_v43, %v9295_v48  ;;  %v9318_v54 = vmul.f32 %v15396_v59, %v1751_v57  ;;  %v1679_v59 = vmul.f32 %v9231_v55, %v8998_v56 }
 0x431   :  { %6245 = vrot.lane.b32.xlu0 %v6234_v28, %s6918_s5  ;;  %v6269_v56 = vpack.i.bf16 %v9338_v58, %v9323_v4  ;;  %v9364_v51 = vmul.f32 %v15405_v0, %v1727_v26  ;;  %v1744_v0 = vadd.f32 %v9209_v40, %v1688_v39  ;;  %v1673_v27 = vmul.f32 %v9215_v37, %v9161_v13  ;;  %v15417_v13 = vld [vmem:[#allocation9_spill] sm:$0xff]  ;;  %v15422_v26 = vld [vmem:[#allocation30_spill] sm:$0xff] }
 0x432   :  { %6230 = vrot.lane.b32.xlu2 %v6229_v32, %s6919_s24  ;;  %v6284_v33 = vpack.i.bf16 %v9318_v54, %v9315_v22  ;;  %v1735_v62 = vadd.f32 %v9263_v25, %v1679_v59  ;;  %v6289_v8 = vpack.i.bf16 %v9338_v58, %v9318_v54  ;;  %v1698_v60 = vmul.f32 %v9236_v36, %v9133_v38  ;;  %v15420_v59 = vld [vmem:[#allocation41_spill] sm:$0xff] }
 0x433   :  { %v1729_v57 = vadd.f32 %v9220_v5, %v1673_v27  ;;  %v15427_v27 = vld [vmem:[#allocation34_spill] sm:$0xff] }
 0x434   :  { %v9356_v6 = vmul.f32 %v8727_v16, %v1735_v62 }
 0x435   :  { %v9417_v53 = vmul.f32 %v15419_v42, %v1729_v57  ;;  %v15432_v42 = vld [vmem:[#allocation18_spill] sm:$0xff] }
 0x436   :  { %v6279_v16 = vpack.i.bf16 %v9364_v51, %v9356_v6 }
 0x438   :  { %6240 = vrot.lane.b32.xlu1 %v6224_v9, %s6918_s5  ;;  %v1672_v9 = vmul.f32 %v9215_v37, %v9154_v17  ;;  %v1696_v17 = vmul.f32 %v9236_v36, %v9103_v24 }
 0x439   :  { %6260 = vrot.lane.b32.xlu0 %v6259_v61, %s6918_s5 }
 0x43a   :  { %6250 = vrot.lane.b32.xlu2 %v6219_v50, %s6918_s5  ;;  %v6264_v50 = vpack.i.bf16 %v9323_v4, %v9315_v22  ;;  %v1728_v12 = vadd.f32 %v9220_v5, %v1672_v9  ;;  %v1752_v24 = vadd.f32 %v9207_v19, %v1696_v17  ;;  %v1690_v9 = vmul.f32 %v9211_v18, %v15420_v59  ;;  %v15423_v17 = vld [vmem:[#allocation22_spill] sm:$0xff] }
 0x43b   :  { %v1682_v39 = vmul.f32 %v9231_v55, %v15423_v17 }
 0x43c   :  { %v9369_v28 = vmul.f32 %v15408_v1, %v1728_v12  ;;  %v9384_v44 = vmul.f32 %v8950_v46, %v1752_v24  ;;  %v9387_v1 = vmul.f32 %v8858_v20, %v1744_v0  ;;  %v1746_v38 = vadd.f32 %v9209_v40, %v1690_v9  ;;  %v15425_v24 = vld [vmem:[#allocation35_spill] sm:$0xff]  ;;  %v15426_v0 = vld [vmem:[#allocation33_spill] sm:$0xff]  ;;  %v15434_v9 = vld [vmem:[#allocation32_spill] sm:$0xff] }
 0x43d   :  { %v1674_v12 = vmul.f32 %v9215_v37, %v15422_v26  ;;  %v1683_v63 = vmul.f32 %v9231_v55, %v15426_v0  ;;  %v1738_v35 = vadd.f32 %v9263_v25, %v1682_v39  ;;  %v15436_v39 = vld [vmem:[#allocation15_spill] sm:$0xff] }
 0x43e   :  { %v6304_v15 = vpack.i.bf16 %v9369_v28, %v9361_v3  ;;  %v6299_v11 = vpack.i.bf16 %v9387_v1, %v9384_v44  ;;  %v6309_v46 = vpack.i.bf16 %v9392_v52, %v9369_v28 }
 0x440   :  { %6255 = vrot.lane.b32.xlu1 %v6229_v32, %s6918_s5  ;;  %v1697_v32 = vmul.f32 %v9236_v36, %v9115_v14 }
 0x441   :  { %6285 = vrot.lane.b32.xlu0 %v6284_v33, %s6919_s24  ;;  %v15418_v33 = vld [vmem:[#allocation10_spill] sm:$0xff] }
 0x442   :  { %6265 = vrot.lane.b32.xlu2 %v6264_v50, %s6918_s5  ;;  %v1753_v14 = vadd.f32 %v9207_v19, %v1697_v32 }
 0x444   :  { %v9414_v50 = vmul.f32 %v15418_v33, %v1753_v14  ;;  %v15429_v14 = vld [vmem:[#allocation17_spill] sm:$0xff] }
 0x446   :  { %v6324_v30 = vpack.i.bf16 %v9414_v50, %v9361_v3  ;;  %v6329_v32 = vpack.i.bf16 %v9392_v52, %v9414_v50 }
 0x448   :  { %6275 = vrot.lane.b32.xlu1 %v6259_v61, %s6919_s24  ;;  %v1681_v61 = vmul.f32 %v9231_v55, %v15416_v23  ;;  %v1699_v23 = vmul.f32 %v9236_v36, %v15427_v27 }
 0x449   :  { %6290 = vrot.lane.b32.xlu0 %v6289_v8, %s6918_s5  ;;  %v1754_v8 = vadd.f32 %v9207_v19, %v1698_v60  ;;  %v15431_v60 = vld [vmem:[#allocation42_spill] sm:$0xff] }
 0x44a   :  { %6270 = vrot.lane.b32.xlu2 %v6269_v56, %s6919_s24  ;;  %v1737_v20 = vadd.f32 %v9263_v25, %v1681_v61  ;;  %v1755_v36 = vadd.f32 %v9207_v19, %v1699_v23  ;;  %v1691_v33 = vmul.f32 %v9211_v18, %v15431_v60  ;;  %v15435_v18 = vld [vmem:[#allocation19_spill] sm:$0xff] }
 0x44b   :  { %v9431_v56 = vmul.f32 %v15421_v29, %v1754_v8 }
 0x44c   :  { %v9409_v49 = vmul.f32 %v15417_v13, %v1737_v20  ;;  %v15430_v13 = vld [vmem:[#allocation26_spill] sm:$0xff]  ;;  %v1747_v8 = vadd.f32 %v9209_v40, %v1691_v33 }
 0x44e   :  { %v6334_v62 = vpack.i.bf16 %v9417_v53, %v9409_v49 }
 0x450   :  { %6280 = vrot.lane.b32.xlu1 %v6279_v16, %s6919_s24 }
 0x451   :  { %6305 = vrot.lane.b32.xlu0 %v6304_v15, %s6919_s24  ;;  %v1675_v15 = vmul.f32 %v9215_v37, %v15425_v24  ;;  %v1730_v37 = vadd.f32 %v9220_v5, %v1674_v12 }
 0x452   :  { %6295 = vrot.lane.b32.xlu2 %v6279_v16, %s6918_s5  ;;  %v9438_v16 = vmul.f32 %v15424_v47, %v1746_v38  ;;  %v9486_v38 = vmul.f32 %v15435_v18, %v1747_v8 }
 0x453   :  { %v1731_v55 = vadd.f32 %v9220_v5, %v1675_v15 }
 0x454   :  { %v6354_v61 = vpack.i.bf16 %v9438_v16, %v9431_v56 }
 0x455   :  { %v9470_v59 = vmul.f32 %v15432_v42, %v1731_v55 }
 0x457   :  { %15433 = vst [vmem:[#allocation37_spill] sm:$0xff] %v9470_v59 }
 0x458   :  { %6300 = vrot.lane.b32.xlu1 %v6299_v11, %s6919_s24 }
 0x459   :  { %6310 = vrot.lane.b32.xlu0 %v6309_v46, %s6918_s5  ;;  %v15428_v46 = vld [vmem:[#allocation20_spill] sm:$0xff] }
 0x45a   :  { %6315 = vrot.lane.b32.xlu2 %v6299_v11, %s6918_s5  ;;  %v1739_v11 = vadd.f32 %v9263_v25, %v1683_v63  ;;  %v9458_v20 = vmul.f32 %v15428_v46, %v1738_v35  ;;  %v9465_v25 = vmul.f32 %v15430_v13, %v1730_v37 }
 0x45c   :  { %v9462_v57 = vmul.f32 %v15429_v14, %v1739_v11  ;;  %v6344_v5 = vpack.i.bf16 %v9465_v25, %v9458_v20  ;;  %v6349_v29 = vpack.i.bf16 %v9486_v38, %v9465_v25 }
 0x45e   :  { %v6359_v19 = vpack.i.bf16 %v9470_v59, %v9462_v57 }
 0x460   :  { %6325 = vrot.lane.b32.xlu1 %v6324_v30, %s6918_s5  ;;  %v9475_v30 = vmul.f32 %v15434_v9, %v1755_v36 }
 0x461   :  { %6335 = vrot.lane.b32.xlu0 %v6334_v62, %s6919_s24 }
 0x462   :  { %6320 = vrot.lane.b32.xlu2 %v6334_v62, %s6918_s5  ;;  %v6364_v62 = vpack.i.bf16 %v9475_v30, %v9458_v20  ;;  %v6369_v26 = vpack.i.bf16 %v9486_v38, %v9475_v30 }
 0x468   :  { %6330 = vrot.lane.b32.xlu1 %v6329_v32, %s6919_s24 }
 0x469   :  { %6355 = vrot.lane.b32.xlu0 %v6354_v61, %s6919_s24 }
 0x46a   :  { %6340 = vrot.lane.b32.xlu2 %v6354_v61, %s6918_s5 }
 0x470   :  { %6345 = vrot.lane.b32.xlu1 %v6344_v5, %s6918_s5 }
 0x471   :  { %6360 = vrot.lane.b32.xlu0 %v6359_v19, %s6919_s24 }
 0x472   :  { %6365 = vrot.lane.b32.xlu2 %v6364_v62, %s6919_s24 }
 0x478   :  { %6350 = vrot.lane.b32.xlu1 %v6349_v29, %s6919_s24 }
 0x47a   :  { %6370 = vrot.lane.b32.xlu2 %v6369_v26, %s6918_s5 }
 0x480   :  { %6375 = vrot.lane.b32.xlu1 %v6359_v19, %s6918_s5 }
 0x484   :  { %v6226_v40 = vpop.permute.xlu2 %6225 }
 0x485   :  { %v6228_v12 = vunpack.i.h.bf16 %v6226_v40  ;;  %v6227_v17 = vunpack.i.l.bf16 %v6226_v40 }
 0x487   :  { %v9498_v24 = vsel %vm527_vm0, %v15436_v39, %v6227_v17  ;;  %v9504_v15 = vsel %vm527_vm0, %v15436_v39, %v6228_v12 }
 0x488   :  { %2013 = vmatpush.msrb.mxu2 %v9498_v24 }
 0x48a   :  { %2014 = vmatpush.msrb.mxu2 %v9504_v15 }
 0x48c   :  { %v9507_v0 = vpop.permute.xlu2 %6230  ;;  %v9509_v63 = vpop.permute.xlu0 %6220 }
 0x48d   :  { %v6223_v27 = vunpack.i.h.bf16 %v9509_v63  ;;  %v6222_v23 = vunpack.i.l.bf16 %v9509_v63  ;;  %v15069_v36 = vunpack.i.h.bf16 %v9507_v0  ;;  %v15070_v14 = vunpack.i.l.bf16 %v9507_v0 }
 0x48f   :  { %v9538_v13 = vsel %vm527_vm0, %v15436_v39, %v6223_v27  ;;  %v9544_v60 = vsel %vm527_vm0, %v6228_v12, %v6222_v23  ;;  %v9565_v18 = vsel %vm527_vm0, %v6223_v27, %v15069_v36 }
 0x494   :  { %v9511_v32 = vpop.permute.xlu2 %6250 }
 0x495   :  { %v6252_v40 = vunpack.i.l.bf16 %v9511_v32  ;;  %v6253_v36 = vunpack.i.h.bf16 %v9511_v32 }
 0x49c   :  { %v9556_v5 = vpop.permute.xlu2 %6265 }
 0x4a2   :  { %v9513_v35 = vpop.permute.xlu1 %6235 }
 0x4a3   :  { %v6238_v61 = vunpack.i.h.bf16 %v9513_v35  ;;  %v6237_v11 = vunpack.i.l.bf16 %v9513_v35  ;;  %v6246_v37 = vpop.permute.xlu0 %6245 }
 0x4a4   :  { %v6247_v9 = vunpack.i.l.bf16 %v6246_v37  ;;  %v6248_v12 = vunpack.i.h.bf16 %v6246_v37 }
 0x4a5   :  { %v9522_v55 = vsel %vm527_vm0, %v15436_v39, %v6238_v61  ;;  %v9528_v46 = vsel %vm527_vm0, %v6227_v17, %v6237_v11  ;;  %v9553_v33 = vsel %vm527_vm0, %v6238_v61, %v15070_v14  ;;  %v15438_v17 = vld [vmem:[#allocation16_spill] sm:$0xff] }
 0x4a6   :  { %2015 = vmatpush.msrb.mxu2 %v9522_v55  ;;  %2046 = vmatpush.msra.mxu0 %v9528_v46  ;;  %v1985_v32 = vsel %vm630_vm1, %v15438_v17, %v6248_v12 }
 0x4a7   :  { %2100 = vmatpush.msra.mxu3 %v9528_v46 }
 0x4a8   :  { %2016 = vmatpush.msrb.mxu2 %v9538_v13  ;;  %2047 = vmatpush.msra.mxu0 %v9544_v60 }
 0x4a9   :  { %2101 = vmatpush.msra.mxu3 %v9544_v60 }
 0x4aa   :  { %v6241_v42 = vpop.permute.xlu1 %6240  ;;  %2048 = vmatpush.msra.mxu0 %v9553_v33 }
 0x4ab   :  { %v6243_v19 = vunpack.i.h.bf16 %v6241_v42  ;;  %v6242_v62 = vunpack.i.l.bf16 %v6241_v42  ;;  %v9558_v8 = vpop.permute.xlu0 %6260  ;;  %2102 = vmatpush.msra.mxu3 %v9553_v33 }
 0x4ac   :  { %v15071_v29 = vunpack.i.h.bf16 %v9558_v8  ;;  %v15072_v26 = vunpack.i.l.bf16 %v9558_v8  ;;  %2049 = vmatpush.msra.mxu0 %v9565_v18 }
 0x4ad   :  { %2103 = vmatpush.msra.mxu3 %v9565_v18  ;;  %v1987_v61 = vsel %vm630_vm1, %v15438_v17, %v6242_v62  ;;  %v1983_v42 = vsel %vm630_vm1, %v6242_v62, %v6247_v9  ;;  %v1986_v37 = vsel %vm630_vm1, %v15438_v17, %v6243_v19  ;;  %v1982_v62 = vsel %vm630_vm1, %v6243_v19, %v6252_v40 }
 0x4ae   :  { %2017 = vmatpush.msrb.mxu2 %v1987_v61  ;;  %2050 = vmatpush.msra.mxu0 %v1983_v42  ;;  %v9581_v27 = vsel %vm630_vm1, %v6247_v9, %v15072_v26  ;;  %v9594_v9 = vsel %vm630_vm1, %v6252_v40, %v15071_v29  ;;  %v1984_v40 = vsel %vm630_vm1, %v15438_v17, %v6253_v36  ;;  %v9606_v29 = vpop.permute.xlu2 %6270  ;;  %v15439_v26 = vmov 0.0  }
 0x4af   :  { %2083 = vmatpush.msrb.mxu1 %v9581_v27  ;;  %2104 = vmatpush.msra.mxu3 %v1983_v42  ;;  %v15073_v42 = vunpack.i.l.bf16 %v9556_v5 }
 0x4b0   :  { %2018 = vmatpush.msrb.mxu2 %v1986_v37  ;;  %2051 = vmatpush.msra.mxu0 %v1982_v62 }
 0x4b1   :  { %2084 = vmatpush.msrb.mxu1 %v9594_v9  ;;  %2105 = vmatpush.msra.mxu3 %v1982_v62 }
 0x4b2   :  { %v6256_v61 = vpop.permute.xlu1 %6255  ;;  %2019 = vmatpush.msrb.mxu2 %v1985_v32 }
 0x4b3   :  { %v6258_v19 = vunpack.i.h.bf16 %v6256_v61  ;;  %v6257_v37 = vunpack.i.l.bf16 %v6256_v61  ;;  %v9601_v14 = vpop.permute.xlu0 %6285  ;;  %v15074_v61 = vunpack.i.h.bf16 %v9556_v5 }
 0x4b4   :  { %2020 = vmatpush.msrb.mxu2 %v1984_v40 }
 0x4b5   :  { %v1981_v62 = vsel %vm630_vm1, %v6248_v12, %v6257_v37  ;;  %v9614_v32 = vsel %vm630_vm1, %v6257_v37, %v15073_v42  ;;  %v1980_v40 = vsel %vm630_vm1, %v6253_v36, %v6258_v19  ;;  %v9626_v12 = vsel %vm630_vm1, %v6258_v19, %v15074_v61  ;;  %v9628_v37 = vld [vmem:[#allocation3 + $0x70] sm:$0xff] }
 0x4b6   :  { %2021 = vmatpush.msrb.mxu2 %v15439_v26  ;;  %2052 = vmatpush.msra.mxu0 %v1981_v62  ;;  %v6272_v61 = vunpack.i.l.bf16 %v9606_v29 }
 0x4b7   :  { %2085 = vmatpush.msrb.mxu1 %v9614_v32  ;;  %2106 = vmatpush.msra.mxu3 %v1981_v62 }
 0x4b8   :  { %2022 = vmatpush.msrb.mxu2 %v15439_v26  ;;  %2053 = vmatpush.msra.mxu0 %v1980_v40 }
 0x4b9   :  { %2086 = vmatpush.msrb.mxu1 %v9626_v12  ;;  %2107 = vmatpush.msra.mxu3 %v1980_v40 }
 0x4ba   :  { %v9631_v42 = vpop.permute.xlu1 %6275  ;;  %2023 = vmatpush.msrb.mxu2 %v15439_v26  ;;  %2054 = vmatpush.msra.mxu0 %v9252_v31 }
 0x4bb   :  { %v6277_v36 = vunpack.i.l.bf16 %v9631_v42  ;;  %v9636_v62 = vpop.permute.xlu0 %6290  ;;  %2108 = vmatpush.msra.mxu3 %v9252_v31  ;;  %5887 = vmatmul.msk.f32.vlgmr.msrb.gmra.mxu1 %vm679_vm2, %v9628_v37  ;;  %v6278_v19 = vunpack.i.h.bf16 %v9631_v42  ;;  %v9654_v31 = vpop.permute.xlu2 %6295  ;;  %v6287_v42 = vunpack.i.l.bf16 %v9601_v14 }
 0x4bc   :  { %2024 = vmatpush.msrb.mxu2 %v15439_v26  ;;  %2055 = vmatpush.msra.mxu0 %v9249_v45  ;;  %v15440_v35 = vunpack.i.l.bf16 %v9636_v62  ;;  %v15441_v26 = vunpack.i.l.bf16 %v9558_v8  ;;  %v15079_v17 = vunpack.i.h.bf16 %v9654_v31 }
 0x4bd   :  { %2109 = vmatpush.msra.mxu3 %v9249_v45  ;;  %v9649_v40 = vsel %vm527_vm0, %v6237_v11, %v6277_v36  ;;  %v9659_v45 = vld [vmem:[#allocation3 + $0x68] sm:$0xff]  ;;  %v9668_v11 = vsel %vm527_vm0, %v6222_v23, %v6278_v19 }
 0x4be   :  { %2025 = vmatpush.msrb.mxu2 %v15436_v39  ;;  %2056 = vmatpush.msra.mxu0 %v9276_v2  ;;  %v9681_v63 = vsel %vm630_vm1, %v15441_v26, %v15440_v35  ;;  %v15443_v26 = vunpack.i.h.bf16 %v9636_v62  ;;  %v15444_v35 = vunpack.i.h.bf16 %v9558_v8  ;;  %v15446_v8 = vunpack.i.l.bf16 %v9654_v31 }
 0x4bf   :  { %2110 = vmatpush.msra.mxu3 %v9276_v2  ;;  %2187 = vmatpush.msra.mxu1 %v9649_v40  ;;  %v9692_v2 = vld [vmem:[#allocation3 + $0x60] sm:$0xff] }
 0x4c0   :  { %2026 = vmatpush.msrb.mxu2 %v15436_v39  ;;  %2057 = vmatpush.msra.mxu0 %v9224_v21  ;;  %v9702_v59 = vsel %vm630_vm1, %v15444_v35, %v15443_v26  ;;  %v15447_v26 = vunpack.i.l.bf16 %v9556_v5 }
 0x4c1   :  { %2111 = vmatpush.msra.mxu3 %v9224_v21  ;;  %2188 = vmatpush.msra.mxu1 %v9668_v11  ;;  %v15442_v21 = vunpack.i.l.bf16 %v9507_v0 }
 0x4c2   :  { %2058 = vmatmul.f32.vlgmr.msra.gmra.mxu0 %v9659_v45  ;;  %2027 = vmatpush.msrb.mxu2 %v15436_v39  ;;  %v9721_v35 = vsel %vm630_vm1, %v15447_v26, %v15446_v8  ;;  %v9740_v26 = vld [vmem:[#allocation3 + $0x80] sm:$0xff] }
 0x4c3   :  { %2170 = vmatpush.msrb.mxu0 %v9681_v63  ;;  %2112 = vmatpush.msra.mxu3 %v9498_v24  ;;  %v9690_v23 = vsel %vm527_vm0, %v15442_v21, %v6287_v42  ;;  %v15445_v24 = vunpack.i.h.bf16 %v9507_v0  ;;  %v9726_v0 = vpop.permute.xlu1 %6280 }
 0x4c4   :  { %2189 = vmatpush.msra.mxu1 %v9690_v23  ;;  %2028 = vmatpush.msrb.mxu2 %v15436_v39 }
 0x4c5   :  { %2171 = vmatpush.msrb.mxu0 %v9702_v59  ;;  %2113 = vmatpush.msra.mxu3 %v9504_v15  ;;  %v9711_v21 = vsel %vm527_vm0, %v15445_v24, %v6272_v61  ;;  %v15080_v15 = vunpack.i.h.bf16 %v9601_v14  ;;  %v15448_v24 = vunpack.i.h.bf16 %v9556_v5  ;;  %v9750_v5 = vld [vmem:[#allocation3 + $0x88] sm:$0xff] }
 0x4c6   :  { %2190 = vmatpush.msra.mxu1 %v9711_v21  ;;  %2029 = vmatmul.f32.vlgmr.msrb.gmra.mxu2 %v9692_v2 }
 0x4c7   :  { %2129 = vmatpush.msra.mxu2 %v9295_v48  ;;  %2172 = vmatpush.msrb.mxu0 %v9721_v35  ;;  %v9736_v8 = vsel %vm630_vm1, %v15448_v24, %v15079_v17  ;;  %v15084_v24 = vunpack.i.h.bf16 %v9606_v29  ;;  %v15082_v17 = vunpack.i.l.bf16 %v9726_v0 }
 0x4c8   :  { %2114 = vmatpush.msra.mxu3 %v9522_v55  ;;  %2191 = vmatpush.msra.mxu1 %v9581_v27  ;;  %v9748_v55 = vsel %vm527_vm0, %v6277_v36, %v15080_v15  ;;  %v15083_v36 = vunpack.i.h.bf16 %v9726_v0  ;;  %v9770_v15 = vld [vmem:[#allocation3 + $0x78] sm:$0xff] }
 0x4c9   :  { %2130 = vmatpush.msra.mxu2 %v9298_v43  ;;  %2173 = vmatpush.msrb.mxu0 %v9736_v8  ;;  %v9778_v39 = vsel %vm527_vm0, %v6287_v42, %v15082_v17  ;;  %v9794_v42 = vld [vmem:[#allocation3 + $0x98] sm:$0xff]  ;;  %v9798_v17 = vld [vmem:[#allocation3 + $0xa0] sm:$0xff] }
 0x4ca   :  { %2115 = vmatpush.msra.mxu3 %v9538_v13  ;;  %2192 = vmatpush.msra.mxu1 %v9594_v9  ;;  %v9765_v13 = vsel %vm527_vm0, %v6278_v19, %v15084_v24  ;;  %v9790_v19 = vsel %vm527_vm0, %v6272_v61, %v15083_v36  ;;  %v9809_v61 = vld [vmem:[#allocation3 + $0x90] sm:$0xff]  ;;  %v9825_v24 = vld [vmem:[#allocation3 + $0xb8] sm:$0xff] }
 0x4cb   :  { %2274 = vmatpush.msra.mxu0 %v9748_v55  ;;  %2116 = vmatmul.f32.vlgmr.msra.gmra.mxu3 %v9692_v2  ;;  %v9821_v36 = vld [vmem:[#allocation3 + $0xb0] sm:$0xff] }
 0x4cc   :  { %2061 = vmatmul.f32.gmra.mxu0 %v9740_v26  ;;  %2131 = vmatpush.msra.mxu2 %v9315_v22 }
 0x4cd   :  { %2216 = vmatpush.msrb.mxu3 %v9318_v54  ;;  %5888 = vmatmul.msk.f32.gmra.mxu1 %vm679_vm2, %v9750_v5 }
 0x4ce   :  { %2193 = vmatpush.msra.mxu1 %v9614_v32  ;;  %2275 = vmatpush.msra.mxu0 %v9765_v13 }
 0x4cf   :  { %2132 = vmatpush.msra.mxu2 %v9323_v4  ;;  %2217 = vmatpush.msrb.mxu3 %v9338_v58 }
 0x4d0   :  { %2194 = vmatpush.msra.mxu1 %v9626_v12  ;;  %2276 = vmatpush.msra.mxu0 %v9778_v39 }
 0x4d1   :  { %2032 = vmatmul.f32.gmra.mxu2 %v9770_v15  ;;  %2218 = vmatpush.msrb.mxu3 %v9356_v6 }
 0x4d2   :  { %2133 = vmatpush.msra.mxu2 %v9649_v40  ;;  %2195 = vmatpush.msra.mxu1 %v9246_v7 }
 0x4d3   :  { %2277 = vmatpush.msra.mxu0 %v9790_v19  ;;  %2219 = vmatpush.msrb.mxu3 %v9364_v51 }
 0x4d4   :  { %2134 = vmatpush.msra.mxu2 %v9668_v11  ;;  %2196 = vmatpush.msra.mxu1 %v9227_v34 }
 0x4d5   :  { %2278 = vmatpush.msra.mxu0 %v9681_v63  ;;  %2119 = vmatmul.f32.gmra.mxu3 %v9770_v15 }
 0x4d6   :  { %2064 = vmatmul.f32.gmra.mxu0 %v9794_v42  ;;  %2135 = vmatpush.msra.mxu2 %v9690_v23 }
 0x4d7   :  { %2220 = vmatpush.msrb.mxu3 %v9748_v55  ;;  %5889 = vmatmul.msk.f32.gmra.mxu1 %vm679_vm2, %v9798_v17 }
 0x4d8   :  { %2197 = vmatpush.msra.mxu1 %v9273_v10  ;;  %2279 = vmatpush.msra.mxu0 %v9702_v59 }
 0x4d9   :  { %2136 = vmatpush.msra.mxu2 %v9711_v21  ;;  %2221 = vmatpush.msrb.mxu3 %v9765_v13 }
 0x4da   :  { %2198 = vmatpush.msra.mxu1 %v9284_v41  ;;  %2280 = vmatpush.msra.mxu0 %v9721_v35 }
 0x4db   :  { %2035 = vmatmul.f32.gmra.mxu2 %v9809_v61  ;;  %2222 = vmatpush.msrb.mxu3 %v9778_v39 }
 0x4dc   :  { %2137 = vmatpush.msra.mxu2 %v9581_v27  ;;  %2199 = vmatpush.msra.mxu1 %v9528_v46  ;;  %v9831_v46 = vpop.permute.xlu1 %6300  ;;  %v9844_v27 = vpop.permute.xlu0 %6305 }
 0x4dd   :  { %2281 = vmatpush.msra.mxu0 %v9736_v8  ;;  %2223 = vmatpush.msrb.mxu3 %v9790_v19 }
 0x4de   :  { %2138 = vmatpush.msra.mxu2 %v9594_v9  ;;  %2200 = vmatpush.msra.mxu1 %v9544_v60  ;;  %v9838_v60 = vld [vmem:[#allocation3 + $0xa8] sm:$0xff] }
 0x4df   :  { %2282 = vmatpush.msra.mxu0 %v9295_v48  ;;  %2122 = vmatmul.f32.gmra.mxu3 %v9809_v61 }
 0x4e0   :  { %2067 = vmatmul.f32.gmra.mxu0 %v9821_v36  ;;  %2139 = vmatpush.msra.mxu2 %v9614_v32 }
 0x4e1   :  { %2224 = vmatpush.msrb.mxu3 %v9681_v63  ;;  %5890 = vmatmul.msk.f32.gmra.mxu1 %vm679_vm2, %v9825_v24  ;;  %v15451_v63 = vunpack.i.h.bf16 %v9636_v62 }
 0x4e2   :  { %2201 = vmatpush.msra.mxu1 %v9553_v33  ;;  %2283 = vmatpush.msra.mxu0 %v9298_v43  ;;  %v6316_v33 = vpop.permute.xlu2 %6315 }
 0x4e3   :  { %2140 = vmatpush.msra.mxu2 %v9626_v12  ;;  %2225 = vmatpush.msrb.mxu3 %v9702_v59  ;;  %v6302_v59 = vunpack.i.l.bf16 %v9831_v46  ;;  %v6318_v32 = vunpack.i.h.bf16 %v6316_v33 }
 0x4e4   :  { %2202 = vmatpush.msra.mxu1 %v9565_v18  ;;  %2284 = vmatpush.msra.mxu0 %v9315_v22  ;;  %v9860_v18 = vpop.permute.xlu1 %6325  ;;  %v9878_v12 = vpop.permute.xlu0 %6310 }
 0x4e5   :  { %2038 = vmatmul.f32.gmra.mxu2 %v9838_v60  ;;  %2226 = vmatpush.msrb.mxu3 %v9721_v35 }
 0x4e6   :  { %2141 = vmatpush.msra.mxu2 %v9246_v7  ;;  %2303 = vmatpush.msrb.mxu1 %v9384_v44  ;;  %v6317_v7 = vunpack.i.l.bf16 %v6316_v33 }
 0x4e7   :  { %2285 = vmatpush.msra.mxu0 %v9323_v4  ;;  %2227 = vmatpush.msrb.mxu3 %v9736_v8  ;;  %v15453_v8 = vunpack.i.l.bf16 %v9654_v31 }
 0x4e8   :  { %2142 = vmatpush.msra.mxu2 %v9227_v34  ;;  %2304 = vmatpush.msrb.mxu1 %v9387_v1  ;;  %v15087_v34 = vunpack.i.h.bf16 %v9831_v46 }
 0x4e9   :  { %2286 = vmatpush.msra.mxu0 %v9649_v40  ;;  %2125 = vmatmul.f32.gmra.mxu3 %v9838_v60  ;;  %v15085_v40 = vunpack.i.h.bf16 %v9860_v18 }
 0x4ea   :  { %2143 = vmatpush.msra.mxu2 %v9273_v10  ;;  %5891 = vmatmul.msk.f32.vlgmr.msrb.gmra.mxu0 %vm679_vm2, %v9628_v37  ;;  %v15449_v10 = vunpack.i.l.bf16 %v9636_v62  ;;  %v6312_v62 = vunpack.i.l.bf16 %v9878_v12  ;;  %v9920_v33 = vpop.permute.xlu2 %6320 }
 0x4eb   :  { %2228 = vmatpush.msrb.mxu3 %v9295_v48  ;;  %2305 = vmatpush.msrb.mxu1 %v9361_v3  ;;  %v6327_v48 = vunpack.i.l.bf16 %v9860_v18 }
 0x4ec   :  { %2203 = vmatmul.f32.vlgmr.msra.gmra.mxu1 %v9692_v2  ;;  %2287 = vmatpush.msra.mxu0 %v9668_v11  ;;  %v9873_v9 = vsel %vm630_vm1, %v15449_v10, %v6317_v7  ;;  %v15086_v11 = vunpack.i.l.bf16 %v9844_v27  ;;  %v15454_v10 = vunpack.i.l.bf16 %v9726_v0 }
 0x4ed   :  { %2144 = vmatpush.msra.mxu2 %v9284_v41  ;;  %2229 = vmatpush.msrb.mxu3 %v9298_v43  ;;  %v15450_v41 = vunpack.i.h.bf16 %v9601_v14  ;;  %v15452_v14 = vunpack.i.h.bf16 %v9606_v29  ;;  %v6308_v29 = vunpack.i.h.bf16 %v9844_v27 }
 0x4ee   :  { %2306 = vmatpush.msrb.mxu1 %v9369_v28  ;;  %2288 = vmatpush.msra.mxu0 %v9690_v23  ;;  %v9898_v23 = vsel %vm630_vm1, %v15451_v63, %v6318_v32  ;;  %v9939_v63 = vpop.permute.xlu1 %6330 }
 0x4ef   :  { %2257 = vmatpush.msrb.mxu2 %v9873_v9  ;;  %v9889_v43 = vsel %vm527_vm0, %v15450_v41, %v6302_v59  ;;  %2230 = vmatpush.msrb.mxu3 %v9315_v22  ;;  %v9908_v35 = vsel %vm527_vm0, %v15452_v14, %v15087_v34  ;;  %v6313_v22 = vunpack.i.h.bf16 %v9878_v12  ;;  %v9937_v41 = vsel %vm527_vm0, %v15454_v10, %v15086_v11 }
 0x4f0   :  { %2145 = vmatmul.f32.vlgmr.msra.gmra.mxu2 %v9659_v45  ;;  %2307 = vmatpush.msrb.mxu1 %v9889_v43  ;;  %v15455_v14 = vunpack.i.h.bf16 %v9654_v31  ;;  %v15089_v34 = vunpack.i.l.bf16 %v9939_v63 }
 0x4f1   :  { %2258 = vmatpush.msrb.mxu2 %v9898_v23  ;;  %2289 = vmatpush.msra.mxu0 %v9711_v21  ;;  %v9918_v21 = vsel %vm630_vm1, %v15453_v8, %v6327_v48  ;;  %v1966_v10 = vsel %vm630_vm1, %v6318_v32, %v6313_v22  ;;  %v15090_v32 = vunpack.i.h.bf16 %v9920_v33 }
 0x4f2   :  { %2231 = vmatpush.msrb.mxu3 %v9323_v4  ;;  %2308 = vmatpush.msrb.mxu1 %v9908_v35  ;;  %v1967_v4 = vsel %vm630_vm1, %v6317_v7, %v15085_v40  ;;  %v15088_v7 = vunpack.i.l.bf16 %v9920_v33  ;;  %v1968_v8 = vsel %vm630_vm1, %v15455_v14, %v6312_v62  ;;  %v15456_v40 = vunpack.i.h.bf16 %v9726_v0  ;;  %v9971_v0 = vpop.permute.xlu0 %6335 }
 0x4f3   :  { %2390 = vmatpush.msrb.mxu0 %v9414_v50  ;;  %2259 = vmatpush.msrb.mxu2 %v9918_v21  ;;  %v9987_v14 = vsel %vm527_vm0, %v6302_v59, %v15089_v34  ;;  %v15457_v59 = vunpack.i.h.bf16 %v9831_v46  ;;  %v15458_v46 = vunpack.i.l.bf16 %v9844_v27 }
 0x4f4   :  { %2344 = vmatpush.msra.mxu3 %v1967_v4  ;;  %5892 = vmatmul.msk.f32.gmra.mxu0 %vm679_vm2, %v9750_v5  ;;  %v9958_v11 = vsel %vm527_vm0, %v15456_v40, %v6308_v29  ;;  %v1965_v31 = vsel %vm630_vm1, %v6327_v48, %v15088_v7  ;;  %v15091_v40 = vunpack.i.h.bf16 %v9939_v63  ;;  %v1964_v48 = vsel %vm630_vm1, %v6312_v62, %v15090_v32  ;;  %v9995_v62 = vpop.permute.xlu2 %6340 }
 0x4f5   :  { %2232 = vmatmul.f32.vlgmr.msrb.gmra.mxu3 %v9659_v45  ;;  %2309 = vmatpush.msrb.mxu1 %v9937_v41  ;;  %v6337_v7 = vunpack.i.l.bf16 %v9971_v0  ;;  %v6338_v32 = vunpack.i.h.bf16 %v9971_v0 }
 0x4f6   :  { %2391 = vmatpush.msrb.mxu0 %v9392_v52  ;;  %2206 = vmatmul.f32.gmra.mxu1 %v9770_v15  ;;  %v10005_v34 = vsel %vm527_vm0, %v15457_v59, %v15091_v40  ;;  %v10031_v40 = vpop.permute.xlu1 %6345 }
 0x4f7   :  { %2260 = vmatpush.msrb.mxu2 %v1968_v8  ;;  %2345 = vmatpush.msra.mxu3 %v1966_v10  ;;  %v10019_v59 = vsel %vm527_vm0, %v15458_v46, %v6337_v7 }
 0x4f8   :  { %2310 = vmatpush.msrb.mxu1 %v9958_v11  ;;  %2392 = vmatpush.msrb.mxu0 %v9409_v49 }
 0x4f9   :  { %2361 = vmatpush.msra.mxu2 %v9889_v43  ;;  %2346 = vmatpush.msra.mxu3 %v1965_v31 }
 0x4fa   :  { %2148 = vmatmul.f32.gmra.mxu2 %v9740_v26  ;;  %2311 = vmatpush.msrb.mxu1 %v9873_v9 }
 0x4fb   :  { %2362 = vmatpush.msra.mxu2 %v9908_v35  ;;  %2393 = vmatpush.msrb.mxu0 %v9417_v53 }
 0x4fc   :  { %2347 = vmatpush.msra.mxu3 %v1964_v48  ;;  %2312 = vmatpush.msrb.mxu1 %v9898_v23  ;;  %v10040_v27 = vpop.permute.xlu2 %6365 }
 0x4fd   :  { %2363 = vmatpush.msra.mxu2 %v9937_v41  ;;  %2394 = vmatpush.msrb.mxu0 %v9987_v14 }
 0x4fe   :  { %2448 = vmatpush.msrb.mxu3 %v9987_v14  ;;  %5893 = vmatmul.msk.f32.gmra.mxu0 %vm679_vm2, %v9798_v17 }
 0x4ff   :  { %2235 = vmatmul.f32.gmra.mxu3 %v9740_v26  ;;  %2313 = vmatpush.msrb.mxu1 %v9918_v21 }
 0x500   :  { %2364 = vmatpush.msra.mxu2 %v9958_v11  ;;  %2395 = vmatpush.msrb.mxu0 %v10005_v34 }
 0x501   :  { %2449 = vmatpush.msrb.mxu3 %v10005_v34  ;;  %2209 = vmatmul.f32.gmra.mxu1 %v9809_v61 }
 0x502   :  { %2314 = vmatpush.msrb.mxu1 %v1968_v8  ;;  %2365 = vmatpush.msra.mxu2 %v9873_v9  ;;  %v10029_v9 = vsel %vm527_vm0, %v6308_v29, %v6338_v32  ;;  %v6347_v29 = vunpack.i.l.bf16 %v10031_v40 }
 0x503   :  { %2396 = vmatpush.msrb.mxu0 %v10019_v59  ;;  %2450 = vmatpush.msrb.mxu3 %v10019_v59 }
 0x504   :  { %2151 = vmatmul.f32.gmra.mxu2 %v9794_v42  ;;  %2315 = vmatpush.msrb.mxu1 %v9318_v54 }
 0x505   :  { %2366 = vmatpush.msra.mxu2 %v9898_v23  ;;  %2397 = vmatpush.msrb.mxu0 %v10029_v9  ;;  %v6342_v23 = vunpack.i.l.bf16 %v9995_v62 }
 0x506   :  { %2451 = vmatpush.msrb.mxu3 %v10029_v9  ;;  %2316 = vmatpush.msrb.mxu1 %v9338_v58 }
 0x507   :  { %2367 = vmatpush.msra.mxu2 %v9918_v21  ;;  %2398 = vmatpush.msrb.mxu0 %v1967_v4  ;;  %v6343_v21 = vunpack.i.h.bf16 %v9995_v62 }
 0x508   :  { %2452 = vmatpush.msrb.mxu3 %v1967_v4  ;;  %5894 = vmatmul.msk.f32.gmra.mxu0 %vm679_vm2, %v9825_v24  ;;  %v15459_v4 = vunpack.i.h.bf16 %v9860_v18  ;;  %v10067_v18 = vpop.permute.xlu0 %6355 }
 0x509   :  { %2238 = vmatmul.f32.gmra.mxu3 %v9794_v42  ;;  %2317 = vmatpush.msrb.mxu1 %v9356_v6 }
 0x50a   :  { %2368 = vmatpush.msra.mxu2 %v1968_v8  ;;  %2399 = vmatpush.msrb.mxu0 %v1966_v10  ;;  %v10054_v8 = vsel %vm630_vm1, %v15459_v4, %v6342_v23 }
 0x50b   :  { %2453 = vmatpush.msrb.mxu3 %v1966_v10  ;;  %2212 = vmatmul.f32.gmra.mxu1 %v9838_v60  ;;  %v10058_v10 = vpop.permute.xlu1 %6350 }
 0x50c   :  { %2318 = vmatpush.msrb.mxu1 %v9364_v51  ;;  %2369 = vmatpush.msra.mxu2 %v9318_v54  ;;  %v10065_v54 = vsel %vm630_vm1, %v6313_v22, %v6343_v21  ;;  %v10083_v22 = vpop.permute.xlu2 %6370 }
 0x50d   :  { %2400 = vmatpush.msrb.mxu0 %v1965_v31  ;;  %2454 = vmatpush.msrb.mxu3 %v1965_v31  ;;  %v6348_v31 = vunpack.i.h.bf16 %v10031_v40  ;;  %v6372_v46 = vunpack.i.l.bf16 %v10083_v22 }
 0x50e   :  { %2431 = vmatpush.msra.mxu1 %v10054_v8  ;;  %2154 = vmatmul.f32.gmra.mxu2 %v9821_v36 }
 0x50f   :  { %2370 = vmatpush.msra.mxu2 %v9338_v58  ;;  %2401 = vmatpush.msrb.mxu0 %v1964_v48  ;;  %v15460_v58 = vunpack.i.l.bf16 %v9920_v33 }
 0x510   :  { %2455 = vmatpush.msrb.mxu3 %v1964_v48  ;;  %2432 = vmatpush.msra.mxu1 %v10065_v54  ;;  %v6357_v48 = vunpack.i.l.bf16 %v10067_v18 }
 0x511   :  { %2371 = vmatpush.msra.mxu2 %v9356_v6  ;;  %2402 = vmatpush.msrb.mxu0 %v9384_v44  ;;  %v10079_v12 = vsel %vm630_vm1, %v15460_v58, %v6347_v29  ;;  %v6358_v6 = vunpack.i.h.bf16 %v10067_v18 }
 0x512   :  { %2456 = vmatpush.msrb.mxu3 %v9384_v44  ;;  %2433 = vmatpush.msra.mxu1 %v10079_v12  ;;  %v15461_v44 = vunpack.i.h.bf16 %v9920_v33  ;;  %v6373_v33 = vunpack.i.h.bf16 %v10083_v22 }
 0x513   :  { %2241 = vmatmul.f32.gmra.mxu3 %v9821_v36  ;;  %2290 = vmatmul.f32.vlgmr.msra.gmra.mxu0 %v9692_v2  ;;  %v10117_v4 = vpop.permute.xlu1 %6375 }
 0x514   :  { %2372 = vmatpush.msra.mxu2 %v9364_v51  ;;  %2403 = vmatpush.msrb.mxu0 %v9387_v1  ;;  %v10097_v62 = vsel %vm630_vm1, %v15461_v44, %v6348_v31  ;;  %v15462_v51 = vunpack.i.l.bf16 %v9939_v63  ;;  %v6352_v44 = vunpack.i.l.bf16 %v10058_v10 }
 0x515   :  { %2457 = vmatpush.msrb.mxu3 %v9387_v1  ;;  %2319 = vmatmul.f32.vlgmr.msrb.gmra.mxu1 %v9659_v45 }
 0x516   :  { %2434 = vmatpush.msra.mxu1 %v10097_v62  ;;  %2373 = vmatpush.msra.mxu2 %v9748_v55  ;;  %v10110_v1 = vsel %vm527_vm0, %v15462_v51, %v6357_v48  ;;  %v6367_v55 = vunpack.i.l.bf16 %v10040_v27 }
 0x517   :  { %2404 = vmatpush.msrb.mxu0 %v9361_v3  ;;  %2458 = vmatpush.msrb.mxu3 %v9361_v3  ;;  %v15463_v3 = vunpack.i.h.bf16 %v9939_v63 }
 0x518   :  { %2535 = vmatpush.msrb.mxu1 %v10110_v1  ;;  %5895 = vmatmul.msk.f32.vlgmr.msrb.gmra.mxu2 %vm679_vm2, %v9628_v37  ;;  %v10146_v63 = vsel %vm527_vm0, %v6337_v7, %v6367_v55  ;;  %v6353_v7 = vunpack.i.h.bf16 %v10058_v10 }
 0x519   :  { %2374 = vmatpush.msra.mxu2 %v9765_v13  ;;  %2405 = vmatpush.msrb.mxu0 %v9369_v28  ;;  %v10127_v58 = vsel %vm527_vm0, %v15463_v3, %v6358_v6  ;;  %v10136_v13 = vsel %vm630_vm1, %v6342_v23, %v6372_v46  ;;  %v10155_v23 = vsel %vm630_vm1, %v6343_v21, %v6373_v33 }
 0x51a   :  { %2459 = vmatpush.msrb.mxu3 %v9369_v28  ;;  %2536 = vmatpush.msrb.mxu1 %v10127_v58  ;;  %v6377_v28 = vunpack.i.l.bf16 %v10117_v4  ;;  %v1858_v21 = vsel %vm527_vm0, %v6358_v6, %v6353_v7 }
 0x51b   :  { %2518 = vmatpush.msra.mxu0 %v10136_v13  ;;  %2375 = vmatpush.msra.mxu2 %v9778_v39  ;;  %v6378_v39 = vunpack.i.h.bf16 %v10117_v4 }
 0x51c   :  { %2460 = vmatpush.msrb.mxu3 %v9889_v43  ;;  %2537 = vmatpush.msrb.mxu1 %v10146_v63  ;;  %v10169_v43 = vsel %vm527_vm0, %v6338_v32, %v6352_v44  ;;  %v15464_v32 = vld [vmem:[#allocation37_spill] sm:$0xff] }
 0x51d   :  { %2519 = vmatpush.msra.mxu0 %v10155_v23  ;;  %5899 = vmatmul.msk.f32.vlgmr.msra.gmra.mxu3 %vm679_vm2, %v9628_v37 }
 0x51e   :  { %2293 = vmatmul.f32.gmra.mxu0 %v9770_v15  ;;  %2376 = vmatpush.msra.mxu2 %v9790_v19  ;;  %v10181_v19 = vsel %vm630_vm1, %v6347_v29, %v6377_v28 }
 0x51f   :  { %2461 = vmatpush.msrb.mxu3 %v9908_v35  ;;  %2538 = vmatpush.msrb.mxu1 %v10169_v43  ;;  %v10191_v35 = vsel %vm630_vm1, %v6348_v31, %v6378_v39 }
 0x520   :  { %2322 = vmatmul.f32.gmra.mxu1 %v9740_v26  ;;  %2477 = vmatpush.msrb.mxu2 %v9431_v56 }
 0x521   :  { %2520 = vmatpush.msra.mxu0 %v10181_v19  ;;  %2462 = vmatpush.msrb.mxu3 %v9937_v41  ;;  %v6361_v41 = vpop.permute.xlu0 %6360 }
 0x522   :  { %2539 = vmatpush.msrb.mxu1 %v10054_v8  ;;  %2478 = vmatpush.msrb.mxu2 %v9438_v16  ;;  %v6362_v40 = vunpack.i.l.bf16 %v6361_v41  ;;  %v6363_v29 = vunpack.i.h.bf16 %v6361_v41 }
 0x523   :  { %2521 = vmatpush.msra.mxu0 %v10191_v35  ;;  %5896 = vmatmul.msk.f32.gmra.mxu2 %vm679_vm2, %v9750_v5 }
 0x524   :  { %2463 = vmatpush.msrb.mxu3 %v9958_v11  ;;  %2540 = vmatpush.msrb.mxu1 %v10065_v54  ;;  %v6368_v11 = vunpack.i.h.bf16 %v10040_v27  ;;  %v1857_v31 = vsel %vm527_vm0, %v6367_v55, %v6362_v40  ;;  %v1856_v18 = vsel %vm527_vm0, %v6352_v44, %v6363_v29 }
 0x525   :  { %2479 = vmatpush.msrb.mxu2 %v9458_v20  ;;  %5900 = vmatmul.msk.f32.gmra.mxu3 %vm679_vm2, %v9750_v5 }
 0x526   :  { %2564 = vmatpush.msra.mxu3 %v9475_v30  ;;  %2541 = vmatpush.msrb.mxu1 %v10079_v12  ;;  %v1859_v0 = vsel %vm527_vm0, %v6357_v48, %v6368_v11 }
 0x527   :  { %2296 = vmatmul.f32.gmra.mxu0 %v9809_v61  ;;  %2480 = vmatpush.msrb.mxu2 %v9465_v25 }
 0x528   :  { %2565 = vmatpush.msra.mxu3 %v9486_v38  ;;  %2542 = vmatpush.msrb.mxu1 %v10097_v62 }
 0x529   :  { %2325 = vmatmul.f32.gmra.mxu1 %v9794_v42  ;;  %2481 = vmatpush.msrb.mxu2 %v10110_v1 }
 0x52a   :  { %2566 = vmatpush.msra.mxu3 %v9462_v57  ;;  %2543 = vmatpush.msrb.mxu1 %v9414_v50 }
 0x52b   :  { %2482 = vmatpush.msrb.mxu2 %v10127_v58 }
 0x52c   :  { %2567 = vmatpush.msra.mxu3 %v15464_v32  ;;  %5897 = vmatmul.msk.f32.gmra.mxu2 %vm679_vm2, %v9798_v17 }
 0x52d   :  { %2544 = vmatpush.msrb.mxu1 %v9392_v52  ;;  %2483 = vmatpush.msrb.mxu2 %v10146_v63 }
 0x52e   :  { %2568 = vmatpush.msra.mxu3 %v1859_v0 }
 0x52f   :  { %2299 = vmatmul.f32.gmra.mxu0 %v9838_v60  ;;  %2545 = vmatpush.msrb.mxu1 %v9409_v49 }
 0x530   :  { %2484 = vmatpush.msrb.mxu2 %v10169_v43  ;;  %2569 = vmatpush.msra.mxu3 %v1858_v21 }
 0x531   :  { %5901 = vmatmul.msk.f32.gmra.mxu3 %vm679_vm2, %v9798_v17  ;;  %2546 = vmatpush.msrb.mxu1 %v9417_v53 }
 0x532   :  { %2328 = vmatmul.f32.gmra.mxu1 %v9821_v36  ;;  %2485 = vmatpush.msrb.mxu2 %v10054_v8 }
 0x533   :  { %2570 = vmatpush.msra.mxu3 %v1857_v31  ;;  %2547 = vmatpush.msrb.mxu1 %v9987_v14 }
 0x534   :  { %2486 = vmatpush.msrb.mxu2 %v10065_v54 }
 0x535   :  { %2571 = vmatpush.msra.mxu3 %v1856_v18  ;;  %5898 = vmatmul.msk.f32.gmra.mxu2 %vm679_vm2, %v9825_v24 }
 0x536   :  { %2548 = vmatpush.msrb.mxu1 %v10005_v34  ;;  %2487 = vmatpush.msrb.mxu2 %v10079_v12  ;;  %v15465_v34 = vld [vmem:[#allocation15_spill] sm:$0xff] }
 0x537   :  { %2572 = vmatpush.msra.mxu3 %v10136_v13  ;;  %2406 = vmatmul.f32.vlgmr.msrb.gmra.mxu0 %v9659_v45  ;;  %v1855_v14 = vsel %vm527_vm0, %v6368_v11, %v15465_v34 }
 0x538   :  { %2549 = vmatpush.msrb.mxu1 %v10019_v59  ;;  %2488 = vmatpush.msrb.mxu2 %v10097_v62  ;;  %v1854_v59 = vsel %vm527_vm0, %v6353_v7, %v15465_v34  ;;  %v10315_v12 = vpop.f32.mrf.mxu1 }
 0x539   :  { %2573 = vmatpush.msra.mxu3 %v10155_v23  ;;  %2622 = vmatpush.msrb.mxu0 %v1859_v0  ;;  %15469 = vst [vmem:[#allocation11_spill] sm:$0xff] %v10315_v12 }
 0x53a   :  { %5902 = vmatmul.msk.f32.gmra.mxu3 %vm679_vm2, %v9825_v24  ;;  %2550 = vmatpush.msrb.mxu1 %v10029_v9 }
 0x53b   :  { %5903 = vmatmul.msk.f32.vlgmr.msra.gmra.mxu1 %vm679_vm2, %v9628_v37  ;;  %2489 = vmatpush.msrb.mxu2 %v9414_v50  ;;  %v1853_v50 = vsel %vm527_vm0, %v6362_v40, %v15465_v34 }
 0x53c   :  { %2574 = vmatpush.msra.mxu3 %v10181_v19  ;;  %2655 = vmatpush.msra.mxu1 %v1855_v14 }
 0x53d   :  { %2623 = vmatpush.msrb.mxu0 %v1858_v21  ;;  %2490 = vmatpush.msrb.mxu2 %v9392_v52  ;;  %v1852_v52 = vsel %vm527_vm0, %v6363_v29, %v15465_v34 }
 0x53e   :  { %2575 = vmatpush.msra.mxu3 %v10191_v35  ;;  %2656 = vmatpush.msra.mxu1 %v1854_v59 }
 0x53f   :  { %2377 = vmatmul.f32.vlgmr.msra.gmra.mxu2 %v9692_v2  ;;  %2624 = vmatpush.msrb.mxu0 %v1857_v31  ;;  %v10303_v8 = vpop.f32.mrf.mxu0 }
 0x540   :  { %2491 = vmatpush.msrb.mxu2 %v9409_v49  ;;  %2576 = vmatpush.msra.mxu3 %v9431_v56  ;;  %v15466_v49 = vld [vmem:[#allocation16_spill] sm:$0xff]  ;;  %15467 = vst [vmem:[#allocation40_spill] sm:$0xff] %v10303_v8 }
 0x541   :  { %2657 = vmatpush.msra.mxu1 %v1853_v50  ;;  %2625 = vmatpush.msrb.mxu0 %v1856_v18  ;;  %v1955_v9 = vsel %vm630_vm1, %v6372_v46, %v15466_v49  ;;  %v1953_v27 = vsel %vm630_vm1, %v6377_v28, %v15466_v49  ;;  %v1952_v10 = vsel %vm630_vm1, %v6378_v39, %v15466_v49 }
 0x542   :  { %2492 = vmatpush.msrb.mxu2 %v9417_v53  ;;  %2577 = vmatpush.msra.mxu3 %v9438_v16  ;;  %v1954_v53 = vsel %vm630_vm1, %v6373_v33, %v15466_v49 }
 0x543   :  { %2658 = vmatpush.msra.mxu1 %v1852_v52  ;;  %2464 = vmatmul.f32.vlgmr.msrb.gmra.mxu3 %v9692_v2 }
 0x544   :  { %2605 = vmatpush.msra.mxu2 %v1955_v9  ;;  %2626 = vmatpush.msrb.mxu0 %v10136_v13 }
 0x545   :  { %2578 = vmatpush.msra.mxu3 %v9458_v20  ;;  %2659 = vmatpush.msra.mxu1 %v1955_v9 }
 0x546   :  { %2606 = vmatpush.msra.mxu2 %v1954_v53  ;;  %2627 = vmatpush.msrb.mxu0 %v10155_v23 }
 0x547   :  { %2579 = vmatpush.msra.mxu3 %v9465_v25  ;;  %2660 = vmatpush.msra.mxu1 %v1954_v53 }
 0x548   :  { %2380 = vmatmul.f32.gmra.mxu2 %v9770_v15  ;;  %2628 = vmatpush.msrb.mxu0 %v10181_v19 }
 0x549   :  { %2607 = vmatpush.msra.mxu2 %v1953_v27  ;;  %2692 = vmatpush.msrb.mxu3 %v15466_v49  ;;  %v10313_v54 = vpop.f32.mrf.mxu2 }
 0x54a   :  { %2661 = vmatpush.msra.mxu1 %v1953_v27  ;;  %2629 = vmatpush.msrb.mxu0 %v10191_v35  ;;  %15468 = vst [vmem:[#allocation36_spill] sm:$0xff] %v10313_v54 }
 0x54b   :  { %2608 = vmatpush.msra.mxu2 %v1952_v10  ;;  %2693 = vmatpush.msrb.mxu3 %v15466_v49 }
 0x54c   :  { %2662 = vmatpush.msra.mxu1 %v1952_v10  ;;  %2467 = vmatmul.f32.gmra.mxu3 %v9770_v15 }
 0x54d   :  { %2630 = vmatpush.msrb.mxu0 %v9431_v56  ;;  %2694 = vmatpush.msrb.mxu3 %v15466_v49 }
 0x54e   :  { %2663 = vmatpush.msra.mxu1 %v9475_v30  ;;  %2409 = vmatmul.f32.gmra.mxu0 %v9740_v26  ;;  %v10328_v56 = vpop.f32.mrf.mxu3  ;;  %v10332_v30 = vpop.f32.mrf.mxu0 }
 0x54f   :  { %2631 = vmatpush.msrb.mxu0 %v9438_v16  ;;  %2695 = vmatpush.msrb.mxu3 %v15466_v49 }
 0x550   :  { %2664 = vmatpush.msra.mxu1 %v9486_v38  ;;  %2383 = vmatmul.f32.gmra.mxu2 %v9809_v61  ;;  %v10340_v38 = vpop.f32.mrf.mxu1 }
 0x551   :  { %5904 = vmatmul.msk.f32.gmra.mxu1 %vm679_vm2, %v9750_v5  ;;  %2632 = vmatpush.msrb.mxu0 %v9458_v20 }
 0x552   :  { %2665 = vmatpush.msra.mxu1 %v9462_v57 }
 0x553   :  { %2633 = vmatpush.msrb.mxu0 %v9465_v25 }
 0x554   :  { %2666 = vmatpush.msra.mxu1 %v15464_v32  ;;  %2470 = vmatmul.f32.gmra.mxu3 %v9809_v61  ;;  %v10338_v16 = vpop.f32.mrf.mxu2 }
 0x555   :  { %2634 = vmatpush.msrb.mxu0 %v10110_v1 }
 0x556   :  { %2412 = vmatmul.f32.gmra.mxu0 %v9794_v42  ;;  %v10351_v57 = vpop.f32.mrf.mxu0 }
 0x557   :  { %2635 = vmatpush.msrb.mxu0 %v10127_v58 }
 0x558   :  { %2386 = vmatmul.f32.gmra.mxu2 %v9838_v60  ;;  %v10348_v20 = vpop.f32.mrf.mxu3  ;;  %v10357_v22 = vpop.f32.mrf.mxu1 }
 0x559   :  { %5905 = vmatmul.msk.f32.gmra.mxu1 %vm679_vm2, %v9798_v17  ;;  %2636 = vmatpush.msrb.mxu0 %v10146_v63 }
 0x55b   :  { %2637 = vmatpush.msrb.mxu0 %v10169_v43 }
 0x55c   :  { %2473 = vmatmul.f32.gmra.mxu3 %v9838_v60 }
 0x55e   :  { %2415 = vmatmul.f32.gmra.mxu0 %v9821_v36  ;;  %v10355_v25 = vpop.f32.mrf.mxu2  ;;  %v10366_v6 = vpop.f32.mrf.mxu0 }
 0x560   :  { %2493 = vmatmul.f32.vlgmr.msrb.gmra.mxu2 %v9659_v45  ;;  %v10372_v46 = vpop.f32.mrf.mxu1 }
 0x561   :  { %5906 = vmatmul.msk.f32.gmra.mxu1 %vm679_vm2, %v9825_v24 }
 0x562   :  { %v10362_v48 = vpop.f32.mrf.mxu3 }
 0x564   :  { %2580 = vmatmul.f32.vlgmr.msra.gmra.mxu3 %v9659_v45 }
 0x566   :  { %5907 = vmatmul.msk.f32.vlgmr.msra.gmra.mxu0 %vm679_vm2, %v9628_v37 }
 0x567   :  { %v10381_v1 = vpop.f32.mrf.mxu0 }
 0x568   :  { %2496 = vmatmul.f32.gmra.mxu2 %v9740_v26  ;;  %v10370_v62 = vpop.f32.mrf.mxu2  ;;  %15470 = vst [vmem:[#allocation38_spill] sm:$0xff] %v10381_v1 }
 0x569   :  { %2551 = vmatmul.f32.vlgmr.msrb.gmra.mxu1 %v9692_v2  ;;  %v10386_v55 = vpop.f32.mrf.mxu1 }
 0x56a   :  { %15471 = vst [vmem:[#allocation39_spill] sm:$0xff] %v10386_v55 }
 0x56c   :  { %2583 = vmatmul.f32.gmra.mxu3 %v9740_v26  ;;  %v10377_v51 = vpop.f32.mrf.mxu3 }
 0x56e   :  { %5908 = vmatmul.msk.f32.gmra.mxu0 %vm679_vm2, %v9750_v5 }
 0x570   :  { %2499 = vmatmul.f32.gmra.mxu2 %v9794_v42 }
 0x571   :  { %2554 = vmatmul.f32.gmra.mxu1 %v9770_v15  ;;  %v10394_v3 = vpop.f32.mrf.mxu0 }
 0x573   :  { %v10384_v33 = vpop.f32.mrf.mxu2  ;;  %v10401_v44 = vpop.f32.mrf.mxu1 }
 0x574   :  { %2586 = vmatmul.f32.gmra.mxu3 %v9794_v42 }
 0x576   :  { %5909 = vmatmul.msk.f32.gmra.mxu0 %vm679_vm2, %v9798_v17 }
 0x578   :  { %2502 = vmatmul.f32.gmra.mxu2 %v9821_v36  ;;  %v10392_v4 = vpop.f32.mrf.mxu3 }
 0x579   :  { %2557 = vmatmul.f32.gmra.mxu1 %v9809_v61  ;;  %15472 = vst [vmem:[#allocation29_spill] sm:$0xff] %v10392_v4 }
 0x57b   :  { %v10410_v63 = vpop.f32.mrf.mxu0 }
 0x57c   :  { %2589 = vmatmul.f32.gmra.mxu3 %v9821_v36 }
 0x57d   :  { %v10399_v58 = vpop.f32.mrf.mxu2 }
 0x57e   :  { %5910 = vmatmul.msk.f32.gmra.mxu0 %vm679_vm2, %v9825_v24  ;;  %v10417_v23 = vpop.f32.mrf.mxu1 }
 0x580   :  { %5911 = vmatmul.msk.f32.vlgmr.msra.gmra.mxu2 %vm679_vm2, %v9628_v37 }
 0x581   :  { %2560 = vmatmul.f32.gmra.mxu1 %v9838_v60 }
 0x582   :  { %v10406_v13 = vpop.f32.mrf.mxu3 }
 0x584   :  { %5915 = vmatmul.msk.f32.vlgmr.msrb.gmra.mxu3 %vm679_vm2, %v9628_v37 }
 0x585   :  { %v10425_v37 = vpop.f32.mrf.mxu0 }
 0x586   :  { %2638 = vmatmul.f32.vlgmr.msrb.gmra.mxu0 %v9692_v2 }
 0x587   :  { %v10415_v28 = vpop.f32.mrf.mxu2 }
 0x588   :  { %5912 = vmatmul.msk.f32.gmra.mxu2 %vm679_vm2, %v9750_v5  ;;  %v10432_v43 = vpop.f32.mrf.mxu1 }
 0x589   :  { %2667 = vmatmul.f32.vlgmr.msra.gmra.mxu1 %v9659_v45 }
 0x58c   :  { %5916 = vmatmul.msk.f32.gmra.mxu3 %vm679_vm2, %v9750_v5  ;;  %v10422_v39 = vpop.f32.mrf.mxu3 }
 0x58e   :  { %2641 = vmatmul.f32.gmra.mxu0 %v9770_v15 }
 0x590   :  { %5913 = vmatmul.msk.f32.gmra.mxu2 %vm679_vm2, %v9798_v17  ;;  %v10442_v15 = vpop.f32.mrf.mxu0 }
 0x591   :  { %2670 = vmatmul.f32.gmra.mxu1 %v9740_v26  ;;  %v10430_v2 = vpop.f32.mrf.mxu2  ;;  %15473 = vst [vmem:[#allocation21_spill] sm:$0xff] %v10442_v15 }
 0x592   :  { %v10448_v5 = vpop.f32.mrf.mxu1 }
 0x593   :  { %15475 = vst [vmem:[#allocation28_spill] sm:$0xff] %v10448_v5 }
 0x594   :  { %5917 = vmatmul.msk.f32.gmra.mxu3 %vm679_vm2, %v9798_v17 }
 0x596   :  { %2644 = vmatmul.f32.gmra.mxu0 %v9809_v61  ;;  %v10437_v45 = vpop.f32.mrf.mxu3 }
 0x598   :  { %5914 = vmatmul.msk.f32.gmra.mxu2 %vm679_vm2, %v9825_v24 }
 0x599   :  { %2673 = vmatmul.f32.gmra.mxu1 %v9794_v42 }
 0x59b   :  { %v10446_v26 = vpop.f32.mrf.mxu2  ;;  %v2294_v61 = vpop.f32.mrf.mxu0 }
 0x59c   :  { %5918 = vmatmul.msk.f32.gmra.mxu3 %vm679_vm2, %v9825_v24  ;;  %15474 = vst [vmem:[#allocation27_spill] sm:$0xff] %v10446_v26 }
 0x59d   :  { %v2323_v35 = vpop.f32.mrf.mxu1 }
 0x59e   :  { %2647 = vmatmul.f32.gmra.mxu0 %v9838_v60 }
 0x5a0   :  { %v10452_v17 = vpop.f32.mrf.mxu3 }
 0x5a1   :  { %2676 = vmatmul.f32.gmra.mxu1 %v9821_v36  ;;  %15476 = vst [vmem:[#allocation25_spill] sm:$0xff] %v10452_v17 }
 0x5a4   :  { %v10454_v42 = vpop.f32.mrf.mxu0 }
 0x5a6   :  { %v2265_v19 = vpop.f32.mrf.mxu2  ;;  %v10458_v7 = vpop.f32.mrf.mxu1 }
 0x5a8   :  { %v2352_v11 = vpop.f32.mrf.mxu3 }
 0x5ac   :  { %v10462_v32 = vpop.f32.mrf.mxu0 }
 0x5af   :  { %v10456_v41 = vpop.f32.mrf.mxu2  ;;  %v10466_v60 = vpop.f32.mrf.mxu1 }
 0x5b4   :  { %v10460_v24 = vpop.f32.mrf.mxu3  ;;  %v10470_v40 = vpop.f32.mrf.mxu0 }
 0x5b5   :  { %15478 = vst [vmem:[#allocation31_spill] sm:$0xff] %v10470_v40 }
 0x5b8   :  { %v10464_v0 = vpop.f32.mrf.mxu2  ;;  %v10474_v29 = vpop.f32.mrf.mxu1 }
 0x5b9   :  { %15480 = vst [vmem:[#allocation10_spill] sm:$0xff] %v10474_v29 }
 0x5bd   :  { %v10468_v36 = vpop.f32.mrf.mxu3 }
 0x5be   :  { %15477 = vst [vmem:[#allocation24_spill] sm:$0xff] %v10468_v36  ;;  %v2324_v36 = vadd.f32 %v2323_v35, %v2294_v61  ;;  %v2240_v35 = vadd.f32 %v10422_v39, %v10417_v23 }
 0x5c2   :  { %v10472_v21 = vpop.f32.mrf.mxu2 }
 0x5c3   :  { %15479 = vst [vmem:[#allocation9_spill] sm:$0xff] %v10472_v21 }
 0x5c6   :  { %v10476_v31 = vpop.f32.mrf.mxu3 }
 0x5c7   :  { %15481 = vst [vmem:[#allocation12_spill] sm:$0xff] %v10476_v31 }
 0x5cb   :  { %v2381_v18 = vpop.f32.mrf.mxu2  ;;  %v2410_v14 = vpop.f32.mrf.mxu0 }
 0x5ce   :  { %v2439_v59 = vpop.f32.mrf.mxu1 }
 0x5cf   :  { %v2468_v50 = vpop.f32.mrf.mxu3 }
 0x5d3   :  { %v2384_v52 = vpop.f32.mrf.mxu2  ;;  %v2413_v9 = vpop.f32.mrf.mxu0 }
 0x5d6   :  { %v10478_v53 = vpop.f32.mrf.mxu1 }
 0x5d7   :  { %v10480_v27 = vpop.f32.mrf.mxu3 }
 0x5db   :  { %v10482_v10 = vpop.f32.mrf.mxu2  ;;  %v10484_v49 = vpop.f32.mrf.mxu0 }
 0x5de   :  { %v10486_v47 = vpop.f32.mrf.mxu1 }
 0x5df   :  { %15482 = vst [vmem:[#allocation41_spill] sm:$0xff] %v10486_v47  ;;  %v10488_v34 = vpop.f32.mrf.mxu3 }
 0x5e0   :  { %15483 = vst [vmem:[#allocation23_spill] sm:$0xff] %v10488_v34  ;;  %v2237_v34 = vadd.f32 %v10406_v13, %v10401_v44  ;;  %v2066_v44 = vadd.f32 %v10351_v57, %v10355_v25 }
 0x5e3   :  { %v10490_v29 = vpop.f32.mrf.mxu2  ;;  %v10492_v31 = vpop.f32.mrf.mxu0 }
 0x5e4   :  { %15484 = vst [vmem:[#allocation30_spill] sm:$0xff] %v10490_v29 }
 0x5e5   :  { %15485 = vst [vmem:[#allocation22_spill] sm:$0xff] %v10492_v31 }
 0x5e6   :  { %v10494_v17 = vpop.f32.mrf.mxu1 }
 0x5e7   :  { %15486 = vst [vmem:[#allocation13_spill] sm:$0xff] %v10494_v17  ;;  %v10496_v40 = vpop.f32.mrf.mxu3  ;;  %v2150_v17 = vadd.f32 %v10399_v58, %v10348_v20  ;;  %v2411_v20 = vadd.f32 %v2410_v14, %v2381_v18  ;;  %v10583_v14 = vadd.f32 %v10456_v41, %v2240_v35 }
 0x5e8   :  { %15487 = vst [vmem:[#allocation35_spill] sm:$0xff] %v10496_v40  ;;  %v2063_v40 = vadd.f32 %v10332_v30, %v10338_v16  ;;  %v2153_v30 = vadd.f32 %v10415_v28, %v10362_v48  ;;  %v10535_v16 = vld [vmem:[%s14971_s1 + $0x48] sm:$0xff]  ;;  %v10548_v48 = vld [vmem:[%s14971_s1 + $0x40] sm:$0xff] }
 0x5e9   :  { %v10517_v54 = vadd.f32 %v10394_v3, %v2150_v17  ;;  %v10555_v17 = vld [vmem:[%s14971_s1 + $0x50] sm:$0xff] }
 0x5ea   :  { %v10564_v25 = vadd.f32 %v10410_v63, %v2153_v30  ;;  %v10580_v63 = vadd.f32 %v10357_v22, %v2066_v44  ;;  %v10595_v22 = vld [vmem:[%s14971_s1 + $0x88] sm:$0xff] }
 0x5eb   :  { %v2497_v21 = vpop.f32.mrf.mxu2  ;;  %v2526_v26 = vpop.f32.mrf.mxu0  ;;  %v2718_v3 = vmul.f32 %v10535_v16, %v10517_v54 }
 0x5ee   :  { %v2555_v12 = vpop.f32.mrf.mxu1 }
 0x5ef   :  { %v2584_v5 = vpop.f32.mrf.mxu3 }
 0x5f0   :  { %v2585_v23 = vadd.f32 %v2584_v5, %v2555_v12  ;;  %v2726_v12 = vmul.f32 %v10595_v22, %v10564_v25  ;;  %v2156_v5 = vadd.f32 %v10430_v2, %v10377_v51  ;;  %v10617_v51 = vld [vmem:[%s14971_s1 + $0x80] sm:$0xff] }
 0x5f1   :  { %v2725_v2 = vmul.f32 %v10617_v51, %v10580_v63 }
 0x5f3   :  { %v2500_v15 = vpop.f32.mrf.mxu2  ;;  %v10498_v4 = vpop.f32.mrf.mxu0 }
 0x5f6   :  { %v10500_v55 = vpop.f32.mrf.mxu1 }
 0x5f7   :  { %v10502_v1 = vpop.f32.mrf.mxu3 }
 0x5fb   :  { %v10504_v47 = vpop.f32.mrf.mxu2  ;;  %v10506_v29 = vpop.f32.mrf.mxu0 }
 0x5fc   :  { %15488 = vst [vmem:[#allocation33_spill] sm:$0xff] %v10504_v47  ;;  %v10522_v47 = vadd.f32 %v10340_v38, %v2063_v40  ;;  %v10539_v38 = vadd.f32 %v2352_v11, %v2324_v36  ;;  %v2327_v11 = vadd.f32 %v10458_v7, %v10454_v42  ;;  %v10573_v40 = vld [vmem:[%s14971_s1 + $0x58] sm:$0xff]  ;;  %v10588_v42 = vld [vmem:[%s14971_s1 + $0x60] sm:$0xff] }
 0x5fd   :  { %15489 = vst [vmem:[#allocation34_spill] sm:$0xff] %v10506_v29  ;;  %v10524_v29 = vadd.f32 %v2265_v19, %v2237_v34  ;;  %v2498_v34 = vadd.f32 %v2497_v21, %v2468_v50  ;;  %v10559_v19 = vadd.f32 %v2439_v59, %v2411_v20  ;;  %v2414_v59 = vadd.f32 %v2413_v9, %v2384_v52  ;;  %v10609_v52 = vld [vmem:[%s14971_s1 + $0x68] sm:$0xff] }
 0x5fe   :  { %v10510_v31 = vpop.f32.mrf.mxu1  ;;  %v2717_v28 = vmul.f32 %v10548_v48, %v10522_v47  ;;  %15491 = vst [vmem:[#allocation17_spill] sm:$0xff] %v10573_v40  ;;  %v2720_v21 = vmul.f32 %v10573_v40, %v10539_v38  ;;  %v10602_v41 = vadd.f32 %v10460_v24, %v2327_v11  ;;  %v2069_v24 = vadd.f32 %v10366_v6, %v10370_v62 }
 0x5ff   :  { %15490 = vst [vmem:[#allocation20_spill] sm:$0xff] %v10510_v31  ;;  %v10514_v8 = vpop.f32.mrf.mxu3  ;;  %v2719_v61 = vmul.f32 %v10555_v17, %v10524_v29  ;;  %v10577_v18 = vadd.f32 %v2526_v26, %v2498_v34  ;;  %v2721_v7 = vmul.f32 %v10588_v42, %v10559_v19  ;;  %v10626_v34 = vld [vmem:[%s14971_s1 + $0x90] sm:$0xff]  ;;  %v2759_v11 = vadd.f32 %v2726_v12, %v2725_v2 }
 0x600   :  { %v2750_v36 = vadd.f32 %v2718_v3, %v2717_v28  ;;  %15492 = vst [vmem:[#allocation26_spill] sm:$0xff] %v10588_v42  ;;  %v2501_v3 = vadd.f32 %v2500_v15, %v10480_v27  ;;  %v2727_v44 = vmul.f32 %v10626_v34, %v10583_v14  ;;  %v10631_v28 = vadd.f32 %v10478_v53, %v2414_v59  ;;  %v10648_v53 = vld [vmem:[%s14971_s1 + $0x98] sm:$0xff] }
 0x601   :  { %15493 = vst [vmem:[#allocation42_spill] sm:$0xff] %v10609_v52  ;;  %v2722_v9 = vmul.f32 %v10609_v52, %v10577_v18 }
 0x602   :  { %v2751_v39 = vadd.f32 %v2750_v36, %v2719_v61  ;;  %v10636_v61 = vld [vmem:[%s14971_s1 + $0x70] sm:$0xff]  ;;  %v10641_v36 = vadd.f32 %v10425_v37, %v2156_v5  ;;  %v2147_v5 = vadd.f32 %v10384_v33, %v10328_v56  ;;  %v15503_v33 = vld [vmem:[#allocation23_spill] sm:$0xff] }
 0x603   :  { %v10526_v58 = vpop.f32.mrf.mxu2  ;;  %v10528_v31 = vpop.f32.mrf.mxu0  ;;  %15494 = vst [vmem:[#allocation18_spill] sm:$0xff] %v10636_v61 }
 0x604   :  { %v2752_v30 = vadd.f32 %v2751_v39, %v2720_v21  ;;  %15495 = vst [vmem:[#allocation32_spill] sm:$0xff] %v10641_v36  ;;  %v2243_v21 = vadd.f32 %v10437_v45, %v10432_v43  ;;  %v2330_v39 = vadd.f32 %v10466_v60, %v10462_v32  ;;  %v2760_v43 = vadd.f32 %v2759_v11, %v2727_v44  ;;  %v10670_v32 = vld [vmem:[%s14971_s1 + $0xa0] sm:$0xff]  ;;  %v15504_v44 = vld [vmem:[#allocation33_spill] sm:$0xff] }
 0x605   :  { %15498 = vst [vmem:[#allocation43_spill] sm:$0xff] %v10670_v32  ;;  %v2417_v60 = vadd.f32 %v10484_v49, %v10482_v10  ;;  %v10711_v11 = vld [vmem:[%s14971_s1 + $0xc0] sm:$0xff] }
 0x606   :  { %v10543_v13 = vpop.f32.mrf.mxu1  ;;  %v2753_v27 = vadd.f32 %v2752_v30, %v2721_v7  ;;  %v10655_v7 = vadd.f32 %v10498_v4, %v2501_v3  ;;  %v10663_v45 = vadd.f32 %v10464_v0, %v2243_v21  ;;  %v2729_v4 = vmul.f32 %v10670_v32, %v10631_v28  ;;  %v10679_v0 = vld [vmem:[%s14971_s1 + $0x78] sm:$0xff]  ;;  %v10688_v30 = vld [vmem:[%s14971_s1 + $0xc8] sm:$0xff]  ;;  %v15501_v3 = vld [vmem:[#allocation24_spill] sm:$0xff]  ;;  %15507 = vst [vmem:[#allocation23_spill] sm:$0xff] %v10711_v11 }
 0x607   :  { %v10561_v57 = vpop.f32.mrf.mxu3  ;;  %15499 = vst [vmem:[#allocation44_spill] sm:$0xff] %v10679_v0  ;;  %v2734_v49 = vmul.f32 %v10688_v30, %v10641_v36  ;;  %v10695_v2 = vadd.f32 %v15501_v3, %v2330_v39  ;;  %v15523_v36 = vld [vmem:[#allocation9_spill] sm:$0xff] }
 0x608   :  { %v2754_v37 = vadd.f32 %v2753_v27, %v2722_v9  ;;  %15497 = vst [vmem:[#allocation37_spill] sm:$0xff] %v10663_v45 }
 0x609   :  { %15500 = vst [vmem:[#allocation45_spill] sm:$0xff] %v10688_v30 }
 0x60b   :  { %v2613_v50 = vpop.f32.mrf.mxu2  ;;  %v2642_v26 = vpop.f32.mrf.mxu0 }
 0x60c   :  { %v10604_v20 = vadd.f32 %v2613_v50, %v2585_v23  ;;  %v2728_v23 = vmul.f32 %v10648_v53, %v10602_v41  ;;  %v10660_v50 = vadd.f32 %v10372_v46, %v2069_v24  ;;  %v10700_v24 = vld [vmem:[%s14971_s1 + $0xa8] sm:$0xff] }
 0x60d   :  { %15502 = vst [vmem:[#allocation24_spill] sm:$0xff] %v10700_v24  ;;  %v2730_v56 = vmul.f32 %v10700_v24, %v10655_v7 }
 0x60e   :  { %v2671_v15 = vpop.f32.mrf.mxu1  ;;  %v2723_v6 = vmul.f32 %v10636_v61, %v10604_v20  ;;  %15496 = vst [vmem:[#allocation19_spill] sm:$0xff] %v10660_v50  ;;  %v2761_v10 = vadd.f32 %v2760_v43, %v2728_v23  ;;  %v2733_v21 = vmul.f32 %v10711_v11, %v10660_v50  ;;  %v10718_v23 = vld [vmem:[%s14971_s1 + $0xd0] sm:$0xff]  ;;  %v10742_v11 = vld [vmem:[%s14971_s1 + $0xd8] sm:$0xff]  ;;  %v15524_v50 = vld [vmem:[#allocation31_spill] sm:$0xff] }
 0x60f   :  { %v2672_v62 = vadd.f32 %v2671_v15, %v2642_v26  ;;  %v2700_v35 = vpop.f32.mrf.mxu3  ;;  %v2588_v26 = vadd.f32 %v10502_v1, %v10500_v55  ;;  %v2504_v15 = vadd.f32 %v15504_v44, %v15503_v33  ;;  %15508 = vst [vmem:[#allocation33_spill] sm:$0xff] %v10718_v23  ;;  %v2735_v39 = vmul.f32 %v10718_v23, %v10663_v45  ;;  %v15511_v44 = vld [vmem:[#allocation38_spill] sm:$0xff]  ;;  %v15514_v23 = vld [vmem:[#allocation29_spill] sm:$0xff]  ;;  %v15518_v45 = vld [vmem:[#allocation11_spill] sm:$0xff] }
 0x610   :  { %v2755_v55 = vadd.f32 %v2754_v37, %v2723_v6  ;;  %v15505_v6 = vld [vmem:[#allocation36_spill] sm:$0xff]  ;;  %v2762_v43 = vadd.f32 %v2761_v10, %v2729_v4  ;;  %v2768_v10 = vadd.f32 %v2734_v49, %v2733_v21  ;;  %v15520_v49 = vld [vmem:[#allocation27_spill] sm:$0xff] }
 0x611   :  { %v10657_v59 = vadd.f32 %v2700_v35, %v2672_v62  ;;  %v15506_v62 = vld [vmem:[#allocation40_spill] sm:$0xff] }
 0x612   :  { %v2060_v35 = vadd.f32 %v15506_v62, %v15505_v6  ;;  %v10733_v6 = vadd.f32 %v15511_v44, %v2147_v5  ;;  %v15513_v62 = vld [vmem:[#allocation39_spill] sm:$0xff]  ;;  %v2763_v44 = vadd.f32 %v2762_v43, %v2730_v56  ;;  %v15528_v43 = vld [vmem:[#allocation25_spill] sm:$0xff] }
 0x613   :  { %v2616_v46 = vpop.f32.mrf.mxu2  ;;  %v2645_v12 = vpop.f32.mrf.mxu0  ;;  %v2724_v1 = vmul.f32 %v10679_v0, %v10657_v59  ;;  %v2234_v4 = vadd.f32 %v15514_v23, %v15513_v62  ;;  %v2769_v62 = vadd.f32 %v2768_v10, %v2735_v39 }
 0x614   :  { %v10692_v9 = vadd.f32 %v2616_v46, %v2588_v26  ;;  %v15509_v26 = vld [vmem:[#allocation41_spill] sm:$0xff]  ;;  %15512 = vst [vmem:[#allocation40_spill] sm:$0xff] %v10733_v6  ;;  %v10752_v23 = vadd.f32 %v15518_v45, %v2060_v35 }
 0x615   :  { %v2756_v27 = vadd.f32 %v2755_v55, %v2724_v1  ;;  %v10723_v46 = vadd.f32 %v15509_v26, %v2417_v60  ;;  %v10728_v1 = vld [vmem:[%s14971_s1 + $0xb0] sm:$0xff]  ;;  %v15515_v60 = vld [vmem:[#allocation21_spill] sm:$0xff]  ;;  %v10755_v21 = vadd.f32 %v15520_v49, %v2234_v4  ;;  %v15530_v4 = vld [vmem:[#allocation30_spill] sm:$0xff] }
 0x616   :  { %v2674_v37 = vpop.f32.mrf.mxu1  ;;  %15510 = vst [vmem:[#allocation36_spill] sm:$0xff] %v10728_v1  ;;  %v2731_v55 = vmul.f32 %v10728_v1, %v10692_v9  ;;  %v15516_v26 = vld [vmem:[#allocation28_spill] sm:$0xff]  ;;  %v2408_v1 = vadd.f32 %v15524_v50, %v15523_v36  ;;  %v10771_v35 = vld [vmem:[%s14971_s1 + $0xb8] sm:$0xff]  ;;  %v10778_v36 = vld [vmem:[%s14971_s1 + $0x8] sm:$0xff] }
 0x617   :  { %v2675_v3 = vadd.f32 %v2674_v37, %v2645_v12  ;;  %2757 = vadd.xlane.f32.xlu1 %v2756_v27  ;;  %v2703_v33 = vpop.f32.mrf.mxu3  ;;  %v2321_v30 = vadd.f32 %v15516_v26, %v15515_v60  ;;  %v2736_v12 = vmul.f32 %v10742_v11, %v10695_v2  ;;  %v15517_v27 = vld [vmem:[#allocation34_spill] sm:$0xff]  ;;  %15519 = vst [vmem:[#allocation41_spill] sm:$0xff] %v10752_v23  ;;  %v15522_v60 = vld [vmem:[#allocation20_spill] sm:$0xff] }
 0x618   :  { %v10747_v37 = vadd.f32 %v15517_v27, %v2504_v15  ;;  %15521 = vst [vmem:[#allocation38_spill] sm:$0xff] %v10755_v21  ;;  %v2591_v26 = vadd.f32 %v10514_v8, %v15522_v60  ;;  %v10764_v15 = vld [vmem:[%s14971_s1 + $0xe0] sm:$0xff]  ;;  %v2764_v39 = vadd.f32 %v2763_v44, %v2731_v55  ;;  %v2710_v50 = vmul.f32 %v10778_v36, %v10733_v6  ;;  %v10792_v55 = vld [vmem:[%s14971_s1 + $0xe8] sm:$0xff] }
 0x619   :  { %v10749_v5 = vadd.f32 %v2703_v33, %v2675_v3  ;;  %15525 = vst [vmem:[#allocation39_spill] sm:$0xff] %v10764_v15  ;;  %v2737_v56 = vmul.f32 %v10764_v15, %v10723_v46  ;;  %v10783_v3 = vadd.f32 %v15528_v43, %v2321_v30  ;;  %v15529_v33 = vld [vmem:[#allocation12_spill] sm:$0xff]  ;;  %v2770_v60 = vadd.f32 %v2769_v62, %v2736_v12  ;;  %v10799_v30 = vld [vmem:[%s14971_s1] sm:$0xff] }
 0x61a   :  { %15526 = vst [vmem:[#allocation29_spill] sm:$0xff] %v10771_v35  ;;  %v2495_v10 = vadd.f32 %v15530_v4, %v15529_v33  ;;  %v2738_v44 = vmul.f32 %v10792_v55, %v10747_v37  ;;  %v10806_v12 = vld [vmem:[%s14971_s1 + $0x10] sm:$0xff]  ;;  %v15533_v43 = vld [vmem:[#allocation10_spill] sm:$0xff] }
 0x61b   :  { %v2619_v45 = vpop.f32.mrf.mxu2  ;;  %v2732_v8 = vmul.f32 %v10771_v35, %v10749_v5  ;;  %15527 = vst [vmem:[#allocation21_spill] sm:$0xff] %v10778_v36  ;;  %v2648_v49 = vpop.f32.mrf.mxu0  ;;  %v2711_v62 = vmul.f32 %v10806_v12, %v10755_v21  ;;  %v10811_v33 = vadd.f32 %v15533_v43, %v2408_v1  ;;  %v15537_v43 = vld [vmem:[#allocation13_spill] sm:$0xff]  ;;  %v15538_v21 = vld [vmem:[#allocation35_spill] sm:$0xff] }
 0x61c   :  { %v10787_v27 = vadd.f32 %v2619_v45, %v2591_v26  ;;  %15531 = vst [vmem:[#allocation28_spill] sm:$0xff] %v10799_v30  ;;  %v2709_v26 = vmul.f32 %v10799_v30, %v10752_v23  ;;  %v2582_v23 = vadd.f32 %v15538_v21, %v15537_v43  ;;  %v10849_v21 = vld [vmem:[%s14971_s1 + $0xf8] sm:$0xff] }
 0x61d   :  { %v2765_v15 = vadd.f32 %v2764_v39, %v2732_v8  ;;  %15532 = vst [vmem:[#allocation34_spill] sm:$0xff] %v10806_v12  ;;  %v2771_v8 = vadd.f32 %v2770_v60, %v2737_v56  ;;  %v10816_v39 = vld [vmem:[%s14971_s1 + $0xf0] sm:$0xff]  ;;  %v10823_v12 = vld [vmem:[%s14971_s1 + $0x18] sm:$0xff]  ;;  %v15536_v56 = vld [vmem:[#allocation22_spill] sm:$0xff] }
 0x61e   :  { %v2677_v45 = vpop.f32.mrf.mxu1  ;;  %15534 = vst [vmem:[#allocation11_spill] sm:$0xff] %v10816_v39  ;;  %v2739_v4 = vmul.f32 %v10816_v39, %v10787_v27  ;;  %v2741_v6 = vadd.f32 %v2710_v50, %v2709_v26  ;;  %v2712_v1 = vmul.f32 %v10823_v12, %v10783_v3  ;;  %v10828_v60 = vadd.f32 %v15536_v56, %v2495_v10 }
 0x61f   :  { %v2678_v36 = vadd.f32 %v2677_v45, %v2648_v49  ;;  %2766 = vadd.xlane.f32.xlu2 %v2765_v15  ;;  %v2706_v30 = vpop.f32.mrf.mxu3  ;;  %15535 = vst [vmem:[#allocation27_spill] sm:$0xff] %v10823_v12  ;;  %v2669_v49 = vadd.f32 %v10543_v13, %v10528_v31  ;;  %v2772_v50 = vadd.f32 %v2771_v8, %v2738_v44  ;;  %v10839_v45 = vld [vmem:[%s14971_s1 + $0x20] sm:$0xff] }
 0x620   :  { %v2742_v26 = vadd.f32 %v2741_v6, %v2711_v62  ;;  %v2713_v12 = vmul.f32 %v10839_v45, %v10811_v33  ;;  %v10844_v10 = vadd.f32 %v10526_v58, %v2582_v23  ;;  %15539 = vst [vmem:[#allocation20_spill] sm:$0xff] %v10849_v21  ;;  %v10866_v62 = vld [vmem:[%s14971_s1 + $0x30] sm:$0xff] }
 0x621   :  { %v10834_v15 = vadd.f32 %v2706_v30, %v2678_v36  ;;  %v2773_v13 = vadd.f32 %v2772_v50, %v2739_v4  ;;  %v10856_v36 = vld [vmem:[%s14971_s1 + $0x28] sm:$0xff]  ;;  %v10861_v58 = vadd.f32 %v10561_v57, %v2669_v49  ;;  %15540 = vst [vmem:[#allocation9_spill] sm:$0xff] %v10866_v62  ;;  %v10873_v4 = vld [vmem:[%s14971_s1 + $0x38] sm:$0xff] }
 0x622   :  { %v2743_v6 = vadd.f32 %v2742_v26, %v2712_v1  ;;  %v2714_v44 = vmul.f32 %v10856_v36, %v10828_v60  ;;  %v2715_v8 = vmul.f32 %v10866_v62, %v10844_v10  ;;  %15541 = vst [vmem:[#allocation31_spill] sm:$0xff] %v10873_v4 }
 0x623   :  { %v2740_v31 = vmul.f32 %v10849_v21, %v10834_v15  ;;  %v2716_v57 = vmul.f32 %v10873_v4, %v10861_v58 }
 0x624   :  { %v2744_v30 = vadd.f32 %v2743_v6, %v2713_v12 }
 0x625   :  { %v2774_v23 = vadd.f32 %v2773_v13, %v2740_v31 }
 0x626   :  { %v2745_v1 = vadd.f32 %v2744_v30, %v2714_v44 }
 0x627   :  { %2775 = vadd.xlane.f32.xlu0 %v2774_v23 }
 0x628   :  { %v2746_v56 = vadd.f32 %v2745_v1, %v2715_v8 }
 0x62a   :  { %v2747_v12 = vadd.f32 %v2746_v56, %v2716_v57 }
 0x62f   :  { %2748 = vadd.xlane.f32.xlu0 %v2747_v12 }
 0x68a   :  { %v2758_v43 = vpop.xlane.xlu1 %2757 }
 0x68b   :  { %v2778_v49 = vmul.f32 0.0078125, %v2758_v43 }
 0x68d   :  { %v2789_v50 = vsub.f32 %v10522_v47, %v2778_v49  ;;  %v2790_v26 = vsub.f32 %v10517_v54, %v2778_v49  ;;  %v2791_v31 = vsub.f32 %v10524_v29, %v2778_v49  ;;  %v2792_v13 = vsub.f32 %v10539_v38, %v2778_v49 }
 0x68e   :  { %v2793_v6 = vsub.f32 %v10559_v19, %v2778_v49  ;;  %v2794_v8 = vsub.f32 %v10577_v18, %v2778_v49  ;;  %v2795_v19 = vsub.f32 %v10604_v20, %v2778_v49  ;;  %v2796_v57 = vsub.f32 %v10657_v59, %v2778_v49 }
 0x68f   :  { %v10883_v23 = vmul.f32 %v10548_v48, %v2789_v50  ;;  %v10886_v44 = vmul.f32 %v10535_v16, %v2790_v26  ;;  %v10889_v30 = vmul.f32 %v10555_v17, %v2791_v31  ;;  %v10893_v47 = vmul.f32 %v10573_v40, %v2792_v13 }
 0x690   :  { %v10902_v1 = vmul.f32 %v10588_v42, %v2793_v6  ;;  %v10907_v43 = vmul.f32 %v10609_v52, %v2794_v8  ;;  %v10915_v49 = vmul.f32 %v10636_v61, %v2795_v19  ;;  %v10918_v13 = vmul.f32 %v10679_v0, %v2796_v57  ;;  %v15555_v42 = vld [vmem:[#allocation41_spill] sm:$0xff] }
 0x691   :  { %v2853_v54 = vmul.f32 %v10883_v23, %v10883_v23  ;;  %v2854_v29 = vmul.f32 %v10886_v44, %v10886_v44  ;;  %v2855_v18 = vmul.f32 %v10889_v30, %v10889_v30  ;;  %v2856_v50 = vmul.f32 %v10893_v47, %v10893_v47 }
 0x692   :  { %v2767_v38 = vpop.xlane.xlu2 %2766  ;;  %15542 = vst [vmem:[#allocation25_spill] sm:$0xff] %v10902_v1  ;;  %v2857_v6 = vmul.f32 %v10902_v1, %v10902_v1  ;;  %v2858_v57 = vmul.f32 %v10907_v43, %v10907_v43  ;;  %v15557_v1 = vld [vmem:[#allocation38_spill] sm:$0xff] }
 0x693   :  { %v2779_v56 = vmul.f32 0.0078125, %v2767_v38  ;;  %v2886_v12 = vadd.f32 %v2854_v29, %v2853_v54  ;;  %15543 = vst [vmem:[#allocation12_spill] sm:$0xff] %v10907_v43 }
 0x694   :  { %15544 = vst [vmem:[#allocation30_spill] sm:$0xff] %v10915_v49 }
 0x695   :  { %v2887_v26 = vadd.f32 %v2886_v12, %v2855_v18  ;;  %v2797_v31 = vsub.f32 %v10580_v63, %v2779_v56  ;;  %v2798_v20 = vsub.f32 %v10564_v25, %v2779_v56  ;;  %v2799_v59 = vsub.f32 %v10583_v14, %v2779_v56  ;;  %15545 = vst [vmem:[#allocation10_spill] sm:$0xff] %v10918_v13 }
 0x696   :  { %v2800_v8 = vsub.f32 %v10602_v41, %v2779_v56  ;;  %v2801_v29 = vsub.f32 %v10631_v28, %v2779_v56  ;;  %v2802_v14 = vsub.f32 %v10655_v7, %v2779_v56  ;;  %v2803_v38 = vsub.f32 %v10692_v9, %v2779_v56 }
 0x697   :  { %v2888_v54 = vadd.f32 %v2887_v26, %v2856_v50  ;;  %v10925_v63 = vmul.f32 %v10617_v51, %v2797_v31  ;;  %v10928_v25 = vmul.f32 %v10595_v22, %v2798_v20  ;;  %v10933_v19 = vmul.f32 %v10626_v34, %v2799_v59 }
 0x698   :  { %v2859_v12 = vmul.f32 %v10915_v49, %v10915_v49  ;;  %v2860_v50 = vmul.f32 %v10918_v13, %v10918_v13  ;;  %v10944_v7 = vmul.f32 %v10648_v53, %v2800_v8  ;;  %v2804_v20 = vsub.f32 %v10749_v5, %v2779_v56  ;;  %v15548_v49 = vld [vmem:[#allocation19_spill] sm:$0xff] }
 0x699   :  { %v2889_v41 = vadd.f32 %v2888_v54, %v2857_v6  ;;  %v2861_v28 = vmul.f32 %v10925_v63, %v10925_v63  ;;  %v2862_v9 = vmul.f32 %v10928_v25, %v10928_v25  ;;  %v10950_v59 = vmul.f32 %v10670_v32, %v2801_v29  ;;  %v15547_v54 = vld [vmem:[#allocation36_spill] sm:$0xff] }
 0x69a   :  { %v2776_v18 = vpop.xlane.xlu0 %2775  ;;  %v10953_v6 = vmul.f32 %v10700_v24, %v2802_v14  ;;  %v10956_v0 = vmul.f32 %v15547_v54, %v2803_v38  ;;  %v2863_v8 = vmul.f32 %v10933_v19, %v10933_v19  ;;  %v2864_v56 = vmul.f32 %v10944_v7, %v10944_v7 }
 0x69b   :  { %v2780_v26 = vmul.f32 0.0078125, %v2776_v18  ;;  %v2890_v31 = vadd.f32 %v2889_v41, %v2858_v57  ;;  %v2895_v13 = vadd.f32 %v2862_v9, %v2861_v28  ;;  %v15549_v18 = vld [vmem:[#allocation32_spill] sm:$0xff]  ;;  %v15550_v41 = vld [vmem:[#allocation37_spill] sm:$0xff]  ;;  %v10967_v38 = vmul.f32 %v10771_v35, %v2804_v20  ;;  %v15551_v28 = vld [vmem:[#allocation23_spill] sm:$0xff] }
 0x69c   :  { %15546 = vst [vmem:[#allocation22_spill] sm:$0xff] %v10953_v6 }
 0x69d   :  { %v2891_v61 = vadd.f32 %v2890_v31, %v2859_v12  ;;  %v2805_v52 = vsub.f32 %v15548_v49, %v2780_v26  ;;  %v2806_v57 = vsub.f32 %v15549_v18, %v2780_v26  ;;  %v2807_v5 = vsub.f32 %v15550_v41, %v2780_v26  ;;  %v15552_v31 = vld [vmem:[#allocation45_spill] sm:$0xff] }
 0x69e   :  { %v2896_v29 = vadd.f32 %v2895_v13, %v2863_v8  ;;  %v2808_v14 = vsub.f32 %v10695_v2, %v2780_v26  ;;  %v2809_v54 = vsub.f32 %v10723_v46, %v2780_v26  ;;  %v2865_v49 = vmul.f32 %v10950_v59, %v10950_v59  ;;  %v15553_v41 = vld [vmem:[#allocation33_spill] sm:$0xff] }
 0x69f   :  { %v2892_v24 = vadd.f32 %v2891_v61, %v2860_v50  ;;  %v10971_v12 = vmul.f32 %v15551_v28, %v2805_v52  ;;  %v10976_v18 = vmul.f32 %v15552_v31, %v2806_v57  ;;  %v10979_v13 = vmul.f32 %v15553_v41, %v2807_v5 }
 0x6a0   :  { %v2897_v9 = vadd.f32 %v2896_v29, %v2864_v56  ;;  %v2866_v61 = vmul.f32 %v10953_v6, %v10953_v6  ;;  %v2867_v2 = vmul.f32 %v10956_v0, %v10956_v0  ;;  %v2810_v52 = vsub.f32 %v10747_v37, %v2780_v26  ;;  %v15554_v29 = vld [vmem:[#allocation39_spill] sm:$0xff]  ;;  %v15556_v6 = vld [vmem:[#allocation40_spill] sm:$0xff] }
 0x6a1   :  { %2893 = vadd.xlane.f32.xlu0 %v2892_v24  ;;  %v10987_v20 = vmul.f32 %v10742_v11, %v2808_v14  ;;  %v2869_v8 = vmul.f32 %v10971_v12, %v10971_v12  ;;  %v2870_v57 = vmul.f32 %v10976_v18, %v10976_v18  ;;  %v2868_v5 = vmul.f32 %v10967_v38, %v10967_v38 }
 0x6a2   :  { %v2749_v46 = vpop.xlane.xlu0 %2748  ;;  %v2898_v50 = vadd.f32 %v2897_v9, %v2865_v49  ;;  %v2811_v56 = vsub.f32 %v10787_v27, %v2780_v26  ;;  %v10997_v35 = vmul.f32 %v15554_v29, %v2809_v54  ;;  %v2812_v49 = vsub.f32 %v10834_v15, %v2780_v26 }
 0x6a3   :  { %v2777_v24 = vmul.f32 0.0078125, %v2749_v46  ;;  %v2871_v14 = vmul.f32 %v10979_v13, %v10979_v13  ;;  %v2904_v9 = vadd.f32 %v2870_v57, %v2869_v8  ;;  %v11003_v43 = vmul.f32 %v10792_v55, %v2810_v52 }
 0x6a4   :  { %v2899_v37 = vadd.f32 %v2898_v50, %v2866_v61  ;;  %v2872_v54 = vmul.f32 %v10987_v20, %v10987_v20  ;;  %v11012_v26 = vmul.f32 %v10816_v39, %v2811_v56  ;;  %v2873_v52 = vmul.f32 %v10997_v35, %v10997_v35  ;;  %v15558_v50 = vld [vmem:[#allocation28_spill] sm:$0xff]  ;;  %v15561_v39 = vld [vmem:[#allocation27_spill] sm:$0xff] }
 0x6a5   :  { %v2781_v46 = vsub.f32 %v15555_v42, %v2777_v24  ;;  %v2782_v32 = vsub.f32 %v15556_v6, %v2777_v24  ;;  %v2783_v40 = vsub.f32 %v15557_v1, %v2777_v24  ;;  %v2905_v61 = vadd.f32 %v2904_v9, %v2871_v14  ;;  %v15559_v42 = vld [vmem:[#allocation21_spill] sm:$0xff] }
 0x6a6   :  { %v2900_v27 = vadd.f32 %v2899_v37, %v2867_v2  ;;  %v2784_v15 = vsub.f32 %v10783_v3, %v2777_v24  ;;  %v2785_v57 = vsub.f32 %v10811_v33, %v2777_v24  ;;  %v15560_v37 = vld [vmem:[#allocation34_spill] sm:$0xff]  ;;  %v11027_v3 = vmul.f32 %v10849_v21, %v2812_v49 }
 0x6a7   :  { %v11017_v8 = vmul.f32 %v15558_v50, %v2781_v46  ;;  %v11020_v6 = vmul.f32 %v15559_v42, %v2782_v32  ;;  %v2906_v2 = vadd.f32 %v2905_v61, %v2872_v54  ;;  %v11024_v14 = vmul.f32 %v15560_v37, %v2783_v40 }
 0x6a8   :  { %v2901_v1 = vadd.f32 %v2900_v27, %v2868_v5  ;;  %v2874_v56 = vmul.f32 %v11003_v43, %v11003_v43  ;;  %v2786_v9 = vsub.f32 %v10828_v60, %v2777_v24  ;;  %v11033_v32 = vmul.f32 %v15561_v39, %v2784_v15 }
 0x6a9   :  { %v2907_v46 = vadd.f32 %v2906_v2, %v2873_v52  ;;  %v2845_v5 = vmul.f32 %v11017_v8, %v11017_v8  ;;  %v2846_v40 = vmul.f32 %v11020_v6, %v11020_v6  ;;  %v2875_v33 = vmul.f32 %v11012_v26, %v11012_v26 }
 0x6aa   :  { %2902 = vadd.xlane.f32.xlu1 %v2901_v1  ;;  %v2787_v49 = vsub.f32 %v10844_v10, %v2777_v24  ;;  %v11043_v54 = vmul.f32 %v10839_v45, %v2785_v57  ;;  %v2847_v60 = vmul.f32 %v11024_v14, %v11024_v14  ;;  %v2876_v15 = vmul.f32 %v11027_v3, %v11027_v3 }
 0x6ab   :  { %v2908_v27 = vadd.f32 %v2907_v46, %v2874_v56  ;;  %v2877_v61 = vadd.f32 %v2846_v40, %v2845_v5  ;;  %v2788_v52 = vsub.f32 %v10861_v58, %v2777_v24  ;;  %v11051_v2 = vmul.f32 %v10856_v36, %v2786_v9 }
 0x6ac   :  { %v2848_v10 = vmul.f32 %v11033_v32, %v11033_v32  ;;  %v11056_v57 = vmul.f32 %v10866_v62, %v2787_v49  ;;  %v2849_v5 = vmul.f32 %v11043_v54, %v11043_v54 }
 0x6ad   :  { %v2909_v1 = vadd.f32 %v2908_v27, %v2875_v33  ;;  %v2878_v56 = vadd.f32 %v2877_v61, %v2847_v60  ;;  %v11061_v21 = vmul.f32 %v10873_v4, %v2788_v52  ;;  %v2850_v58 = vmul.f32 %v11051_v2, %v11051_v2  ;;  %v5925_v61 = vld [vmem:[%s14977_s7 + $0x30] sm:$0xff] }
 0x6ae   :  { %v2851_v9 = vmul.f32 %v11056_v57, %v11056_v57 }
 0x6af   :  { %v2910_v46 = vadd.f32 %v2909_v1, %v2876_v15  ;;  %v2879_v40 = vadd.f32 %v2878_v56, %v2848_v10  ;;  %15562 = vst [vmem:[#allocation13_spill] sm:$0xff] %v11061_v21  ;;  %v2852_v49 = vmul.f32 %v11061_v21, %v11061_v21  ;;  %v5926_v15 = vld [vmem:[%s14977_s7 + $0x38] sm:$0xff] }
 0x6b1   :  { %2911 = vadd.xlane.f32.xlu2 %v2910_v46  ;;  %v2880_v24 = vadd.f32 %v2879_v40, %v2849_v5 }
 0x6b3   :  { %v2881_v33 = vadd.f32 %v2880_v24, %v2850_v58 }
 0x6b5   :  { %v2882_v27 = vadd.f32 %v2881_v33, %v2851_v9 }
 0x6b7   :  { %v2883_v60 = vadd.f32 %v2882_v27, %v2852_v49 }
 0x6b9   :  { %2884 = vadd.xlane.f32.xlu2 %v2883_v60 }
 0x6c3   :  { %3039 = vperm.xlu1 %6056, %v5925_v61  }
 0x6d1   :  { %3044 = vperm.xlu2 %6057, %v5926_v15   ;;  %v5920_v15 = vld [vmem:[%s14976_s6 + $0x28] sm:$0xff] }
 0x714   :  { %v2894_v52 = vpop.xlane.xlu0 %2893 }
 0x715   :  { %v2914_v1 = vmul.f32 0.0078125, %v2894_v52 }
 0x717   :  { %v2923_v10 = vadd.f32 1e-05, %v2914_v1 }
 0x719   :  { %6707 = vrsqrt.f32 %v2923_v10  ;;  %vm2942_vm3 = vweird.f32 %v2923_v10 }
 0x71d   :  { %v2903_v56 = vpop.xlane.xlu1 %2902 }
 0x71e   :  { %v2915_v46 = vmul.f32 0.0078125, %v2903_v56 }
 0x71f   :  { %v6708_v5 = vpop.eup %6707 }
 0x720   :  { %v2937_v40 = vmul.f32 %v6708_v5, %v2923_v10  ;;  %v2924_v58 = vadd.f32 1e-05, %v2915_v46  ;;  %vm2943_vm15 = vweird.f32 %v6708_v5 }
 0x721   :  { %vm2944_vm4 = vmor %vm2942_vm3, %vm2943_vm15 }
 0x722   :  { %v2938_v24 = vmul.f32 %v6708_v5, %v2937_v40  ;;  %6709 = vrsqrt.f32 %v2924_v58  ;;  %vm2952_vm6 = vweird.f32 %v2924_v58 }
 0x724   :  { %v2939_v9 = vmul.f32 0.5, %v2938_v24  ;;  %v2912_v33 = vpop.xlane.xlu2 %2911 }
 0x725   :  { %v2916_v27 = vmul.f32 0.0078125, %v2912_v33 }
 0x726   :  { %v2940_v49 = vsub.f32 1.5, %v2939_v9 }
 0x727   :  { %v2925_v61 = vadd.f32 1e-05, %v2916_v27 }
 0x728   :  { %v6710_v60 = vpop.eup %6709  ;;  %v2941_v52 = vmul.f32 %v6708_v5, %v2940_v49  ;;  %v5921_v49 = vld [vmem:[%s14976_s6 + $0x30] sm:$0xff] }
 0x729   :  { %v2947_v1 = vmul.f32 %v6710_v60, %v2924_v58  ;;  %6711 = vrsqrt.f32 %v2925_v61  ;;  %vm2953_vm5 = vweird.f32 %v6710_v60  ;;  %vm2962_vm9 = vweird.f32 %v2925_v61  ;;  %v5922_v58 = vld [vmem:[%s14976_s6 + $0x38] sm:$0xff] }
 0x72a   :  { %v2945_v56 = vsel %vm2944_vm4, %v6708_v5, %v2941_v52  ;;  %vm2954_vm7 = vmor %vm2952_vm6, %vm2953_vm5 }
 0x72b   :  { %v2948_v46 = vmul.f32 %v6710_v60, %v2947_v1  ;;  %v2967_v40 = vmul.f32 %v5920_v15, %v2945_v56 }
 0x72c   :  { %v2885_v24 = vpop.xlane.xlu2 %2884 }
 0x72d   :  { %v2949_v4 = vmul.f32 0.5, %v2948_v46  ;;  %2977 = vperm.xlu0 %6058, %v2967_v40   ;;  %v2913_v9 = vmul.f32 0.0078125, %v2885_v24 }
 0x72f   :  { %v2950_v21 = vsub.f32 1.5, %v2949_v4  ;;  %v6712_v33 = vpop.eup %6711  ;;  %v2922_v10 = vadd.f32 1e-05, %v2913_v9 }
 0x730   :  { %v2957_v27 = vmul.f32 %v6712_v33, %v2925_v61  ;;  %vm2963_vm8 = vweird.f32 %v6712_v33  ;;  %v5919_v61 = vld [vmem:[%s14976_s6 + $0x20] sm:$0xff] }
 0x731   :  { %v2951_v62 = vmul.f32 %v6710_v60, %v2950_v21  ;;  %6713 = vrsqrt.f32 %v2922_v10  ;;  %vm2964_vm10 = vmor %vm2962_vm9, %vm2963_vm8  ;;  %vm2932_vm12 = vweird.f32 %v2922_v10 }
 0x732   :  { %v2958_v5 = vmul.f32 %v6712_v33, %v2957_v27 }
 0x733   :  { %v2955_v52 = vsel %vm2954_vm7, %v6710_v60, %v2951_v62  ;;  %v5924_v62 = vld [vmem:[%s14977_s7 + $0x28] sm:$0xff] }
 0x734   :  { %v2968_v15 = vmul.f32 %v5921_v49, %v2955_v52  ;;  %v2959_v1 = vmul.f32 0.5, %v2958_v5 }
 0x736   :  { %2982 = vperm.xlu0 %6058, %v2968_v15   ;;  %v2960_v56 = vsub.f32 1.5, %v2959_v1  ;;  %v11095_v1 = vpop.permute.xlu1 %3039 }
 0x737   :  { %v6714_v4 = vpop.eup %6713 }
 0x738   :  { %v2927_v46 = vmul.f32 %v6714_v4, %v2922_v10  ;;  %v2961_v40 = vmul.f32 %v6712_v33, %v2960_v56  ;;  %vm2933_vm11 = vweird.f32 %v6714_v4 }
 0x739   :  { %vm2934_vm13 = vmor %vm2932_vm12, %vm2933_vm11 }
 0x73a   :  { %v2928_v24 = vmul.f32 %v6714_v4, %v2927_v46  ;;  %v2965_v21 = vsel %vm2964_vm10, %v6712_v33, %v2961_v40  ;;  %v5923_v33 = vld [vmem:[%s14977_s7 + $0x20] sm:$0xff] }
 0x73b   :  { %v2969_v60 = vmul.f32 %v5922_v58, %v2965_v21  ;;  %v11103_v58 = vpop.permute.xlu2 %3044 }
 0x73c   :  { %v2929_v9 = vmul.f32 0.5, %v2928_v24 }
 0x73d   :  { %2987 = vperm.xlu1 %6056, %v2969_v60  }
 0x73e   :  { %3034 = vperm.xlu0 %6058, %v5924_v62   ;;  %v2930_v27 = vsub.f32 1.5, %v2929_v9 }
 0x740   :  { %v2931_v49 = vmul.f32 %v6714_v4, %v2930_v27 }
 0x742   :  { %v2935_v5 = vsel %vm2934_vm13, %v6714_v4, %v2931_v49 }
 0x743   :  { %v2966_v52 = vmul.f32 %v5919_v61, %v2935_v5 }
 0x745   :  { %3029 = vperm.xlu1 %6056, %v5923_v33   ;;  %2972 = vperm.xlu2 %6057, %v2966_v52  }
 0x79f   :  { %v11093_v15 = vpop.permute.xlu0 %2977  ;;  %v11127_v61 = vpop.permute.xlu2 %2972 }
 0x7a8   :  { %v11097_v56 = vpop.permute.xlu0 %2982 }
 0x7a9   :  { %v3012_v10 = vmul.f32 %v11097_v56, %v10956_v0  ;;  %v3013_v46 = vmul.f32 %v11097_v56, %v10967_v38  ;;  %v3006_v24 = vmul.f32 %v11097_v56, %v10925_v63  ;;  %v3007_v0 = vmul.f32 %v11097_v56, %v10928_v25 }
 0x7aa   :  { %v2998_v38 = vmul.f32 %v11093_v15, %v10883_v23  ;;  %v2999_v23 = vmul.f32 %v11093_v15, %v10886_v44  ;;  %v2990_v44 = vmul.f32 %v11127_v61, %v11017_v8 }
 0x7ab   :  { %v11106_v40 = vadd.f32 %v11095_v1, %v3012_v10  ;;  %v11109_v4 = vadd.f32 %v11095_v1, %v3013_v46  ;;  %v3063_v60 = vadd.f32 %v11095_v1, %v3006_v24  ;;  %v3064_v33 = vadd.f32 %v11095_v1, %v3007_v0 }
 0x7ac   :  { %v2991_v46 = vmul.f32 %v11127_v61, %v11020_v6 }
 0x7ad   :  { %v11135_v5 = vmul.f32 %v10617_v51, %v3063_v60 }
 0x7af   :  { %v11113_v21 = vpop.permute.xlu1 %2987 }
 0x7b0   :  { %v11115_v62 = vpop.permute.xlu0 %3034  ;;  %v3015_v9 = vmul.f32 %v11113_v21, %v10976_v18  ;;  %v3014_v27 = vmul.f32 %v11113_v21, %v10971_v12 }
 0x7b1   :  { %v3055_v63 = vadd.f32 %v11115_v62, %v2998_v38  ;;  %v3056_v10 = vadd.f32 %v11115_v62, %v2999_v23  ;;  %v3020_v38 = vmul.f32 %v11113_v21, %v11012_v26  ;;  %v3021_v26 = vmul.f32 %v11113_v21, %v11027_v3 }
 0x7b2   :  { %v3072_v49 = vadd.f32 %v11103_v58, %v3015_v9  ;;  %v3071_v25 = vadd.f32 %v11103_v58, %v3014_v27  ;;  %v3008_v9 = vmul.f32 %v11097_v56, %v10933_v19  ;;  %v3000_v3 = vmul.f32 %v11093_v15, %v10889_v30 }
 0x7b3   :  { %v11144_v52 = vmul.f32 %v10548_v48, %v3055_v63  ;;  %v11166_v8 = vmul.f32 %v10535_v16, %v3056_v10  ;;  %v11196_v27 = vadd.f32 %v11103_v58, %v3021_v26  ;;  %v3017_v19 = vmul.f32 %v11113_v21, %v10987_v20 }
 0x7b4   :  { %v11138_v18 = vmul.f32 %v15552_v31, %v3072_v49  ;;  %v11141_v12 = vmul.f32 %v15551_v28, %v3071_v25  ;;  %v11155_v31 = vmul.f32 %v10595_v22, %v3064_v33  ;;  %v2992_v49 = vmul.f32 %v11127_v61, %v11024_v14 }
 0x7b5   :  { %v3057_v23 = vadd.f32 %v11115_v62, %v3000_v3  ;;  %v3074_v20 = vadd.f32 %v11103_v58, %v3017_v19 }
 0x7b6   :  { %3365 = vmatpush.msra.mxu0 %v11138_v18  ;;  %v6384_v28 = vpack.i.bf16 %v11135_v5, %v11141_v12  ;;  %v6394_v48 = vpack.i.bf16 %v11144_v52, %v11138_v18 }
 0x7b7   :  { %v11152_v51 = vpop.permute.xlu1 %3029 }
 0x7b8   :  { %v3048_v24 = vadd.f32 %v11152_v51, %v2991_v46  ;;  %v3047_v6 = vadd.f32 %v11152_v51, %v2990_v44  ;;  %3366 = vmatpush.msra.mxu0 %v11155_v31  ;;  %6385 = vrot.lane.b32.xlu2 %v6384_v28, %s6919_s24  ;;  %v3049_v33 = vadd.f32 %v11152_v51, %v2992_v49 }
 0x7b9   :  { %6395 = vrot.lane.b32.xlu0 %v6394_v48, %s6919_s24  ;;  %v11226_v46 = vmul.f32 %v10555_v17, %v3057_v23  ;;  %v2993_v44 = vmul.f32 %v11127_v61, %v11033_v32  ;;  %v3018_v32 = vmul.f32 %v11113_v21, %v10997_v35 }
 0x7ba   :  { %v11170_v22 = vmul.f32 %v15559_v42, %v3048_v24  ;;  %v11173_v0 = vmul.f32 %v15558_v50, %v3047_v6  ;;  %3367 = vmatpush.msra.mxu0 %v11166_v8  ;;  %v11185_v42 = vadd.f32 %v11103_v58, %v3020_v38  ;;  %v3016_v50 = vmul.f32 %v11113_v21, %v10979_v13  ;;  %v15563_v38 = vld [vmem:[#allocation17_spill] sm:$0xff] }
 0x7bb   :  { %v3065_v13 = vadd.f32 %v11095_v1, %v3008_v9  ;;  %v11218_v10 = vmul.f32 %v15560_v37, %v3049_v33  ;;  %v3001_v37 = vmul.f32 %v11093_v15, %v10893_v47  ;;  %v3010_v6 = vmul.f32 %v11097_v56, %v10950_v59 }
 0x7bc   :  { %v6379_v60 = vpack.i.bf16 %v11173_v0, %v11155_v31  ;;  %3368 = vmatpush.msra.mxu0 %v11170_v22  ;;  %v6389_v16 = vpack.i.bf16 %v11170_v22, %v11166_v8  ;;  %v3073_v63 = vadd.f32 %v11103_v58, %v3016_v50  ;;  %v15564_v50 = vld [vmem:[#allocation25_spill] sm:$0xff]  ;;  %v3019_v9 = vmul.f32 %v11113_v21, %v11003_v43 }
 0x7bd   :  { %v11215_v14 = vmul.f32 %v10626_v34, %v3065_v13  ;;  %v6424_v34 = vpack.i.bf16 %v11218_v10, %v11226_v46  ;;  %v3067_v59 = vadd.f32 %v11095_v1, %v3010_v6  ;;  %v3002_v26 = vmul.f32 %v11093_v15, %v15564_v50  ;;  %v15573_v50 = vld [vmem:[#allocation9_spill] sm:$0xff] }
 0x7be   :  { %6380 = vrot.lane.b32.xlu1 %v6379_v60, %s6919_s24  ;;  %v11209_v25 = vmul.f32 %v15553_v41, %v3073_v63  ;;  %v3009_v41 = vmul.f32 %v11097_v56, %v10944_v7  ;;  %v3058_v7 = vadd.f32 %v11115_v62, %v3001_v37  ;;  %v3076_v21 = vadd.f32 %v11103_v58, %v3019_v9  ;;  %v15574_v9 = vld [vmem:[#allocation36_spill] sm:$0xff] }
 0x7bf   :  { %v3059_v33 = vadd.f32 %v11115_v62, %v3002_v26  ;;  %v2996_v6 = vmul.f32 %v11127_v61, %v11056_v57  ;;  %v15572_v57 = vld [vmem:[#allocation11_spill] sm:$0xff] }
 0x7c0   :  { %6390 = vrot.lane.b32.xlu2 %v6389_v16, %s6919_s24  ;;  %v6419_v30 = vpack.i.bf16 %v11215_v14, %v11209_v25  ;;  %v3066_v17 = vadd.f32 %v11095_v1, %v3009_v41 }
 0x7c1   :  { %6400 = vrot.lane.b32.xlu0 %v6384_v28, %s6918_s5  ;;  %v11236_v28 = vmul.f32 %v10742_v11, %v3074_v20 }
 0x7c2   :  { %v11251_v11 = vmul.f32 %v10648_v53, %v3066_v17  ;;  %v2994_v53 = vmul.f32 %v11127_v61, %v11043_v54  ;;  %v15565_v54 = vld [vmem:[#allocation43_spill] sm:$0xff]  ;;  %v15569_v17 = vld [vmem:[#allocation24_spill] sm:$0xff] }
 0x7c3   :  { %v6444_v24 = vpack.i.bf16 %v11236_v28, %v11226_v46  ;;  %v11281_v3 = vmul.f32 %v15565_v54, %v3067_v59  ;;  %v11340_v59 = vmul.f32 %v15572_v57, %v11185_v42  ;;  %v15576_v42 = vld [vmem:[#allocation13_spill] sm:$0xff] }
 0x7c4   :  { %v6429_v35 = vpack.i.bf16 %v11251_v11, %v11218_v10  ;;  %v6449_v63 = vpack.i.bf16 %v11251_v11, %v11236_v28  ;;  %v3051_v13 = vadd.f32 %v11152_v51, %v2994_v53 }
 0x7c6   :  { %6405 = vrot.lane.b32.xlu1 %v6394_v48, %s6918_s5  ;;  %v3050_v48 = vadd.f32 %v11152_v51, %v2993_v44  ;;  %v11287_v43 = vmul.f32 %v10839_v45, %v3051_v13  ;;  %v11300_v44 = vmul.f32 %v10792_v55, %v3076_v21  ;;  %v2995_v45 = vmul.f32 %v11127_v61, %v11051_v2  ;;  %v15575_v13 = vld [vmem:[#allocation18_spill] sm:$0xff] }
 0x7c7   :  { %v2997_v21 = vmul.f32 %v11127_v61, %v15576_v42 }
 0x7c8   :  { %6410 = vrot.lane.b32.xlu2 %v6379_v60, %s6918_s5  ;;  %v11248_v47 = vmul.f32 %v15561_v39, %v3050_v48  ;;  %v11257_v60 = vmul.f32 %v15563_v38, %v3058_v7  ;;  %v3075_v39 = vadd.f32 %v11103_v58, %v3018_v32  ;;  %v3052_v37 = vadd.f32 %v11152_v51, %v2995_v45  ;;  %v15570_v32 = vld [vmem:[#allocation42_spill] sm:$0xff]  ;;  %v15579_v45 = vld [vmem:[#allocation29_spill] sm:$0xff] }
 0x7c9   :  { %6415 = vrot.lane.b32.xlu0 %v6389_v16, %s6918_s5 }
 0x7ca   :  { %v6439_v16 = vpack.i.bf16 %v11248_v47, %v11257_v60  ;;  %v11276_v49 = vmul.f32 %v15554_v29, %v3075_v39  ;;  %v15566_v29 = vld [vmem:[#allocation22_spill] sm:$0xff]  ;;  %v11318_v7 = vmul.f32 %v10856_v36, %v3052_v37  ;;  %v3053_v39 = vadd.f32 %v11152_v51, %v2996_v6 }
 0x7cb   :  { %v3011_v23 = vmul.f32 %v11097_v56, %v15566_v29 }
 0x7cc   :  { %v6459_v19 = vpack.i.bf16 %v11281_v3, %v11276_v49  ;;  %v11343_v26 = vmul.f32 %v15573_v50, %v3053_v39 }
 0x7cd   :  { %v3068_v58 = vadd.f32 %v11095_v1, %v3011_v23  ;;  %v15578_v23 = vld [vmem:[#allocation10_spill] sm:$0xff] }
 0x7ce   :  { %6420 = vrot.lane.b32.xlu1 %v6419_v30, %s6918_s5 }
 0x7cf   :  { %v11315_v2 = vmul.f32 %v15569_v17, %v3068_v58  ;;  %v11371_v58 = vmul.f32 %v15579_v45, %v11109_v4 }
 0x7d0   :  { %6425 = vrot.lane.b32.xlu2 %v6424_v34, %s6918_s5  ;;  %v15568_v34 = vld [vmem:[#allocation12_spill] sm:$0xff] }
 0x7d1   :  { %6435 = vrot.lane.b32.xlu0 %v6419_v30, %s6919_s24  ;;  %v15567_v30 = vld [vmem:[#allocation26_spill] sm:$0xff]  ;;  %v3003_v56 = vmul.f32 %v11093_v15, %v15568_v34  ;;  %v6469_v1 = vpack.i.bf16 %v11315_v2, %v11287_v43  ;;  %v6489_v36 = vpack.i.bf16 %v11315_v2, %v11300_v44  ;;  %15580 = vst [vmem:[#allocation35_spill] sm:$0xff] %v11371_v58 }
 0x7d2   :  { %v11295_v20 = vmul.f32 %v15567_v30, %v3059_v33  ;;  %v3005_v30 = vmul.f32 %v11093_v15, %v15578_v23 }
 0x7d3   :  { %v3060_v55 = vadd.f32 %v11115_v62, %v3003_v56  ;;  %v15581_v56 = vld [vmem:[#allocation31_spill] sm:$0xff] }
 0x7d4   :  { %v6464_v41 = vpack.i.bf16 %v11287_v43, %v11295_v20  ;;  %v6484_v48 = vpack.i.bf16 %v11300_v44, %v11295_v20  ;;  %v3062_v34 = vadd.f32 %v11115_v62, %v3005_v30 }
 0x7d6   :  { %6445 = vrot.lane.b32.xlu1 %v6444_v24, %s6919_s24  ;;  %v11323_v24 = vmul.f32 %v15570_v32, %v3060_v55 }
 0x7d8   :  { %6430 = vrot.lane.b32.xlu2 %v6429_v35, %s6919_s24  ;;  %v6479_v38 = vpack.i.bf16 %v11318_v7, %v11323_v24  ;;  %v15571_v35 = vld [vmem:[#allocation30_spill] sm:$0xff] }
 0x7d9   :  { %6440 = vrot.lane.b32.xlu0 %v6439_v16, %s6919_s24 }
 0x7de   :  { %6450 = vrot.lane.b32.xlu1 %v6449_v63, %s6918_s5  ;;  %v11347_v63 = vmul.f32 %v15574_v9, %v11106_v40  ;;  %v15577_v40 = vld [vmem:[#allocation20_spill] sm:$0xff] }
 0x7df   :  { %v11363_v29 = vmul.f32 %v15577_v40, %v11196_v27  ;;  %v6509_v27 = vpack.i.bf16 %v11371_v58, %v11343_v26 }
 0x7e0   :  { %6455 = vrot.lane.b32.xlu2 %v6439_v16, %s6918_s5  ;;  %v3004_v16 = vmul.f32 %v11093_v15, %v15571_v35  ;;  %v6499_v33 = vpack.i.bf16 %v11347_v63, %v11340_v59  ;;  %v15583_v15 = vld [vmem:[#allocation44_spill] sm:$0xff] }
 0x7e1   :  { %6460 = vrot.lane.b32.xlu0 %v6459_v19, %s6919_s24 }
 0x7e2   :  { %v3061_v53 = vadd.f32 %v11115_v62, %v3004_v16  ;;  %v6529_v62 = vpack.i.bf16 %v11371_v58, %v11363_v29  ;;  %v11715_v58 = vld [vmem:[#allocation3 + $0x110] sm:$0xff] }
 0x7e4   :  { %v11351_v54 = vmul.f32 %v15575_v13, %v3061_v53 }
 0x7e6   :  { %6465 = vrot.lane.b32.xlu1 %v6464_v41, %s6919_s24  ;;  %v3054_v41 = vadd.f32 %v11152_v51, %v2997_v21  ;;  %v6524_v61 = vpack.i.bf16 %v11363_v29, %v11351_v54  ;;  %v11384_v51 = vmul.f32 %v15583_v15, %v3062_v34  ;;  %v15587_v34 = vld [vmem:[#allocation16_spill] sm:$0xff] }
 0x7e8   :  { %6475 = vrot.lane.b32.xlu2 %v6459_v19, %s6918_s5  ;;  %v6504_v19 = vpack.i.bf16 %v11343_v26, %v11351_v54  ;;  %v11379_v37 = vmul.f32 %v15581_v56, %v3054_v41  ;;  %15584 = vst [vmem:[#allocation32_spill] sm:$0xff] %v11384_v51 }
 0x7e9   :  { %6485 = vrot.lane.b32.xlu0 %v6484_v48, %s6918_s5 }
 0x7ea   :  { %15582 = vst [vmem:[#allocation19_spill] sm:$0xff] %v11379_v37  ;;  %v6519_v4 = vpack.i.bf16 %v11379_v37, %v11384_v51 }
 0x7ee   :  { %6470 = vrot.lane.b32.xlu1 %v6469_v1, %s6918_s5  ;;  %v15585_v1 = vld [vmem:[#allocation15_spill] sm:$0xff] }
 0x7f0   :  { %6480 = vrot.lane.b32.xlu2 %v6479_v38, %s6918_s5 }
 0x7f1   :  { %6490 = vrot.lane.b32.xlu0 %v6489_v36, %s6919_s24 }
 0x7f6   :  { %6495 = vrot.lane.b32.xlu1 %v6479_v38, %s6919_s24 }
 0x7f8   :  { %6500 = vrot.lane.b32.xlu2 %v6499_v33, %s6918_s5 }
 0x7f9   :  { %6505 = vrot.lane.b32.xlu0 %v6504_v19, %s6918_s5 }
 0x7fe   :  { %6515 = vrot.lane.b32.xlu1 %v6499_v33, %s6919_s24 }
 0x800   :  { %6525 = vrot.lane.b32.xlu2 %v6524_v61, %s6919_s24 }
 0x801   :  { %6510 = vrot.lane.b32.xlu0 %v6509_v27, %s6919_s24 }
 0x806   :  { %6520 = vrot.lane.b32.xlu1 %v6519_v4, %s6919_s24 }
 0x808   :  { %6530 = vrot.lane.b32.xlu2 %v6529_v62, %s6918_s5 }
 0x809   :  { %6535 = vrot.lane.b32.xlu0 %v6519_v4, %s6918_s5 }
 0x812   :  { %v6386_v48 = vpop.permute.xlu2 %6385 }
 0x813   :  { %v6388_v55 = vunpack.i.h.bf16 %v6386_v48  ;;  %v6387_v17 = vunpack.i.l.bf16 %v6386_v48 }
 0x815   :  { %v11396_v6 = vsel %vm527_vm0, %v15585_v1, %v6387_v17  ;;  %v11402_v38 = vsel %vm527_vm0, %v15585_v1, %v6388_v55 }
 0x816   :  { %3336 = vmatpush.msrb.mxu2 %v11396_v6 }
 0x818   :  { %3337 = vmatpush.msrb.mxu2 %v11402_v38 }
 0x81a   :  { %v11405_v35 = vpop.permute.xlu2 %6390 }
 0x81b   :  { %v6392_v33 = vunpack.i.l.bf16 %v11405_v35  ;;  %v15137_v40 = vunpack.i.h.bf16 %v11405_v35 }
 0x822   :  { %v6411_v45 = vpop.permute.xlu2 %6410 }
 0x823   :  { %v6413_v15 = vunpack.i.h.bf16 %v6411_v45 }
 0x82b   :  { %v11407_v16 = vpop.permute.xlu0 %6395 }
 0x82c   :  { %v6398_v36 = vunpack.i.h.bf16 %v11407_v16  ;;  %v6397_v39 = vunpack.i.l.bf16 %v11407_v16  ;;  %v11562_v16 = vld [vmem:[#allocation3 + $0xc0] sm:$0xff] }
 0x82e   :  { %v11414_v53 = vsel %vm527_vm0, %v15585_v1, %v6398_v36  ;;  %v11420_v57 = vsel %vm527_vm0, %v6387_v17, %v6397_v39  ;;  %v11449_v41 = vsel %vm527_vm0, %v6398_v36, %v6392_v33 }
 0x82f   :  { %3338 = vmatpush.msrb.mxu2 %v11414_v53  ;;  %3369 = vmatpush.msra.mxu0 %v11420_v57 }
 0x830   :  { %v11424_v50 = vpop.permute.xlu1 %6380  ;;  %3423 = vmatpush.msra.mxu3 %v11420_v57 }
 0x831   :  { %v6383_v9 = vunpack.i.h.bf16 %v11424_v50  ;;  %v6382_v13 = vunpack.i.l.bf16 %v11424_v50 }
 0x833   :  { %v11433_v19 = vsel %vm527_vm0, %v15585_v1, %v6383_v9  ;;  %v11439_v42 = vsel %vm527_vm0, %v6388_v55, %v6382_v13  ;;  %v6401_v21 = vpop.permute.xlu0 %6400  ;;  %v11460_v27 = vsel %vm527_vm0, %v6383_v9, %v15137_v40  ;;  %v6412_v55 = vunpack.i.l.bf16 %v6411_v45 }
 0x834   :  { %3339 = vmatpush.msrb.mxu2 %v11433_v19  ;;  %3370 = vmatpush.msra.mxu0 %v11439_v42  ;;  %v6403_v23 = vunpack.i.h.bf16 %v6401_v21  ;;  %v6402_v30 = vunpack.i.l.bf16 %v6401_v21  ;;  %v15588_v40 = vmov 0.0  }
 0x835   :  { %3424 = vmatpush.msra.mxu3 %v11439_v42 }
 0x836   :  { %3371 = vmatpush.msra.mxu0 %v11449_v41  ;;  %v3310_v61 = vsel %vm630_vm1, %v15587_v34, %v6402_v30  ;;  %v3309_v48 = vsel %vm630_vm1, %v15587_v34, %v6403_v23  ;;  %v3305_v45 = vsel %vm630_vm1, %v6403_v23, %v6412_v55 }
 0x837   :  { %3425 = vmatpush.msra.mxu3 %v11449_v41  ;;  %3340 = vmatpush.msrb.mxu2 %v3310_v61 }
 0x838   :  { %v6406_v56 = vpop.permute.xlu1 %6405  ;;  %3372 = vmatpush.msra.mxu0 %v11460_v27 }
 0x839   :  { %v6408_v4 = vunpack.i.h.bf16 %v6406_v56  ;;  %v6407_v62 = vunpack.i.l.bf16 %v6406_v56  ;;  %3426 = vmatpush.msra.mxu3 %v11460_v27  ;;  %3341 = vmatpush.msrb.mxu2 %v3309_v48  ;;  %v3307_v56 = vsel %vm630_vm1, %v15587_v34, %v6413_v15 }
 0x83b   :  { %v3308_v17 = vsel %vm630_vm1, %v15587_v34, %v6408_v4  ;;  %v3306_v36 = vsel %vm630_vm1, %v6402_v30, %v6407_v62  ;;  %v6416_v9 = vpop.permute.xlu0 %6415  ;;  %v11479_v30 = vpop.permute.xlu2 %6425 }
 0x83c   :  { %3342 = vmatpush.msrb.mxu2 %v3308_v17  ;;  %3373 = vmatpush.msra.mxu0 %v3306_v36  ;;  %v6418_v21 = vunpack.i.h.bf16 %v6416_v9  ;;  %v6417_v61 = vunpack.i.l.bf16 %v6416_v9 }
 0x83d   :  { %3427 = vmatpush.msra.mxu3 %v3306_v36 }
 0x83e   :  { %3343 = vmatpush.msrb.mxu2 %v3307_v56  ;;  %3374 = vmatpush.msra.mxu0 %v3305_v45  ;;  %v3304_v48 = vsel %vm630_vm1, %v6408_v4, %v6417_v61  ;;  %v3303_v9 = vsel %vm630_vm1, %v6413_v15, %v6418_v21  ;;  %v15139_v15 = vunpack.i.l.bf16 %v11479_v30 }
 0x83f   :  { %3428 = vmatpush.msra.mxu3 %v3305_v45 }
 0x840   :  { %v11481_v17 = vpop.permute.xlu1 %6420  ;;  %3344 = vmatpush.msrb.mxu2 %v15588_v40  ;;  %3375 = vmatpush.msra.mxu0 %v3304_v48 }
 0x841   :  { %v6422_v36 = vunpack.i.l.bf16 %v11481_v17  ;;  %3429 = vmatpush.msra.mxu3 %v3304_v48  ;;  %v15138_v23 = vunpack.i.h.bf16 %v11481_v17 }
 0x842   :  { %3345 = vmatpush.msrb.mxu2 %v15588_v40  ;;  %3376 = vmatpush.msra.mxu0 %v3303_v9 }
 0x843   :  { %3430 = vmatpush.msra.mxu3 %v3303_v9  ;;  %v11493_v4 = vsel %vm630_vm1, %v6407_v62, %v6422_v36  ;;  %v11495_v56 = vpop.permute.xlu0 %6435  ;;  %v11508_v62 = vsel %vm630_vm1, %v6412_v55, %v15138_v23  ;;  %v11522_v55 = vsel %vm630_vm1, %v6417_v61, %v15139_v15  ;;  %v11529_v23 = vpop.permute.xlu2 %6430 }
 0x844   :  { %3346 = vmatpush.msrb.mxu2 %v15588_v40  ;;  %3377 = vmatpush.msra.mxu0 %v11141_v12  ;;  %v15142_v45 = vunpack.i.l.bf16 %v11495_v56  ;;  %v15140_v9 = vunpack.i.h.bf16 %v11495_v56 }
 0x845   :  { %3406 = vmatpush.msrb.mxu1 %v11493_v4  ;;  %3431 = vmatpush.msra.mxu3 %v11141_v12  ;;  %v15145_v12 = vunpack.i.h.bf16 %v11479_v30 }
 0x846   :  { %3347 = vmatpush.msrb.mxu2 %v15588_v40  ;;  %3378 = vmatpush.msra.mxu0 %v11135_v5  ;;  %v15593_v40 = vunpack.i.h.bf16 %v11479_v30 }
 0x847   :  { %3407 = vmatpush.msrb.mxu1 %v11508_v62  ;;  %3432 = vmatpush.msra.mxu3 %v11135_v5  ;;  %v11527_v5 = vld [vmem:[#allocation3 + $0xc8] sm:$0xff]  ;;  %v11537_v61 = vsel %vm630_vm1, %v6418_v21, %v15145_v12  ;;  %v15144_v21 = vunpack.i.l.bf16 %v11529_v23 }
 0x848   :  { %v11514_v48 = vpop.permute.xlu1 %6445  ;;  %3348 = vmatpush.msrb.mxu2 %v15585_v1  ;;  %3379 = vmatpush.msra.mxu0 %v11144_v52 }
 0x849   :  { %3408 = vmatpush.msrb.mxu1 %v11522_v55  ;;  %3433 = vmatpush.msra.mxu3 %v11144_v52  ;;  %v11547_v52 = vsel %vm527_vm0, %v6397_v39, %v15142_v45  ;;  %v15141_v15 = vunpack.i.l.bf16 %v11514_v48  ;;  %v11564_v39 = vld [vmem:[#allocation3 + $0xd0] sm:$0xff] }
 0x84a   :  { %3349 = vmatpush.msrb.mxu2 %v15585_v1  ;;  %3380 = vmatpush.msra.mxu0 %v11173_v0 }
 0x84b   :  { %3409 = vmatpush.msrb.mxu1 %v11537_v61  ;;  %3434 = vmatpush.msra.mxu3 %v11173_v0  ;;  %v11560_v0 = vsel %vm527_vm0, %v6382_v13, %v15140_v9  ;;  %v11586_v13 = vld [vmem:[#allocation3 + $0xe0] sm:$0xff]  ;;  %v15589_v9 = vunpack.i.h.bf16 %v11405_v35 }
 0x84c   :  { %3381 = vmatmul.f32.vlgmr.msra.gmra.mxu0 %v11527_v5  ;;  %3350 = vmatpush.msrb.mxu2 %v15585_v1 }
 0x84d   :  { %3510 = vmatpush.msra.mxu1 %v11547_v52  ;;  %3435 = vmatpush.msra.mxu3 %v11396_v6  ;;  %v11579_v6 = vsel %vm527_vm0, %v6392_v33, %v15141_v15  ;;  %v11595_v33 = vsel %vm527_vm0, %v15589_v9, %v15144_v21  ;;  %v11599_v15 = vpop.permute.xlu2 %6455  ;;  %v11621_v9 = vld [vmem:[#allocation3 + $0xe8] sm:$0xff]  ;;  %v11648_v21 = vpop.permute.xlu0 %6440 }
 0x84e   :  { %3351 = vmatpush.msrb.mxu2 %v15585_v1  ;;  %5927 = vmatmul.msk.f32.vlgmr.msrb.gmra.mxu1 %vm679_vm2, %v11564_v39  ;;  %v15592_v12 = vunpack.i.h.bf16 %v11599_v15  ;;  %v15595_v1 = vunpack.i.l.bf16 %v11495_v56 }
 0x84f   :  { %3511 = vmatpush.msra.mxu1 %v11560_v0  ;;  %3436 = vmatpush.msra.mxu3 %v11402_v38 }
 0x850   :  { %3352 = vmatmul.f32.vlgmr.msrb.gmra.mxu2 %v11562_v16  ;;  %v11581_v50 = vpop.permute.xlu1 %6450  ;;  %v3295_v34 = vsel %vm630_vm1, %v15593_v40, %v15592_v12  ;;  %v11673_v40 = vld [vmem:[#allocation3 + $0xf0] sm:$0xff]  ;;  %v15596_v12 = vunpack.i.h.bf16 %v11495_v56  ;;  %v15597_v56 = vunpack.i.l.bf16 %v11648_v21 }
 0x851   :  { %3452 = vmatpush.msra.mxu2 %v11209_v25  ;;  %3512 = vmatpush.msra.mxu1 %v11579_v6  ;;  %v15143_v38 = vunpack.i.l.bf16 %v11581_v50  ;;  %v15146_v45 = vunpack.i.h.bf16 %v11581_v50 }
 0x852   :  { %3437 = vmatpush.msra.mxu3 %v11414_v53  ;;  %v11616_v53 = vld [vmem:[#allocation3 + $0xd8] sm:$0xff] }
 0x853   :  { %3453 = vmatpush.msra.mxu2 %v11215_v14  ;;  %3513 = vmatpush.msra.mxu1 %v11595_v33  ;;  %v11610_v35 = vsel %vm630_vm1, %v6422_v36, %v15143_v38  ;;  %v15590_v36 = vunpack.i.h.bf16 %v11481_v17  ;;  %v15591_v17 = vunpack.i.l.bf16 %v11479_v30  ;;  %v6443_v30 = vunpack.i.h.bf16 %v11648_v21 }
 0x854   :  { %3438 = vmatpush.msra.mxu3 %v11433_v19  ;;  %3384 = vmatmul.f32.gmra.mxu0 %v11586_v13  ;;  %v15149_v19 = vunpack.i.l.bf16 %v11599_v15 }
 0x855   :  { %3439 = vmatmul.f32.vlgmr.msra.gmra.mxu3 %v11562_v16  ;;  %3454 = vmatpush.msra.mxu2 %v11226_v46  ;;  %v3297_v38 = vsel %vm630_vm1, %v15590_v36, %v15146_v45  ;;  %v11646_v45 = vld [vmem:[#allocation3 + $0xf8] sm:$0xff] }
 0x856   :  { %3514 = vmatpush.msra.mxu1 %v11493_v4  ;;  %3539 = vmatpush.msrb.mxu3 %v11236_v28  ;;  %v3296_v36 = vsel %vm630_vm1, %v15591_v17, %v15149_v19  ;;  %v15153_v17 = vunpack.i.h.bf16 %v11529_v23  ;;  %v15594_v19 = vunpack.i.h.bf16 %v11514_v48 }
 0x857   :  { %3493 = vmatpush.msrb.mxu0 %v11610_v35  ;;  %3455 = vmatpush.msra.mxu2 %v11218_v10 }
 0x858   :  { %3515 = vmatpush.msra.mxu1 %v11508_v62  ;;  %3540 = vmatpush.msrb.mxu3 %v11251_v11  ;;  %v11668_v37 = vsel %vm527_vm0, %v15595_v1, %v15594_v19  ;;  %v11683_v1 = vsel %vm527_vm0, %v15596_v12, %v15153_v17  ;;  %v11685_v19 = vld [vmem:[#allocation3 + $0x100] sm:$0xff]  ;;  %v15598_v12 = vunpack.i.l.bf16 %v11514_v48 }
 0x859   :  { %3494 = vmatpush.msrb.mxu0 %v3297_v38  ;;  %3355 = vmatmul.f32.gmra.mxu2 %v11616_v53 }
 0x85a   :  { %5928 = vmatmul.msk.f32.gmra.mxu1 %vm679_vm2, %v11621_v9  ;;  %3456 = vmatpush.msra.mxu2 %v11547_v52  ;;  %v11701_v17 = vsel %vm527_vm0, %v15598_v12, %v15597_v56  ;;  %v11727_v56 = vld [vmem:[#allocation3 + $0x108] sm:$0xff]  ;;  %v11731_v12 = vld [vmem:[#allocation3 + $0x118] sm:$0xff] }
 0x85b   :  { %3516 = vmatpush.msra.mxu1 %v11522_v55  ;;  %3541 = vmatpush.msrb.mxu3 %v11257_v60 }
 0x85c   :  { %3495 = vmatpush.msrb.mxu0 %v3296_v36  ;;  %3457 = vmatpush.msra.mxu2 %v11560_v0 }
 0x85d   :  { %3517 = vmatpush.msra.mxu1 %v11537_v61  ;;  %3542 = vmatpush.msrb.mxu3 %v11248_v47 }
 0x85e   :  { %3496 = vmatpush.msrb.mxu0 %v3295_v34  ;;  %3442 = vmatmul.f32.gmra.mxu3 %v11616_v53 }
 0x85f   :  { %3387 = vmatmul.f32.gmra.mxu0 %v11646_v45  ;;  %3458 = vmatpush.msra.mxu2 %v11579_v6 }
 0x860   :  { %3518 = vmatpush.msra.mxu1 %v11138_v18  ;;  %3543 = vmatpush.msrb.mxu3 %v11668_v37 }
 0x861   :  { %3597 = vmatpush.msra.mxu0 %v11668_v37  ;;  %3459 = vmatpush.msra.mxu2 %v11595_v33 }
 0x862   :  { %3519 = vmatpush.msra.mxu1 %v11155_v31  ;;  %3544 = vmatpush.msrb.mxu3 %v11683_v1 }
 0x863   :  { %3598 = vmatpush.msra.mxu0 %v11683_v1  ;;  %3358 = vmatmul.f32.gmra.mxu2 %v11673_v40 }
 0x864   :  { %5929 = vmatmul.msk.f32.gmra.mxu1 %vm679_vm2, %v11685_v19  ;;  %3460 = vmatpush.msra.mxu2 %v11493_v4  ;;  %v15599_v4 = vunpack.i.l.bf16 %v11529_v23 }
 0x865   :  { %3520 = vmatpush.msra.mxu1 %v11166_v8  ;;  %3545 = vmatpush.msrb.mxu3 %v11701_v17 }
 0x866   :  { %3599 = vmatpush.msra.mxu0 %v11701_v17  ;;  %3461 = vmatpush.msra.mxu2 %v11508_v62  ;;  %v11713_v51 = vsel %vm527_vm0, %v15599_v4, %v6443_v30  ;;  %v11723_v62 = vpop.permute.xlu0 %6460  ;;  %v11734_v4 = vpop.permute.xlu1 %6465 }
 0x867   :  { %3521 = vmatpush.msra.mxu1 %v11170_v22  ;;  %3546 = vmatpush.msrb.mxu3 %v11713_v51 }
 0x868   :  { %3600 = vmatpush.msra.mxu0 %v11713_v51  ;;  %3445 = vmatmul.f32.gmra.mxu3 %v11673_v40 }
 0x869   :  { %3390 = vmatmul.f32.gmra.mxu0 %v11715_v58  ;;  %3462 = vmatpush.msra.mxu2 %v11522_v55 }
 0x86a   :  { %3522 = vmatpush.msra.mxu1 %v11420_v57  ;;  %3547 = vmatpush.msrb.mxu3 %v11610_v35  ;;  %v6476_v57 = vpop.permute.xlu2 %6475 }
 0x86b   :  { %3601 = vmatpush.msra.mxu0 %v11610_v35  ;;  %3463 = vmatpush.msra.mxu2 %v11537_v61 }
 0x86c   :  { %3523 = vmatpush.msra.mxu1 %v11439_v42  ;;  %3548 = vmatpush.msrb.mxu3 %v3297_v38  ;;  %v6477_v42 = vunpack.i.l.bf16 %v6476_v57 }
 0x86d   :  { %3602 = vmatpush.msra.mxu0 %v3297_v38  ;;  %3361 = vmatmul.f32.gmra.mxu2 %v11727_v56  ;;  %v6463_v38 = vunpack.i.h.bf16 %v11723_v62 }
 0x86e   :  { %5930 = vmatmul.msk.f32.gmra.mxu1 %vm679_vm2, %v11731_v12  ;;  %3464 = vmatpush.msra.mxu2 %v11138_v18  ;;  %v11746_v55 = vpop.permute.xlu0 %6485  ;;  %v15600_v18 = vunpack.i.l.bf16 %v11581_v50 }
 0x86f   :  { %3524 = vmatpush.msra.mxu1 %v11449_v41  ;;  %3549 = vmatpush.msrb.mxu3 %v3296_v36  ;;  %v6487_v41 = vunpack.i.l.bf16 %v11746_v55 }
 0x870   :  { %3603 = vmatpush.msra.mxu0 %v3296_v36  ;;  %3465 = vmatpush.msra.mxu2 %v11155_v31  ;;  %v11759_v31 = vsel %vm630_vm1, %v15600_v18, %v6477_v42 }
 0x871   :  { %3525 = vmatpush.msra.mxu1 %v11460_v27  ;;  %3550 = vmatpush.msrb.mxu3 %v3295_v34  ;;  %v15601_v27 = vunpack.i.h.bf16 %v11581_v50  ;;  %v15602_v50 = vunpack.i.l.bf16 %v11599_v15 }
 0x872   :  { %3604 = vmatpush.msra.mxu0 %v3295_v34  ;;  %3448 = vmatmul.f32.gmra.mxu3 %v11727_v56  ;;  %v11762_v34 = vpop.permute.xlu1 %6470 }
 0x873   :  { %3626 = vmatpush.msrb.mxu1 %v11276_v49  ;;  %3466 = vmatpush.msra.mxu2 %v11166_v8  ;;  %v6478_v8 = vunpack.i.h.bf16 %v6476_v57  ;;  %v6473_v35 = vunpack.i.h.bf16 %v11762_v34  ;;  %v11789_v36 = vsel %vm630_vm1, %v15602_v50, %v6487_v41  ;;  %v11791_v57 = vpop.permute.xlu2 %6480 }
 0x874   :  { %5931 = vmatmul.msk.f32.vlgmr.msrb.gmra.mxu0 %vm679_vm2, %v11564_v39  ;;  %3551 = vmatpush.msrb.mxu3 %v11209_v25  ;;  %v15159_v50 = vunpack.i.l.bf16 %v11791_v57 }
 0x875   :  { %3605 = vmatpush.msra.mxu0 %v11209_v25  ;;  %3627 = vmatpush.msrb.mxu1 %v11281_v3  ;;  %v6462_v25 = vunpack.i.l.bf16 %v11723_v62  ;;  %v11776_v61 = vsel %vm630_vm1, %v15601_v27, %v6478_v8  ;;  %v6467_v27 = vunpack.i.l.bf16 %v11734_v4 }
 0x876   :  { %3467 = vmatpush.msra.mxu2 %v11170_v22  ;;  %3552 = vmatpush.msrb.mxu3 %v11215_v14  ;;  %v15158_v22 = vunpack.i.h.bf16 %v11746_v55 }
 0x877   :  { %3606 = vmatpush.msra.mxu0 %v11215_v14  ;;  %3628 = vmatpush.msrb.mxu1 %v11295_v20  ;;  %v6472_v14 = vunpack.i.l.bf16 %v11762_v34 }
 0x878   :  { %3580 = vmatpush.msrb.mxu2 %v11759_v31  ;;  %3526 = vmatmul.f32.vlgmr.msra.gmra.mxu1 %v11562_v16  ;;  %v11805_v18 = vsel %vm630_vm1, %v6477_v42, %v15158_v22  ;;  %v11818_v42 = vpop.permute.xlu0 %6490 }
 0x879   :  { %3468 = vmatmul.f32.vlgmr.msra.gmra.mxu2 %v11527_v5  ;;  %3553 = vmatpush.msrb.mxu3 %v11226_v46 }
 0x87a   :  { %3607 = vmatpush.msra.mxu0 %v11226_v46  ;;  %3581 = vmatpush.msrb.mxu2 %v11776_v61  ;;  %v15603_v46 = vunpack.i.h.bf16 %v11514_v48 }
 0x87b   :  { %3629 = vmatpush.msrb.mxu1 %v11287_v43  ;;  %3554 = vmatpush.msrb.mxu3 %v11218_v10 }
 0x87c   :  { %3608 = vmatpush.msra.mxu0 %v11218_v10  ;;  %3582 = vmatpush.msrb.mxu2 %v11789_v36  ;;  %v11799_v62 = vsel %vm527_vm0, %v15603_v46, %v6462_v25  ;;  %v15604_v10 = vunpack.i.h.bf16 %v11599_v15  ;;  %v15605_v46 = vunpack.i.h.bf16 %v11529_v23  ;;  %v11831_v15 = vsel %vm630_vm1, %v6478_v8, %v6473_v35 }
 0x87d   :  { %3630 = vmatpush.msrb.mxu1 %v11799_v62  ;;  %3667 = vmatpush.msra.mxu3 %v11805_v18  ;;  %v15606_v23 = vunpack.i.l.bf16 %v11648_v21  ;;  %v11848_v8 = vsel %vm630_vm1, %v6487_v41, %v15159_v50  ;;  %v6493_v50 = vunpack.i.h.bf16 %v11818_v42 }
 0x87e   :  { %5932 = vmatmul.msk.f32.gmra.mxu0 %vm679_vm2, %v11621_v9  ;;  %3555 = vmatmul.f32.vlgmr.msrb.gmra.mxu3 %v11527_v5  ;;  %v3291_v48 = vsel %vm630_vm1, %v15604_v10, %v6472_v14  ;;  %v11825_v22 = vsel %vm527_vm0, %v15605_v46, %v6463_v38  ;;  %v6468_v10 = vunpack.i.h.bf16 %v11734_v4  ;;  %v6483_v4 = vunpack.i.h.bf16 %v11791_v57 }
 0x87f   :  { %3609 = vmatpush.msra.mxu0 %v11547_v52  ;;  %3583 = vmatpush.msrb.mxu2 %v3291_v48  ;;  %v11842_v52 = vsel %vm527_vm0, %v15606_v23, %v6467_v27  ;;  %v6492_v46 = vunpack.i.l.bf16 %v11818_v42 }
 0x880   :  { %3631 = vmatpush.msrb.mxu1 %v11825_v22  ;;  %3668 = vmatpush.msra.mxu3 %v11831_v15  ;;  %v11864_v41 = vsel %vm527_vm0, %v6443_v30, %v6468_v10  ;;  %v11870_v23 = vsel %vm630_vm1, %v6472_v14, %v6483_v4 }
 0x881   :  { %3610 = vmatpush.msra.mxu0 %v11560_v0  ;;  %3684 = vmatpush.msra.mxu2 %v11799_v62  ;;  %v11856_v0 = vpop.permute.xlu1 %6495  ;;  %v11881_v21 = vsel %vm527_vm0, %v6462_v25, %v6492_v46 }
 0x882   :  { %3632 = vmatpush.msrb.mxu1 %v11842_v52  ;;  %3669 = vmatpush.msra.mxu3 %v11848_v8  ;;  %v6498_v30 = vunpack.i.h.bf16 %v11856_v0 }
 0x883   :  { %3471 = vmatmul.f32.gmra.mxu2 %v11586_v13  ;;  %3529 = vmatmul.f32.gmra.mxu1 %v11616_v53 }
 0x884   :  { %3611 = vmatpush.msra.mxu0 %v11579_v6  ;;  %3685 = vmatpush.msra.mxu2 %v11825_v22  ;;  %v6497_v6 = vunpack.i.l.bf16 %v11856_v0 }
 0x885   :  { %3633 = vmatpush.msrb.mxu1 %v11864_v41  ;;  %3670 = vmatpush.msra.mxu3 %v11870_v23 }
 0x886   :  { %3612 = vmatpush.msra.mxu0 %v11595_v33  ;;  %3686 = vmatpush.msra.mxu2 %v11842_v52  ;;  %v11895_v33 = vsel %vm527_vm0, %v6463_v38, %v6493_v50  ;;  %v11906_v25 = vsel %vm527_vm0, %v6467_v27, %v6497_v6  ;;  %v11940_v38 = vpop.permute.xlu0 %6505 }
 0x887   :  { %3771 = vmatpush.msrb.mxu3 %v11881_v21  ;;  %3634 = vmatpush.msrb.mxu1 %v11759_v31 }
 0x888   :  { %3713 = vmatpush.msrb.mxu0 %v11300_v44  ;;  %3558 = vmatmul.f32.gmra.mxu3 %v11586_v13 }
 0x889   :  { %5933 = vmatmul.msk.f32.gmra.mxu0 %vm679_vm2, %v11685_v19  ;;  %3687 = vmatpush.msra.mxu2 %v11864_v41 }
 0x88a   :  { %3772 = vmatpush.msrb.mxu3 %v11895_v33  ;;  %3635 = vmatpush.msrb.mxu1 %v11776_v61 }
 0x88b   :  { %3714 = vmatpush.msrb.mxu0 %v11315_v2  ;;  %3688 = vmatpush.msra.mxu2 %v11759_v31  ;;  %v11918_v31 = vsel %vm527_vm0, %v6468_v10, %v6498_v30  ;;  %v6508_v10 = vunpack.i.h.bf16 %v11940_v38 }
 0x88c   :  { %3773 = vmatpush.msrb.mxu3 %v11906_v25  ;;  %3636 = vmatpush.msrb.mxu1 %v11789_v36 }
 0x88d   :  { %3715 = vmatpush.msrb.mxu0 %v11323_v24  ;;  %3474 = vmatmul.f32.gmra.mxu2 %v11646_v45 }
 0x88e   :  { %3532 = vmatmul.f32.gmra.mxu1 %v11673_v40  ;;  %3689 = vmatpush.msra.mxu2 %v11776_v61  ;;  %v11929_v61 = vpop.permute.xlu2 %6500 }
 0x88f   :  { %3774 = vmatpush.msrb.mxu3 %v11918_v31  ;;  %3637 = vmatpush.msrb.mxu1 %v3291_v48  ;;  %v6502_v14 = vunpack.i.l.bf16 %v11929_v61  ;;  %v6503_v27 = vunpack.i.h.bf16 %v11929_v61 }
 0x890   :  { %3716 = vmatpush.msrb.mxu0 %v11318_v7  ;;  %3690 = vmatpush.msra.mxu2 %v11789_v36 }
 0x891   :  { %3775 = vmatpush.msrb.mxu3 %v11805_v18  ;;  %3638 = vmatpush.msrb.mxu1 %v11236_v28 }
 0x892   :  { %3717 = vmatpush.msrb.mxu0 %v11881_v21  ;;  %3561 = vmatmul.f32.gmra.mxu3 %v11646_v45 }
 0x893   :  { %5934 = vmatmul.msk.f32.gmra.mxu0 %vm679_vm2, %v11731_v12  ;;  %3691 = vmatpush.msra.mxu2 %v3291_v48  ;;  %v11960_v48 = vpop.permute.xlu1 %6515 }
 0x894   :  { %3776 = vmatpush.msrb.mxu3 %v11831_v15  ;;  %3639 = vmatpush.msrb.mxu1 %v11251_v11 }
 0x895   :  { %3718 = vmatpush.msrb.mxu0 %v11895_v33  ;;  %3692 = vmatpush.msra.mxu2 %v11236_v28  ;;  %v15607_v28 = vunpack.i.h.bf16 %v11746_v55 }
 0x896   :  { %3777 = vmatpush.msrb.mxu3 %v11848_v8  ;;  %3640 = vmatpush.msrb.mxu1 %v11257_v60  ;;  %v11974_v55 = vpop.permute.xlu2 %6525 }
 0x897   :  { %3719 = vmatpush.msrb.mxu0 %v11906_v25  ;;  %3477 = vmatmul.f32.gmra.mxu2 %v11715_v58  ;;  %v11954_v36 = vsel %vm630_vm1, %v15607_v28, %v6502_v14 }
 0x898   :  { %3535 = vmatmul.f32.gmra.mxu1 %v11727_v56  ;;  %3693 = vmatpush.msra.mxu2 %v11251_v11  ;;  %v6507_v11 = vunpack.i.l.bf16 %v11940_v38 }
 0x899   :  { %3778 = vmatpush.msrb.mxu3 %v11870_v23  ;;  %3641 = vmatpush.msrb.mxu1 %v11248_v47 }
 0x89a   :  { %3720 = vmatpush.msrb.mxu0 %v11918_v31  ;;  %3694 = vmatpush.msra.mxu2 %v11257_v60  ;;  %v11972_v60 = vsel %vm630_vm1, %v6473_v35, %v6503_v27  ;;  %v6518_v35 = vunpack.i.h.bf16 %v11960_v48 }
 0x89b   :  { %3754 = vmatpush.msra.mxu1 %v11954_v36  ;;  %3779 = vmatpush.msrb.mxu3 %v11276_v49 }
 0x89c   :  { %3721 = vmatpush.msrb.mxu0 %v11805_v18  ;;  %3564 = vmatmul.f32.gmra.mxu3 %v11715_v58  ;;  %v6517_v18 = vunpack.i.l.bf16 %v11960_v48 }
 0x89d   :  { %3613 = vmatmul.f32.vlgmr.msra.gmra.mxu0 %v11562_v16  ;;  %3695 = vmatpush.msra.mxu2 %v11248_v47  ;;  %v15608_v47 = vunpack.i.l.bf16 %v11791_v57  ;;  %v12028_v57 = vsel %vm527_vm0, %v6493_v50, %v6518_v35 }
 0x89e   :  { %3755 = vmatpush.msra.mxu1 %v11972_v60  ;;  %3780 = vmatpush.msrb.mxu3 %v11281_v3 }
 0x89f   :  { %3722 = vmatpush.msrb.mxu0 %v11831_v15  ;;  %3696 = vmatpush.msra.mxu2 %v11668_v37  ;;  %v11988_v34 = vsel %vm630_vm1, %v15608_v47, %v6507_v11  ;;  %v12004_v37 = vsel %vm630_vm1, %v6483_v4, %v6508_v10  ;;  %v12006_v15 = vpop.permute.xlu0 %6510 }
 0x8a0   :  { %3756 = vmatpush.msra.mxu1 %v11988_v34  ;;  %3781 = vmatpush.msrb.mxu3 %v11295_v20  ;;  %v6512_v4 = vunpack.i.l.bf16 %v12006_v15 }
 0x8a1   :  { %3723 = vmatpush.msrb.mxu0 %v11848_v8  ;;  %5935 = vmatmul.msk.f32.vlgmr.msrb.gmra.mxu2 %vm679_vm2, %v11564_v39  ;;  %v6527_v8 = vunpack.i.l.bf16 %v11974_v55 }
 0x8a2   :  { %3642 = vmatmul.f32.vlgmr.msrb.gmra.mxu1 %v11527_v5  ;;  %3697 = vmatpush.msra.mxu2 %v11683_v1  ;;  %v12016_v1 = vsel %vm527_vm0, %v6492_v46, %v6517_v18  ;;  %v15610_v46 = vld [vmem:[#allocation32_spill] sm:$0xff] }
 0x8a3   :  { %3757 = vmatpush.msra.mxu1 %v12004_v37  ;;  %3782 = vmatpush.msrb.mxu3 %v11287_v43 }
 0x8a4   :  { %3724 = vmatpush.msrb.mxu0 %v11870_v23  ;;  %3698 = vmatpush.msra.mxu2 %v11701_v17  ;;  %v12037_v17 = vpop.permute.xlu2 %6530  ;;  %v6528_v23 = vunpack.i.h.bf16 %v11974_v55 }
 0x8a5   :  { %3858 = vmatpush.msrb.mxu1 %v12016_v1  ;;  %3783 = vmatpush.msrb.mxu3 %v11799_v62 }
 0x8a6   :  { %3725 = vmatpush.msrb.mxu0 %v11276_v49  ;;  %5939 = vmatmul.msk.f32.vlgmr.msra.gmra.mxu3 %vm679_vm2, %v11564_v39  ;;  %v12049_v49 = vsel %vm527_vm0, %v6497_v6, %v6527_v8  ;;  %v6513_v6 = vunpack.i.h.bf16 %v12006_v15  ;;  %v3182_v28 = vsel %vm527_vm0, %v6517_v18, %v6528_v23 }
 0x8a7   :  { %3859 = vmatpush.msrb.mxu1 %v12028_v57  ;;  %3616 = vmatmul.f32.gmra.mxu0 %v11616_v53 }
 0x8a8   :  { %3699 = vmatpush.msra.mxu2 %v11713_v51  ;;  %3784 = vmatpush.msrb.mxu3 %v11825_v22  ;;  %v6532_v51 = vunpack.i.l.bf16 %v12037_v17  ;;  %v12067_v22 = vpop.permute.xlu0 %6535 }
 0x8a9   :  { %3726 = vmatpush.msrb.mxu0 %v11281_v3  ;;  %3860 = vmatpush.msrb.mxu1 %v12049_v49  ;;  %v12062_v3 = vsel %vm527_vm0, %v6498_v30, %v6512_v4  ;;  %v6537_v50 = vunpack.i.l.bf16 %v12067_v22  ;;  %v15611_v30 = vld [vmem:[#allocation19_spill] sm:$0xff] }
 0x8aa   :  { %3800 = vmatpush.msrb.mxu2 %v11340_v59  ;;  %3785 = vmatpush.msrb.mxu3 %v11842_v52  ;;  %v12082_v62 = vsel %vm630_vm1, %v6502_v14, %v6532_v51  ;;  %v6538_v52 = vunpack.i.h.bf16 %v12067_v22 }
 0x8ab   :  { %3727 = vmatpush.msrb.mxu0 %v11295_v20  ;;  %3861 = vmatpush.msrb.mxu1 %v12062_v3  ;;  %v6533_v20 = vunpack.i.h.bf16 %v12037_v17  ;;  %v12111_v0 = vsel %vm630_vm1, %v6507_v11, %v6537_v50 }
 0x8ac   :  { %3801 = vmatpush.msrb.mxu2 %v11347_v63  ;;  %3645 = vmatmul.f32.gmra.mxu1 %v11586_v13  ;;  %v12130_v61 = vsel %vm630_vm1, %v6508_v10, %v6538_v52 }
 0x8ad   :  { %5936 = vmatmul.msk.f32.gmra.mxu2 %vm679_vm2, %v11621_v9  ;;  %3786 = vmatpush.msrb.mxu3 %v11864_v41  ;;  %v12098_v42 = vsel %vm630_vm1, %v6503_v27, %v6533_v20  ;;  %v12113_v41 = vpop.permute.xlu1 %6520  ;;  %v3181_v27 = vsel %vm527_vm0, %v6518_v35, %v6513_v6 }
 0x8ae   :  { %3728 = vmatpush.msrb.mxu0 %v11287_v43  ;;  %3802 = vmatpush.msrb.mxu2 %v11351_v54  ;;  %v15609_v43 = vld [vmem:[#allocation35_spill] sm:$0xff]  ;;  %v6522_v14 = vunpack.i.l.bf16 %v12113_v41  ;;  %v6523_v38 = vunpack.i.h.bf16 %v12113_v41 }
 0x8af   :  { %3862 = vmatpush.msrb.mxu1 %v11954_v36  ;;  %3887 = vmatpush.msra.mxu3 %v11363_v29 }
 0x8b0   :  { %3841 = vmatpush.msra.mxu0 %v12082_v62  ;;  %3803 = vmatpush.msrb.mxu2 %v11343_v26  ;;  %v3180_v11 = vsel %vm527_vm0, %v6527_v8, %v6522_v14  ;;  %v3179_v48 = vsel %vm527_vm0, %v6512_v4, %v6523_v38 }
 0x8b1   :  { %3863 = vmatpush.msrb.mxu1 %v11972_v60  ;;  %3888 = vmatpush.msra.mxu3 %v15609_v43 }
 0x8b2   :  { %3619 = vmatmul.f32.gmra.mxu0 %v11673_v40  ;;  %5940 = vmatmul.msk.f32.gmra.mxu3 %vm679_vm2, %v11621_v9 }
 0x8b3   :  { %3842 = vmatpush.msra.mxu0 %v12098_v42  ;;  %3804 = vmatpush.msrb.mxu2 %v12016_v1 }
 0x8b4   :  { %3864 = vmatpush.msrb.mxu1 %v11988_v34  ;;  %3889 = vmatpush.msra.mxu3 %v15610_v46 }
 0x8b5   :  { %3843 = vmatpush.msra.mxu0 %v12111_v0  ;;  %3805 = vmatpush.msrb.mxu2 %v12028_v57 }
 0x8b6   :  { %3865 = vmatpush.msrb.mxu1 %v12004_v37  ;;  %3890 = vmatpush.msra.mxu3 %v15611_v30 }
 0x8b7   :  { %5937 = vmatmul.msk.f32.gmra.mxu2 %vm679_vm2, %v11685_v19  ;;  %3648 = vmatmul.f32.gmra.mxu1 %v11646_v45 }
 0x8b8   :  { %3844 = vmatpush.msra.mxu0 %v12130_v61  ;;  %3806 = vmatpush.msrb.mxu2 %v12049_v49 }
 0x8b9   :  { %3866 = vmatpush.msrb.mxu1 %v11300_v44  ;;  %3891 = vmatpush.msra.mxu3 %v3182_v28 }
 0x8ba   :  { %3807 = vmatpush.msrb.mxu2 %v12062_v3  ;;  %3622 = vmatmul.f32.gmra.mxu0 %v11727_v56 }
 0x8bb   :  { %3867 = vmatpush.msrb.mxu1 %v11315_v2  ;;  %3892 = vmatpush.msra.mxu3 %v3181_v27 }
 0x8bc   :  { %5941 = vmatmul.msk.f32.gmra.mxu3 %vm679_vm2, %v11685_v19  ;;  %3808 = vmatpush.msrb.mxu2 %v11954_v36 }
 0x8bd   :  { %3868 = vmatpush.msrb.mxu1 %v11323_v24  ;;  %3893 = vmatpush.msra.mxu3 %v3180_v11 }
 0x8be   :  { %3809 = vmatpush.msrb.mxu2 %v11972_v60 }
 0x8bf   :  { %3869 = vmatpush.msrb.mxu1 %v11318_v7  ;;  %3894 = vmatpush.msra.mxu3 %v3179_v48 }
 0x8c0   :  { %5938 = vmatmul.msk.f32.gmra.mxu2 %vm679_vm2, %v11731_v12  ;;  %3651 = vmatmul.f32.gmra.mxu1 %v11715_v58 }
 0x8c1   :  { %3810 = vmatpush.msrb.mxu2 %v11988_v34  ;;  %3870 = vmatpush.msrb.mxu1 %v11881_v21  ;;  %v15612_v21 = vld [vmem:[#allocation15_spill] sm:$0xff] }
 0x8c2   :  { %3895 = vmatpush.msra.mxu3 %v12082_v62  ;;  %3729 = vmatmul.f32.vlgmr.msrb.gmra.mxu0 %v11527_v5 }
 0x8c3   :  { %3811 = vmatpush.msrb.mxu2 %v12004_v37  ;;  %3871 = vmatpush.msrb.mxu1 %v11895_v33  ;;  %v15613_v33 = vld [vmem:[#allocation16_spill] sm:$0xff] }
 0x8c4   :  { %3896 = vmatpush.msra.mxu3 %v12098_v42  ;;  %3945 = vmatpush.msrb.mxu0 %v3182_v28  ;;  %v3276_v36 = vsel %vm630_vm1, %v6537_v50, %v15613_v33  ;;  %v3275_v55 = vsel %vm630_vm1, %v6538_v52, %v15613_v33 }
 0x8c5   :  { %5942 = vmatmul.msk.f32.gmra.mxu3 %vm679_vm2, %v11731_v12  ;;  %3812 = vmatpush.msrb.mxu2 %v11300_v44  ;;  %v3178_v44 = vsel %vm527_vm0, %v6528_v23, %v15612_v21 }
 0x8c6   :  { %3872 = vmatpush.msrb.mxu1 %v11906_v25  ;;  %3897 = vmatpush.msra.mxu3 %v12111_v0  ;;  %v3278_v25 = vsel %vm630_vm1, %v6532_v51, %v15613_v33 }
 0x8c7   :  { %3946 = vmatpush.msrb.mxu0 %v3181_v27  ;;  %3813 = vmatpush.msrb.mxu2 %v11315_v2  ;;  %v3177_v2 = vsel %vm527_vm0, %v6513_v6, %v15612_v21 }
 0x8c8   :  { %3873 = vmatpush.msrb.mxu1 %v11918_v31  ;;  %3898 = vmatpush.msra.mxu3 %v12130_v61  ;;  %v3175_v31 = vsel %vm527_vm0, %v6523_v38, %v15612_v21 }
 0x8c9   :  { %3700 = vmatmul.f32.vlgmr.msra.gmra.mxu2 %v11562_v16  ;;  %5943 = vmatmul.msk.f32.vlgmr.msra.gmra.mxu1 %vm679_vm2, %v11564_v39  ;;  %v12221_v60 = vpop.f32.mrf.mxu0 }
 0x8ca   :  { %3947 = vmatpush.msrb.mxu0 %v3180_v11  ;;  %3978 = vmatpush.msra.mxu1 %v3178_v44  ;;  %15614 = vst [vmem:[#allocation37_spill] sm:$0xff] %v12221_v60 }
 0x8cb   :  { %3814 = vmatpush.msrb.mxu2 %v11323_v24  ;;  %3899 = vmatpush.msra.mxu3 %v11340_v59  ;;  %v3176_v24 = vsel %vm527_vm0, %v6522_v14, %v15612_v21  ;;  %v12229_v10 = vpop.f32.mrf.mxu1 }
 0x8cc   :  { %3948 = vmatpush.msrb.mxu0 %v3179_v48  ;;  %3979 = vmatpush.msra.mxu1 %v3177_v2  ;;  %15615 = vst [vmem:[#allocation23_spill] sm:$0xff] %v12229_v10 }
 0x8cd   :  { %3815 = vmatpush.msrb.mxu2 %v11318_v7  ;;  %3900 = vmatpush.msra.mxu3 %v11347_v63  ;;  %v3277_v7 = vsel %vm630_vm1, %v6533_v20, %v15613_v33 }
 0x8ce   :  { %3787 = vmatmul.f32.vlgmr.msrb.gmra.mxu3 %v11562_v16  ;;  %3949 = vmatpush.msrb.mxu0 %v12082_v62 }
 0x8cf   :  { %3928 = vmatpush.msra.mxu2 %v3278_v25  ;;  %3980 = vmatpush.msra.mxu1 %v3176_v24 }
 0x8d0   :  { %3901 = vmatpush.msra.mxu3 %v11351_v54  ;;  %3950 = vmatpush.msrb.mxu0 %v12098_v42 }
 0x8d1   :  { %3929 = vmatpush.msra.mxu2 %v3277_v7  ;;  %3981 = vmatpush.msra.mxu1 %v3175_v31 }
 0x8d2   :  { %3902 = vmatpush.msra.mxu3 %v11343_v26  ;;  %3703 = vmatmul.f32.gmra.mxu2 %v11616_v53 }
 0x8d3   :  { %3930 = vmatpush.msra.mxu2 %v3276_v36  ;;  %3951 = vmatpush.msrb.mxu0 %v12111_v0  ;;  %v12233_v18 = vpop.f32.mrf.mxu2 }
 0x8d4   :  { %3982 = vmatpush.msra.mxu1 %v3278_v25  ;;  %4015 = vmatpush.msrb.mxu3 %v15613_v33  ;;  %15616 = vst [vmem:[#allocation45_spill] sm:$0xff] %v12233_v18 }
 0x8d5   :  { %3931 = vmatpush.msra.mxu2 %v3275_v55  ;;  %3952 = vmatpush.msrb.mxu0 %v12130_v61 }
 0x8d6   :  { %3983 = vmatpush.msra.mxu1 %v3277_v7  ;;  %4016 = vmatpush.msrb.mxu3 %v15613_v33 }
 0x8d7   :  { %3790 = vmatmul.f32.gmra.mxu3 %v11616_v53  ;;  %3953 = vmatpush.msrb.mxu0 %v11340_v59  ;;  %v12248_v59 = vpop.f32.mrf.mxu0  ;;  %v12252_v34 = vpop.f32.mrf.mxu1 }
 0x8d8   :  { %3984 = vmatpush.msra.mxu1 %v3276_v36  ;;  %4017 = vmatpush.msrb.mxu3 %v15613_v33  ;;  %v12244_v47 = vpop.f32.mrf.mxu3 }
 0x8d9   :  { %3732 = vmatmul.f32.gmra.mxu0 %v11586_v13  ;;  %5944 = vmatmul.msk.f32.gmra.mxu1 %vm679_vm2, %v11621_v9 }
 0x8da   :  { %3954 = vmatpush.msrb.mxu0 %v11347_v63  ;;  %3985 = vmatpush.msra.mxu1 %v3275_v55 }
 0x8db   :  { %4018 = vmatpush.msrb.mxu3 %v15613_v33  ;;  %3706 = vmatmul.f32.gmra.mxu2 %v11673_v40 }
 0x8dc   :  { %3955 = vmatpush.msrb.mxu0 %v11351_v54  ;;  %3986 = vmatpush.msra.mxu1 %v11363_v29  ;;  %v12257_v63 = vpop.f32.mrf.mxu2 }
 0x8de   :  { %3956 = vmatpush.msrb.mxu0 %v11343_v26  ;;  %3987 = vmatpush.msra.mxu1 %v15609_v43 }
 0x8df   :  { %3793 = vmatmul.f32.gmra.mxu3 %v11673_v40  ;;  %v12270_v54 = vpop.f32.mrf.mxu0 }
 0x8e0   :  { %3957 = vmatpush.msrb.mxu0 %v12016_v1  ;;  %3988 = vmatpush.msra.mxu1 %v15610_v46 }
 0x8e1   :  { %3735 = vmatmul.f32.gmra.mxu0 %v11646_v45  ;;  %5945 = vmatmul.msk.f32.gmra.mxu1 %vm679_vm2, %v11685_v19  ;;  %v12266_v26 = vpop.f32.mrf.mxu3  ;;  %v12272_v29 = vpop.f32.mrf.mxu1 }
 0x8e2   :  { %3958 = vmatpush.msrb.mxu0 %v12028_v57  ;;  %3989 = vmatpush.msra.mxu1 %v15611_v30 }
 0x8e3   :  { %3709 = vmatmul.f32.gmra.mxu2 %v11727_v56 }
 0x8e4   :  { %3959 = vmatpush.msrb.mxu0 %v12049_v49 }
 0x8e6   :  { %3960 = vmatpush.msrb.mxu0 %v12062_v3  ;;  %v12277_v35 = vpop.f32.mrf.mxu2 }
 0x8e7   :  { %3796 = vmatmul.f32.gmra.mxu3 %v11727_v56  ;;  %v12286_v15 = vpop.f32.mrf.mxu0 }
 0x8e9   :  { %3738 = vmatmul.f32.gmra.mxu0 %v11715_v58  ;;  %5946 = vmatmul.msk.f32.gmra.mxu1 %vm679_vm2, %v11731_v12 }
 0x8eb   :  { %3816 = vmatmul.f32.vlgmr.msrb.gmra.mxu2 %v11527_v5  ;;  %v12281_v37 = vpop.f32.mrf.mxu3  ;;  %v12288_v1 = vpop.f32.mrf.mxu1 }
 0x8ef   :  { %3903 = vmatmul.f32.vlgmr.msra.gmra.mxu3 %v11527_v5 }
 0x8f0   :  { %v12291_v57 = vpop.f32.mrf.mxu2 }
 0x8f1   :  { %5947 = vmatmul.msk.f32.vlgmr.msra.gmra.mxu0 %vm679_vm2, %v11564_v39  ;;  %3874 = vmatmul.f32.vlgmr.msrb.gmra.mxu1 %v11562_v16  ;;  %v12300_v4 = vpop.f32.mrf.mxu0 }
 0x8f2   :  { %15617 = vst [vmem:[#allocation33_spill] sm:$0xff] %v12300_v4 }
 0x8f3   :  { %3819 = vmatmul.f32.gmra.mxu2 %v11586_v13 }
 0x8f5   :  { %v12297_v8 = vpop.f32.mrf.mxu3  ;;  %v12302_v17 = vpop.f32.mrf.mxu1 }
 0x8f6   :  { %15618 = vst [vmem:[#allocation39_spill] sm:$0xff] %v12302_v17 }
 0x8f7   :  { %3906 = vmatmul.f32.gmra.mxu3 %v11586_v13 }
 0x8f9   :  { %5948 = vmatmul.msk.f32.gmra.mxu0 %vm679_vm2, %v11621_v9  ;;  %3877 = vmatmul.f32.gmra.mxu1 %v11616_v53 }
 0x8fb   :  { %3822 = vmatmul.f32.gmra.mxu2 %v11646_v45  ;;  %v12313_v3 = vpop.f32.mrf.mxu0 }
 0x8fc   :  { %v12304_v49 = vpop.f32.mrf.mxu2 }
 0x8ff   :  { %3909 = vmatmul.f32.gmra.mxu3 %v11646_v45 }
 0x900   :  { %v12315_v22 = vpop.f32.mrf.mxu1 }
 0x901   :  { %5949 = vmatmul.msk.f32.gmra.mxu0 %vm679_vm2, %v11685_v19  ;;  %3880 = vmatmul.f32.gmra.mxu1 %v11673_v40  ;;  %v12311_v51 = vpop.f32.mrf.mxu3 }
 0x902   :  { %15619 = vst [vmem:[#allocation41_spill] sm:$0xff] %v12311_v51 }
 0x903   :  { %3825 = vmatmul.f32.gmra.mxu2 %v11715_v58 }
 0x906   :  { %v12318_v20 = vpop.f32.mrf.mxu2  ;;  %v12329_v50 = vpop.f32.mrf.mxu0 }
 0x907   :  { %3912 = vmatmul.f32.gmra.mxu3 %v11715_v58 }
 0x909   :  { %5950 = vmatmul.msk.f32.gmra.mxu0 %vm679_vm2, %v11731_v12  ;;  %3883 = vmatmul.f32.gmra.mxu1 %v11727_v56 }
 0x90b   :  { %5951 = vmatmul.msk.f32.vlgmr.msra.gmra.mxu2 %vm679_vm2, %v11564_v39  ;;  %v12325_v62 = vpop.f32.mrf.mxu3  ;;  %v12331_v43 = vpop.f32.mrf.mxu1 }
 0x90f   :  { %5955 = vmatmul.msk.f32.vlgmr.msrb.gmra.mxu3 %vm679_vm2, %v11564_v39 }
 0x910   :  { %v12335_v42 = vpop.f32.mrf.mxu2  ;;  %v12345_v39 = vpop.f32.mrf.mxu0 }
 0x911   :  { %3961 = vmatmul.f32.vlgmr.msrb.gmra.mxu0 %v11562_v16  ;;  %3990 = vmatmul.f32.vlgmr.msra.gmra.mxu1 %v11527_v5 }
 0x913   :  { %5952 = vmatmul.msk.f32.gmra.mxu2 %vm679_vm2, %v11621_v9 }
 0x915   :  { %v12341_v52 = vpop.f32.mrf.mxu3  ;;  %v12347_v46 = vpop.f32.mrf.mxu1 }
 0x917   :  { %5956 = vmatmul.msk.f32.gmra.mxu3 %vm679_vm2, %v11621_v9 }
 0x919   :  { %3964 = vmatmul.f32.gmra.mxu0 %v11616_v53  ;;  %3993 = vmatmul.f32.gmra.mxu1 %v11586_v13 }
 0x91a   :  { %v12351_v5 = vpop.f32.mrf.mxu2  ;;  %v12361_v13 = vpop.f32.mrf.mxu0 }
 0x91b   :  { %5953 = vmatmul.msk.f32.gmra.mxu2 %vm679_vm2, %v11685_v19  ;;  %15620 = vst [vmem:[#allocation40_spill] sm:$0xff] %v12361_v13 }
 0x91f   :  { %5957 = vmatmul.msk.f32.gmra.mxu3 %vm679_vm2, %v11685_v19  ;;  %v12357_v16 = vpop.f32.mrf.mxu3  ;;  %v12363_v53 = vpop.f32.mrf.mxu1 }
 0x920   :  { %15621 = vst [vmem:[#allocation38_spill] sm:$0xff] %v12363_v53 }
 0x921   :  { %3967 = vmatmul.f32.gmra.mxu0 %v11673_v40  ;;  %3996 = vmatmul.f32.gmra.mxu1 %v11646_v45 }
 0x923   :  { %5954 = vmatmul.msk.f32.gmra.mxu2 %vm679_vm2, %v11731_v12 }
 0x924   :  { %v12365_v9 = vpop.f32.mrf.mxu2  ;;  %v3617_v45 = vpop.f32.mrf.mxu0 }
 0x925   :  { %15622 = vst [vmem:[#allocation28_spill] sm:$0xff] %v12365_v9 }
 0x927   :  { %5958 = vmatmul.msk.f32.gmra.mxu3 %vm679_vm2, %v11731_v12 }
 0x929   :  { %3970 = vmatmul.f32.gmra.mxu0 %v11727_v56  ;;  %3999 = vmatmul.f32.gmra.mxu1 %v11715_v58  ;;  %v12371_v40 = vpop.f32.mrf.mxu3  ;;  %v3646_v19 = vpop.f32.mrf.mxu1 }
 0x92a   :  { %15623 = vst [vmem:[#allocation21_spill] sm:$0xff] %v12371_v40 }
 0x92f   :  { %v12373_v23 = vpop.f32.mrf.mxu0 }
 0x930   :  { %v3588_v0 = vpop.f32.mrf.mxu2 }
 0x934   :  { %v12375_v6 = vpop.f32.mrf.mxu1 }
 0x935   :  { %v3675_v41 = vpop.f32.mrf.mxu3 }
 0x937   :  { %v12381_v14 = vpop.f32.mrf.mxu0 }
 0x93a   :  { %v12377_v30 = vpop.f32.mrf.mxu2 }
 0x93d   :  { %v12383_v12 = vpop.f32.mrf.mxu1 }
 0x93f   :  { %v12379_v61 = vpop.f32.mrf.mxu3  ;;  %v12389_v28 = vpop.f32.mrf.mxu0 }
 0x940   :  { %15625 = vst [vmem:[#allocation27_spill] sm:$0xff] %v12389_v28 }
 0x943   :  { %v12385_v56 = vpop.f32.mrf.mxu2 }
 0x946   :  { %v12393_v27 = vpop.f32.mrf.mxu1 }
 0x947   :  { %15627 = vst [vmem:[#allocation25_spill] sm:$0xff] %v12393_v27 }
 0x948   :  { %v12387_v58 = vpop.f32.mrf.mxu3 }
 0x949   :  { %15624 = vst [vmem:[#allocation34_spill] sm:$0xff] %v12387_v58  ;;  %v3647_v58 = vadd.f32 %v3646_v19, %v3617_v45 }
 0x94c   :  { %v12391_v38 = vpop.f32.mrf.mxu2 }
 0x94d   :  { %15626 = vst [vmem:[#allocation17_spill] sm:$0xff] %v12391_v38 }
 0x951   :  { %v12395_v11 = vpop.f32.mrf.mxu3 }
 0x952   :  { %15628 = vst [vmem:[#allocation43_spill] sm:$0xff] %v12395_v11 }
 0x955   :  { %v3704_v48 = vpop.f32.mrf.mxu2 }
 0x956   :  { %v3733_v44 = vpop.f32.mrf.mxu0  ;;  %v3762_v2 = vpop.f32.mrf.mxu1 }
 0x95a   :  { %v3791_v25 = vpop.f32.mrf.mxu3 }
 0x95e   :  { %v3707_v24 = vpop.f32.mrf.mxu2  ;;  %v3736_v7 = vpop.f32.mrf.mxu0 }
 0x95f   :  { %v12397_v31 = vpop.f32.mrf.mxu1 }
 0x962   :  { %v12399_v36 = vpop.f32.mrf.mxu3 }
 0x966   :  { %v12401_v55 = vpop.f32.mrf.mxu2  ;;  %v12403_v33 = vpop.f32.mrf.mxu0 }
 0x967   :  { %v12405_v32 = vpop.f32.mrf.mxu1 }
 0x968   :  { %15629 = vst [vmem:[#allocation22_spill] sm:$0xff] %v12405_v32 }
 0x96a   :  { %v12407_v21 = vpop.f32.mrf.mxu3 }
 0x96b   :  { %15630 = vst [vmem:[#allocation26_spill] sm:$0xff] %v12407_v21  ;;  %v3560_v21 = vadd.f32 %v12325_v62, %v12315_v22  ;;  %v12456_v22 = vld [vmem:[%s14971_s1 + $0x48] sm:$0xff]  ;;  %v12460_v62 = vadd.f32 %v3675_v41, %v3647_v58  ;;  %v3563_v41 = vadd.f32 %v12341_v52, %v12331_v43  ;;  %v3737_v43 = vadd.f32 %v3736_v7, %v3707_v24 }
 0x96c   :  { %v12507_v52 = vld [vmem:[%s14971_s1 + $0x88] sm:$0xff]  ;;  %v3479_v24 = vadd.f32 %v12351_v5, %v12297_v8  ;;  %v3392_v8 = vadd.f32 %v12286_v15, %v12291_v57  ;;  %v12545_v5 = vld [vmem:[%s14971_s1 + $0x90] sm:$0xff] }
 0x96e   :  { %v12409_v27 = vpop.f32.mrf.mxu2  ;;  %v12411_v11 = vpop.f32.mrf.mxu0  ;;  %v12560_v57 = vadd.f32 %v12345_v39, %v3479_v24  ;;  %v12587_v24 = vld [vmem:[%s14971_s1 + $0xa0] sm:$0xff] }
 0x96f   :  { %15631 = vst [vmem:[#allocation12_spill] sm:$0xff] %v12409_v27  ;;  %v12413_v40 = vpop.f32.mrf.mxu1 }
 0x970   :  { %15632 = vst [vmem:[#allocation24_spill] sm:$0xff] %v12411_v11 }
 0x971   :  { %15633 = vst [vmem:[#allocation42_spill] sm:$0xff] %v12413_v40  ;;  %v3473_v40 = vadd.f32 %v12318_v20, %v12266_v26  ;;  %v3476_v26 = vadd.f32 %v12335_v42, %v12281_v37  ;;  %v12445_v20 = vadd.f32 %v3588_v0, %v3560_v21 }
 0x972   :  { %v12415_v28 = vpop.f32.mrf.mxu3  ;;  %15640 = vst [vmem:[#allocation20_spill] sm:$0xff] %v12560_v57 }
 0x973   :  { %15634 = vst [vmem:[#allocation30_spill] sm:$0xff] %v12415_v28  ;;  %v3386_v28 = vadd.f32 %v12248_v59, %v12257_v63  ;;  %v12436_v18 = vadd.f32 %v12313_v3, %v3473_v40  ;;  %v3389_v59 = vadd.f32 %v12270_v54, %v12277_v35  ;;  %v12467_v54 = vld [vmem:[%s14971_s1 + $0x40] sm:$0xff]  ;;  %v12472_v42 = vadd.f32 %v12329_v50, %v3476_v26  ;;  %v12477_v40 = vld [vmem:[%s14971_s1 + $0x50] sm:$0xff] }
 0x974   :  { %v4042_v45 = vmul.f32 %v12477_v40, %v12445_v20  ;;  %v3650_v50 = vadd.f32 %v12375_v6, %v12373_v23  ;;  %15642 = vst [vmem:[#allocation29_spill] sm:$0xff] %v12587_v24 }
 0x975   :  { %v12484_v0 = vadd.f32 %v12272_v29, %v3389_v59  ;;  %v12502_v29 = vadd.f32 %v12377_v30, %v3563_v41  ;;  %v4049_v23 = vmul.f32 %v12507_v52, %v12472_v42  ;;  %v12550_v41 = vadd.f32 %v12397_v31, %v3737_v43  ;;  %v12567_v31 = vld [vmem:[%s14971_s1 + $0x98] sm:$0xff] }
 0x976   :  { %v3820_v38 = vpop.f32.mrf.mxu2  ;;  %v3849_v9 = vpop.f32.mrf.mxu0  ;;  %v12528_v7 = vadd.f32 %v12379_v61, %v3650_v50 }
 0x977   :  { %v3878_v10 = vpop.f32.mrf.mxu1  ;;  %v3821_v21 = vadd.f32 %v3820_v38, %v3791_v25  ;;  %v12495_v38 = vld [vmem:[%s14971_s1 + $0x58] sm:$0xff]  ;;  %v4050_v61 = vmul.f32 %v12545_v5, %v12502_v29 }
 0x978   :  { %v4051_v43 = vmul.f32 %v12567_v31, %v12528_v7 }
 0x97a   :  { %v3907_v53 = vpop.f32.mrf.mxu3 }
 0x97b   :  { %v3908_v30 = vadd.f32 %v3907_v53, %v3878_v10  ;;  %v12533_v10 = vld [vmem:[%s14971_s1 + $0x68] sm:$0xff] }
 0x97c   :  { %15638 = vst [vmem:[#allocation18_spill] sm:$0xff] %v12533_v10 }
 0x97e   :  { %v3823_v13 = vpop.f32.mrf.mxu2  ;;  %v12417_v51 = vpop.f32.mrf.mxu0 }
 0x97f   :  { %v12419_v17 = vpop.f32.mrf.mxu1 }
 0x982   :  { %v12421_v4 = vpop.f32.mrf.mxu3 }
 0x986   :  { %v12423_v32 = vpop.f32.mrf.mxu2  ;;  %v12425_v27 = vpop.f32.mrf.mxu0 }
 0x987   :  { %15635 = vst [vmem:[#allocation11_spill] sm:$0xff] %v12423_v32  ;;  %v12429_v11 = vpop.f32.mrf.mxu1  ;;  %v12441_v32 = vadd.f32 %v12252_v34, %v3386_v28  ;;  %v4041_v34 = vmul.f32 %v12456_v22, %v12436_v18 }
 0x988   :  { %15636 = vst [vmem:[#allocation9_spill] sm:$0xff] %v12429_v11  ;;  %v3734_v11 = vadd.f32 %v3733_v44, %v3704_v48  ;;  %v12499_v48 = vadd.f32 %v3849_v9, %v3821_v21  ;;  %v12514_v44 = vld [vmem:[%s14971_s1 + $0x60] sm:$0xff]  ;;  %v3824_v21 = vadd.f32 %v3823_v13, %v12399_v36  ;;  %v12555_v36 = vld [vmem:[%s14971_s1 + $0x70] sm:$0xff] }
 0x989   :  { %v4040_v35 = vmul.f32 %v12467_v54, %v12441_v32  ;;  %15637 = vst [vmem:[#allocation36_spill] sm:$0xff] %v12514_v44 }
 0x98a   :  { %v12433_v60 = vpop.f32.mrf.mxu3  ;;  %v12481_v19 = vadd.f32 %v3762_v2, %v3734_v11  ;;  %v4043_v11 = vmul.f32 %v12495_v38, %v12460_v62  ;;  %v12521_v2 = vld [vmem:[%s14971_s1 + $0x80] sm:$0xff]  ;;  %v4045_v53 = vmul.f32 %v12533_v10, %v12499_v48  ;;  %15639 = vst [vmem:[#allocation13_spill] sm:$0xff] %v12555_v36 }
 0x98b   :  { %v4073_v28 = vadd.f32 %v4041_v34, %v4040_v35  ;;  %v4048_v25 = vmul.f32 %v12521_v2, %v12484_v0 }
 0x98c   :  { %v4044_v9 = vmul.f32 %v12514_v44, %v12481_v19 }
 0x98d   :  { %v4074_v6 = vadd.f32 %v4073_v28, %v4042_v45  ;;  %v4082_v28 = vadd.f32 %v4049_v23, %v4048_v25  ;;  %v3653_v23 = vadd.f32 %v12383_v12, %v12381_v14  ;;  %v4052_v14 = vmul.f32 %v12587_v24, %v12550_v41 }
 0x98e   :  { %v12449_v63 = vpop.f32.mrf.mxu2  ;;  %v12451_v3 = vpop.f32.mrf.mxu0  ;;  %v3911_v12 = vadd.f32 %v12421_v4, %v12419_v17  ;;  %v15645_v17 = vld [vmem:[#allocation34_spill] sm:$0xff] }
 0x98f   :  { %v12462_v37 = vpop.f32.mrf.mxu1  ;;  %v4075_v34 = vadd.f32 %v4074_v6, %v4043_v11  ;;  %v3566_v11 = vadd.f32 %v12357_v16, %v12347_v46  ;;  %v12579_v46 = vadd.f32 %v12288_v1, %v3392_v8  ;;  %v4083_v16 = vadd.f32 %v4082_v28, %v4050_v61  ;;  %v12598_v1 = vld [vmem:[%s14971_s1 + $0x78] sm:$0xff]  ;;  %v15648_v8 = vld [vmem:[#allocation11_spill] sm:$0xff] }
 0x990   :  { %15643 = vst [vmem:[#allocation31_spill] sm:$0xff] %v12598_v1 }
 0x991   :  { %v4076_v13 = vadd.f32 %v4075_v34, %v4044_v9  ;;  %v12574_v9 = vadd.f32 %v12417_v51, %v3824_v21  ;;  %v12582_v25 = vadd.f32 %v12385_v56, %v3566_v11  ;;  %v3740_v51 = vadd.f32 %v12403_v33, %v12401_v55  ;;  %v12607_v34 = vld [vmem:[%s14971_s1 + $0xc8] sm:$0xff]  ;;  %v15650_v11 = vld [vmem:[#allocation37_spill] sm:$0xff] }
 0x992   :  { %v12490_v58 = vpop.f32.mrf.mxu3  ;;  %15644 = vst [vmem:[#allocation44_spill] sm:$0xff] %v12607_v34  ;;  %v4057_v33 = vmul.f32 %v12607_v34, %v12560_v57  ;;  %v4084_v4 = vadd.f32 %v4083_v16, %v4051_v43  ;;  %v12612_v55 = vadd.f32 %v15645_v17, %v3653_v23  ;;  %v12630_v23 = vld [vmem:[%s14971_s1 + $0xc0] sm:$0xff]  ;;  %v15658_v34 = vld [vmem:[#allocation41_spill] sm:$0xff] }
 0x993   :  { %15641 = vst [vmem:[#allocation10_spill] sm:$0xff] %v12582_v25 }
 0x994   :  { %15651 = vst [vmem:[#allocation32_spill] sm:$0xff] %v12630_v23 }
 0x996   :  { %v3936_v26 = vpop.f32.mrf.mxu2  ;;  %v3965_v59 = vpop.f32.mrf.mxu0 }
 0x997   :  { %v12538_v35 = vadd.f32 %v3936_v26, %v3908_v30  ;;  %v3994_v45 = vpop.f32.mrf.mxu1  ;;  %v4077_v30 = vadd.f32 %v4076_v13, %v4045_v53 }
 0x998   :  { %v3995_v50 = vadd.f32 %v3994_v45, %v3965_v59  ;;  %v3470_v59 = vadd.f32 %v12304_v49, %v12244_v47  ;;  %v12617_v45 = vld [vmem:[%s14971_s1 + $0xa8] sm:$0xff]  ;;  %v15647_v49 = vld [vmem:[#allocation26_spill] sm:$0xff] }
 0x999   :  { %v4046_v15 = vmul.f32 %v12555_v36, %v12538_v35  ;;  %15646 = vst [vmem:[#allocation35_spill] sm:$0xff] %v12617_v45  ;;  %v4053_v47 = vmul.f32 %v12617_v45, %v12574_v9  ;;  %v3827_v61 = vadd.f32 %v15648_v8, %v15647_v49  ;;  %v15655_v8 = vld [vmem:[#allocation33_spill] sm:$0xff] }
 0x99a   :  { %v4023_v6 = vpop.f32.mrf.mxu3 }
 0x99b   :  { %v12576_v39 = vadd.f32 %v4023_v6, %v3995_v50  ;;  %v4078_v26 = vadd.f32 %v4077_v30, %v4046_v15  ;;  %v15649_v15 = vld [vmem:[#allocation45_spill] sm:$0xff]  ;;  %v4056_v6 = vmul.f32 %v12630_v23, %v12579_v46  ;;  %v12637_v30 = vld [vmem:[%s14971_s1 + $0xd0] sm:$0xff] }
 0x99c   :  { %v3383_v43 = vadd.f32 %v15650_v11, %v15649_v15  ;;  %15652 = vst [vmem:[#allocation19_spill] sm:$0xff] %v12637_v30  ;;  %v4058_v16 = vmul.f32 %v12637_v30, %v12582_v25  ;;  %v12652_v15 = vadd.f32 %v15655_v8, %v3470_v59  ;;  %v15657_v11 = vld [vmem:[#allocation39_spill] sm:$0xff] }
 0x99d   :  { %v4047_v56 = vmul.f32 %v12598_v1, %v12576_v39  ;;  %v3557_v30 = vadd.f32 %v15658_v34, %v15657_v11  ;;  %v15662_v34 = vld [vmem:[#allocation23_spill] sm:$0xff] }
 0x99e   :  { %v3939_v53 = vpop.f32.mrf.mxu2  ;;  %v3968_v21 = vpop.f32.mrf.mxu0  ;;  %15656 = vst [vmem:[#allocation26_spill] sm:$0xff] %v12652_v15  ;;  %v15667_v25 = vld [vmem:[#allocation27_spill] sm:$0xff] }
 0x99f   :  { %v12623_v50 = vadd.f32 %v3939_v53, %v3911_v12  ;;  %v3997_v28 = vpop.f32.mrf.mxu1  ;;  %v4079_v13 = vadd.f32 %v4078_v26, %v4047_v56  ;;  %v4085_v56 = vadd.f32 %v4084_v4, %v4052_v14  ;;  %v15653_v26 = vld [vmem:[#allocation22_spill] sm:$0xff]  ;;  %v12647_v53 = vld [vmem:[%s14971_s1 + $0xb0] sm:$0xff] }
 0x9a0   :  { %v3998_v12 = vadd.f32 %v3997_v28, %v3968_v21  ;;  %v12642_v17 = vadd.f32 %v15653_v26, %v3740_v51  ;;  %15654 = vst [vmem:[#allocation34_spill] sm:$0xff] %v12647_v53  ;;  %v4091_v21 = vadd.f32 %v4057_v33, %v4056_v6  ;;  %v15659_v14 = vld [vmem:[#allocation40_spill] sm:$0xff]  ;;  %v15660_v4 = vld [vmem:[#allocation38_spill] sm:$0xff]  ;;  %v12661_v26 = vld [vmem:[%s14971_s1 + $0xd8] sm:$0xff]  ;;  %v12671_v33 = vadd.f32 %v15662_v34, %v3383_v43 }
 0x9a1   :  { %v4054_v49 = vmul.f32 %v12647_v53, %v12623_v50  ;;  %4080 = vadd.xlane.f32.xlu0 %v4079_v13  ;;  %v3644_v51 = vadd.f32 %v15660_v4, %v15659_v14  ;;  %15661 = vst [vmem:[#allocation11_spill] sm:$0xff] %v12661_v26  ;;  %v4059_v23 = vmul.f32 %v12661_v26, %v12612_v55  ;;  %v15664_v6 = vld [vmem:[#allocation28_spill] sm:$0xff]  ;;  %v15666_v4 = vld [vmem:[#allocation17_spill] sm:$0xff]  ;;  %v12681_v26 = vld [vmem:[%s14971_s1 + $0xe0] sm:$0xff] }
 0x9a2   :  { %v4026_v28 = vpop.f32.mrf.mxu3  ;;  %v12666_v13 = vadd.f32 %v12425_v27, %v3827_v61  ;;  %v4086_v8 = vadd.f32 %v4085_v56, %v4053_v47  ;;  %15663 = vst [vmem:[#allocation45_spill] sm:$0xff] %v12671_v33  ;;  %v12674_v11 = vadd.f32 %v15664_v6, %v3557_v30  ;;  %v4092_v14 = vadd.f32 %v4091_v21, %v4058_v16  ;;  %v15669_v61 = vld [vmem:[#allocation9_spill] sm:$0xff]  ;;  %v12697_v16 = vld [vmem:[%s14971_s1 + $0x8] sm:$0xff] }
 0x9a3   :  { %v12668_v59 = vadd.f32 %v4026_v28, %v3998_v12  ;;  %v3731_v57 = vadd.f32 %v15667_v25, %v15666_v4  ;;  %15668 = vst [vmem:[#allocation22_spill] sm:$0xff] %v12681_v26  ;;  %v4060_v27 = vmul.f32 %v12681_v26, %v12642_v17  ;;  %v3914_v47 = vadd.f32 %v12433_v60, %v15669_v61  ;;  %v12690_v43 = vld [vmem:[%s14971_s1 + $0xb8] sm:$0xff]  ;;  %v15673_v60 = vld [vmem:[#allocation43_spill] sm:$0xff]  ;;  %v15674_v28 = vld [vmem:[#allocation12_spill] sm:$0xff] }
 0x9a4   :  { %15665 = vst [vmem:[#allocation37_spill] sm:$0xff] %v12674_v11  ;;  %v4087_v25 = vadd.f32 %v4086_v8, %v4054_v49  ;;  %v4033_v12 = vmul.f32 %v12697_v16, %v12652_v15  ;;  %v15672_v56 = vld [vmem:[#allocation21_spill] sm:$0xff]  ;;  %v3818_v34 = vadd.f32 %v15674_v28, %v15673_v60  ;;  %v4093_v61 = vadd.f32 %v4092_v14, %v4059_v23  ;;  %v12709_v49 = vld [vmem:[%s14971_s1 + $0xe8] sm:$0xff]  ;;  %v12725_v14 = vld [vmem:[%s14971_s1 + $0x10] sm:$0xff] }
 0x9a5   :  { %15670 = vst [vmem:[#allocation33_spill] sm:$0xff] %v12690_v43  ;;  %v4055_v30 = vmul.f32 %v12690_v43, %v12668_v59  ;;  %v12702_v21 = vadd.f32 %v15672_v56, %v3644_v51  ;;  %v4061_v8 = vmul.f32 %v12709_v49, %v12666_v13  ;;  %v12718_v51 = vld [vmem:[%s14971_s1] sm:$0xff]  ;;  %v4034_v56 = vmul.f32 %v12725_v14, %v12674_v11  ;;  %v15678_v60 = vld [vmem:[#allocation25_spill] sm:$0xff] }
 0x9a6   :  { %15671 = vst [vmem:[#allocation39_spill] sm:$0xff] %v12697_v16  ;;  %v3942_v6 = vpop.f32.mrf.mxu2  ;;  %v3971_v4 = vpop.f32.mrf.mxu0  ;;  %v4032_v23 = vmul.f32 %v12718_v51, %v12671_v33  ;;  %v12730_v28 = vadd.f32 %v15678_v60, %v3731_v57  ;;  %v12742_v33 = vld [vmem:[%s14971_s1 + $0x18] sm:$0xff]  ;;  %v15682_v60 = vld [vmem:[#allocation30_spill] sm:$0xff] }
 0x9a7   :  { %15675 = vst [vmem:[#allocation41_spill] sm:$0xff] %v12709_v49  ;;  %v12713_v26 = vadd.f32 %v3942_v6, %v3914_v47  ;;  %v4000_v16 = vpop.f32.mrf.mxu1  ;;  %v4088_v15 = vadd.f32 %v4087_v25, %v4055_v30  ;;  %v4094_v30 = vadd.f32 %v4093_v61, %v4060_v27  ;;  %v12735_v25 = vld [vmem:[%s14971_s1 + $0xf0] sm:$0xff]  ;;  %v4035_v57 = vmul.f32 %v12742_v33, %v12702_v21  ;;  %v15681_v61 = vld [vmem:[#allocation42_spill] sm:$0xff] }
 0x9a8   :  { %15676 = vst [vmem:[#allocation40_spill] sm:$0xff] %v12718_v51  ;;  %v4001_v47 = vadd.f32 %v4000_v16, %v3971_v4  ;;  %v4064_v51 = vadd.f32 %v4033_v12, %v4032_v23  ;;  %v15680_v16 = vld [vmem:[#allocation24_spill] sm:$0xff]  ;;  %v12758_v11 = vld [vmem:[%s14971_s1 + $0x20] sm:$0xff] }
 0x9a9   :  { %15677 = vst [vmem:[#allocation38_spill] sm:$0xff] %v12725_v14  ;;  %v4062_v6 = vmul.f32 %v12735_v25, %v12713_v26  ;;  %4089 = vadd.xlane.f32.xlu2 %v4088_v15  ;;  %v12747_v27 = vadd.f32 %v15680_v16, %v3818_v34  ;;  %v3905_v14 = vadd.f32 %v15682_v60, %v15681_v61  ;;  %v12768_v61 = vld [vmem:[%s14971_s1 + $0xf8] sm:$0xff] }
 0x9aa   :  { %15679 = vst [vmem:[#allocation23_spill] sm:$0xff] %v12735_v25  ;;  %v4029_v4 = vpop.f32.mrf.mxu3  ;;  %v3992_v25 = vadd.f32 %v12462_v37, %v12451_v3  ;;  %v4095_v12 = vadd.f32 %v4094_v30, %v4061_v8  ;;  %v4065_v23 = vadd.f32 %v4064_v51, %v4034_v56  ;;  %v4036_v34 = vmul.f32 %v12758_v11, %v12730_v28  ;;  %v12775_v51 = vld [vmem:[%s14971_s1 + $0x28] sm:$0xff]  ;;  %v12785_v30 = vld [vmem:[%s14971_s1 + $0x30] sm:$0xff] }
 0x9ab   :  { %v12753_v15 = vadd.f32 %v4029_v4, %v4001_v47  ;;  %v12763_v16 = vadd.f32 %v12449_v63, %v3905_v14  ;;  %15683 = vst [vmem:[#allocation28_spill] sm:$0xff] %v12768_v61  ;;  %v4037_v56 = vmul.f32 %v12775_v51, %v12747_v27 }
 0x9ac   :  { %v4096_v37 = vadd.f32 %v4095_v12, %v4062_v6  ;;  %v4066_v8 = vadd.f32 %v4065_v23, %v4035_v57  ;;  %v12780_v63 = vadd.f32 %v12490_v58, %v3992_v25  ;;  %15684 = vst [vmem:[#allocation17_spill] sm:$0xff] %v12785_v30  ;;  %v12792_v57 = vld [vmem:[%s14971_s1 + $0x38] sm:$0xff] }
 0x9ad   :  { %v4063_v3 = vmul.f32 %v12768_v61, %v12753_v15  ;;  %v4038_v6 = vmul.f32 %v12785_v30, %v12763_v16  ;;  %15685 = vst [vmem:[#allocation27_spill] sm:$0xff] %v12792_v57 }
 0x9ae   :  { %v4067_v47 = vadd.f32 %v4066_v8, %v4036_v34  ;;  %v4039_v58 = vmul.f32 %v12792_v57, %v12780_v63 }
 0x9af   :  { %v4097_v14 = vadd.f32 %v4096_v37, %v4063_v3 }
 0x9b0   :  { %v4068_v25 = vadd.f32 %v4067_v47, %v4037_v56 }
 0x9b1   :  { %4098 = vadd.xlane.f32.xlu1 %v4097_v14 }
 0x9b2   :  { %v4069_v4 = vadd.f32 %v4068_v25, %v4038_v6 }
 0x9b4   :  { %v4070_v60 = vadd.f32 %v4069_v4, %v4039_v58 }
 0x9b9   :  { %4071 = vadd.xlane.f32.xlu1 %v4070_v60 }
 0xa14   :  { %v4081_v12 = vpop.xlane.xlu0 %4080 }
 0xa15   :  { %v4101_v23 = vmul.f32 0.0078125, %v4081_v12 }
 0xa17   :  { %v4112_v34 = vsub.f32 %v12441_v32, %v4101_v23  ;;  %v4113_v3 = vsub.f32 %v12436_v18, %v4101_v23  ;;  %v4114_v37 = vsub.f32 %v12445_v20, %v4101_v23  ;;  %v4115_v8 = vsub.f32 %v12460_v62, %v4101_v23 }
 0xa18   :  { %v4116_v14 = vsub.f32 %v12481_v19, %v4101_v23  ;;  %v4117_v6 = vsub.f32 %v12499_v48, %v4101_v23  ;;  %v4118_v19 = vsub.f32 %v12538_v35, %v4101_v23  ;;  %v4119_v58 = vsub.f32 %v12576_v39, %v4101_v23 }
 0xa19   :  { %v12802_v30 = vmul.f32 %v12467_v54, %v4112_v34  ;;  %v12805_v56 = vmul.f32 %v12456_v22, %v4113_v3  ;;  %v12808_v47 = vmul.f32 %v12477_v40, %v4114_v37  ;;  %v12812_v32 = vmul.f32 %v12495_v38, %v4115_v8 }
 0xa1a   :  { %v12821_v25 = vmul.f32 %v12514_v44, %v4116_v14  ;;  %v12826_v12 = vmul.f32 %v12533_v10, %v4117_v6  ;;  %v12834_v23 = vmul.f32 %v12555_v36, %v4118_v19  ;;  %v12837_v8 = vmul.f32 %v12598_v1, %v4119_v58  ;;  %v15699_v44 = vld [vmem:[#allocation26_spill] sm:$0xff] }
 0xa1b   :  { %v4176_v18 = vmul.f32 %v12802_v30, %v12802_v30  ;;  %v4177_v20 = vmul.f32 %v12805_v56, %v12805_v56  ;;  %v4178_v48 = vmul.f32 %v12808_v47, %v12808_v47  ;;  %v4179_v34 = vmul.f32 %v12812_v32, %v12812_v32 }
 0xa1c   :  { %v4090_v62 = vpop.xlane.xlu2 %4089  ;;  %15686 = vst [vmem:[#allocation9_spill] sm:$0xff] %v12821_v25  ;;  %v4180_v14 = vmul.f32 %v12821_v25, %v12821_v25  ;;  %v4181_v58 = vmul.f32 %v12826_v12, %v12826_v12 }
 0xa1d   :  { %v4102_v4 = vmul.f32 0.0078125, %v4090_v62  ;;  %v4209_v60 = vadd.f32 %v4177_v20, %v4176_v18  ;;  %15687 = vst [vmem:[#allocation21_spill] sm:$0xff] %v12826_v12  ;;  %v15698_v12 = vld [vmem:[#allocation45_spill] sm:$0xff] }
 0xa1e   :  { %15688 = vst [vmem:[#allocation43_spill] sm:$0xff] %v12834_v23 }
 0xa1f   :  { %v4210_v3 = vadd.f32 %v4209_v60, %v4178_v48  ;;  %v4120_v37 = vsub.f32 %v12484_v0, %v4102_v4  ;;  %v4121_v35 = vsub.f32 %v12472_v42, %v4102_v4  ;;  %v4122_v39 = vsub.f32 %v12502_v29, %v4102_v4  ;;  %15689 = vst [vmem:[#allocation12_spill] sm:$0xff] %v12837_v8 }
 0xa20   :  { %v4123_v6 = vsub.f32 %v12528_v7, %v4102_v4  ;;  %v4124_v20 = vsub.f32 %v12550_v41, %v4102_v4  ;;  %v4125_v29 = vsub.f32 %v12574_v9, %v4102_v4  ;;  %v4126_v62 = vsub.f32 %v12623_v50, %v4102_v4 }
 0xa21   :  { %v4211_v18 = vadd.f32 %v4210_v3, %v4179_v34  ;;  %v12844_v0 = vmul.f32 %v12521_v2, %v4120_v37  ;;  %v12847_v42 = vmul.f32 %v12507_v52, %v4121_v35  ;;  %v12852_v19 = vmul.f32 %v12545_v5, %v4122_v39 }
 0xa22   :  { %v4182_v60 = vmul.f32 %v12834_v23, %v12834_v23  ;;  %v4183_v34 = vmul.f32 %v12837_v8, %v12837_v8  ;;  %v12863_v9 = vmul.f32 %v12567_v31, %v4123_v6  ;;  %v4127_v35 = vsub.f32 %v12668_v59, %v4102_v4 }
 0xa23   :  { %v4212_v7 = vadd.f32 %v4211_v18, %v4180_v14  ;;  %v4184_v41 = vmul.f32 %v12844_v0, %v12844_v0  ;;  %v4185_v50 = vmul.f32 %v12847_v42, %v12847_v42  ;;  %v12869_v39 = vmul.f32 %v12587_v24, %v4124_v20  ;;  %v15700_v24 = vld [vmem:[#allocation37_spill] sm:$0xff] }
 0xa24   :  { %v4099_v48 = vpop.xlane.xlu1 %4098  ;;  %v12872_v14 = vmul.f32 %v12617_v45, %v4125_v29  ;;  %v12875_v18 = vmul.f32 %v12647_v53, %v4126_v62  ;;  %v4186_v6 = vmul.f32 %v12852_v19, %v12852_v19  ;;  %v4187_v4 = vmul.f32 %v12863_v9, %v12863_v9 }
 0xa25   :  { %v4103_v3 = vmul.f32 0.0078125, %v4099_v48  ;;  %v4213_v37 = vadd.f32 %v4212_v7, %v4181_v58  ;;  %v4218_v1 = vadd.f32 %v4185_v50, %v4184_v41  ;;  %v15691_v48 = vld [vmem:[#allocation20_spill] sm:$0xff]  ;;  %v15692_v7 = vld [vmem:[#allocation10_spill] sm:$0xff]  ;;  %v12886_v62 = vmul.f32 %v12690_v43, %v4127_v35  ;;  %v15696_v35 = vld [vmem:[#allocation11_spill] sm:$0xff] }
 0xa26   :  { %15690 = vst [vmem:[#allocation25_spill] sm:$0xff] %v12872_v14  ;;  %v15693_v41 = vld [vmem:[#allocation32_spill] sm:$0xff]  ;;  %v15697_v43 = vld [vmem:[#allocation22_spill] sm:$0xff] }
 0xa27   :  { %v4214_v8 = vadd.f32 %v4213_v37, %v4182_v60  ;;  %v4128_v36 = vsub.f32 %v12579_v46, %v4103_v3  ;;  %v4129_v58 = vsub.f32 %v15691_v48, %v4103_v3  ;;  %v4130_v59 = vsub.f32 %v15692_v7, %v4103_v3  ;;  %v15694_v37 = vld [vmem:[#allocation44_spill] sm:$0xff]  ;;  %v15695_v7 = vld [vmem:[#allocation19_spill] sm:$0xff] }
 0xa28   :  { %v4219_v20 = vadd.f32 %v4218_v1, %v4186_v6  ;;  %v4131_v29 = vsub.f32 %v12612_v55, %v4103_v3  ;;  %v4132_v53 = vsub.f32 %v12642_v17, %v4103_v3  ;;  %v4188_v46 = vmul.f32 %v12869_v39, %v12869_v39 }
 0xa29   :  { %v4215_v10 = vadd.f32 %v4214_v8, %v4183_v34  ;;  %v12890_v60 = vmul.f32 %v15693_v41, %v4128_v36  ;;  %v12895_v48 = vmul.f32 %v15694_v37, %v4129_v58  ;;  %v12898_v1 = vmul.f32 %v15695_v7, %v4130_v59 }
 0xa2a   :  { %v4220_v50 = vadd.f32 %v4219_v20, %v4187_v4  ;;  %v4189_v55 = vmul.f32 %v12872_v14, %v12872_v14  ;;  %v4190_v17 = vmul.f32 %v12875_v18, %v12875_v18  ;;  %v4133_v36 = vsub.f32 %v12666_v13, %v4103_v3 }
 0xa2b   :  { %4216 = vadd.xlane.f32.xlu1 %v4215_v10  ;;  %v12906_v6 = vmul.f32 %v15696_v35, %v4131_v29  ;;  %v4192_v58 = vmul.f32 %v12890_v60, %v12890_v60  ;;  %v4193_v59 = vmul.f32 %v12895_v48, %v12895_v48  ;;  %v4191_v4 = vmul.f32 %v12886_v62, %v12886_v62 }
 0xa2c   :  { %v4072_v8 = vpop.xlane.xlu1 %4071  ;;  %v4221_v34 = vadd.f32 %v4220_v50, %v4188_v46  ;;  %v4134_v20 = vsub.f32 %v12713_v26, %v4103_v3  ;;  %v12916_v45 = vmul.f32 %v15697_v43, %v4132_v53  ;;  %v4135_v46 = vsub.f32 %v12753_v15, %v4103_v3  ;;  %v15701_v3 = vld [vmem:[#allocation23_spill] sm:$0xff] }
 0xa2d   :  { %v4100_v10 = vmul.f32 0.0078125, %v4072_v8  ;;  %v4194_v29 = vmul.f32 %v12898_v1, %v12898_v1  ;;  %v4227_v50 = vadd.f32 %v4193_v59, %v4192_v58  ;;  %v12922_v23 = vmul.f32 %v12709_v49, %v4133_v36  ;;  %v15702_v58 = vld [vmem:[#allocation40_spill] sm:$0xff]  ;;  %v15704_v49 = vld [vmem:[#allocation38_spill] sm:$0xff] }
 0xa2e   :  { %v4222_v13 = vadd.f32 %v4221_v34, %v4189_v55  ;;  %v4195_v53 = vmul.f32 %v12906_v6, %v12906_v6  ;;  %v12931_v34 = vmul.f32 %v15701_v3, %v4134_v20  ;;  %v4196_v36 = vmul.f32 %v12916_v45, %v12916_v45  ;;  %v5961_v3 = vld [vmem:[%s14976_s6 + $0x50] sm:$0xff] }
 0xa2f   :  { %v4104_v8 = vsub.f32 %v15698_v12, %v4100_v10  ;;  %v4105_v14 = vsub.f32 %v15699_v44, %v4100_v10  ;;  %v4106_v25 = vsub.f32 %v15700_v24, %v4100_v10  ;;  %v4228_v55 = vadd.f32 %v4227_v50, %v4194_v29  ;;  %v15703_v12 = vld [vmem:[#allocation39_spill] sm:$0xff] }
 0xa30   :  { %v4223_v26 = vadd.f32 %v4222_v13, %v4190_v17  ;;  %v4107_v15 = vsub.f32 %v12702_v21, %v4100_v10  ;;  %v4108_v13 = vsub.f32 %v12730_v28, %v4100_v10  ;;  %v12946_v21 = vmul.f32 %v12768_v61, %v4135_v46 }
 0xa31   :  { %v12936_v59 = vmul.f32 %v15702_v58, %v4104_v8  ;;  %v12939_v44 = vmul.f32 %v15703_v12, %v4105_v14  ;;  %v4229_v17 = vadd.f32 %v4228_v55, %v4195_v53  ;;  %v12943_v29 = vmul.f32 %v15704_v49, %v4106_v25 }
 0xa32   :  { %v4224_v24 = vadd.f32 %v4223_v26, %v4191_v4  ;;  %15705 = vst [vmem:[#allocation24_spill] sm:$0xff] %v12946_v21  ;;  %v4197_v20 = vmul.f32 %v12922_v23, %v12922_v23  ;;  %v4109_v50 = vsub.f32 %v12747_v27, %v4100_v10  ;;  %v12952_v14 = vmul.f32 %v12742_v33, %v4107_v15 }
 0xa33   :  { %v4230_v8 = vadd.f32 %v4229_v17, %v4196_v36  ;;  %v4168_v4 = vmul.f32 %v12936_v59, %v12936_v59  ;;  %v4169_v28 = vmul.f32 %v12939_v44, %v12939_v44  ;;  %v4198_v25 = vmul.f32 %v12931_v34, %v12931_v34 }
 0xa34   :  { %4225 = vadd.xlane.f32.xlu0 %v4224_v24  ;;  %v4110_v46 = vsub.f32 %v12763_v16, %v4100_v10  ;;  %v12962_v53 = vmul.f32 %v12758_v11, %v4108_v13  ;;  %v4170_v27 = vmul.f32 %v12943_v29, %v12943_v29  ;;  %v4199_v15 = vmul.f32 %v12946_v21, %v12946_v21  ;;  %v15706_v13 = vld [vmem:[#allocation17_spill] sm:$0xff] }
 0xa35   :  { %v4231_v26 = vadd.f32 %v4230_v8, %v4197_v20  ;;  %v4200_v55 = vadd.f32 %v4169_v28, %v4168_v4  ;;  %v4111_v36 = vsub.f32 %v12780_v63, %v4100_v10  ;;  %v12970_v17 = vmul.f32 %v12775_v51, %v4109_v50 }
 0xa36   :  { %v4171_v16 = vmul.f32 %v12952_v14, %v12952_v14  ;;  %v12975_v61 = vmul.f32 %v15706_v13, %v4110_v46  ;;  %v4172_v4 = vmul.f32 %v12962_v53, %v12962_v53 }
 0xa37   :  { %v4232_v24 = vadd.f32 %v4231_v26, %v4198_v25  ;;  %v4201_v20 = vadd.f32 %v4200_v55, %v4170_v27  ;;  %v12980_v21 = vmul.f32 %v12792_v57, %v4111_v36  ;;  %v4173_v63 = vmul.f32 %v12970_v17, %v12970_v17  ;;  %v5965_v27 = vld [vmem:[%s14977_s7 + $0x50] sm:$0xff]  ;;  %v5964_v36 = vld [vmem:[%s14977_s7 + $0x48] sm:$0xff] }
 0xa38   :  { %v4174_v50 = vmul.f32 %v12975_v61, %v12975_v61 }
 0xa39   :  { %v4233_v8 = vadd.f32 %v4232_v24, %v4199_v15  ;;  %v4202_v28 = vadd.f32 %v4201_v20, %v4171_v16  ;;  %15707 = vst [vmem:[#allocation42_spill] sm:$0xff] %v12980_v21  ;;  %v4175_v46 = vmul.f32 %v12980_v21, %v12980_v21  ;;  %v5966_v15 = vld [vmem:[%s14977_s7 + $0x58] sm:$0xff] }
 0xa3b   :  { %4234 = vadd.xlane.f32.xlu2 %v4233_v8  ;;  %v4203_v10 = vadd.f32 %v4202_v28, %v4172_v4 }
 0xa3d   :  { %v4204_v25 = vadd.f32 %v4203_v10, %v4173_v63 }
 0xa3f   :  { %v4205_v26 = vadd.f32 %v4204_v25, %v4174_v50 }
 0xa41   :  { %v4206_v55 = vadd.f32 %v4205_v26, %v4175_v46 }
 0xa43   :  { %4207 = vadd.xlane.f32.xlu2 %v4206_v55 }
 0xa44   :  { %4362 = vperm.xlu1 %6056, %v5965_v27  }
 0xa5b   :  { %4367 = vperm.xlu2 %6057, %v5966_v15  }
 0xa63   :  { %4357 = vperm.xlu2 %6057, %v5964_v36  }
 0xa9e   :  { %v4217_v24 = vpop.xlane.xlu1 %4216 }
 0xa9f   :  { %v4237_v16 = vmul.f32 0.0078125, %v4217_v24  ;;  %v5960_v24 = vld [vmem:[%s14976_s6 + $0x48] sm:$0xff] }
 0xaa1   :  { %v4246_v20 = vadd.f32 1e-05, %v4237_v16 }
 0xaa3   :  { %6715 = vrsqrt.f32 %v4246_v20  ;;  %vm4265_vm15 = vweird.f32 %v4246_v20 }
 0xaa7   :  { %v4226_v8 = vpop.xlane.xlu0 %4225 }
 0xaa8   :  { %v4238_v4 = vmul.f32 0.0078125, %v4226_v8 }
 0xaa9   :  { %v6716_v28 = vpop.eup %6715 }
 0xaaa   :  { %v4260_v63 = vmul.f32 %v6716_v28, %v4246_v20  ;;  %v4247_v10 = vadd.f32 1e-05, %v4238_v4  ;;  %vm4266_vm14 = vweird.f32 %v6716_v28 }
 0xaab   :  { %vm4267_vm3 = vmor %vm4265_vm15, %vm4266_vm14 }
 0xaac   :  { %v4261_v50 = vmul.f32 %v6716_v28, %v4260_v63  ;;  %6717 = vrsqrt.f32 %v4247_v10  ;;  %vm4275_vm5 = vweird.f32 %v4247_v10 }
 0xaae   :  { %v4262_v25 = vmul.f32 0.5, %v4261_v50  ;;  %v4235_v46 = vpop.xlane.xlu2 %4234 }
 0xaaf   :  { %v4239_v27 = vmul.f32 0.0078125, %v4235_v46 }
 0xab0   :  { %v4263_v26 = vsub.f32 1.5, %v4262_v25 }
 0xab1   :  { %v4248_v36 = vadd.f32 1e-05, %v4239_v27 }
 0xab2   :  { %v6718_v55 = vpop.eup %6717  ;;  %v4264_v15 = vmul.f32 %v6716_v28, %v4263_v26 }
 0xab3   :  { %v4270_v16 = vmul.f32 %v6718_v55, %v4247_v10  ;;  %6719 = vrsqrt.f32 %v4248_v36  ;;  %vm4276_vm4 = vweird.f32 %v6718_v55  ;;  %vm4285_vm8 = vweird.f32 %v4248_v36 }
 0xab4   :  { %v4268_v8 = vsel %vm4267_vm3, %v6716_v28, %v4264_v15  ;;  %vm4277_vm6 = vmor %vm4275_vm5, %vm4276_vm4 }
 0xab5   :  { %v4271_v4 = vmul.f32 %v6718_v55, %v4270_v16  ;;  %v4290_v63 = vmul.f32 %v5960_v24, %v4268_v8 }
 0xab6   :  { %v4208_v50 = vpop.xlane.xlu2 %4207 }
 0xab7   :  { %v4272_v57 = vmul.f32 0.5, %v4271_v4  ;;  %4300 = vperm.xlu0 %6058, %v4290_v63   ;;  %v4236_v25 = vmul.f32 0.0078125, %v4208_v50  ;;  %v5963_v50 = vld [vmem:[%s14977_s7 + $0x40] sm:$0xff] }
 0xab9   :  { %v4273_v21 = vsub.f32 1.5, %v4272_v57  ;;  %v6720_v46 = vpop.eup %6719  ;;  %v4245_v26 = vadd.f32 1e-05, %v4236_v25 }
 0xaba   :  { %v4280_v27 = vmul.f32 %v6720_v46, %v4248_v36  ;;  %vm4286_vm7 = vweird.f32 %v6720_v46  ;;  %v5959_v36 = vld [vmem:[%s14976_s6 + $0x40] sm:$0xff] }
 0xabb   :  { %v4274_v20 = vmul.f32 %v6718_v55, %v4273_v21  ;;  %6721 = vrsqrt.f32 %v4245_v26  ;;  %v5962_v21 = vld [vmem:[%s14976_s6 + $0x58] sm:$0xff]  ;;  %vm4287_vm9 = vmor %vm4285_vm8, %vm4286_vm7  ;;  %vm4255_vm11 = vweird.f32 %v4245_v26 }
 0xabc   :  { %v4281_v28 = vmul.f32 %v6720_v46, %v4280_v27 }
 0xabd   :  { %v4278_v15 = vsel %vm4277_vm6, %v6718_v55, %v4274_v20 }
 0xabe   :  { %v4291_v24 = vmul.f32 %v5961_v3, %v4278_v15  ;;  %v4282_v16 = vmul.f32 0.5, %v4281_v28 }
 0xac0   :  { %4305 = vperm.xlu1 %6056, %v4291_v24   ;;  %v4283_v8 = vsub.f32 1.5, %v4282_v16  ;;  %v13012_v24 = vpop.permute.xlu1 %4362  ;;  %v13014_v16 = vpop.permute.xlu2 %4367 }
 0xac1   :  { %v6722_v57 = vpop.eup %6721 }
 0xac2   :  { %v4284_v4 = vmul.f32 %v6720_v46, %v4283_v8  ;;  %v4250_v63 = vmul.f32 %v6722_v57, %v4245_v26  ;;  %vm4256_vm10 = vweird.f32 %v6722_v57 }
 0xac3   :  { %vm4257_vm12 = vmor %vm4255_vm11, %vm4256_vm10 }
 0xac4   :  { %v4251_v10 = vmul.f32 %v6722_v57, %v4250_v63  ;;  %v4288_v55 = vsel %vm4287_vm9, %v6720_v46, %v4284_v4 }
 0xac5   :  { %v4292_v3 = vmul.f32 %v5962_v21, %v4288_v55 }
 0xac6   :  { %v4252_v25 = vmul.f32 0.5, %v4251_v10 }
 0xac7   :  { %4310 = vperm.xlu0 %6058, %v4292_v3  }
 0xac8   :  { %4352 = vperm.xlu1 %6056, %v5963_v50   ;;  %v4253_v20 = vsub.f32 1.5, %v4252_v25  ;;  %v13038_v55 = vpop.permute.xlu2 %4357 }
 0xaca   :  { %v4254_v27 = vmul.f32 %v6722_v57, %v4253_v20 }
 0xacc   :  { %v4258_v28 = vsel %vm4257_vm12, %v6722_v57, %v4254_v27 }
 0xacd   :  { %v4289_v15 = vmul.f32 %v5959_v36, %v4258_v28 }
 0xacf   :  { %4295 = vperm.xlu0 %6058, %v4289_v15  }
 0xb29   :  { %v13016_v46 = vpop.permute.xlu0 %4300 }
 0xb2a   :  { %v4321_v21 = vmul.f32 %v13016_v46, %v12802_v30 }
 0xb2c   :  { %v4378_v25 = vadd.f32 %v13038_v55, %v4321_v21 }
 0xb32   :  { %v13018_v8 = vpop.permute.xlu1 %4305 }
 0xb33   :  { %v4335_v4 = vmul.f32 %v13018_v8, %v12875_v18  ;;  %v4336_v26 = vmul.f32 %v13018_v8, %v12886_v62  ;;  %v4329_v10 = vmul.f32 %v13018_v8, %v12844_v0  ;;  %v4330_v18 = vmul.f32 %v13018_v8, %v12847_v42 }
 0xb34   :  { %v4322_v62 = vmul.f32 %v13016_v46, %v12805_v56 }
 0xb35   :  { %v13025_v63 = vadd.f32 %v13012_v24, %v4335_v4  ;;  %v13028_v57 = vadd.f32 %v13012_v24, %v4336_v26  ;;  %v4386_v0 = vadd.f32 %v13012_v24, %v4329_v10  ;;  %v4387_v27 = vadd.f32 %v13012_v24, %v4330_v18 }
 0xb36   :  { %v4379_v36 = vadd.f32 %v13038_v55, %v4322_v62  ;;  %v4331_v62 = vmul.f32 %v13018_v8, %v12852_v19 }
 0xb37   :  { %v13059_v28 = vmul.f32 %v12521_v2, %v4386_v0  ;;  %v13070_v26 = vmul.f32 %v12507_v52, %v4387_v27  ;;  %v4324_v27 = vmul.f32 %v13016_v46, %v12812_v32 }
 0xb38   :  { %v13077_v2 = vmul.f32 %v12456_v22, %v4379_v36  ;;  %v4388_v0 = vadd.f32 %v13012_v24, %v4331_v62  ;;  %v4332_v36 = vmul.f32 %v13018_v8, %v12863_v9 }
 0xb39   :  { %v13034_v50 = vpop.permute.xlu0 %4310  ;;  %v4381_v32 = vadd.f32 %v13038_v55, %v4324_v27 }
 0xb3a   :  { %v4338_v3 = vmul.f32 %v13034_v50, %v12895_v48  ;;  %v4337_v30 = vmul.f32 %v13034_v50, %v12890_v60  ;;  %v13056_v48 = vmul.f32 %v12467_v54, %v4378_v25  ;;  %v13083_v21 = vpop.permute.xlu1 %4352  ;;  %v4340_v19 = vmul.f32 %v13034_v50, %v12906_v6 }
 0xb3c   :  { %v4395_v20 = vadd.f32 %v13014_v16, %v4338_v3  ;;  %v4394_v42 = vadd.f32 %v13014_v16, %v4337_v30  ;;  %v4323_v3 = vmul.f32 %v13016_v46, %v12808_v47 }
 0xb3e   :  { %v13053_v56 = vmul.f32 %v15694_v37, %v4395_v20  ;;  %v13062_v60 = vmul.f32 %v15693_v41, %v4394_v42  ;;  %v13131_v42 = vmul.f32 %v12545_v5, %v4388_v0  ;;  %v4389_v5 = vadd.f32 %v13012_v24, %v4332_v36  ;;  %v15712_v36 = vld [vmem:[#allocation36_spill] sm:$0xff] }
 0xb40   :  { %4688 = vmatpush.msra.mxu0 %v13053_v56  ;;  %v6554_v4 = vpack.i.bf16 %v13056_v48, %v13053_v56  ;;  %v6544_v54 = vpack.i.bf16 %v13059_v28, %v13062_v60 }
 0xb41   :  { %v13065_v15 = vpop.permute.xlu0 %4295 }
 0xb42   :  { %6555 = vrot.lane.b32.xlu2 %v6554_v4, %s6919_s24  ;;  %4689 = vmatpush.msra.mxu0 %v13070_v26  ;;  %v4314_v41 = vmul.f32 %v13065_v15, %v12939_v44  ;;  %v4313_v37 = vmul.f32 %v13065_v15, %v12936_v59  ;;  %v4316_v47 = vmul.f32 %v13065_v15, %v12952_v14 }
 0xb43   :  { %6545 = vrot.lane.b32.xlu0 %v6544_v54, %s6919_s24  ;;  %v4397_v14 = vadd.f32 %v13014_v16, %v4340_v19  ;;  %v4318_v19 = vmul.f32 %v13065_v15, %v12970_v17 }
 0xb44   :  { %4690 = vmatpush.msra.mxu0 %v13077_v2  ;;  %v4371_v52 = vadd.f32 %v13083_v21, %v4314_v41  ;;  %v4370_v10 = vadd.f32 %v13083_v21, %v4313_v37  ;;  %v4333_v41 = vmul.f32 %v13018_v8, %v12869_v39  ;;  %v13160_v37 = vmul.f32 %v12495_v38, %v4381_v32 }
 0xb45   :  { %v4342_v38 = vmul.f32 %v13034_v50, %v12922_v23 }
 0xb46   :  { %v13090_v18 = vmul.f32 %v15703_v12, %v4371_v52  ;;  %v13093_v22 = vmul.f32 %v15702_v58, %v4370_v10  ;;  %v4339_v12 = vmul.f32 %v13034_v50, %v12898_v1  ;;  %v4315_v58 = vmul.f32 %v13065_v15, %v12943_v29 }
 0xb47   :  { %v4380_v1 = vadd.f32 %v13038_v55, %v4323_v3  ;;  %v13163_v52 = vmul.f32 %v12567_v31, %v4389_v5  ;;  %v4317_v31 = vmul.f32 %v13065_v15, %v12962_v53  ;;  %v4399_v3 = vadd.f32 %v13014_v16, %v4342_v38 }
 0xb48   :  { %4691 = vmatpush.msra.mxu0 %v13090_v18  ;;  %v6549_v59 = vpack.i.bf16 %v13090_v18, %v13077_v2  ;;  %v6539_v44 = vpack.i.bf16 %v13093_v22, %v13070_v26  ;;  %v4396_v25 = vadd.f32 %v13014_v16, %v4339_v12  ;;  %v4372_v30 = vadd.f32 %v13083_v21, %v4315_v58  ;;  %v15709_v58 = vld [vmem:[#allocation29_spill] sm:$0xff] }
 0xb49   :  { %v13136_v6 = vmul.f32 %v12477_v40, %v4380_v1  ;;  %v4341_v40 = vmul.f32 %v13034_v50, %v12916_v45 }
 0xb4a   :  { %6560 = vrot.lane.b32.xlu2 %v6544_v54, %s6918_s5  ;;  %6540 = vrot.lane.b32.xlu1 %v6539_v44, %s6919_s24  ;;  %v13123_v29 = vmul.f32 %v15695_v7, %v4396_v25  ;;  %v13126_v20 = vmul.f32 %v15704_v49, %v4372_v30  ;;  %v4373_v7 = vadd.f32 %v13083_v21, %v4316_v47  ;;  %v15711_v47 = vld [vmem:[#allocation25_spill] sm:$0xff] }
 0xb4b   :  { %6550 = vrot.lane.b32.xlu0 %v6549_v59, %s6919_s24  ;;  %v13155_v54 = vmul.f32 %v15696_v35, %v4397_v14  ;;  %v4398_v10 = vadd.f32 %v13014_v16, %v4341_v40  ;;  %v4374_v25 = vadd.f32 %v13083_v21, %v4317_v31  ;;  %v4334_v27 = vmul.f32 %v13018_v8, %v15711_v47 }
 0xb4c   :  { %v6594_v49 = vpack.i.bf16 %v13131_v42, %v13123_v29  ;;  %v13152_v9 = vmul.f32 %v12742_v33, %v4373_v7  ;;  %v6589_v35 = vpack.i.bf16 %v13163_v52, %v13126_v20  ;;  %v15713_v7 = vld [vmem:[#allocation21_spill] sm:$0xff]  ;;  %v4319_v8 = vmul.f32 %v13065_v15, %v12975_v61 }
 0xb4d   :  { %v6604_v33 = vpack.i.bf16 %v13155_v54, %v13136_v6  ;;  %v13181_v39 = vmul.f32 %v15697_v43, %v4398_v10  ;;  %v6609_v23 = vpack.i.bf16 %v13163_v52, %v13155_v54  ;;  %v15710_v43 = vld [vmem:[#allocation41_spill] sm:$0xff]  ;;  %v13202_v1 = vmul.f32 %v12758_v11, %v4374_v25  ;;  %v15714_v10 = vld [vmem:[#allocation43_spill] sm:$0xff]  ;;  %v15718_v25 = vld [vmem:[#allocation24_spill] sm:$0xff] }
 0xb4e   :  { %v6599_v45 = vpack.i.bf16 %v13152_v9, %v13160_v37  ;;  %v13199_v0 = vmul.f32 %v15710_v43, %v4399_v3  ;;  %v4375_v11 = vadd.f32 %v13083_v21, %v4318_v19  ;;  %v4391_v5 = vadd.f32 %v13012_v24, %v4334_v27  ;;  %v15720_v43 = vld [vmem:[#allocation34_spill] sm:$0xff] }
 0xb4f   :  { %v4343_v40 = vmul.f32 %v13034_v50, %v12931_v34  ;;  %v4376_v38 = vadd.f32 %v13083_v21, %v4319_v8  ;;  %v13263_v19 = vmul.f32 %v15720_v43, %v13025_v63 }
 0xb52   :  { %6575 = vrot.lane.b32.xlu2 %v6549_v59, %s6918_s5  ;;  %6565 = vrot.lane.b32.xlu1 %v6554_v4, %s6918_s5  ;;  %v6584_v4 = vpack.i.bf16 %v13126_v20, %v13136_v6  ;;  %v4390_v59 = vadd.f32 %v13012_v24, %v4333_v41  ;;  %v13228_v41 = vmul.f32 %v12775_v51, %v4375_v11 }
 0xb53   :  { %6570 = vrot.lane.b32.xlu0 %v6539_v44, %s6918_s5  ;;  %v15708_v44 = vld [vmem:[#allocation9_spill] sm:$0xff]  ;;  %v4327_v24 = vmul.f32 %v13016_v46, %v15714_v10  ;;  %v4400_v51 = vadd.f32 %v13014_v16, %v4343_v40 }
 0xb54   :  { %v4325_v12 = vmul.f32 %v13016_v46, %v15708_v44  ;;  %v13186_v62 = vmul.f32 %v15709_v58, %v4390_v59  ;;  %v15717_v58 = vld [vmem:[#allocation23_spill] sm:$0xff] }
 0xb55   :  { %v4384_v44 = vadd.f32 %v13038_v55, %v4327_v24  ;;  %v13254_v3 = vmul.f32 %v15717_v58, %v4400_v51 }
 0xb56   :  { %v6619_v30 = vpack.i.bf16 %v13186_v62, %v13181_v39  ;;  %v4382_v53 = vadd.f32 %v13038_v55, %v4325_v12  ;;  %v13251_v12 = vmul.f32 %v15706_v13, %v4376_v38 }
 0xb57   :  { %v6659_v13 = vpack.i.bf16 %v13263_v19, %v13254_v3 }
 0xb58   :  { %v13209_v14 = vmul.f32 %v15712_v36, %v4382_v53 }
 0xb5a   :  { %6595 = vrot.lane.b32.xlu2 %v6594_v49, %s6919_s24  ;;  %6580 = vrot.lane.b32.xlu1 %v6594_v49, %s6918_s5  ;;  %v4326_v49 = vmul.f32 %v13016_v46, %v15713_v7  ;;  %v6624_v32 = vpack.i.bf16 %v13202_v1, %v13209_v14  ;;  %v15722_v7 = vld [vmem:[#allocation28_spill] sm:$0xff] }
 0xb5b   :  { %6585 = vrot.lane.b32.xlu0 %v6584_v4, %s6918_s5  ;;  %v6644_v4 = vpack.i.bf16 %v13199_v0, %v13209_v14 }
 0xb5c   :  { %v4383_v17 = vadd.f32 %v13038_v55, %v4326_v49  ;;  %v15723_v49 = vld [vmem:[#allocation33_spill] sm:$0xff] }
 0xb62   :  { %6600 = vrot.lane.b32.xlu2 %v6599_v45, %s6919_s24  ;;  %6605 = vrot.lane.b32.xlu1 %v6604_v33, %s6919_s24 }
 0xb63   :  { %6590 = vrot.lane.b32.xlu0 %v6589_v35, %s6919_s24  ;;  %v15716_v35 = vld [vmem:[#allocation18_spill] sm:$0xff] }
 0xb64   :  { %v13236_v59 = vmul.f32 %v15716_v35, %v4383_v17 }
 0xb66   :  { %v6639_v31 = vpack.i.bf16 %v13228_v41, %v13236_v59 }
 0xb6a   :  { %6620 = vrot.lane.b32.xlu2 %v6619_v30, %s6919_s24  ;;  %6610 = vrot.lane.b32.xlu1 %v6609_v23, %s6918_s5  ;;  %v15719_v23 = vld [vmem:[#allocation13_spill] sm:$0xff] }
 0xb6b   :  { %6615 = vrot.lane.b32.xlu0 %v6599_v45, %s6918_s5  ;;  %v15715_v45 = vld [vmem:[#allocation35_spill] sm:$0xff]  ;;  %v13259_v53 = vmul.f32 %v15719_v23, %v4384_v44 }
 0xb6c   :  { %v13233_v33 = vmul.f32 %v15715_v45, %v4391_v5 }
 0xb6d   :  { %v6664_v47 = vpack.i.bf16 %v13251_v12, %v13259_v53 }
 0xb6e   :  { %v6649_v61 = vpack.i.bf16 %v13233_v33, %v13199_v0  ;;  %v6629_v34 = vpack.i.bf16 %v13233_v33, %v13202_v1 }
 0xb72   :  { %6645 = vrot.lane.b32.xlu2 %v6644_v4, %s6918_s5  ;;  %6625 = vrot.lane.b32.xlu1 %v6624_v32, %s6919_s24  ;;  %v13280_v4 = vmul.f32 %v15723_v49, %v13028_v57  ;;  %v15725_v32 = vld [vmem:[#allocation12_spill] sm:$0xff]  ;;  %v15726_v57 = vld [vmem:[#allocation27_spill] sm:$0xff] }
 0xb73   :  { %6635 = vrot.lane.b32.xlu0 %v6619_v30, %s6918_s5  ;;  %v4344_v30 = vmul.f32 %v13034_v50, %v15718_v25  ;;  %v15721_v50 = vld [vmem:[#allocation42_spill] sm:$0xff]  ;;  %v4328_v11 = vmul.f32 %v13016_v46, %v15725_v32  ;;  %v15728_v46 = vld [vmem:[#allocation31_spill] sm:$0xff] }
 0xb74   :  { %v4320_v36 = vmul.f32 %v13065_v15, %v15721_v50  ;;  %15724 = vst [vmem:[#allocation30_spill] sm:$0xff] %v13280_v4 }
 0xb75   :  { %v4401_v27 = vadd.f32 %v13014_v16, %v4344_v30  ;;  %v6669_v16 = vpack.i.bf16 %v13280_v4, %v13251_v12  ;;  %v4385_v15 = vadd.f32 %v13038_v55, %v4328_v11  ;;  %v15732_v11 = vld [vmem:[#allocation16_spill] sm:$0xff] }
 0xb76   :  { %v4377_v5 = vadd.f32 %v13083_v21, %v4320_v36 }
 0xb77   :  { %v13276_v63 = vmul.f32 %v15722_v7, %v4401_v27  ;;  %v13297_v40 = vmul.f32 %v15728_v46, %v4385_v15 }
 0xb78   :  { %v13294_v8 = vmul.f32 %v15726_v57, %v4377_v5 }
 0xb79   :  { %v6684_v17 = vpack.i.bf16 %v13276_v63, %v13259_v53  ;;  %15729 = vst [vmem:[#allocation10_spill] sm:$0xff] %v13297_v40  ;;  %v6689_v10 = vpack.i.bf16 %v13280_v4, %v13276_v63  ;;  %v13628_v4 = vld [vmem:[#allocation3 + $0x170] sm:$0xff] }
 0xb7a   :  { %6650 = vrot.lane.b32.xlu2 %v6649_v61, %s6919_s24  ;;  %6630 = vrot.lane.b32.xlu1 %v6629_v34, %s6918_s5  ;;  %15727 = vst [vmem:[#allocation20_spill] sm:$0xff] %v13294_v8  ;;  %v6694_v21 = vpack.i.bf16 %v13294_v8, %v13297_v40  ;;  %v15730_v34 = vld [vmem:[#allocation15_spill] sm:$0xff] }
 0xb7b   :  { %6640 = vrot.lane.b32.xlu0 %v6639_v31, %s6918_s5 }
 0xb82   :  { %6665 = vrot.lane.b32.xlu2 %v6664_v47, %s6918_s5  ;;  %6655 = vrot.lane.b32.xlu1 %v6639_v31, %s6919_s24 }
 0xb83   :  { %6660 = vrot.lane.b32.xlu0 %v6659_v13, %s6918_s5 }
 0xb8a   :  { %6670 = vrot.lane.b32.xlu2 %v6669_v16, %s6919_s24  ;;  %6675 = vrot.lane.b32.xlu1 %v6659_v13, %s6919_s24 }
 0xb8b   :  { %6685 = vrot.lane.b32.xlu0 %v6684_v17, %s6919_s24 }
 0xb92   :  { %6695 = vrot.lane.b32.xlu2 %v6694_v21, %s6918_s5  ;;  %6680 = vrot.lane.b32.xlu1 %v6694_v21, %s6919_s24 }
 0xb93   :  { %6690 = vrot.lane.b32.xlu0 %v6689_v10, %s6918_s5 }
 0xb9c   :  { %v13306_v55 = vpop.permute.xlu2 %6555 }
 0xb9d   :  { %v6557_v45 = vunpack.i.l.bf16 %v13306_v55  ;;  %v6558_v61 = vunpack.i.h.bf16 %v13306_v55  ;;  %v13475_v55 = vld [vmem:[#allocation3 + $0x120] sm:$0xff] }
 0xb9f   :  { %v13333_v30 = vsel %vm527_vm0, %v15730_v34, %v6558_v61 }
 0xba4   :  { %v6561_v58 = vpop.permute.xlu2 %6560 }
 0xba5   :  { %v6562_v43 = vunpack.i.l.bf16 %v6561_v58  ;;  %v6563_v36 = vunpack.i.h.bf16 %v6561_v58 }
 0xba7   :  { %v4633_v16 = vsel %vm630_vm1, %v15732_v11, %v6562_v43  ;;  %v4632_v17 = vsel %vm630_vm1, %v15732_v11, %v6563_v36 }
 0xbb5   :  { %v6546_v24 = vpop.permute.xlu0 %6545 }
 0xbb6   :  { %v6548_v35 = vunpack.i.h.bf16 %v6546_v24  ;;  %v6547_v38 = vunpack.i.l.bf16 %v6546_v24  ;;  %v6576_v24 = vpop.permute.xlu2 %6575 }
 0xbb8   :  { %v13313_v31 = vsel %vm527_vm0, %v15730_v34, %v6547_v38  ;;  %v13319_v44 = vsel %vm527_vm0, %v6547_v38, %v6557_v45  ;;  %v13327_v25 = vsel %vm527_vm0, %v15730_v34, %v6548_v35 }
 0xbb9   :  { %4659 = vmatpush.msrb.mxu2 %v13313_v31  ;;  %4692 = vmatpush.msra.mxu0 %v13319_v44 }
 0xbba   :  { %4746 = vmatpush.msra.mxu3 %v13319_v44 }
 0xbbb   :  { %4660 = vmatpush.msrb.mxu2 %v13327_v25 }
 0xbbc   :  { %v13335_v23 = vpop.permute.xlu1 %6540 }
 0xbbd   :  { %4661 = vmatpush.msrb.mxu2 %v13333_v30  ;;  %v13338_v47 = vpop.permute.xlu0 %6550  ;;  %v6543_v13 = vunpack.i.h.bf16 %v13335_v23  ;;  %v6542_v27 = vunpack.i.l.bf16 %v13335_v23 }
 0xbbe   :  { %v6552_v50 = vunpack.i.l.bf16 %v13338_v47  ;;  %v15206_v7 = vunpack.i.h.bf16 %v13338_v47 }
 0xbbf   :  { %v13347_v49 = vsel %vm527_vm0, %v15730_v34, %v6543_v13  ;;  %v13353_v32 = vsel %vm527_vm0, %v6548_v35, %v6542_v27 }
 0xbc0   :  { %4662 = vmatpush.msrb.mxu2 %v13347_v49  ;;  %4693 = vmatpush.msra.mxu0 %v13353_v32  ;;  %v13365_v5 = vsel %vm527_vm0, %v6558_v61, %v6552_v50  ;;  %v13376_v15 = vsel %vm527_vm0, %v6543_v13, %v15206_v7  ;;  %v6577_v13 = vunpack.i.l.bf16 %v6576_v24 }
 0xbc1   :  { %4747 = vmatpush.msra.mxu3 %v13353_v32 }
 0xbc2   :  { %4663 = vmatpush.msrb.mxu2 %v4633_v16  ;;  %4694 = vmatpush.msra.mxu0 %v13365_v5 }
 0xbc3   :  { %4748 = vmatpush.msra.mxu3 %v13365_v5 }
 0xbc4   :  { %v6566_v57 = vpop.permute.xlu1 %6565  ;;  %4664 = vmatpush.msrb.mxu2 %v4632_v17  ;;  %4695 = vmatpush.msra.mxu0 %v13376_v15 }
 0xbc5   :  { %v6571_v46 = vpop.permute.xlu0 %6570  ;;  %v6568_v21 = vunpack.i.h.bf16 %v6566_v57  ;;  %v6567_v10 = vunpack.i.l.bf16 %v6566_v57  ;;  %4749 = vmatpush.msra.mxu3 %v13376_v15  ;;  %v6578_v57 = vunpack.i.h.bf16 %v6576_v24  ;;  %v13408_v24 = vpop.permute.xlu2 %6595 }
 0xbc6   :  { %v6573_v35 = vunpack.i.h.bf16 %v6571_v46  ;;  %v6572_v38 = vunpack.i.l.bf16 %v6571_v46 }
 0xbc7   :  { %v4631_v61 = vsel %vm630_vm1, %v15732_v11, %v6568_v21  ;;  %v4629_v58 = vsel %vm630_vm1, %v6562_v43, %v6567_v10  ;;  %v4627_v46 = vsel %vm630_vm1, %v6568_v21, %v6577_v13  ;;  %v15733_v43 = vmov 0.0  }
 0xbc8   :  { %4665 = vmatpush.msrb.mxu2 %v4631_v61  ;;  %4696 = vmatpush.msra.mxu0 %v4629_v58  ;;  %v4630_v16 = vsel %vm630_vm1, %v15732_v11, %v6573_v35  ;;  %v4628_v17 = vsel %vm630_vm1, %v6563_v36, %v6572_v38  ;;  %v4626_v36 = vsel %vm630_vm1, %v6573_v35, %v6578_v57 }
 0xbc9   :  { %4750 = vmatpush.msra.mxu3 %v4629_v58 }
 0xbca   :  { %4666 = vmatpush.msrb.mxu2 %v4630_v16  ;;  %4697 = vmatpush.msra.mxu0 %v4628_v17 }
 0xbcb   :  { %4751 = vmatpush.msra.mxu3 %v4628_v17 }
 0xbcc   :  { %v13392_v7 = vpop.permute.xlu1 %6580  ;;  %4667 = vmatpush.msrb.mxu2 %v15733_v43  ;;  %4698 = vmatpush.msra.mxu0 %v4627_v46 }
 0xbcd   :  { %v13395_v61 = vpop.permute.xlu0 %6585  ;;  %v6582_v58 = vunpack.i.l.bf16 %v13392_v7  ;;  %4752 = vmatpush.msra.mxu3 %v4627_v46  ;;  %v6583_v16 = vunpack.i.h.bf16 %v13392_v7  ;;  %v15210_v46 = vunpack.i.l.bf16 %v13408_v24 }
 0xbce   :  { %4668 = vmatpush.msrb.mxu2 %v15733_v43  ;;  %4699 = vmatpush.msra.mxu0 %v4626_v36  ;;  %v15207_v17 = vunpack.i.l.bf16 %v13395_v61  ;;  %v15214_v35 = vunpack.i.h.bf16 %v13395_v61  ;;  %v15735_v7 = vunpack.i.l.bf16 %v13395_v61 }
 0xbcf   :  { %4753 = vmatpush.msra.mxu3 %v4626_v36  ;;  %v13406_v21 = vsel %vm630_vm1, %v6567_v10, %v6582_v58  ;;  %v13422_v10 = vsel %vm630_vm1, %v6572_v38, %v6583_v16  ;;  %v13439_v38 = vld [vmem:[#allocation3 + $0x128] sm:$0xff] }
 0xbd0   :  { %4669 = vmatpush.msrb.mxu2 %v15733_v43  ;;  %4700 = vmatpush.msra.mxu0 %v13062_v60 }
 0xbd1   :  { %4729 = vmatpush.msrb.mxu1 %v13406_v21  ;;  %4754 = vmatpush.msra.mxu3 %v13062_v60  ;;  %v13435_v60 = vsel %vm630_vm1, %v6577_v13, %v15207_v17  ;;  %v15208_v13 = vunpack.i.h.bf16 %v13408_v24 }
 0xbd2   :  { %4670 = vmatpush.msrb.mxu2 %v15733_v43  ;;  %4701 = vmatpush.msra.mxu0 %v13059_v28 }
 0xbd3   :  { %4730 = vmatpush.msrb.mxu1 %v13422_v10  ;;  %4755 = vmatpush.msra.mxu3 %v13059_v28  ;;  %v13449_v28 = vsel %vm630_vm1, %v6578_v57, %v15214_v35  ;;  %v15738_v35 = vunpack.i.l.bf16 %v13408_v24 }
 0xbd4   :  { %v13427_v36 = vpop.permute.xlu1 %6605  ;;  %4671 = vmatpush.msrb.mxu2 %v15730_v34  ;;  %4702 = vmatpush.msra.mxu0 %v13056_v48 }
 0xbd5   :  { %4731 = vmatpush.msrb.mxu1 %v13435_v60  ;;  %4756 = vmatpush.msra.mxu3 %v13056_v48  ;;  %v13441_v43 = vpop.permute.xlu0 %6590  ;;  %v13460_v48 = vsel %vm527_vm0, %v6557_v45, %v15210_v46  ;;  %v15209_v17 = vunpack.i.l.bf16 %v13427_v36  ;;  %v13477_v45 = vld [vmem:[#allocation3 + $0x130] sm:$0xff] }
 0xbd6   :  { %4672 = vmatpush.msrb.mxu2 %v15730_v34  ;;  %4703 = vmatpush.msra.mxu0 %v13093_v22  ;;  %v15212_v57 = vunpack.i.l.bf16 %v13441_v43 }
 0xbd7   :  { %4732 = vmatpush.msrb.mxu1 %v13449_v28  ;;  %4757 = vmatpush.msra.mxu3 %v13093_v22  ;;  %v13473_v22 = vsel %vm527_vm0, %v6542_v27, %v15208_v13  ;;  %v13499_v27 = vld [vmem:[#allocation3 + $0x140] sm:$0xff]  ;;  %v15734_v13 = vunpack.i.h.bf16 %v13338_v47  ;;  %v13529_v47 = vld [vmem:[#allocation3 + $0x138] sm:$0xff] }
 0xbd8   :  { %4704 = vmatmul.f32.vlgmr.msra.gmra.mxu0 %v13439_v38  ;;  %4673 = vmatpush.msrb.mxu2 %v15730_v34 }
 0xbd9   :  { %4833 = vmatpush.msra.mxu1 %v13460_v48  ;;  %4758 = vmatpush.msra.mxu3 %v13313_v31  ;;  %v13492_v31 = vsel %vm527_vm0, %v6552_v50, %v15209_v17  ;;  %v13508_v50 = vsel %vm527_vm0, %v15734_v13, %v15212_v57  ;;  %v13534_v13 = vld [vmem:[#allocation3 + $0x148] sm:$0xff]  ;;  %v15736_v57 = vunpack.i.h.bf16 %v13395_v61  ;;  %v13585_v61 = vld [vmem:[#allocation3 + $0x150] sm:$0xff] }
 0xbda   :  { %4674 = vmatpush.msrb.mxu2 %v15730_v34  ;;  %5967 = vmatmul.msk.f32.vlgmr.msrb.gmra.mxu1 %vm679_vm2, %v13477_v45 }
 0xbdb   :  { %4834 = vmatpush.msra.mxu1 %v13473_v22  ;;  %4759 = vmatpush.msra.mxu3 %v13327_v25 }
 0xbdc   :  { %4675 = vmatmul.f32.vlgmr.msrb.gmra.mxu2 %v13475_v55  ;;  %v13494_v23 = vpop.permute.xlu1 %6610 }
 0xbdd   :  { %4775 = vmatpush.msra.mxu2 %v13123_v29  ;;  %4835 = vmatpush.msra.mxu1 %v13492_v31  ;;  %v15211_v25 = vunpack.i.l.bf16 %v13494_v23  ;;  %v13512_v17 = vpop.permute.xlu0 %6615  ;;  %v15213_v46 = vunpack.i.h.bf16 %v13494_v23 }
 0xbde   :  { %4760 = vmatpush.msra.mxu3 %v13333_v30 }
 0xbdf   :  { %4776 = vmatpush.msra.mxu2 %v13131_v42  ;;  %4836 = vmatpush.msra.mxu1 %v13508_v50  ;;  %v13523_v30 = vsel %vm630_vm1, %v6582_v58, %v15211_v25  ;;  %v4620_v58 = vsel %vm630_vm1, %v6583_v16, %v15213_v46  ;;  %v15218_v25 = vunpack.i.h.bf16 %v13512_v17  ;;  %v13559_v46 = vld [vmem:[#allocation3 + $0x158] sm:$0xff] }
 0xbe0   :  { %4761 = vmatpush.msra.mxu3 %v13347_v49  ;;  %4707 = vmatmul.f32.gmra.mxu0 %v13499_v27  ;;  %v15216_v49 = vunpack.i.l.bf16 %v13512_v17 }
 0xbe1   :  { %4762 = vmatmul.f32.vlgmr.msra.gmra.mxu3 %v13475_v55  ;;  %4777 = vmatpush.msra.mxu2 %v13136_v6  ;;  %v4618_v11 = vsel %vm630_vm1, %v15736_v57, %v15218_v25  ;;  %v15739_v57 = vunpack.i.h.bf16 %v13441_v43  ;;  %v15740_v25 = vunpack.i.h.bf16 %v13408_v24  ;;  %v15741_v24 = vunpack.i.l.bf16 %v13427_v36 }
 0xbe2   :  { %4837 = vmatpush.msra.mxu1 %v13406_v21  ;;  %4862 = vmatpush.msrb.mxu3 %v13155_v54  ;;  %v4619_v16 = vsel %vm630_vm1, %v15735_v7, %v15216_v49  ;;  %v13571_v7 = vpop.permute.xlu2 %6600  ;;  %v15737_v49 = vunpack.i.h.bf16 %v13427_v36 }
 0xbe3   :  { %4816 = vmatpush.msrb.mxu0 %v13523_v30  ;;  %4778 = vmatpush.msra.mxu2 %v13126_v20  ;;  %v13595_v8 = vsel %vm527_vm0, %v15740_v25, %v15739_v57  ;;  %v15225_v40 = vunpack.i.h.bf16 %v13571_v7 }
 0xbe4   :  { %4838 = vmatpush.msra.mxu1 %v13422_v10  ;;  %4863 = vmatpush.msrb.mxu3 %v13163_v52  ;;  %v13581_v34 = vsel %vm527_vm0, %v15738_v35, %v15737_v49  ;;  %v13597_v35 = vld [vmem:[#allocation3 + $0x160] sm:$0xff]  ;;  %v6602_v49 = vunpack.i.l.bf16 %v13571_v7 }
 0xbe5   :  { %4817 = vmatpush.msrb.mxu0 %v4620_v58  ;;  %4678 = vmatmul.f32.gmra.mxu2 %v13529_v47 }
 0xbe6   :  { %5968 = vmatmul.msk.f32.gmra.mxu1 %vm679_vm2, %v13534_v13  ;;  %4779 = vmatpush.msra.mxu2 %v13460_v48  ;;  %v13614_v25 = vsel %vm527_vm0, %v15741_v24, %v6602_v49 }
 0xbe7   :  { %4839 = vmatpush.msra.mxu1 %v13435_v60  ;;  %4864 = vmatpush.msrb.mxu3 %v13160_v37 }
 0xbe8   :  { %4818 = vmatpush.msrb.mxu0 %v4619_v16  ;;  %4780 = vmatpush.msra.mxu2 %v13473_v22 }
 0xbe9   :  { %4840 = vmatpush.msra.mxu1 %v13449_v28  ;;  %4865 = vmatpush.msrb.mxu3 %v13152_v9 }
 0xbea   :  { %4819 = vmatpush.msrb.mxu0 %v4618_v11  ;;  %4765 = vmatmul.f32.gmra.mxu3 %v13529_v47  ;;  %v13640_v24 = vpop.permute.xlu2 %6620 }
 0xbeb   :  { %4710 = vmatmul.f32.gmra.mxu0 %v13559_v46  ;;  %4781 = vmatpush.msra.mxu2 %v13492_v31 }
 0xbec   :  { %4841 = vmatpush.msra.mxu1 %v13053_v56  ;;  %4866 = vmatpush.msrb.mxu3 %v13581_v34 }
 0xbed   :  { %4920 = vmatpush.msra.mxu0 %v13581_v34  ;;  %4782 = vmatpush.msra.mxu2 %v13508_v50 }
 0xbee   :  { %4842 = vmatpush.msra.mxu1 %v13070_v26  ;;  %4867 = vmatpush.msrb.mxu3 %v13595_v8 }
 0xbef   :  { %4921 = vmatpush.msra.mxu0 %v13595_v8  ;;  %4681 = vmatmul.f32.gmra.mxu2 %v13585_v61 }
 0xbf0   :  { %5969 = vmatmul.msk.f32.gmra.mxu1 %vm679_vm2, %v13597_v35  ;;  %4783 = vmatpush.msra.mxu2 %v13406_v21  ;;  %v15742_v21 = vunpack.i.l.bf16 %v13441_v43 }
 0xbf1   :  { %4843 = vmatpush.msra.mxu1 %v13077_v2  ;;  %4868 = vmatpush.msrb.mxu3 %v13614_v25 }
 0xbf2   :  { %4922 = vmatpush.msra.mxu0 %v13614_v25  ;;  %4784 = vmatpush.msra.mxu2 %v13422_v10  ;;  %v13626_v57 = vsel %vm527_vm0, %v15742_v21, %v15225_v40  ;;  %v13638_v10 = vld [vmem:[#allocation3 + $0x168] sm:$0xff]  ;;  %v13644_v21 = vld [vmem:[#allocation3 + $0x178] sm:$0xff]  ;;  %v13647_v40 = vpop.permute.xlu1 %6625 }
 0xbf3   :  { %4844 = vmatpush.msra.mxu1 %v13090_v18  ;;  %4869 = vmatpush.msrb.mxu3 %v13626_v57 }
 0xbf4   :  { %4923 = vmatpush.msra.mxu0 %v13626_v57  ;;  %4768 = vmatmul.f32.gmra.mxu3 %v13585_v61 }
 0xbf5   :  { %4713 = vmatmul.f32.gmra.mxu0 %v13628_v4  ;;  %4785 = vmatpush.msra.mxu2 %v13435_v60 }
 0xbf6   :  { %4845 = vmatpush.msra.mxu1 %v13319_v44  ;;  %4870 = vmatpush.msrb.mxu3 %v13523_v30  ;;  %v6636_v44 = vpop.permute.xlu0 %6635 }
 0xbf7   :  { %4924 = vmatpush.msra.mxu0 %v13523_v30  ;;  %4786 = vmatpush.msra.mxu2 %v13449_v28 }
 0xbf8   :  { %4846 = vmatpush.msra.mxu1 %v13353_v32  ;;  %4871 = vmatpush.msrb.mxu3 %v4620_v58  ;;  %v6637_v32 = vunpack.i.l.bf16 %v6636_v44 }
 0xbf9   :  { %4925 = vmatpush.msra.mxu0 %v4620_v58  ;;  %4684 = vmatmul.f32.gmra.mxu2 %v13638_v10 }
 0xbfa   :  { %5970 = vmatmul.msk.f32.gmra.mxu1 %vm679_vm2, %v13644_v21  ;;  %4787 = vmatpush.msra.mxu2 %v13053_v56  ;;  %v13662_v56 = vpop.permute.xlu2 %6645 }
 0xbfb   :  { %4847 = vmatpush.msra.mxu1 %v13365_v5  ;;  %4872 = vmatpush.msrb.mxu3 %v4619_v16  ;;  %v6638_v5 = vunpack.i.h.bf16 %v6636_v44  ;;  %v15226_v60 = vunpack.i.h.bf16 %v13662_v56 }
 0xbfc   :  { %4926 = vmatpush.msra.mxu0 %v4619_v16  ;;  %4788 = vmatpush.msra.mxu2 %v13070_v26  ;;  %v15743_v26 = vunpack.i.l.bf16 %v13494_v23 }
 0xbfd   :  { %4848 = vmatpush.msra.mxu1 %v13376_v15  ;;  %4873 = vmatpush.msrb.mxu3 %v4618_v11 }
 0xbfe   :  { %4927 = vmatpush.msra.mxu0 %v4618_v11  ;;  %4771 = vmatmul.f32.gmra.mxu3 %v13638_v10  ;;  %v13674_v11 = vpop.permute.xlu1 %6630  ;;  %v13691_v28 = vpop.permute.xlu0 %6640 }
 0xbff   :  { %4949 = vmatpush.msrb.mxu1 %v13181_v39  ;;  %4789 = vmatpush.msra.mxu2 %v13077_v2  ;;  %v13672_v2 = vsel %vm630_vm1, %v15743_v26, %v6637_v32  ;;  %v6632_v30 = vunpack.i.l.bf16 %v13674_v11  ;;  %v6633_v58 = vunpack.i.h.bf16 %v13674_v11  ;;  %v13717_v26 = vsel %vm630_vm1, %v6637_v32, %v15226_v60 }
 0xc00   :  { %5971 = vmatmul.msk.f32.vlgmr.msrb.gmra.mxu0 %vm679_vm2, %v13477_v45  ;;  %4874 = vmatpush.msrb.mxu3 %v13123_v29 }
 0xc01   :  { %4928 = vmatpush.msra.mxu0 %v13123_v29  ;;  %4950 = vmatpush.msrb.mxu1 %v13186_v62  ;;  %v15744_v29 = vunpack.i.h.bf16 %v13494_v23  ;;  %v15745_v23 = vunpack.i.l.bf16 %v13512_v17 }
 0xc02   :  { %4790 = vmatpush.msra.mxu2 %v13090_v18  ;;  %4875 = vmatpush.msrb.mxu3 %v13131_v42  ;;  %v6647_v18 = vunpack.i.l.bf16 %v13662_v56 }
 0xc03   :  { %4929 = vmatpush.msra.mxu0 %v13131_v42  ;;  %4951 = vmatpush.msrb.mxu1 %v13209_v14  ;;  %v13687_v15 = vsel %vm630_vm1, %v15744_v29, %v6638_v5  ;;  %v6622_v42 = vunpack.i.l.bf16 %v13640_v24  ;;  %v6623_v29 = vunpack.i.h.bf16 %v13640_v24  ;;  %v15748_v24 = vunpack.i.h.bf16 %v13441_v43 }
 0xc04   :  { %4903 = vmatpush.msrb.mxu2 %v13672_v2  ;;  %4849 = vmatmul.f32.vlgmr.msra.gmra.mxu1 %v13475_v55  ;;  %v13703_v16 = vsel %vm630_vm1, %v15745_v23, %v6647_v18  ;;  %v6627_v23 = vunpack.i.l.bf16 %v13647_v40 }
 0xc05   :  { %4791 = vmatmul.f32.vlgmr.msra.gmra.mxu2 %v13439_v38  ;;  %4876 = vmatpush.msrb.mxu3 %v13136_v6  ;;  %v13738_v60 = vsel %vm527_vm0, %v15748_v24, %v6623_v29 }
 0xc06   :  { %4930 = vmatpush.msra.mxu0 %v13136_v6  ;;  %4904 = vmatpush.msrb.mxu2 %v13687_v15  ;;  %v15746_v6 = vunpack.i.h.bf16 %v13427_v36  ;;  %v15747_v36 = vunpack.i.h.bf16 %v13512_v17  ;;  %v6628_v17 = vunpack.i.h.bf16 %v13647_v40  ;;  %v13756_v43 = vsel %vm527_vm0, %v6602_v49, %v6627_v23 }
 0xc07   :  { %4952 = vmatpush.msrb.mxu1 %v13202_v1  ;;  %4877 = vmatpush.msrb.mxu3 %v13126_v20  ;;  %v15750_v49 = vunpack.i.h.bf16 %v13571_v7 }
 0xc08   :  { %4931 = vmatpush.msra.mxu0 %v13126_v20  ;;  %4905 = vmatpush.msrb.mxu2 %v13703_v16  ;;  %v13711_v44 = vsel %vm527_vm0, %v15746_v6, %v6622_v42  ;;  %v4614_v32 = vsel %vm630_vm1, %v15747_v36, %v6632_v30  ;;  %v13731_v6 = vpop.permute.xlu2 %6650  ;;  %v13744_v20 = vsel %vm630_vm1, %v6638_v5, %v6633_v58  ;;  %v6643_v36 = vunpack.i.h.bf16 %v13691_v28 }
 0xc09   :  { %4953 = vmatpush.msrb.mxu1 %v13711_v44  ;;  %4990 = vmatpush.msra.mxu3 %v13717_v26  ;;  %v6652_v5 = vunpack.i.l.bf16 %v13731_v6 }
 0xc0a   :  { %5972 = vmatmul.msk.f32.gmra.mxu0 %vm679_vm2, %v13534_v13  ;;  %4878 = vmatmul.f32.vlgmr.msrb.gmra.mxu3 %v13439_v38  ;;  %v13783_v24 = vsel %vm630_vm1, %v6632_v30, %v6643_v36 }
 0xc0b   :  { %4932 = vmatpush.msra.mxu0 %v13460_v48  ;;  %4906 = vmatpush.msrb.mxu2 %v4614_v32  ;;  %v15749_v48 = vunpack.i.l.bf16 %v13691_v28 }
 0xc0c   :  { %4954 = vmatpush.msrb.mxu1 %v13738_v60  ;;  %4991 = vmatpush.msra.mxu3 %v13744_v20 }
 0xc0d   :  { %4933 = vmatpush.msra.mxu0 %v13473_v22  ;;  %5007 = vmatpush.msra.mxu2 %v13711_v44  ;;  %v13762_v40 = vsel %vm630_vm1, %v6647_v18, %v15749_v48  ;;  %v13769_v22 = vpop.permute.xlu1 %6655  ;;  %v13777_v18 = vsel %vm527_vm0, %v15750_v49, %v6628_v17  ;;  %v6653_v48 = vunpack.i.h.bf16 %v13731_v6 }
 0xc0e   :  { %4955 = vmatpush.msrb.mxu1 %v13756_v43  ;;  %4992 = vmatpush.msra.mxu3 %v13762_v40  ;;  %v6657_v7 = vunpack.i.l.bf16 %v13769_v22 }
 0xc0f   :  { %4794 = vmatmul.f32.gmra.mxu2 %v13499_v27  ;;  %4852 = vmatmul.f32.gmra.mxu1 %v13529_v47 }
 0xc10   :  { %4934 = vmatpush.msra.mxu0 %v13492_v31  ;;  %5008 = vmatpush.msra.mxu2 %v13738_v60  ;;  %v13794_v31 = vsel %vm527_vm0, %v6622_v42, %v6652_v5  ;;  %v6658_v42 = vunpack.i.h.bf16 %v13769_v22  ;;  %v13819_v30 = vsel %vm527_vm0, %v6627_v23, %v6657_v7 }
 0xc11   :  { %4956 = vmatpush.msrb.mxu1 %v13777_v18  ;;  %4993 = vmatpush.msra.mxu3 %v13783_v24 }
 0xc12   :  { %4935 = vmatpush.msra.mxu0 %v13508_v50  ;;  %5009 = vmatpush.msra.mxu2 %v13756_v43  ;;  %v13808_v50 = vsel %vm527_vm0, %v6623_v29, %v6653_v48  ;;  %v13855_v29 = vpop.permute.xlu2 %6665 }
 0xc13   :  { %5094 = vmatpush.msrb.mxu3 %v13794_v31  ;;  %4957 = vmatpush.msrb.mxu1 %v13672_v2 }
 0xc14   :  { %5036 = vmatpush.msrb.mxu0 %v13199_v0  ;;  %4881 = vmatmul.f32.gmra.mxu3 %v13499_v27 }
 0xc15   :  { %5973 = vmatmul.msk.f32.gmra.mxu0 %vm679_vm2, %v13597_v35  ;;  %5010 = vmatpush.msra.mxu2 %v13777_v18 }
 0xc16   :  { %5095 = vmatpush.msrb.mxu3 %v13808_v50  ;;  %4958 = vmatpush.msrb.mxu1 %v13687_v15 }
 0xc17   :  { %5037 = vmatpush.msrb.mxu0 %v13233_v33  ;;  %5011 = vmatpush.msra.mxu2 %v13672_v2  ;;  %v13831_v2 = vsel %vm527_vm0, %v6628_v17, %v6658_v42 }
 0xc18   :  { %5096 = vmatpush.msrb.mxu3 %v13819_v30  ;;  %4959 = vmatpush.msrb.mxu1 %v13703_v16 }
 0xc19   :  { %5038 = vmatpush.msrb.mxu0 %v13236_v59  ;;  %4797 = vmatmul.f32.gmra.mxu2 %v13559_v46 }
 0xc1a   :  { %4855 = vmatmul.f32.gmra.mxu1 %v13585_v61  ;;  %5012 = vmatpush.msra.mxu2 %v13687_v15  ;;  %v13840_v15 = vpop.permute.xlu0 %6660 }
 0xc1b   :  { %5097 = vmatpush.msrb.mxu3 %v13831_v2  ;;  %4960 = vmatpush.msrb.mxu1 %v4614_v32  ;;  %v6663_v23 = vunpack.i.h.bf16 %v13840_v15 }
 0xc1c   :  { %5039 = vmatpush.msrb.mxu0 %v13228_v41  ;;  %5013 = vmatpush.msra.mxu2 %v13703_v16  ;;  %v6662_v16 = vunpack.i.l.bf16 %v13840_v15 }
 0xc1d   :  { %5098 = vmatpush.msrb.mxu3 %v13717_v26  ;;  %4961 = vmatpush.msrb.mxu1 %v13155_v54 }
 0xc1e   :  { %5040 = vmatpush.msrb.mxu0 %v13794_v31  ;;  %4884 = vmatmul.f32.gmra.mxu3 %v13559_v46 }
 0xc1f   :  { %5974 = vmatmul.msk.f32.gmra.mxu0 %vm679_vm2, %v13644_v21  ;;  %5014 = vmatpush.msra.mxu2 %v4614_v32 }
 0xc20   :  { %5099 = vmatpush.msrb.mxu3 %v13744_v20  ;;  %4962 = vmatpush.msrb.mxu1 %v13163_v52 }
 0xc21   :  { %5041 = vmatpush.msrb.mxu0 %v13808_v50  ;;  %5015 = vmatpush.msra.mxu2 %v13155_v54  ;;  %v15751_v54 = vunpack.i.h.bf16 %v13662_v56  ;;  %v13885_v56 = vsel %vm630_vm1, %v6633_v58, %v6663_v23  ;;  %v6668_v58 = vunpack.i.h.bf16 %v13855_v29 }
 0xc22   :  { %5100 = vmatpush.msrb.mxu3 %v13762_v40  ;;  %4963 = vmatpush.msrb.mxu1 %v13160_v37  ;;  %v13887_v17 = vpop.permute.xlu0 %6685 }
 0xc23   :  { %5042 = vmatpush.msrb.mxu0 %v13819_v30  ;;  %4800 = vmatmul.f32.gmra.mxu2 %v13628_v4  ;;  %v13868_v32 = vsel %vm630_vm1, %v15751_v54, %v6662_v16  ;;  %v6688_v22 = vunpack.i.h.bf16 %v13887_v17 }
 0xc24   :  { %4858 = vmatmul.f32.gmra.mxu1 %v13638_v10  ;;  %5016 = vmatpush.msra.mxu2 %v13163_v52  ;;  %v13872_v52 = vpop.permute.xlu1 %6675 }
 0xc25   :  { %5101 = vmatpush.msrb.mxu3 %v13783_v24  ;;  %4964 = vmatpush.msrb.mxu1 %v13152_v9  ;;  %v6678_v49 = vunpack.i.h.bf16 %v13872_v52 }
 0xc26   :  { %5043 = vmatpush.msrb.mxu0 %v13831_v2  ;;  %5017 = vmatpush.msra.mxu2 %v13160_v37  ;;  %v6667_v37 = vunpack.i.l.bf16 %v13855_v29 }
 0xc27   :  { %5077 = vmatpush.msra.mxu1 %v13868_v32  ;;  %5102 = vmatpush.msrb.mxu3 %v13181_v39 }
 0xc28   :  { %5044 = vmatpush.msrb.mxu0 %v13717_v26  ;;  %4887 = vmatmul.f32.gmra.mxu3 %v13628_v4  ;;  %v6677_v26 = vunpack.i.l.bf16 %v13872_v52 }
 0xc29   :  { %4936 = vmatmul.f32.vlgmr.msra.gmra.mxu0 %v13475_v55  ;;  %5018 = vmatpush.msra.mxu2 %v13152_v9  ;;  %v15752_v9 = vunpack.i.l.bf16 %v13691_v28  ;;  %v6687_v28 = vunpack.i.l.bf16 %v13887_v17 }
 0xc2a   :  { %5078 = vmatpush.msra.mxu1 %v13885_v56  ;;  %5103 = vmatpush.msrb.mxu3 %v13186_v62 }
 0xc2b   :  { %5045 = vmatpush.msrb.mxu0 %v13744_v20  ;;  %5019 = vmatpush.msra.mxu2 %v13581_v34  ;;  %v13900_v11 = vsel %vm630_vm1, %v15752_v9, %v6667_v37  ;;  %v13917_v34 = vsel %vm630_vm1, %v6643_v36, %v6668_v58  ;;  %v13919_v20 = vpop.permute.xlu2 %6670  ;;  %v13942_v36 = vsel %vm527_vm0, %v6653_v48, %v6678_v49 }
 0xc2c   :  { %5079 = vmatpush.msra.mxu1 %v13900_v11  ;;  %5104 = vmatpush.msrb.mxu3 %v13209_v14  ;;  %v14027_v48 = vpop.permute.xlu1 %6680  ;;  %v6673_v15 = vunpack.i.h.bf16 %v13919_v20 }
 0xc2d   :  { %5046 = vmatpush.msrb.mxu0 %v13762_v40  ;;  %5975 = vmatmul.msk.f32.vlgmr.msrb.gmra.mxu2 %vm679_vm2, %v13477_v45  ;;  %v6683_v29 = vunpack.i.h.bf16 %v14027_v48 }
 0xc2e   :  { %4965 = vmatmul.f32.vlgmr.msrb.gmra.mxu1 %v13439_v38  ;;  %5020 = vmatpush.msra.mxu2 %v13595_v8  ;;  %v13929_v8 = vsel %vm527_vm0, %v6652_v5, %v6677_v26  ;;  %v4504_v54 = vsel %vm527_vm0, %v6678_v49, %v6673_v15 }
 0xc2f   :  { %5080 = vmatpush.msra.mxu1 %v13917_v34  ;;  %5105 = vmatpush.msrb.mxu3 %v13202_v1 }
 0xc30   :  { %5047 = vmatpush.msrb.mxu0 %v13783_v24  ;;  %5021 = vmatpush.msra.mxu2 %v13614_v25  ;;  %v13949_v25 = vpop.permute.xlu0 %6690 }
 0xc31   :  { %5181 = vmatpush.msrb.mxu1 %v13929_v8  ;;  %5106 = vmatpush.msrb.mxu3 %v13711_v44  ;;  %v6672_v44 = vunpack.i.l.bf16 %v13919_v20 }
 0xc32   :  { %5048 = vmatpush.msrb.mxu0 %v13181_v39  ;;  %5979 = vmatmul.msk.f32.vlgmr.msra.gmra.mxu3 %vm679_vm2, %v13477_v45  ;;  %v13962_v39 = vsel %vm527_vm0, %v6657_v7, %v6687_v28  ;;  %v15755_v7 = vld [vmem:[#allocation20_spill] sm:$0xff] }
 0xc33   :  { %5182 = vmatpush.msrb.mxu1 %v13942_v36  ;;  %4939 = vmatmul.f32.gmra.mxu0 %v13529_v47  ;;  %v4502_v52 = vsel %vm527_vm0, %v6672_v44, %v6683_v29 }
 0xc34   :  { %5022 = vmatpush.msra.mxu2 %v13626_v57  ;;  %5107 = vmatpush.msrb.mxu3 %v13738_v60  ;;  %v6692_v57 = vunpack.i.l.bf16 %v13949_v25  ;;  %v13980_v60 = vpop.permute.xlu2 %6695 }
 0xc35   :  { %5049 = vmatpush.msrb.mxu0 %v13186_v62  ;;  %5183 = vmatpush.msrb.mxu1 %v13962_v39  ;;  %v13975_v62 = vsel %vm527_vm0, %v6658_v42, %v6672_v44  ;;  %v6698_v5 = vunpack.i.h.bf16 %v13980_v60 }
 0xc36   :  { %5123 = vmatpush.msrb.mxu2 %v13254_v3  ;;  %5108 = vmatpush.msrb.mxu3 %v13756_v43  ;;  %v13995_v6 = vsel %vm630_vm1, %v6662_v16, %v6692_v57  ;;  %v6697_v43 = vunpack.i.l.bf16 %v13980_v60  ;;  %v6682_v16 = vunpack.i.l.bf16 %v14027_v48 }
 0xc37   :  { %5050 = vmatpush.msrb.mxu0 %v13209_v14  ;;  %5184 = vmatpush.msrb.mxu1 %v13975_v62  ;;  %v6693_v14 = vunpack.i.h.bf16 %v13949_v25  ;;  %v14042_v42 = vsel %vm630_vm1, %v6668_v58, %v6698_v5 }
 0xc38   :  { %5124 = vmatpush.msrb.mxu2 %v13263_v19  ;;  %4968 = vmatmul.f32.gmra.mxu1 %v13499_v27  ;;  %v14025_v24 = vsel %vm630_vm1, %v6667_v37, %v6697_v43  ;;  %v4503_v37 = vsel %vm527_vm0, %v6687_v28, %v6682_v16 }
 0xc39   :  { %5976 = vmatmul.msk.f32.gmra.mxu2 %vm679_vm2, %v13534_v13  ;;  %5109 = vmatpush.msrb.mxu3 %v13777_v18  ;;  %v14011_v40 = vsel %vm630_vm1, %v6663_v23, %v6693_v14  ;;  %v15754_v18 = vld [vmem:[#allocation10_spill] sm:$0xff]  ;;  %v4505_v23 = vsel %vm527_vm0, %v6677_v26, %v6688_v22 }
 0xc3a   :  { %5051 = vmatpush.msrb.mxu0 %v13202_v1  ;;  %5125 = vmatpush.msrb.mxu2 %v13259_v53  ;;  %v15753_v1 = vld [vmem:[#allocation30_spill] sm:$0xff] }
 0xc3b   :  { %5185 = vmatpush.msrb.mxu1 %v13868_v32  ;;  %5210 = vmatpush.msra.mxu3 %v13276_v63 }
 0xc3c   :  { %5164 = vmatpush.msra.mxu0 %v13995_v6  ;;  %5126 = vmatpush.msrb.mxu2 %v13251_v12 }
 0xc3d   :  { %5186 = vmatpush.msrb.mxu1 %v13885_v56  ;;  %5211 = vmatpush.msra.mxu3 %v15753_v1 }
 0xc3e   :  { %4942 = vmatmul.f32.gmra.mxu0 %v13585_v61  ;;  %5980 = vmatmul.msk.f32.gmra.mxu3 %vm679_vm2, %v13534_v13 }
 0xc3f   :  { %5165 = vmatpush.msra.mxu0 %v14011_v40  ;;  %5127 = vmatpush.msrb.mxu2 %v13929_v8 }
 0xc40   :  { %5187 = vmatpush.msrb.mxu1 %v13900_v11  ;;  %5212 = vmatpush.msra.mxu3 %v15754_v18 }
 0xc41   :  { %5166 = vmatpush.msra.mxu0 %v14025_v24  ;;  %5128 = vmatpush.msrb.mxu2 %v13942_v36 }
 0xc42   :  { %5188 = vmatpush.msrb.mxu1 %v13917_v34  ;;  %5213 = vmatpush.msra.mxu3 %v15755_v7 }
 0xc43   :  { %5977 = vmatmul.msk.f32.gmra.mxu2 %vm679_vm2, %v13597_v35  ;;  %4971 = vmatmul.f32.gmra.mxu1 %v13559_v46 }
 0xc44   :  { %5167 = vmatpush.msra.mxu0 %v14042_v42  ;;  %5129 = vmatpush.msrb.mxu2 %v13962_v39 }
 0xc45   :  { %5189 = vmatpush.msrb.mxu1 %v13199_v0  ;;  %5214 = vmatpush.msra.mxu3 %v4505_v23 }
 0xc46   :  { %5130 = vmatpush.msrb.mxu2 %v13975_v62  ;;  %4945 = vmatmul.f32.gmra.mxu0 %v13638_v10 }
 0xc47   :  { %5190 = vmatpush.msrb.mxu1 %v13233_v33  ;;  %5215 = vmatpush.msra.mxu3 %v4504_v54 }
 0xc48   :  { %5981 = vmatmul.msk.f32.gmra.mxu3 %vm679_vm2, %v13597_v35  ;;  %5131 = vmatpush.msrb.mxu2 %v13868_v32 }
 0xc49   :  { %5191 = vmatpush.msrb.mxu1 %v13236_v59  ;;  %5216 = vmatpush.msra.mxu3 %v4503_v37 }
 0xc4a   :  { %5132 = vmatpush.msrb.mxu2 %v13885_v56 }
 0xc4b   :  { %5192 = vmatpush.msrb.mxu1 %v13228_v41  ;;  %5217 = vmatpush.msra.mxu3 %v4502_v52 }
 0xc4c   :  { %5978 = vmatmul.msk.f32.gmra.mxu2 %vm679_vm2, %v13644_v21  ;;  %4974 = vmatmul.f32.gmra.mxu1 %v13628_v4 }
 0xc4d   :  { %5133 = vmatpush.msrb.mxu2 %v13900_v11  ;;  %5193 = vmatpush.msrb.mxu1 %v13794_v31  ;;  %v15756_v31 = vld [vmem:[#allocation15_spill] sm:$0xff] }
 0xc4e   :  { %5218 = vmatpush.msra.mxu3 %v13995_v6  ;;  %5052 = vmatmul.f32.vlgmr.msrb.gmra.mxu0 %v13439_v38  ;;  %v4498_v56 = vsel %vm527_vm0, %v6683_v29, %v15756_v31 }
 0xc4f   :  { %5134 = vmatpush.msrb.mxu2 %v13917_v34  ;;  %5194 = vmatpush.msrb.mxu1 %v13808_v50  ;;  %v15757_v50 = vld [vmem:[#allocation16_spill] sm:$0xff] }
 0xc50   :  { %5219 = vmatpush.msra.mxu3 %v14011_v40  ;;  %5268 = vmatpush.msrb.mxu0 %v4505_v23  ;;  %v4599_v17 = vsel %vm630_vm1, %v6697_v43, %v15757_v50  ;;  %v4598_v9 = vsel %vm630_vm1, %v6698_v5, %v15757_v50 }
 0xc51   :  { %5982 = vmatmul.msk.f32.gmra.mxu3 %vm679_vm2, %v13644_v21  ;;  %5135 = vmatpush.msrb.mxu2 %v13199_v0  ;;  %v4501_v0 = vsel %vm527_vm0, %v6688_v22, %v15756_v31 }
 0xc52   :  { %5195 = vmatpush.msrb.mxu1 %v13819_v30  ;;  %5220 = vmatpush.msra.mxu3 %v14025_v24  ;;  %v4601_v30 = vsel %vm630_vm1, %v6692_v57, %v15757_v50 }
 0xc53   :  { %5269 = vmatpush.msrb.mxu0 %v4504_v54  ;;  %5136 = vmatpush.msrb.mxu2 %v13233_v33  ;;  %v4500_v33 = vsel %vm527_vm0, %v6673_v15, %v15756_v31 }
 0xc54   :  { %5196 = vmatpush.msrb.mxu1 %v13831_v2  ;;  %5221 = vmatpush.msra.mxu3 %v14042_v42 }
 0xc55   :  { %5023 = vmatmul.f32.vlgmr.msra.gmra.mxu2 %v13475_v55  ;;  %5983 = vmatmul.msk.f32.vlgmr.msra.gmra.mxu1 %vm679_vm2, %v13477_v45  ;;  %v14115_v2 = vpop.f32.mrf.mxu0 }
 0xc56   :  { %5270 = vmatpush.msrb.mxu0 %v4503_v37  ;;  %5301 = vmatpush.msra.mxu1 %v4501_v0 }
 0xc57   :  { %5137 = vmatpush.msrb.mxu2 %v13236_v59  ;;  %5222 = vmatpush.msra.mxu3 %v13254_v3  ;;  %v4499_v59 = vsel %vm527_vm0, %v6682_v16, %v15756_v31  ;;  %v14123_v32 = vpop.f32.mrf.mxu1 }
 0xc58   :  { %5271 = vmatpush.msrb.mxu0 %v4502_v52  ;;  %5302 = vmatpush.msra.mxu1 %v4500_v33 }
 0xc59   :  { %5138 = vmatpush.msrb.mxu2 %v13228_v41  ;;  %5223 = vmatpush.msra.mxu3 %v13263_v19  ;;  %v4600_v41 = vsel %vm630_vm1, %v6693_v14, %v15757_v50 }
 0xc5a   :  { %5110 = vmatmul.f32.vlgmr.msrb.gmra.mxu3 %v13475_v55  ;;  %5272 = vmatpush.msrb.mxu0 %v13995_v6 }
 0xc5b   :  { %5251 = vmatpush.msra.mxu2 %v4601_v30  ;;  %5303 = vmatpush.msra.mxu1 %v4499_v59 }
 0xc5c   :  { %5224 = vmatpush.msra.mxu3 %v13259_v53  ;;  %5273 = vmatpush.msrb.mxu0 %v14011_v40 }
 0xc5d   :  { %5252 = vmatpush.msra.mxu2 %v4600_v41  ;;  %5304 = vmatpush.msra.mxu1 %v4498_v56  ;;  %v14151_v11 = vpop.f32.mrf.mxu0 }
 0xc5e   :  { %5225 = vmatpush.msra.mxu3 %v13251_v12  ;;  %5026 = vmatmul.f32.gmra.mxu2 %v13529_v47 }
 0xc5f   :  { %5253 = vmatpush.msra.mxu2 %v4599_v17  ;;  %5274 = vmatpush.msrb.mxu0 %v14025_v24  ;;  %v14138_v26 = vpop.f32.mrf.mxu2 }
 0xc60   :  { %5305 = vmatpush.msra.mxu1 %v4601_v30  ;;  %5338 = vmatpush.msrb.mxu3 %v15757_v50 }
 0xc61   :  { %5254 = vmatpush.msra.mxu2 %v4598_v9  ;;  %5275 = vmatpush.msrb.mxu0 %v14042_v42 }
 0xc62   :  { %5306 = vmatpush.msra.mxu1 %v4600_v41  ;;  %5339 = vmatpush.msrb.mxu3 %v15757_v50 }
 0xc63   :  { %5113 = vmatmul.f32.gmra.mxu3 %v13529_v47  ;;  %5276 = vmatpush.msrb.mxu0 %v13254_v3  ;;  %v14156_v58 = vpop.f32.mrf.mxu1 }
 0xc64   :  { %5307 = vmatpush.msra.mxu1 %v4599_v17  ;;  %5340 = vmatpush.msrb.mxu3 %v15757_v50  ;;  %v4763_v51 = vpop.f32.mrf.mxu3 }
 0xc65   :  { %5055 = vmatmul.f32.gmra.mxu0 %v13499_v27  ;;  %5984 = vmatmul.msk.f32.gmra.mxu1 %vm679_vm2, %v13534_v13 }
 0xc66   :  { %5277 = vmatpush.msrb.mxu0 %v13263_v19  ;;  %5308 = vmatpush.msra.mxu1 %v4598_v9 }
 0xc67   :  { %5341 = vmatpush.msrb.mxu3 %v15757_v50  ;;  %5029 = vmatmul.f32.gmra.mxu2 %v13585_v61 }
 0xc68   :  { %5278 = vmatpush.msrb.mxu0 %v13259_v53  ;;  %5309 = vmatpush.msra.mxu1 %v13276_v63  ;;  %v14163_v3 = vpop.f32.mrf.mxu2  ;;  %v14175_v53 = vpop.f32.mrf.mxu0 }
 0xc6a   :  { %5279 = vmatpush.msrb.mxu0 %v13251_v12  ;;  %5310 = vmatpush.msra.mxu1 %v15753_v1 }
 0xc6b   :  { %5116 = vmatmul.f32.gmra.mxu3 %v13585_v61 }
 0xc6c   :  { %5280 = vmatpush.msrb.mxu0 %v13929_v8  ;;  %5311 = vmatpush.msra.mxu1 %v15754_v18 }
 0xc6d   :  { %5058 = vmatmul.f32.gmra.mxu0 %v13559_v46  ;;  %5985 = vmatmul.msk.f32.gmra.mxu1 %vm679_vm2, %v13597_v35  ;;  %v4766_v12 = vpop.f32.mrf.mxu3  ;;  %v14178_v19 = vpop.f32.mrf.mxu1 }
 0xc6e   :  { %5281 = vmatpush.msrb.mxu0 %v13942_v36  ;;  %5312 = vmatpush.msra.mxu1 %v15755_v7 }
 0xc6f   :  { %5032 = vmatmul.f32.gmra.mxu2 %v13638_v10 }
 0xc70   :  { %5282 = vmatpush.msrb.mxu0 %v13962_v39 }
 0xc72   :  { %5283 = vmatpush.msrb.mxu0 %v13975_v62  ;;  %v14182_v63 = vpop.f32.mrf.mxu2  ;;  %v4714_v49 = vpop.f32.mrf.mxu0 }
 0xc73   :  { %5119 = vmatmul.f32.gmra.mxu3 %v13638_v10 }
 0xc75   :  { %5061 = vmatmul.f32.gmra.mxu0 %v13628_v4  ;;  %5986 = vmatmul.msk.f32.gmra.mxu1 %vm679_vm2, %v13644_v21 }
 0xc77   :  { %5139 = vmatmul.f32.vlgmr.msrb.gmra.mxu2 %v13439_v38  ;;  %v4769_v34 = vpop.f32.mrf.mxu3  ;;  %v4743_v20 = vpop.f32.mrf.mxu1 }
 0xc7b   :  { %5226 = vmatmul.f32.vlgmr.msra.gmra.mxu3 %v13439_v38 }
 0xc7c   :  { %v4685_v8 = vpop.f32.mrf.mxu2 }
 0xc7d   :  { %5987 = vmatmul.msk.f32.vlgmr.msra.gmra.mxu0 %vm679_vm2, %v13477_v45  ;;  %5197 = vmatmul.f32.vlgmr.msrb.gmra.mxu1 %v13475_v55  ;;  %v4715_v28 = vadd.f32 %v4714_v49, %v4685_v8  ;;  %v4821_v25 = vpop.f32.mrf.mxu0 }
 0xc7f   :  { %5142 = vmatmul.f32.gmra.mxu2 %v13499_v27  ;;  %v14194_v36 = vadd.f32 %v4743_v20, %v4715_v28 }
 0xc81   :  { %v4772_v44 = vpop.f32.mrf.mxu3  ;;  %v4850_v39 = vpop.f32.mrf.mxu1 }
 0xc83   :  { %5229 = vmatmul.f32.gmra.mxu3 %v13499_v27 }
 0xc85   :  { %5988 = vmatmul.msk.f32.gmra.mxu0 %vm679_vm2, %v13534_v13  ;;  %5200 = vmatmul.f32.gmra.mxu1 %v13529_v47 }
 0xc87   :  { %5145 = vmatmul.f32.gmra.mxu2 %v13559_v46  ;;  %v4824_v14 = vpop.f32.mrf.mxu0 }
 0xc88   :  { %v4792_v57 = vpop.f32.mrf.mxu2 }
 0xc89   :  { %v4793_v62 = vadd.f32 %v4792_v57, %v4763_v51 }
 0xc8b   :  { %v14201_v60 = vadd.f32 %v4821_v25, %v4793_v62  ;;  %5232 = vmatmul.f32.gmra.mxu3 %v13559_v46 }
 0xc8c   :  { %v4853_v43 = vpop.f32.mrf.mxu1 }
 0xc8d   :  { %5989 = vmatmul.msk.f32.gmra.mxu0 %vm679_vm2, %v13597_v35  ;;  %5203 = vmatmul.f32.gmra.mxu1 %v13585_v61  ;;  %v4879_v6 = vpop.f32.mrf.mxu3 }
 0xc8e   :  { %v4880_v1 = vadd.f32 %v4879_v6, %v4850_v39 }
 0xc8f   :  { %5148 = vmatmul.f32.gmra.mxu2 %v13628_v4 }
 0xc92   :  { %v4795_v40 = vpop.f32.mrf.mxu2  ;;  %v4827_v18 = vpop.f32.mrf.mxu0 }
 0xc93   :  { %5235 = vmatmul.f32.gmra.mxu3 %v13628_v4  ;;  %v4796_v5 = vadd.f32 %v4795_v40, %v4766_v12 }
 0xc95   :  { %5990 = vmatmul.msk.f32.gmra.mxu0 %vm679_vm2, %v13644_v21  ;;  %5206 = vmatmul.f32.gmra.mxu1 %v13638_v10  ;;  %v14212_v22 = vadd.f32 %v4824_v14, %v4796_v5 }
 0xc97   :  { %5991 = vmatmul.msk.f32.vlgmr.msra.gmra.mxu2 %vm679_vm2, %v13477_v45  ;;  %v4882_v24 = vpop.f32.mrf.mxu3  ;;  %v4856_v48 = vpop.f32.mrf.mxu1 }
 0xc98   :  { %v4883_v7 = vadd.f32 %v4882_v24, %v4853_v43 }
 0xc9b   :  { %5995 = vmatmul.msk.f32.vlgmr.msrb.gmra.mxu3 %vm679_vm2, %v13477_v45 }
 0xc9c   :  { %v4798_v42 = vpop.f32.mrf.mxu2  ;;  %v4830_v23 = vpop.f32.mrf.mxu0 }
 0xc9d   :  { %5284 = vmatmul.f32.vlgmr.msrb.gmra.mxu0 %v13475_v55  ;;  %5313 = vmatmul.f32.vlgmr.msra.gmra.mxu1 %v13439_v38  ;;  %v4799_v15 = vadd.f32 %v4798_v42, %v4769_v34 }
 0xc9f   :  { %5992 = vmatmul.msk.f32.gmra.mxu2 %vm679_vm2, %v13534_v13  ;;  %v14222_v16 = vadd.f32 %v4827_v18, %v4799_v15 }
 0xca1   :  { %15758 = vst [vmem:[#allocation32_spill] sm:$0xff] %v14222_v16  ;;  %v4885_v29 = vpop.f32.mrf.mxu3  ;;  %v4859_v54 = vpop.f32.mrf.mxu1 }
 0xca2   :  { %v4886_v37 = vadd.f32 %v4885_v29, %v4856_v48 }
 0xca3   :  { %5996 = vmatmul.msk.f32.gmra.mxu3 %vm679_vm2, %v13534_v13 }
 0xca5   :  { %5287 = vmatmul.f32.gmra.mxu0 %v13529_v47  ;;  %5316 = vmatmul.f32.gmra.mxu1 %v13499_v27 }
 0xca6   :  { %v4801_v55 = vpop.f32.mrf.mxu2  ;;  %v4937_v52 = vpop.f32.mrf.mxu0 }
 0xca7   :  { %5993 = vmatmul.msk.f32.gmra.mxu2 %vm679_vm2, %v13597_v35  ;;  %v4802_v38 = vadd.f32 %v4801_v55, %v4772_v44 }
 0xca9   :  { %v14230_v45 = vadd.f32 %v4830_v23, %v4802_v38 }
 0xcab   :  { %5997 = vmatmul.msk.f32.gmra.mxu3 %vm679_vm2, %v13597_v35  ;;  %v4888_v31 = vpop.f32.mrf.mxu3  ;;  %v4966_v0 = vpop.f32.mrf.mxu1 }
 0xcac   :  { %v4889_v33 = vadd.f32 %v4888_v31, %v4859_v54  ;;  %v4967_v50 = vadd.f32 %v4966_v0, %v4937_v52 }
 0xcad   :  { %5290 = vmatmul.f32.gmra.mxu0 %v13585_v61  ;;  %5319 = vmatmul.f32.gmra.mxu1 %v13559_v46 }
 0xcaf   :  { %5994 = vmatmul.msk.f32.gmra.mxu2 %vm679_vm2, %v13644_v21 }
 0xcb0   :  { %v4908_v27 = vpop.f32.mrf.mxu2  ;;  %v4940_v13 = vpop.f32.mrf.mxu0 }
 0xcb1   :  { %v14238_v47 = vadd.f32 %v4908_v27, %v4880_v1 }
 0xcb3   :  { %5998 = vmatmul.msk.f32.gmra.mxu3 %vm679_vm2, %v13644_v21 }
 0xcb5   :  { %5293 = vmatmul.f32.gmra.mxu0 %v13638_v10  ;;  %5322 = vmatmul.f32.gmra.mxu1 %v13628_v4  ;;  %v4995_v35 = vpop.f32.mrf.mxu3  ;;  %v4969_v30 = vpop.f32.mrf.mxu1 }
 0xcb6   :  { %v14244_v59 = vadd.f32 %v4995_v35, %v4967_v50  ;;  %v4970_v61 = vadd.f32 %v4969_v30, %v4940_v13 }
 0xcbb   :  { %v4943_v56 = vpop.f32.mrf.mxu0 }
 0xcbc   :  { %v4911_v46 = vpop.f32.mrf.mxu2 }
 0xcbd   :  { %v14246_v41 = vadd.f32 %v4911_v46, %v4883_v7 }
 0xcc0   :  { %v4972_v17 = vpop.f32.mrf.mxu1 }
 0xcc1   :  { %v4998_v9 = vpop.f32.mrf.mxu3  ;;  %v4973_v51 = vadd.f32 %v4972_v17, %v4943_v56 }
 0xcc2   :  { %v14248_v12 = vadd.f32 %v4998_v9, %v4970_v61  ;;  %v4709_v9 = vadd.f32 %v14151_v11, %v14163_v3  ;;  %v14309_v3 = vld [vmem:[%s14971_s1 + $0x40] sm:$0xff] }
 0xcc3   :  { %v4946_v10 = vpop.f32.mrf.mxu0  ;;  %15760 = vst [vmem:[#allocation19_spill] sm:$0xff] %v14309_v3 }
 0xcc6   :  { %v4914_v21 = vpop.f32.mrf.mxu2 }
 0xcc7   :  { %v14250_v49 = vadd.f32 %v4914_v21, %v4886_v37  ;;  %v14289_v21 = vadd.f32 %v14156_v58, %v4709_v9  ;;  %v4712_v58 = vadd.f32 %v14175_v53, %v14182_v63  ;;  %v14327_v63 = vld [vmem:[%s14971_s1 + $0x58] sm:$0xff] }
 0xcc9   :  { %v4975_v4 = vpop.f32.mrf.mxu1 }
 0xcca   :  { %v4976_v34 = vadd.f32 %v4975_v4, %v4946_v10 }
 0xccb   :  { %v5001_v20 = vpop.f32.mrf.mxu3  ;;  %v5053_v57 = vpop.f32.mrf.mxu0 }
 0xccc   :  { %v14252_v8 = vadd.f32 %v5001_v20, %v4973_v51  ;;  %v14298_v20 = vld [vmem:[%s14971_s1 + $0x48] sm:$0xff] }
 0xccd   :  { %15759 = vst [vmem:[#allocation44_spill] sm:$0xff] %v14298_v20 }
 0xccf   :  { %v4917_v28 = vpop.f32.mrf.mxu2 }
 0xcd0   :  { %v14254_v25 = vadd.f32 %v4917_v28, %v4889_v33  ;;  %v5364_v28 = vmul.f32 %v14298_v20, %v14212_v22 }
 0xcd2   :  { %v5082_v14 = vpop.f32.mrf.mxu1 }
 0xcd4   :  { %v5004_v44 = vpop.f32.mrf.mxu3 }
 0xcd5   :  { %v14256_v39 = vadd.f32 %v5004_v44, %v4976_v34 }
 0xcd8   :  { %v5024_v62 = vpop.f32.mrf.mxu2 }
 0xcd9   :  { %v5054_v6 = vadd.f32 %v5053_v57, %v5024_v62  ;;  %v5363_v57 = vmul.f32 %v14309_v3, %v14289_v21  ;;  %v14316_v62 = vld [vmem:[%s14971_s1 + $0x50] sm:$0xff] }
 0xcda   :  { %15761 = vst [vmem:[#allocation11_spill] sm:$0xff] %v14316_v62 }
 0xcdb   :  { %v14258_v43 = vadd.f32 %v5082_v14, %v5054_v6  ;;  %v5365_v14 = vmul.f32 %v14316_v62, %v14246_v41  ;;  %v5396_v53 = vadd.f32 %v5364_v28, %v5363_v57  ;;  %v14346_v57 = vld [vmem:[%s14971_s1 + $0x88] sm:$0xff] }
 0xcdc   :  { %15764 = vst [vmem:[#allocation26_spill] sm:$0xff] %v14346_v57 }
 0xcdd   :  { %v14260_v1 = vpop.f32.mrf.mxu3  ;;  %v5397_v62 = vadd.f32 %v5396_v53, %v5365_v14  ;;  %v14362_v53 = vld [vmem:[%s14971_s1 + $0x80] sm:$0xff] }
 0xcde   :  { %15766 = vst [vmem:[#allocation40_spill] sm:$0xff] %v14362_v53 }
 0xce1   :  { %v5027_v40 = vpop.f32.mrf.mxu2 }
 0xce2   :  { %v5056_v5 = vpop.f32.mrf.mxu0  ;;  %v5085_v18 = vpop.f32.mrf.mxu1 }
 0xce3   :  { %v5057_v10 = vadd.f32 %v5056_v5, %v5027_v40  ;;  %v5366_v5 = vmul.f32 %v14327_v63, %v14248_v12 }
 0xce5   :  { %v14320_v6 = vadd.f32 %v5085_v18, %v5057_v10  ;;  %v14339_v18 = vld [vmem:[%s14971_s1 + $0x60] sm:$0xff] }
 0xce6   :  { %v5114_v24 = vpop.f32.mrf.mxu3  ;;  %15763 = vst [vmem:[#allocation45_spill] sm:$0xff] %v14339_v18 }
 0xce7   :  { %v5367_v10 = vmul.f32 %v14339_v18, %v14320_v6 }
 0xcea   :  { %v5030_v48 = vpop.f32.mrf.mxu2  ;;  %v5059_v7 = vpop.f32.mrf.mxu0 }
 0xceb   :  { %v5088_v42 = vpop.f32.mrf.mxu1  ;;  %v5060_v9 = vadd.f32 %v5059_v7, %v5030_v48  ;;  %v5398_v7 = vadd.f32 %v5397_v62, %v5366_v5  ;;  %v14369_v5 = vld [vmem:[%s14971_s1 + $0x90] sm:$0xff] }
 0xcec   :  { %15767 = vst [vmem:[#allocation39_spill] sm:$0xff] %v14369_v5 }
 0xcee   :  { %v5117_v15 = vpop.f32.mrf.mxu3 }
 0xcf2   :  { %v14262_v23 = vpop.f32.mrf.mxu2  ;;  %v14264_v29 = vpop.f32.mrf.mxu0 }
 0xcf3   :  { %v14266_v54 = vpop.f32.mrf.mxu1 }
 0xcf6   :  { %v14268_v37 = vpop.f32.mrf.mxu3 }
 0xcfa   :  { %v14270_v55 = vpop.f32.mrf.mxu2  ;;  %v14272_v38 = vpop.f32.mrf.mxu0 }
 0xcfb   :  { %v14274_v52 = vpop.f32.mrf.mxu1 }
 0xcfe   :  { %v14276_v31 = vpop.f32.mrf.mxu3 }
 0xd02   :  { %v5143_v0 = vpop.f32.mrf.mxu2  ;;  %v5172_v33 = vpop.f32.mrf.mxu0 }
 0xd03   :  { %v5201_v50 = vpop.f32.mrf.mxu1  ;;  %v5144_v44 = vadd.f32 %v5143_v0, %v5114_v24  ;;  %v14334_v0 = vadd.f32 %v14178_v19, %v4712_v58  ;;  %v5372_v19 = vmul.f32 %v14346_v57, %v14222_v16  ;;  %v5373_v57 = vmul.f32 %v14369_v5, %v14250_v49  ;;  %v14396_v5 = vld [vmem:[%s14971_s1 + $0xa0] sm:$0xff] }
 0xd04   :  { %15770 = vst [vmem:[#allocation9_spill] sm:$0xff] %v14396_v5 }
 0xd05   :  { %v14331_v24 = vadd.f32 %v5172_v33, %v5144_v44  ;;  %15762 = vst [vmem:[#allocation22_spill] sm:$0xff] %v14334_v0  ;;  %v14353_v44 = vld [vmem:[%s14971_s1 + $0x68] sm:$0xff]  ;;  %v5371_v62 = vmul.f32 %v14362_v53, %v14334_v0  ;;  %v14385_v0 = vld [vmem:[%s14971_s1 + $0x98] sm:$0xff] }
 0xd06   :  { %v5230_v27 = vpop.f32.mrf.mxu3  ;;  %15765 = vst [vmem:[#allocation37_spill] sm:$0xff] %v14353_v44 }
 0xd07   :  { %v5231_v28 = vadd.f32 %v5230_v27, %v5201_v50  ;;  %v5368_v58 = vmul.f32 %v14353_v44, %v14331_v24  ;;  %v5405_v16 = vadd.f32 %v5372_v19, %v5371_v62  ;;  %15769 = vst [vmem:[#allocation17_spill] sm:$0xff] %v14385_v0  ;;  %v5063_v62 = vadd.f32 %v14264_v29, %v14262_v23 }
 0xd0a   :  { %v5146_v13 = vpop.f32.mrf.mxu2  ;;  %v5175_v35 = vpop.f32.mrf.mxu0 }
 0xd0b   :  { %v5204_v30 = vpop.f32.mrf.mxu1  ;;  %v5147_v50 = vadd.f32 %v5146_v13, %v5117_v15  ;;  %v14373_v15 = vadd.f32 %v5088_v42, %v5060_v9  ;;  %v5374_v42 = vmul.f32 %v14385_v0, %v14252_v8 }
 0xd0d   :  { %v5375_v19 = vmul.f32 %v14396_v5, %v14373_v15 }
 0xd0e   :  { %v5233_v61 = vpop.f32.mrf.mxu3 }
 0xd12   :  { %v14278_v46 = vpop.f32.mrf.mxu2  ;;  %v14280_v56 = vpop.f32.mrf.mxu0 }
 0xd13   :  { %v14282_v17 = vpop.f32.mrf.mxu1 }
 0xd16   :  { %v14286_v51 = vpop.f32.mrf.mxu3 }
 0xd1a   :  { %v14291_v4 = vpop.f32.mrf.mxu2  ;;  %v14293_v34 = vpop.f32.mrf.mxu0 }
 0xd1b   :  { %v14302_v11 = vpop.f32.mrf.mxu1 }
 0xd1e   :  { %v14322_v40 = vpop.f32.mrf.mxu3 }
 0xd22   :  { %v5259_v33 = vpop.f32.mrf.mxu2  ;;  %v5288_v48 = vpop.f32.mrf.mxu0 }
 0xd23   :  { %v14357_v27 = vadd.f32 %v5259_v33, %v5231_v28  ;;  %v5317_v14 = vpop.f32.mrf.mxu1  ;;  %v5399_v28 = vadd.f32 %v5398_v7, %v5367_v10  ;;  %v14378_v33 = vld [vmem:[%s14971_s1 + $0x70] sm:$0xff]  ;;  %v14389_v10 = vadd.f32 %v5175_v35, %v5147_v50  ;;  %v14405_v35 = vld [vmem:[%s14971_s1 + $0x78] sm:$0xff] }
 0xd24   :  { %v5318_v13 = vadd.f32 %v5317_v14, %v5288_v48  ;;  %15768 = vst [vmem:[#allocation38_spill] sm:$0xff] %v14378_v33  ;;  %v5406_v14 = vadd.f32 %v5405_v16, %v5373_v57  ;;  %v14412_v57 = vld [vmem:[%s14971_s1 + $0xc8] sm:$0xff] }
 0xd25   :  { %v5369_v53 = vmul.f32 %v14378_v33, %v14357_v27  ;;  %v5400_v48 = vadd.f32 %v5399_v28, %v5368_v58  ;;  %v5234_v33 = vadd.f32 %v5233_v61, %v5204_v30  ;;  %15771 = vst [vmem:[#allocation29_spill] sm:$0xff] %v14412_v57  ;;  %v5380_v58 = vmul.f32 %v14412_v57, %v14230_v45  ;;  %v14419_v30 = vld [vmem:[%s14971_s1 + $0xa8] sm:$0xff]  ;;  %v14439_v57 = vld [vmem:[%s14971_s1 + $0xd0] sm:$0xff] }
 0xd26   :  { %v5346_v9 = vpop.f32.mrf.mxu3  ;;  %v5407_v50 = vadd.f32 %v5406_v14, %v5374_v42  ;;  %v5376_v61 = vmul.f32 %v14419_v30, %v14389_v10  ;;  %v4706_v42 = vadd.f32 %v14115_v2, %v14138_v26  ;;  %15773 = vst [vmem:[#allocation25_spill] sm:$0xff] %v14439_v57  ;;  %v14444_v2 = vadd.f32 %v14266_v54, %v5063_v62  ;;  %v14449_v26 = vld [vmem:[%s14971_s1 + $0xb0] sm:$0xff] }
 0xd27   :  { %v14391_v7 = vadd.f32 %v5346_v9, %v5318_v13  ;;  %v5401_v0 = vadd.f32 %v5400_v48, %v5369_v53  ;;  %v5150_v53 = vadd.f32 %v14278_v46, %v14268_v37  ;;  %v14432_v48 = vld [vmem:[%s14971_s1 + $0xc0] sm:$0xff]  ;;  %v5381_v37 = vmul.f32 %v14439_v57, %v14254_v25  ;;  %v14456_v57 = vld [vmem:[%s14971_s1 + $0xd8] sm:$0xff] }
 0xd28   :  { %15772 = vst [vmem:[#allocation41_spill] sm:$0xff] %v14432_v48  ;;  %v5379_v14 = vmul.f32 %v14432_v48, %v14194_v36  ;;  %v5382_v54 = vmul.f32 %v14456_v57, %v14256_v39 }
 0xd29   :  { %v5370_v16 = vmul.f32 %v14405_v35, %v14391_v7  ;;  %v14461_v62 = vadd.f32 %v14280_v56, %v5150_v53  ;;  %v14480_v56 = vld [vmem:[%s14971_s1 + $0xb8] sm:$0xff]  ;;  %v14487_v53 = vld [vmem:[%s14971_s1 + $0x8] sm:$0xff] }
 0xd2a   :  { %v5262_v23 = vpop.f32.mrf.mxu2  ;;  %v5291_v29 = vpop.f32.mrf.mxu0  ;;  %15775 = vst [vmem:[#allocation21_spill] sm:$0xff] %v14487_v53 }
 0xd2b   :  { %v14425_v13 = vadd.f32 %v5262_v23, %v5234_v33  ;;  %v5320_v28 = vpop.f32.mrf.mxu1  ;;  %v5402_v9 = vadd.f32 %v5401_v0, %v5370_v16  ;;  %v5408_v0 = vadd.f32 %v5407_v50, %v5375_v19  ;;  %v5414_v16 = vadd.f32 %v5380_v58, %v5379_v14  ;;  %v14471_v58 = vld [vmem:[%s14971_s1 + $0xe0] sm:$0xff] }
 0xd2c   :  { %v5321_v46 = vadd.f32 %v5320_v28, %v5291_v29  ;;  %v14466_v29 = vadd.f32 %v14123_v32, %v4706_v42  ;;  %15774 = vst [vmem:[#allocation36_spill] sm:$0xff] %v14471_v58  ;;  %v5356_v42 = vmul.f32 %v14487_v53, %v14201_v60  ;;  %v14505_v53 = vld [vmem:[%s14971_s1] sm:$0xff] }
 0xd2d   :  { %v5377_v33 = vmul.f32 %v14449_v26, %v14425_v13  ;;  %5403 = vadd.xlane.f32.xlu2 %v5402_v9  ;;  %v5409_v19 = vadd.f32 %v5408_v0, %v5376_v61  ;;  %v5415_v28 = vadd.f32 %v5414_v16, %v5381_v37  ;;  %v5383_v9 = vmul.f32 %v14471_v58, %v14444_v2  ;;  %v14496_v0 = vld [vmem:[%s14971_s1 + $0xe8] sm:$0xff] }
 0xd2e   :  { %v5349_v23 = vpop.f32.mrf.mxu3  ;;  %v5237_v61 = vadd.f32 %v14286_v51, %v14282_v17  ;;  %v5141_v17 = vadd.f32 %v14270_v55, %v14260_v1  ;;  %15776 = vst [vmem:[#allocation43_spill] sm:$0xff] %v14505_v53  ;;  %v5355_v1 = vmul.f32 %v14505_v53, %v14466_v29  ;;  %v14512_v55 = vld [vmem:[%s14971_s1 + $0x10] sm:$0xff]  ;;  %v14526_v53 = vld [vmem:[%s14971_s1 + $0x18] sm:$0xff] }
 0xd2f   :  { %v14463_v50 = vadd.f32 %v5349_v23, %v5321_v46  ;;  %v5410_v14 = vadd.f32 %v5409_v19, %v5377_v33  ;;  %v5416_v46 = vadd.f32 %v5415_v28, %v5382_v54  ;;  %v5384_v33 = vmul.f32 %v14496_v0, %v14461_v62  ;;  %15777 = vst [vmem:[#allocation35_spill] sm:$0xff] %v14512_v55 }
 0xd30   :  { %v5357_v54 = vmul.f32 %v14512_v55, %v14238_v47  ;;  %15779 = vst [vmem:[#allocation23_spill] sm:$0xff] %v14526_v53  ;;  %v5358_v55 = vmul.f32 %v14526_v53, %v14244_v59 }
 0xd31   :  { %v5378_v32 = vmul.f32 %v14480_v56, %v14463_v50 }
 0xd32   :  { %v5265_v51 = vpop.f32.mrf.mxu2  ;;  %v5294_v37 = vpop.f32.mrf.mxu0 }
 0xd33   :  { %v14500_v16 = vadd.f32 %v5265_v51, %v5237_v61  ;;  %v5323_v23 = vpop.f32.mrf.mxu1  ;;  %v5411_v19 = vadd.f32 %v5410_v14, %v5378_v32  ;;  %v5417_v61 = vadd.f32 %v5416_v46, %v5383_v9  ;;  %v14519_v14 = vld [vmem:[%s14971_s1 + $0xf0] sm:$0xff]  ;;  %v5387_v51 = vadd.f32 %v5356_v42, %v5355_v1 }
 0xd34   :  { %v5324_v28 = vadd.f32 %v5323_v23, %v5294_v37  ;;  %15778 = vst [vmem:[#allocation18_spill] sm:$0xff] %v14519_v14  ;;  %v14531_v9 = vadd.f32 %v14272_v38, %v5141_v17  ;;  %v5228_v46 = vadd.f32 %v14276_v31, %v14274_v52  ;;  %v14552_v52 = vld [vmem:[%s14971_s1 + $0xf8] sm:$0xff] }
 0xd35   :  { %v5385_v32 = vmul.f32 %v14519_v14, %v14500_v16  ;;  %5412 = vadd.xlane.f32.xlu0 %v5411_v19  ;;  %v5418_v23 = vadd.f32 %v5417_v61, %v5384_v33  ;;  %v5315_v19 = vadd.f32 %v14302_v11, %v14293_v34  ;;  %v5388_v1 = vadd.f32 %v5387_v51, %v5357_v54  ;;  %v14542_v14 = vld [vmem:[%s14971_s1 + $0x20] sm:$0xff]  ;;  %v14559_v11 = vld [vmem:[%s14971_s1 + $0x28] sm:$0xff]  ;;  %v14569_v61 = vld [vmem:[%s14971_s1 + $0x30] sm:$0xff] }
 0xd36   :  { %v5352_v37 = vpop.f32.mrf.mxu3  ;;  %15780 = vst [vmem:[#allocation24_spill] sm:$0xff] %v14542_v14  ;;  %v5359_v38 = vmul.f32 %v14542_v14, %v14258_v43  ;;  %v14547_v17 = vadd.f32 %v14291_v4, %v5228_v46  ;;  %v5360_v33 = vmul.f32 %v14559_v11, %v14531_v9  ;;  %v14576_v51 = vld [vmem:[%s14971_s1 + $0x38] sm:$0xff] }
 0xd37   :  { %v14537_v42 = vadd.f32 %v5352_v37, %v5324_v28  ;;  %v5419_v53 = vadd.f32 %v5418_v23, %v5385_v32  ;;  %v5389_v34 = vadd.f32 %v5388_v1, %v5358_v55  ;;  %15781 = vst [vmem:[#allocation13_spill] sm:$0xff] %v14559_v11  ;;  %v14564_v4 = vadd.f32 %v14322_v40, %v5315_v19 }
 0xd38   :  { %v5361_v55 = vmul.f32 %v14569_v61, %v14547_v17 }
 0xd39   :  { %v5386_v31 = vmul.f32 %v14552_v52, %v14537_v42  ;;  %v5390_v28 = vadd.f32 %v5389_v34, %v5359_v38  ;;  %v5362_v40 = vmul.f32 %v14576_v51, %v14564_v4 }
 0xd3b   :  { %v5420_v54 = vadd.f32 %v5419_v53, %v5386_v31  ;;  %v5391_v32 = vadd.f32 %v5390_v28, %v5360_v33  ;;  %v15783_v28 = vld [vmem:[#allocation11_spill] sm:$0xff] }
 0xd3d   :  { %5421 = vadd.xlane.f32.xlu1 %v5420_v54  ;;  %v5392_v53 = vadd.f32 %v5391_v32, %v5361_v55 }
 0xd3f   :  { %v5393_v37 = vadd.f32 %v5392_v53, %v5362_v40 }
 0xd45   :  { %5394 = vadd.xlane.f32.xlu1 %v5393_v37 }
 0xda0   :  { %v5404_v46 = vpop.xlane.xlu2 %5403 }
 0xda1   :  { %v5424_v23 = vmul.f32 0.0078125, %v5404_v46 }
 0xda3   :  { %v5435_v19 = vsub.f32 %v14289_v21, %v5424_v23  ;;  %v5436_v1 = vsub.f32 %v14212_v22, %v5424_v23  ;;  %v5437_v38 = vsub.f32 %v14246_v41, %v5424_v23  ;;  %v5438_v31 = vsub.f32 %v14248_v12, %v5424_v23 }
 0xda4   :  { %v5439_v34 = vsub.f32 %v14320_v6, %v5424_v23  ;;  %v5440_v32 = vsub.f32 %v14331_v24, %v5424_v23  ;;  %v5441_v6 = vsub.f32 %v14357_v27, %v5424_v23  ;;  %v5442_v40 = vsub.f32 %v14391_v7, %v5424_v23  ;;  %v15787_v27 = vld [vmem:[#allocation32_spill] sm:$0xff]  ;;  %v15788_v23 = vld [vmem:[#allocation38_spill] sm:$0xff] }
 0xda5   :  { %v14586_v33 = vmul.f32 %v14309_v3, %v5435_v19  ;;  %v14589_v54 = vmul.f32 %v14298_v20, %v5436_v1  ;;  %v14592_v55 = vmul.f32 %v15783_v28, %v5437_v38  ;;  %v14596_v21 = vmul.f32 %v14327_v63, %v5438_v31  ;;  %v15786_v31 = vld [vmem:[#allocation22_spill] sm:$0xff] }
 0xda6   :  { %v14605_v53 = vmul.f32 %v14339_v18, %v5439_v34  ;;  %v14610_v19 = vmul.f32 %v14353_v44, %v5440_v32  ;;  %v14618_v34 = vmul.f32 %v15788_v23, %v5441_v6 }
 0xda7   :  { %15782 = vst [vmem:[#allocation34_spill] sm:$0xff] %v14586_v33  ;;  %v5499_v22 = vmul.f32 %v14586_v33, %v14586_v33  ;;  %v5500_v41 = vmul.f32 %v14589_v54, %v14589_v54  ;;  %v5501_v24 = vmul.f32 %v14592_v55, %v14592_v55  ;;  %v5502_v1 = vmul.f32 %v14596_v21, %v14596_v21 }
 0xda8   :  { %v5413_v12 = vpop.xlane.xlu0 %5412  ;;  %15784 = vst [vmem:[#allocation42_spill] sm:$0xff] %v14605_v53  ;;  %v5503_v32 = vmul.f32 %v14605_v53, %v14605_v53  ;;  %v5504_v53 = vmul.f32 %v14610_v19, %v14610_v19 }
 0xda9   :  { %v5425_v37 = vmul.f32 0.0078125, %v5413_v12  ;;  %v5532_v46 = vadd.f32 %v5500_v41, %v5499_v22  ;;  %15785 = vst [vmem:[#allocation28_spill] sm:$0xff] %v14610_v19  ;;  %v14621_v12 = vmul.f32 %v14405_v35, %v5442_v40  ;;  %v15792_v40 = vld [vmem:[#allocation39_spill] sm:$0xff] }
 0xdab   :  { %v5533_v38 = vadd.f32 %v5532_v46, %v5501_v24  ;;  %v5443_v3 = vsub.f32 %v15786_v31, %v5425_v37  ;;  %v5444_v20 = vsub.f32 %v15787_v27, %v5425_v37  ;;  %v5445_v7 = vsub.f32 %v14250_v49, %v5425_v37  ;;  %v15789_v46 = vld [vmem:[#allocation40_spill] sm:$0xff]  ;;  %v15791_v27 = vld [vmem:[#allocation26_spill] sm:$0xff] }
 0xdac   :  { %v5446_v22 = vsub.f32 %v14252_v8, %v5425_v37  ;;  %v5447_v24 = vsub.f32 %v14373_v15, %v5425_v37  ;;  %v5448_v49 = vsub.f32 %v14389_v10, %v5425_v37  ;;  %v5449_v6 = vsub.f32 %v14425_v13, %v5425_v37  ;;  %v15793_v10 = vld [vmem:[#allocation17_spill] sm:$0xff] }
 0xdad   :  { %v5534_v41 = vadd.f32 %v5533_v38, %v5502_v1  ;;  %v14628_v31 = vmul.f32 %v15789_v46, %v5443_v3  ;;  %v14631_v18 = vmul.f32 %v15791_v27, %v5444_v20  ;;  %v14636_v44 = vmul.f32 %v15792_v40, %v5445_v7 }
 0xdae   :  { %v5505_v3 = vmul.f32 %v14618_v34, %v14618_v34  ;;  %v5506_v20 = vmul.f32 %v14621_v12, %v14621_v12  ;;  %v14647_v38 = vmul.f32 %v15793_v10, %v5446_v22  ;;  %v14656_v33 = vmul.f32 %v14419_v30, %v5448_v49 }
 0xdaf   :  { %15790 = vst [vmem:[#allocation33_spill] sm:$0xff] %v14628_v31  ;;  %v5535_v8 = vadd.f32 %v5534_v41, %v5503_v32  ;;  %v5507_v15 = vmul.f32 %v14628_v31, %v14628_v31  ;;  %v5508_v13 = vmul.f32 %v14631_v18, %v14631_v18  ;;  %v5450_v32 = vsub.f32 %v14463_v50, %v5425_v37 }
 0xdb0   :  { %v5422_v1 = vpop.xlane.xlu1 %5421  ;;  %v14653_v41 = vmul.f32 %v14396_v5, %v5447_v24  ;;  %v14659_v31 = vmul.f32 %v14449_v26, %v5449_v6  ;;  %v5509_v22 = vmul.f32 %v14636_v44, %v14636_v44  ;;  %v5510_v37 = vmul.f32 %v14647_v38, %v14647_v38 }
 0xdb1   :  { %v5426_v7 = vmul.f32 0.0078125, %v5422_v1  ;;  %v5536_v46 = vadd.f32 %v5535_v8, %v5504_v53  ;;  %v5541_v27 = vadd.f32 %v5508_v13, %v5507_v15  ;;  %v14670_v6 = vmul.f32 %v14480_v56, %v5450_v32 }
 0xdb3   :  { %v5537_v19 = vadd.f32 %v5536_v46, %v5505_v3  ;;  %v5451_v23 = vsub.f32 %v14194_v36, %v5426_v7  ;;  %v5452_v53 = vsub.f32 %v14230_v45, %v5426_v7  ;;  %v5453_v50 = vsub.f32 %v14254_v25, %v5426_v7  ;;  %v15794_v25 = vld [vmem:[#allocation29_spill] sm:$0xff] }
 0xdb4   :  { %v5542_v24 = vadd.f32 %v5541_v27, %v5509_v22  ;;  %v5454_v49 = vsub.f32 %v14256_v39, %v5426_v7  ;;  %v5455_v1 = vsub.f32 %v14444_v2, %v5426_v7  ;;  %v5511_v36 = vmul.f32 %v14653_v41, %v14653_v41  ;;  %v15795_v3 = vld [vmem:[#allocation25_spill] sm:$0xff] }
 0xdb5   :  { %v5538_v8 = vadd.f32 %v5537_v19, %v5506_v20  ;;  %v14674_v46 = vmul.f32 %v14432_v48, %v5451_v23  ;;  %v14679_v15 = vmul.f32 %v15794_v25, %v5452_v53  ;;  %v14682_v27 = vmul.f32 %v15795_v3, %v5453_v50 }
 0xdb6   :  { %v5543_v45 = vadd.f32 %v5542_v24, %v5510_v37  ;;  %v5512_v39 = vmul.f32 %v14656_v33, %v14656_v33  ;;  %v5513_v2 = vmul.f32 %v14659_v31, %v14659_v31  ;;  %v5456_v19 = vsub.f32 %v14461_v62, %v5426_v7 }
 0xdb7   :  { %5539 = vadd.xlane.f32.xlu1 %v5538_v8  ;;  %v14690_v13 = vmul.f32 %v14456_v57, %v5454_v49  ;;  %v5515_v32 = vmul.f32 %v14674_v46, %v14674_v46  ;;  %v5516_v22 = vmul.f32 %v14679_v15, %v14679_v15  ;;  %v5514_v50 = vmul.f32 %v14670_v6, %v14670_v6 }
 0xdb8   :  { %v5395_v23 = vpop.xlane.xlu1 %5394  ;;  %v5544_v20 = vadd.f32 %v5543_v45, %v5511_v36  ;;  %v5457_v37 = vsub.f32 %v14500_v16, %v5426_v7  ;;  %v14700_v24 = vmul.f32 %v14471_v58, %v5455_v1  ;;  %v5458_v8 = vsub.f32 %v14537_v42, %v5426_v7  ;;  %v15796_v7 = vld [vmem:[#allocation18_spill] sm:$0xff]  ;;  %v15800_v58 = vld [vmem:[#allocation35_spill] sm:$0xff] }
 0xdb9   :  { %v5423_v53 = vmul.f32 0.0078125, %v5395_v23  ;;  %v5517_v49 = vmul.f32 %v14682_v27, %v14682_v27  ;;  %v5550_v36 = vadd.f32 %v5516_v22, %v5515_v32  ;;  %v14706_v45 = vmul.f32 %v14496_v0, %v5456_v19  ;;  %v15797_v32 = vld [vmem:[#allocation43_spill] sm:$0xff] }
 0xdba   :  { %v5545_v62 = vadd.f32 %v5544_v20, %v5512_v39  ;;  %v5518_v1 = vmul.f32 %v14690_v13, %v14690_v13  ;;  %v14715_v20 = vmul.f32 %v15796_v7, %v5457_v37  ;;  %v5519_v19 = vmul.f32 %v14700_v24, %v14700_v24 }
 0xdbb   :  { %v5427_v23 = vsub.f32 %v14466_v29, %v5423_v53  ;;  %v5428_v5 = vsub.f32 %v14201_v60, %v5423_v53  ;;  %v5429_v48 = vsub.f32 %v14238_v47, %v5423_v53  ;;  %v5551_v39 = vadd.f32 %v5550_v36, %v5517_v49  ;;  %v15799_v29 = vld [vmem:[#allocation21_spill] sm:$0xff] }
 0xdbc   :  { %v5546_v16 = vadd.f32 %v5545_v62, %v5513_v2  ;;  %v5430_v42 = vsub.f32 %v14244_v59, %v5423_v53  ;;  %v5431_v62 = vsub.f32 %v14258_v43, %v5423_v53  ;;  %v14730_v59 = vmul.f32 %v14552_v52, %v5458_v8 }
 0xdbd   :  { %v14720_v22 = vmul.f32 %v15797_v32, %v5427_v23  ;;  %v14723_v60 = vmul.f32 %v15799_v29, %v5428_v5  ;;  %v5552_v2 = vadd.f32 %v5551_v39, %v5518_v1  ;;  %v14727_v49 = vmul.f32 %v15800_v58, %v5429_v48  ;;  %v15801_v32 = vld [vmem:[#allocation23_spill] sm:$0xff]  ;;  %v6001_v29 = vld [vmem:[%s14976_s6 + $0x70] sm:$0xff] }
 0xdbe   :  { %v5547_v47 = vadd.f32 %v5546_v16, %v5514_v50  ;;  %v5520_v37 = vmul.f32 %v14706_v45, %v14706_v45  ;;  %v5432_v36 = vsub.f32 %v14531_v9, %v5423_v53  ;;  %v14736_v5 = vmul.f32 %v15801_v32, %v5430_v42 }
 0xdbf   :  { %15798 = vst [vmem:[#allocation12_spill] sm:$0xff] %v14720_v22  ;;  %v5553_v23 = vadd.f32 %v5552_v2, %v5519_v19  ;;  %v5491_v50 = vmul.f32 %v14720_v22, %v14720_v22  ;;  %v5492_v43 = vmul.f32 %v14723_v60, %v14723_v60  ;;  %v5521_v48 = vmul.f32 %v14715_v20, %v14715_v20 }
 0xdc0   :  { %5548 = vadd.xlane.f32.xlu2 %v5547_v47  ;;  %v5433_v8 = vsub.f32 %v14547_v17, %v5423_v53  ;;  %v14746_v1 = vmul.f32 %v14542_v14, %v5431_v62  ;;  %v5493_v9 = vmul.f32 %v14727_v49, %v14727_v49  ;;  %v5522_v42 = vmul.f32 %v14730_v59, %v14730_v59 }
 0xdc1   :  { %v5554_v16 = vadd.f32 %v5553_v23, %v5520_v37  ;;  %v5523_v39 = vadd.f32 %v5492_v43, %v5491_v50  ;;  %v5434_v19 = vsub.f32 %v14564_v4, %v5423_v53  ;;  %v14754_v2 = vmul.f32 %v14559_v11, %v5432_v36 }
 0xdc2   :  { %15802 = vst [vmem:[#allocation27_spill] sm:$0xff] %v14746_v1  ;;  %v5494_v17 = vmul.f32 %v14736_v5, %v14736_v5  ;;  %v14759_v62 = vmul.f32 %v14569_v61, %v5433_v8  ;;  %v5495_v50 = vmul.f32 %v14746_v1, %v14746_v1 }
 0xdc3   :  { %v5555_v47 = vadd.f32 %v5554_v16, %v5521_v48  ;;  %v5524_v37 = vadd.f32 %v5523_v39, %v5493_v9  ;;  %v14764_v14 = vmul.f32 %v14576_v51, %v5434_v19  ;;  %v5496_v4 = vmul.f32 %v14754_v2, %v14754_v2  ;;  %v6006_v39 = vld [vmem:[%s14977_s7 + $0x78] sm:$0xff]  ;;  %v6003_v19 = vld [vmem:[%s14977_s7 + $0x60] sm:$0xff] }
 0xdc4   :  { %v5497_v36 = vmul.f32 %v14759_v62, %v14759_v62 }
 0xdc5   :  { %v5556_v23 = vadd.f32 %v5555_v47, %v5522_v42  ;;  %v5525_v43 = vadd.f32 %v5524_v37, %v5494_v17  ;;  %v5498_v8 = vmul.f32 %v14764_v14, %v14764_v14  ;;  %v6005_v42 = vld [vmem:[%s14977_s7 + $0x70] sm:$0xff] }
 0xdc6   :  { %v5765_v47 = vld [vmem:[%s14979_s9 + $0x10] sm:$0xff] }
 0xdc7   :  { %5557 = vadd.xlane.f32.xlu0 %v5556_v23  ;;  %v5526_v53 = vadd.f32 %v5525_v43, %v5495_v50 }
 0xdc9   :  { %v5527_v48 = vadd.f32 %v5526_v53, %v5496_v4 }
 0xdcb   :  { %v5528_v16 = vadd.f32 %v5527_v48, %v5497_v36 }
 0xdcd   :  { %v5529_v9 = vadd.f32 %v5528_v16, %v5498_v8 }
 0xdcf   :  { %5530 = vadd.xlane.f32.xlu0 %v5529_v9 }
 0xde3   :  { %5690 = vperm.xlu0 %6058, %v6006_v39  }
 0xdeb   :  { %5685 = vperm.xlu0 %6058, %v6005_v42  }
 0xdf3   :  { %5675 = vperm.xlu0 %6058, %v6003_v19  }
 0xdfb   :  { %5778 = vperm.xlu0 %6058, %v5765_v47  }
 0xe2a   :  { %v5540_v17 = vpop.xlane.xlu1 %5539 }
 0xe2b   :  { %v5560_v37 = vmul.f32 0.0078125, %v5540_v17  ;;  %v6000_v17 = vld [vmem:[%s14976_s6 + $0x68] sm:$0xff] }
 0xe2d   :  { %v5569_v23 = vadd.f32 1e-05, %v5560_v37 }
 0xe2f   :  { %6723 = vrsqrt.f32 %v5569_v23  ;;  %vm5588_vm1 = vweird.f32 %v5569_v23 }
 0xe33   :  { %v5549_v50 = vpop.xlane.xlu2 %5548 }
 0xe34   :  { %v5561_v43 = vmul.f32 0.0078125, %v5549_v50 }
 0xe35   :  { %v6724_v4 = vpop.eup %6723 }
 0xe36   :  { %v5583_v53 = vmul.f32 %v6724_v4, %v5569_v23  ;;  %v5570_v36 = vadd.f32 1e-05, %v5561_v43  ;;  %vm5589_vm0 = vweird.f32 %v6724_v4 }
 0xe37   :  { %vm5590_vm2 = vmor %vm5588_vm1, %vm5589_vm0 }
 0xe38   :  { %v5584_v48 = vmul.f32 %v6724_v4, %v5583_v53  ;;  %6725 = vrsqrt.f32 %v5570_v36  ;;  %vm5598_vm14 = vweird.f32 %v5570_v36 }
 0xe3a   :  { %v5585_v8 = vmul.f32 0.5, %v5584_v48  ;;  %v5558_v16 = vpop.xlane.xlu0 %5557 }
 0xe3b   :  { %v5562_v39 = vmul.f32 0.0078125, %v5558_v16 }
 0xe3c   :  { %v5586_v9 = vsub.f32 1.5, %v5585_v8 }
 0xe3d   :  { %v5571_v47 = vadd.f32 1e-05, %v5562_v39 }
 0xe3e   :  { %v6726_v42 = vpop.eup %6725  ;;  %v5587_v19 = vmul.f32 %v6724_v4, %v5586_v9 }
 0xe3f   :  { %v5593_v37 = vmul.f32 %v6726_v42, %v5570_v36  ;;  %6727 = vrsqrt.f32 %v5571_v47  ;;  %vm5599_vm13 = vweird.f32 %v6726_v42  ;;  %vm5608_vm4 = vweird.f32 %v5571_v47 }
 0xe40   :  { %v5591_v50 = vsel %vm5590_vm2, %v6724_v4, %v5587_v19  ;;  %vm5600_vm15 = vmor %vm5598_vm14, %vm5599_vm13 }
 0xe41   :  { %v5594_v43 = vmul.f32 %v6726_v42, %v5593_v37  ;;  %v5613_v53 = vmul.f32 %v6000_v17, %v5591_v50 }
 0xe42   :  { %v5531_v48 = vpop.xlane.xlu0 %5530 }
 0xe43   :  { %v5595_v1 = vmul.f32 0.5, %v5594_v43  ;;  %5623 = vperm.xlu2 %6057, %v5613_v53   ;;  %v5559_v8 = vmul.f32 0.0078125, %v5531_v48 }
 0xe45   :  { %v5596_v11 = vsub.f32 1.5, %v5595_v1  ;;  %v6728_v16 = vpop.eup %6727  ;;  %v5568_v9 = vadd.f32 1e-05, %v5559_v8 }
 0xe46   :  { %v5603_v39 = vmul.f32 %v6728_v16, %v5571_v47  ;;  %vm5609_vm3 = vweird.f32 %v6728_v16 }
 0xe47   :  { %v5597_v23 = vmul.f32 %v6726_v42, %v5596_v11  ;;  %6729 = vrsqrt.f32 %v5568_v9  ;;  %v6002_v11 = vld [vmem:[%s14976_s6 + $0x78] sm:$0xff]  ;;  %vm5610_vm5 = vmor %vm5608_vm4, %vm5609_vm3  ;;  %vm5578_vm7 = vweird.f32 %v5568_v9 }
 0xe48   :  { %v5604_v4 = vmul.f32 %v6728_v16, %v5603_v39  ;;  %v6004_v39 = vld [vmem:[%s14977_s7 + $0x68] sm:$0xff] }
 0xe49   :  { %v5601_v19 = vsel %vm5600_vm15, %v6726_v42, %v5597_v23  ;;  %v5999_v23 = vld [vmem:[%s14976_s6 + $0x60] sm:$0xff] }
 0xe4a   :  { %v5614_v17 = vmul.f32 %v6001_v29, %v5601_v19  ;;  %v5605_v37 = vmul.f32 0.5, %v5604_v4 }
 0xe4c   :  { %5628 = vperm.xlu1 %6056, %v5614_v17   ;;  %v5606_v50 = vsub.f32 1.5, %v5605_v37 }
 0xe4d   :  { %v6730_v1 = vpop.eup %6729 }
 0xe4e   :  { %v5607_v43 = vmul.f32 %v6728_v16, %v5606_v50  ;;  %v5573_v53 = vmul.f32 %v6730_v1, %v5568_v9  ;;  %vm5579_vm6 = vweird.f32 %v6730_v1 }
 0xe4f   :  { %vm5580_vm8 = vmor %vm5578_vm7, %vm5579_vm6 }
 0xe50   :  { %v5574_v36 = vmul.f32 %v6730_v1, %v5573_v53  ;;  %v5611_v48 = vsel %vm5610_vm5, %v6728_v16, %v5607_v43  ;;  %v5764_v16 = vld [vmem:[%s14979_s9 + $0x8] sm:$0xff] }
 0xe51   :  { %v5615_v8 = vmul.f32 %v6002_v11, %v5611_v48 }
 0xe52   :  { %v5575_v22 = vmul.f32 0.5, %v5574_v36 }
 0xe53   :  { %5633 = vperm.xlu2 %6057, %v5615_v8  }
 0xe54   :  { %v5576_v42 = vsub.f32 1.5, %v5575_v22  ;;  %v5763_v22 = vld [vmem:[%s14979_s9] sm:$0xff] }
 0xe55   :  { %v14813_v50 = vpop.permute.xlu0 %5690 }
 0xe56   :  { %v5577_v29 = vmul.f32 %v6730_v1, %v5576_v42 }
 0xe58   :  { %v5581_v47 = vsel %vm5580_vm8, %v6730_v1, %v5577_v29 }
 0xe59   :  { %v5612_v4 = vmul.f32 %v5999_v23, %v5581_v47 }
 0xe5b   :  { %5618 = vperm.xlu1 %6056, %v5612_v4   ;;  %5680 = vperm.xlu2 %6057, %v6004_v39  }
 0xe5d   :  { %v14831_v42 = vpop.permute.xlu0 %5685 }
 0xe63   :  { %5768 = vperm.xlu1 %6056, %v5763_v22   ;;  %5773 = vperm.xlu2 %6057, %v5764_v16  }
 0xe65   :  { %v14855_v16 = vpop.permute.xlu0 %5675 }
 0xe9d   :  { %v14805_v9 = vpop.permute.xlu2 %5623 }
 0xe9e   :  { %v5647_v8 = vmul.f32 %v14805_v9, %v14596_v21 }
 0xead   :  { %v14807_v19 = vpop.permute.xlu2 %5633 }
 0xeae   :  { %v5663_v17 = vmul.f32 %v14807_v19, %v14690_v13  ;;  %v5667_v37 = vmul.f32 %v14807_v19, %v14730_v59  ;;  %v5662_v39 = vmul.f32 %v14807_v19, %v14682_v27  ;;  %v5666_v4 = vmul.f32 %v14807_v19, %v14715_v20 }
 0xeb0   :  { %v5720_v1 = vadd.f32 %v14813_v50, %v5663_v17  ;;  %v5724_v43 = vadd.f32 %v14813_v50, %v5667_v37  ;;  %v5719_v27 = vadd.f32 %v14813_v50, %v5662_v39  ;;  %v5723_v37 = vadd.f32 %v14813_v50, %v5666_v4 }
 0xeb1   :  { %v5664_v39 = vmul.f32 %v14807_v19, %v14700_v24 }
 0xeb2   :  { %v5752_v53 = vmul.f32 %v14456_v57, %v5720_v1  ;;  %v5756_v11 = vmul.f32 %v14552_v52, %v5724_v43  ;;  %v5651_v57 = vmul.f32 %v14805_v9, %v14621_v12 }
 0xeb4   :  { %5781 = vmatpush.msrb.mxu2 %v5752_v53  ;;  %5807 = vmatpush.msra.mxu0 %v5756_v11 }
 0xeb5   :  { %v14819_v36 = vpop.permute.xlu2 %5680 }
 0xeb6   :  { %v5704_v23 = vadd.f32 %v14819_v36, %v5647_v8  ;;  %v5708_v47 = vadd.f32 %v14819_v36, %v5651_v57  ;;  %v5645_v57 = vmul.f32 %v14805_v9, %v14589_v54 }
 0xeb8   :  { %v5736_v21 = vmul.f32 %v14327_v63, %v5704_v23  ;;  %v5740_v12 = vmul.f32 %v14405_v35, %v5708_v47  ;;  %v15804_v23 = vld [vmem:[#allocation28_spill] sm:$0xff]  ;;  %v5702_v4 = vadd.f32 %v14819_v36, %v5645_v57 }
 0xeb9   :  { %v5649_v47 = vmul.f32 %v14805_v9, %v15804_v23  ;;  %v5761_v23 = vld [vmem:[%s14978_s8 + $0x20] sm:$0xff] }
 0xebe   :  { %v14821_v48 = vpop.permute.xlu1 %5628 }
 0xebf   :  { %v5655_v13 = vmul.f32 %v14821_v48, %v14647_v38  ;;  %v5659_v59 = vmul.f32 %v14821_v48, %v14670_v6 }
 0xec1   :  { %v5712_v52 = vadd.f32 %v14831_v42, %v5655_v13  ;;  %v5716_v29 = vadd.f32 %v14831_v42, %v5659_v59  ;;  %v5751_v13 = vmul.f32 %v15795_v3, %v5719_v27  ;;  %v5661_v59 = vmul.f32 %v14807_v19, %v14679_v15  ;;  %v15808_v27 = vld [vmem:[#allocation44_spill] sm:$0xff] }
 0xec2   :  { %v5657_v3 = vmul.f32 %v14821_v48, %v14656_v33 }
 0xec3   :  { %v5744_v38 = vmul.f32 %v15793_v10, %v5712_v52  ;;  %v5748_v6 = vmul.f32 %v14480_v56, %v5716_v29  ;;  %v5654_v10 = vmul.f32 %v14821_v48, %v14636_v44  ;;  %v5658_v56 = vmul.f32 %v14821_v48, %v14659_v31 }
 0xec4   :  { %v5718_v8 = vadd.f32 %v14813_v50, %v5661_v59 }
 0xec5   :  { %5782 = vmatpush.msrb.mxu2 %v5744_v38  ;;  %5808 = vmatpush.msra.mxu0 %v5748_v6  ;;  %v5711_v44 = vadd.f32 %v14831_v42, %v5654_v10  ;;  %v5715_v31 = vadd.f32 %v14831_v42, %v5658_v56  ;;  %v15806_v56 = vld [vmem:[#allocation33_spill] sm:$0xff] }
 0xec7   :  { %5783 = vmatpush.msrb.mxu2 %v5736_v21  ;;  %5809 = vmatpush.msra.mxu0 %v5740_v12  ;;  %v5747_v15 = vmul.f32 %v14449_v26, %v5715_v31  ;;  %v5714_v26 = vadd.f32 %v14831_v42, %v5657_v3  ;;  %v5750_v21 = vmul.f32 %v15794_v25, %v5718_v8  ;;  %v15820_v8 = vld [vmem:[#allocation45_spill] sm:$0xff] }
 0xec8   :  { %v5660_v12 = vmul.f32 %v14807_v19, %v14674_v46  ;;  %v5656_v25 = vmul.f32 %v14821_v48, %v14653_v41  ;;  %v5721_v41 = vadd.f32 %v14813_v50, %v5664_v39  ;;  %v5774_v39 = vpop.permute.xlu2 %5773 }
 0xec9   :  { %v5746_v46 = vmul.f32 %v14419_v30, %v5714_v26  ;;  %v5760_v26 = vld [vmem:[%s14978_s8 + $0x18] sm:$0xff] }
 0xeca   :  { %v5713_v30 = vadd.f32 %v14831_v42, %v5656_v25 }
 0xecd   :  { %v14845_v22 = vpop.permute.xlu1 %5618 }
 0xece   :  { %v5639_v63 = vmul.f32 %v14845_v22, %v14736_v5  ;;  %v5643_v35 = vmul.f32 %v14845_v22, %v14764_v14  ;;  %v5646_v5 = vmul.f32 %v14805_v9, %v14592_v55  ;;  %v5650_v14 = vmul.f32 %v14805_v9, %v14618_v34 }
 0xecf   :  { %v5638_v53 = vmul.f32 %v14845_v22, %v14727_v49  ;;  %v5642_v11 = vmul.f32 %v14845_v22, %v14759_v62  ;;  %v5665_v55 = vmul.f32 %v14807_v19, %v14706_v45  ;;  %v5755_v34 = vmul.f32 %v15796_v7, %v5723_v37 }
 0xed0   :  { %v5696_v20 = vadd.f32 %v14855_v16, %v5639_v63  ;;  %v5700_v17 = vadd.f32 %v14855_v16, %v5643_v35  ;;  %v5743_v49 = vmul.f32 %v15792_v40, %v5711_v44  ;;  %v5653_v62 = vmul.f32 %v14821_v48, %v14631_v18  ;;  %v15803_v40 = vld [vmem:[#allocation38_spill] sm:$0xff] }
 0xed1   :  { %v5695_v45 = vadd.f32 %v14855_v16, %v5638_v53  ;;  %v5699_v7 = vadd.f32 %v14855_v16, %v5642_v11  ;;  %v5722_v33 = vadd.f32 %v14813_v50, %v5665_v55  ;;  %v5637_v38 = vmul.f32 %v14845_v22, %v14723_v60  ;;  %v15807_v63 = vld [vmem:[#allocation34_spill] sm:$0xff]  ;;  %v15813_v53 = vld [vmem:[#allocation13_spill] sm:$0xff] }
 0xed2   :  { %v5728_v1 = vmul.f32 %v15801_v32, %v5696_v20  ;;  %v5732_v43 = vmul.f32 %v14576_v51, %v5700_v17  ;;  %v5703_v51 = vadd.f32 %v14819_v36, %v5646_v5  ;;  %v5707_v32 = vadd.f32 %v14819_v36, %v5650_v14  ;;  %v15809_v17 = vld [vmem:[#allocation37_spill] sm:$0xff]  ;;  %v15810_v44 = vld [vmem:[#allocation42_spill] sm:$0xff]  ;;  %v15811_v5 = vld [vmem:[#allocation12_spill] sm:$0xff] }
 0xed3   :  { %v5710_v29 = vadd.f32 %v14831_v42, %v5653_v62  ;;  %v5727_v54 = vmul.f32 %v15800_v58, %v5695_v45  ;;  %v5641_v6 = vmul.f32 %v14845_v22, %v14754_v2  ;;  %v5754_v60 = vmul.f32 %v14496_v0, %v5722_v33  ;;  %v15818_v62 = vld [vmem:[#allocation9_spill] sm:$0xff]  ;;  %v15819_v45 = vld [vmem:[#allocation19_spill] sm:$0xff]  ;;  %v5757_v33 = vld [vmem:[%s14978_s8] sm:$0xff] }
 0xed4   :  { %5784 = vmatpush.msrb.mxu2 %v5728_v1  ;;  %5810 = vmatpush.msra.mxu0 %v5732_v43  ;;  %v5735_v18 = vmul.f32 %v15783_v28, %v5703_v51  ;;  %v5739_v52 = vmul.f32 %v15803_v40, %v5707_v32  ;;  %v5731_v28 = vmul.f32 %v14569_v61, %v5699_v7  ;;  %v15805_v61 = vld [vmem:[#allocation26_spill] sm:$0xff]  ;;  %v15812_v1 = vld [vmem:[#allocation21_spill] sm:$0xff]  ;;  %v15817_v32 = vld [vmem:[#allocation40_spill] sm:$0xff] }
 0xed5   :  { %v5706_v58 = vadd.f32 %v14819_v36, %v5649_v47  ;;  %v5742_v10 = vmul.f32 %v15805_v61, %v5710_v29  ;;  %v5652_v2 = vmul.f32 %v14821_v48, %v15806_v56  ;;  %v5694_v24 = vadd.f32 %v14855_v16, %v5637_v38  ;;  %v15822_v40 = vld [vmem:[#allocation24_spill] sm:$0xff]  ;;  %v5762_v47 = vld [vmem:[%s14978_s8 + $0x28] sm:$0xff]  ;;  %v5779_v61 = vpop.permute.xlu0 %5778 }
 0xed6   :  { %5785 = vmatpush.msrb.mxu2 %v5751_v13  ;;  %5811 = vmatpush.msra.mxu0 %v5755_v34  ;;  %v5698_v0 = vadd.f32 %v14855_v16, %v5641_v6  ;;  %v5717_v19 = vadd.f32 %v14813_v50, %v5660_v12  ;;  %v5644_v35 = vmul.f32 %v14805_v9, %v15807_v63  ;;  %v15814_v13 = vld [vmem:[#allocation27_spill] sm:$0xff]  ;;  %v15815_v50 = vld [vmem:[#allocation41_spill] sm:$0xff]  ;;  %v5759_v29 = vld [vmem:[%s14978_s8 + $0x10] sm:$0xff] }
 0xed7   :  { %v5734_v20 = vmul.f32 %v15808_v27, %v5702_v4  ;;  %v5738_v37 = vmul.f32 %v15809_v17, %v5706_v58  ;;  %v5709_v48 = vadd.f32 %v14831_v42, %v5652_v2  ;;  %v5648_v31 = vmul.f32 %v14805_v9, %v15810_v44  ;;  %v15816_v42 = vld [vmem:[#allocation36_spill] sm:$0xff] }
 0xed8   :  { %5786 = vmatpush.msrb.mxu2 %v5743_v49  ;;  %5812 = vmatpush.msra.mxu0 %v5747_v15  ;;  %v5636_v14 = vmul.f32 %v14845_v22, %v15811_v5  ;;  %v5726_v43 = vmul.f32 %v15812_v1, %v5694_v24  ;;  %v5730_v11 = vmul.f32 %v15813_v53, %v5698_v0 }
 0xed9   :  { %v5640_v59 = vmul.f32 %v14845_v22, %v15814_v13  ;;  %v5749_v55 = vmul.f32 %v15815_v50, %v5717_v19  ;;  %v5753_v34 = vmul.f32 %v15816_v42, %v5721_v41  ;;  %v5701_v9 = vadd.f32 %v14819_v36, %v5644_v35 }
 0xeda   :  { %5787 = vmatpush.msrb.mxu2 %v5735_v18  ;;  %5813 = vmatpush.msra.mxu0 %v5739_v52  ;;  %v5705_v51 = vadd.f32 %v14819_v36, %v5648_v31  ;;  %v5741_v49 = vmul.f32 %v15817_v32, %v5709_v48  ;;  %v5745_v3 = vmul.f32 %v15818_v62, %v5713_v30  ;;  %v15821_v18 = vld [vmem:[#allocation43_spill] sm:$0xff] }
 0xedb   :  { %v5693_v15 = vadd.f32 %v14855_v16, %v5636_v14  ;;  %v5697_v22 = vadd.f32 %v14855_v16, %v5640_v59  ;;  %v5733_v7 = vmul.f32 %v15819_v45, %v5701_v9  ;;  %v5758_v16 = vld [vmem:[%s14978_s8 + $0x8] sm:$0xff]  ;;  %s5842_s8 = sshll.u32 %s14980_s10, 4  ;;  %s5843_s8 = int_to_ptr.hbm [resolvable:$true] %s5842_s8 }
 0xedc   :  { %5788 = vmatpush.msrb.mxu2 %v5727_v54  ;;  %5814 = vmatpush.msra.mxu0 %v5731_v28  ;;  %v5737_v57 = vmul.f32 %v15820_v8, %v5705_v51  ;;  %v5769_v54 = vpop.permute.xlu1 %5768 }
 0xedd   :  { %v5725_v36 = vmul.f32 %v15821_v18, %v5693_v15  ;;  %v5729_v52 = vmul.f32 %v15822_v40, %v5697_v22 }
 0xede   :  { %5789 = vmatpush.msrb.mxu2 %v5750_v21  ;;  %5815 = vmatpush.msra.mxu0 %v5754_v60 }
 0xee0   :  { %5790 = vmatpush.msrb.mxu2 %v5742_v10  ;;  %5816 = vmatpush.msra.mxu0 %v5746_v46 }
 0xee2   :  { %5791 = vmatpush.msrb.mxu2 %v5734_v20  ;;  %5817 = vmatpush.msra.mxu0 %v5738_v37 }
 0xee4   :  { %5792 = vmatpush.msrb.mxu2 %v5726_v43  ;;  %5818 = vmatpush.msra.mxu0 %v5730_v11 }
 0xee6   :  { %5793 = vmatpush.msrb.mxu2 %v5749_v55  ;;  %5819 = vmatpush.msra.mxu0 %v5753_v34 }
 0xee8   :  { %5794 = vmatpush.msrb.mxu2 %v5741_v49  ;;  %5820 = vmatpush.msra.mxu0 %v5745_v3 }
 0xeea   :  { %5795 = vmatpush.msrb.mxu2 %v5733_v7  ;;  %5821 = vmatpush.msra.mxu0 %v5737_v57 }
 0xeec   :  { %5796 = vmatpush.msrb.mxu2 %v5725_v36  ;;  %5822 = vmatpush.msra.mxu0 %v5729_v52 }
 0xeed   :  { %5797 = vmatmul.f32.vlgmr.msrb.gmra.mxu2 %v5757_v33  ;;  %5823 = vmatmul.f32.vlgmr.msra.gmra.mxu0 %v5758_v16 }
 0xef5   :  { %5800 = vmatmul.f32.gmra.mxu2 %v5759_v29  ;;  %5826 = vmatmul.f32.gmra.mxu0 %v5760_v26 }
 0xefd   :  { %5803 = vmatmul.f32.gmra.mxu2 %v5761_v23  ;;  %5829 = vmatmul.f32.gmra.mxu0 %v5762_v47 }
 0xf6a   :  { %v5824_v38 = vpop.f32.mrf.mxu0 }
 0xf70   :  { %v5798_v28 = vpop.f32.mrf.mxu2 }
 0xf71   :  { %v5799_v6 = vadd.f32 %v5798_v28, %v5769_v54 }
 0xf72   :  { %v5827_v12 = vpop.f32.mrf.mxu0 }
 0xf73   :  { %v5825_v21 = vadd.f32 %v5824_v38, %v5799_v6 }
 0xf75   :  { %5833 = vst [vmem:[#allocation6] sm:$0xff] %v5825_v21 }
 0xf78   :  { %v5801_v60 = vpop.f32.mrf.mxu2 }
 0xf79   :  { %v5802_v4 = vadd.f32 %v5801_v60, %v5774_v39 }
 0xf7a   :  { %v5830_v56 = vpop.f32.mrf.mxu0 }
 0xf7b   :  { %v5828_v58 = vadd.f32 %v5827_v12, %v5802_v4 }
 0xf7d   :  { %5834 = vst [vmem:[#allocation6 + $0x8] sm:$0xff] %v5828_v58 }
 0xf80   :  { %v5804_v10 = vpop.f32.mrf.mxu2 }
 0xf81   :  { %v5805_v2 = vadd.f32 %v5804_v10, %v5779_v61 }
 0xf83   :  { %v5831_v25 = vadd.f32 %v5830_v56, %v5805_v2 }
 0xf85   :  { %5835 = vst [vmem:[#allocation6 + $0x10] sm:$0xff] %v5831_v25 }
 0xf86   :  { %5848 = dma.vmem_to_hbm [thread:$0]  %s5841_s17, 384, %s5843_s8, [#allocation5], %s6922_s20, %s6922_s20, %s6923_s21  }
 0xf87   :  { %6911 = dma.done.wait [#allocation5], 384  }
 0xf88   :  { %6912 = vsyncadd [#allocation5], 4294966912 }
 0xf89   :  { %5853 = vsyncpa [#allocation4], 1 }
 0xf8a   :  { %5854 = vsyncpa [#allocation5], 1 }

</bundles_post_ra>
